<compile_context>
chip_gen: v7x
topology: tpu7x:2x2x1
jax: 0.10.0
libtpu: 0.0.40
codegen_flags: <defaults>
</compile_context>

<pallas_src>
import functools

import jax
import jax.numpy as jnp
from jax import lax
from jax.experimental import pallas as pl
from jax.experimental.pallas import tpu as pltpu


def _round_up(x, m):
    return ((x + m - 1) // m) * m


def _rep_layer_kernel(x_ref, w_ref, b_ref, s2o2_ref, out_ref, acc_ref, *,
                      K, Wp, W, th, RT):
    """One (batch, row-tile) grid step.

    x_ref:    (1, L, Cin)       flattened padded image (VMEM-resident across row tiles)
    w_ref:    (K*K, Cin, Cout)  fully fused weights (kxk + 1x1 + identity, pre-scaled by lab)
    b_ref:    (1, Cout)         fully fused bias, f32
    s2o2_ref: (2,) SMEM f32     [act.lab.scale / 6, act.lab.bias]
    out_ref:  (1, th, W, Cout)  NHWC output rows for this tile (padded columns already cropped)
    acc_ref:  (RT, Cout) f32    VMEM accumulator scratch, RT = th * Wp
    """
    cout = out_ref.shape[-1]
    # Row-tile base offset into the flattened image; RT % 8 == 0 because Wp % 8 == 0.
    base = pl.multiple_of(pl.program_id(1) * RT, 8)

    # Uninterrupted K*K-tap matmul chain; every tap is a contiguous shifted slice of the
    # resident flattened image (rows = spatial, lanes = Cin).
    for t in range(K * K):
        kh, kw = divmod(t, K)
        xs = x_ref[0, pl.ds(base + kh * Wp + kw, RT), :]
        contrib = jnp.dot(xs, w_ref[t], preferred_element_type=jnp.float32)
        if t == 0:
            acc_ref[...] = contrib
        else:
            acc_ref[...] += contrib

    # Epilogue (f32): fused bias, hardswish (1/6 folded into s2), second affine, width crop.
    y = acc_ref[...] + b_ref[...]
    y = (s2o2_ref[0] * y) * jnp.clip(y + 3.0, 0.0, 6.0) + s2o2_ref[1]
    out_ref[0, :, :, :] = y.reshape(th, Wp, cout)[:, :W, :].astype(out_ref.dtype)


def _pick_row_tile(H, Wp, *, target_rows=1024, min_tiles=1):
    """Largest divisor th of H with th*Wp <= target rows and H/th >= min_tiles."""
    target = max(target_rows, Wp)   # always allow at least one image row per tile
    best = None
    for th in range(1, H + 1):
        if H % th == 0 and th * Wp <= target and (H // th) >= min_tiles:
            best = th
    if best is None:                # e.g. H == 1: relax the min_tiles requirement
        best = 1
        for th in range(1, H + 1):
            if H % th == 0 and th * Wp <= target:
                best = th
    return best


def _const_spec(block_shape, index_map, single_buffer):
    """BlockSpec for a constant-index operand; single-buffered when supported."""
    if single_buffer:
        return pl.BlockSpec(block_shape, index_map, pipeline_mode=pl.Buffered(1))
    return pl.BlockSpec(block_shape, index_map)


def learnable_rep_layer_forward(x, params, *, kernel_size, stride=1,
                                compute_dtype=jnp.bfloat16, out_dtype=None,
                                data_format="NCHW", target_rows=1024):
    """Pallas implementation of LearnableRepLayer.forward (is_repped=False, eval-mode BN)."""
    assert stride == 1, "identity branch + activation path require stride == 1"
    assert kernel_size > 1 and kernel_size % 2 == 1, "expects odd kernel_size > 1 (has a 1x1 branch)"
    assert data_format in ("NCHW", "NHWC")
    if data_format == "NCHW":
        N, Cin, H, W = x.shape
    else:
        N, H, W, Cin = x.shape
    K = kernel_size
    p = (K - 1) // 2
    if out_dtype is None:
        out_dtype = x.dtype

    # --- fold every linear branch + eval-mode BN + first affine into one kxk weight/bias (exact)
    def fuse_bn(w_oihw, bn):
        gamma, beta, mean, var, eps = bn
        t = gamma / jnp.sqrt(var + eps)                       # (Cout,)
        return w_oihw * t[:, None, None, None], beta - mean * t

    wk, bk = 0.0, 0.0
    for w, bn in params['conv_kxk']:
        wf, bf = fuse_bn(w, bn)
        wk = wk + wf
        bk = bk + bf
    Cout = wk.shape[0]

    w1_raw, bn1 = params['conv_1x1']
    w1f, b1f = fuse_bn(w1_raw, bn1)
    wk = wk.at[:, :, p, p].add(w1f[:, :, 0, 0])
    bk = bk + b1f

    assert Cin == Cout, "identity branch requires in_channels == out_channels"
    g_i, b_i, m_i, v_i, eps_i = params['identity_bn']
    t_i = g_i / jnp.sqrt(v_i + eps_i)
    idx = jnp.arange(Cin)
    wk = wk.at[idx, idx, p, p].add(t_i)
    bk = bk + (b_i - m_i * t_i)

    s1, o1 = params['lab']
    wk = s1 * wk
    bk = s1 * bk + o1

    w_kkio = jnp.transpose(wk, (2, 3, 1, 0)).reshape(K * K, Cin, Cout).astype(compute_dtype)
    b_fused = bk.reshape(1, Cout).astype(jnp.float32)
    s2, o2 = params['act_lab']
    s2o2 = jnp.asarray([s2 / 6.0, o2], jnp.float32)      # hardswish 1/6 folded into s2

    # --- input layout: NHWC, zero-pad (width aligned to 8 sublanes, one extra bottom row so the
    #     last tap window stays in-bounds), then a *free* reshape to flattened (N, L, Cin).
    Wp = _round_up(W + 2 * p, 8)
    Hpad = H + 2 * p + 1
    L = Hpad * Wp
    x_nhwc = x if data_format == "NHWC" else jnp.transpose(x, (0, 2, 3, 1))
    x_pad = jnp.pad(x_nhwc.astype(compute_dtype),
                    ((0, 0), (p, p + 1), (p, Wp - W - p), (0, 0)))
    x_flat = x_pad.reshape(N, L, Cin)

    th = _pick_row_tile(H, Wp, target_rows=target_rows,
                        min_tiles=2 if N == 1 else 1)     # keep both v7x cores busy at batch 1
    J = H // th
    RT = th * Wp

    # --- VMEM budget: stays <= 48 MiB so the working set also fits v7x's 64 MiB VMEM.
    isz = jnp.dtype(compute_dtype).itemsize
    osz = jnp.dtype(out_dtype).itemsize
    est = (2 * L * Cin * isz                      # double-buffered resident image
           + 2 * K * K * Cin * Cout * isz         # fused weights (worst case: double-buffered)
           + 2 * th * W * Cout * osz              # output blocks
           + RT * Cout * 4 + (1 << 20))           # f32 accumulator + slack
    assert est <= (48 << 20), "feature map too large for VMEM-resident tiling (see TODO)"
    vmem_limit = int(min(48 << 20, max(16 << 20, 2 * est)))

    kernel = functools.partial(_rep_layer_kernel, K=K, Wp=Wp, W=W, th=th, RT=RT)

    def run(single_buffer_consts):
        return pl.pallas_call(
            kernel,
            out_shape=jax.ShapeDtypeStruct((N, H, W, Cout), out_dtype),
            grid=(N, J),
            in_specs=[
                # whole flattened padded image: block index only changes with n, so it is
                # DMA'd once per batch element and stays resident across its row tiles.
                pl.BlockSpec((1, L, Cin), lambda n, j: (n, 0, 0)),
                _const_spec((K * K, Cin, Cout), lambda n, j: (0, 0, 0), single_buffer_consts),
                _const_spec((1, Cout), lambda n, j: (0, 0), single_buffer_consts),
                pl.BlockSpec(memory_space=pltpu.MemorySpace.SMEM),
            ],
            out_specs=pl.BlockSpec((1, th, W, Cout), lambda n, j: (n, j, 0, 0)),
            scratch_shapes=[pltpu.VMEM((RT, Cout), jnp.float32)],
            compiler_params=pltpu.CompilerParams(
                dimension_semantics=("parallel", "parallel"),
                vmem_limit_bytes=vmem_limit),
        )(x_flat, w_kkio, b_fused, s2o2)

    try:
        out_nhwc = run(True)
    except Exception:
        # pipeline_mode=pl.Buffered(1) is a pure VMEM optimization for the constant operands;
        # fall back transparently if this JAX build rejects single-buffered blocks.
        out_nhwc = run(False)

    if data_format == "NHWC":
        return out_nhwc
    return jnp.transpose(out_nhwc, (0, 3, 1, 2))


def reference_forward(x, params, *, kernel_size, stride=1):
    """Plain-JAX reference mirroring the PyTorch forward (eval-mode BN)."""
    K = kernel_size
    p = (K - 1) // 2

    def bn_eval(y, bn):
        gamma, beta, mean, var, eps = bn
        inv = gamma / jnp.sqrt(var + eps)
        return (y - mean[None, :, None, None]) * inv[None, :, None, None] \
            + beta[None, :, None, None]

    out = bn_eval(x, params['identity_bn'])
    w1, bn1 = params['conv_1x1']
    y = lax.conv_general_dilated(x, w1, (stride, stride), [(0, 0), (0, 0)],
                                 dimension_numbers=('NCHW', 'OIHW', 'NCHW'))
    out = out + bn_eval(y, bn1)
    for w, bn in params['conv_kxk']:
        y = lax.conv_general_dilated(x, w, (stride, stride), [(p, p), (p, p)],
                                     dimension_numbers=('NCHW', 'OIHW', 'NCHW'))
        out = out + bn_eval(y, bn)
    s1, b1 = params['lab']
    out = s1 * out + b1
    out = out * jnp.clip(out + 3.0, 0.0, 6.0) / 6.0
    s2, b2 = params['act_lab']
    return s2 * out + b2


def make_params(key, in_channels, out_channels, kernel_size, num_conv_branches):
    eps = 1e-5

    def bn_params(k, c):
        k1, k2, k3, k4 = jax.random.split(k, 4)
        gamma = 0.5 + jax.random.uniform(k1, (c,), jnp.float32)
        beta = 0.1 * jax.random.normal(k2, (c,), jnp.float32)
        mean = 0.1 * jax.random.normal(k3, (c,), jnp.float32)
        var = 0.5 + jax.random.uniform(k4, (c,), jnp.float32)
        return (gamma, beta, mean, var, eps)

    keys = jax.random.split(key, 2 * num_conv_branches + 3)
    conv_kxk = []
    for b in range(num_conv_branches):
        w = 0.1 * jax.random.normal(
            keys[2 * b], (out_channels, in_channels, kernel_size, kernel_size), jnp.float32)
        conv_kxk.append((w, bn_params(keys[2 * b + 1], out_channels)))
    w1 = 0.1 * jax.random.normal(
        keys[-3], (out_channels, in_channels, 1, 1), jnp.float32)
    return {
        'conv_kxk': conv_kxk,
        'conv_1x1': (w1, bn_params(keys[-2], out_channels)),
        'identity_bn': bn_params(keys[-1], in_channels),
        'lab': (1.0, 0.0),        # LearnableAffineBlock __init__ defaults
        'act_lab': (1.0, 0.0),    # Act's LearnableAffineBlock defaults
    }


if __name__ == "__main__":
    N, C, H, W = 2, 4, 16, 16
    K = 3
    num_conv_branches = 2

    key = jax.random.PRNGKey(0)
    kx, kp = jax.random.split(key)
    x = jax.random.normal(kx, (N, C, H, W), jnp.float32)
    params = make_params(kp, C, C, K, num_conv_branches)

    ref = reference_forward(x, params, kernel_size=K, stride=1)

    # f32 compute path: wrapper-side folding is exact -> tight tolerance.
    out_f32 = learnable_rep_layer_forward(x, params, kernel_size=K, stride=1,
                                          compute_dtype=jnp.float32)
    out_f32 = jax.block_until_ready(out_f32)
    assert out_f32.shape == (N, C, H, W)
    err = jnp.max(jnp.abs(out_f32 - ref))
    assert jnp.allclose(out_f32, ref, rtol=1e-4, atol=1e-4), f"f32 max abs err = {err}"

    # Default path: bf16 HBM residency / MXU inputs, f32 accumulation -> looser tolerance.
    out_bf16 = learnable_rep_layer_forward(x, params, kernel_size=K, stride=1)
    out_bf16 = jax.block_until_ready(out_bf16).astype(jnp.float32)
    err = jnp.max(jnp.abs(out_bf16 - ref))
    assert jnp.allclose(out_bf16, ref, rtol=5e-2, atol=5e-2), f"bf16 max abs err = {err}"

    print("KERNEL_OK")
</pallas_src>

<mosaic_0001>
module attributes {stable_mosaic.version = 11 : i64} {
  func.func @_rep_layer_kernel(%arg0: i32, %arg1: i32, %arg2: memref<1x456x4xf32, #tpu.memory_space<vmem>>, %arg3: memref<9x4x4xf32, #tpu.memory_space<vmem>>, %arg4: memref<1x4xf32, #tpu.memory_space<vmem>>, %arg5: memref<2xf32, #tpu.memory_space<smem>>, %arg6: memref<1x16x16x4xf32, #tpu.memory_space<vmem>>, %arg7: memref<384x4xf32, #tpu.memory_space<vmem>>) attributes {dimension_semantics = [#tpu.dimension_semantics<parallel>, #tpu.dimension_semantics<parallel>], iteration_bounds = array<i64: 2, 1>, scalar_prefetch = 0 : i64, scratch_operands = 1 : i64, tpu.core_type = #tpu.core_type<tc>, window_params = [{transform_indices = @transform_0, window_bounds = array<i64: 1, 456, 4>}, {pipeline_mode = #tpu.pipeline_mode<synchronous>, transform_indices = @transform_1, window_bounds = array<i64: 9, 4, 4>}, {pipeline_mode = #tpu.pipeline_mode<synchronous>, transform_indices = @transform_2, window_bounds = array<i64: 1, 4>}, {transform_indices = @transform_3, window_bounds = array<i64: 2>}, {transform_indices = @transform_4, window_bounds = array<i64: 1, 16, 16, 4>}]} {
    %c384_i32 = arith.constant 384 : i32
    %0 = arith.muli %arg1, %c384_i32 : i32
    %1 = tpu.assume_multiple %0, 8 : i32
    %c0_i32 = arith.constant 0 : i32
    %2 = arith.addi %1, %c0_i32 : i32
    %c0_i32_0 = arith.constant 0 : i32
    %3 = arith.addi %2, %c0_i32_0 : i32
    %c0 = arith.constant 0 : index
    %4 = arith.index_cast %3 : i32 to index
    %c0_1 = arith.constant 0 : index
    %5 = vector.load %arg2[%c0, %4, %c0_1] : memref<1x456x4xf32, #tpu.memory_space<vmem>>, vector<1x384x4xf32>
    %6 = vector.shape_cast %5 : vector<1x384x4xf32> to vector<384x4xf32>
    %c0_2 = arith.constant 0 : index
    %c0_3 = arith.constant 0 : index
    %c0_4 = arith.constant 0 : index
    %7 = vector.load %arg3[%c0_2, %c0_3, %c0_4] : memref<9x4x4xf32, #tpu.memory_space<vmem>>, vector<1x4x4xf32>
    %8 = vector.shape_cast %7 : vector<1x4x4xf32> to vector<4x4xf32>
    %cst = arith.constant dense<0.000000e+00> : vector<384x4xf32>
    %9 = tpu.matmul %6, %8, %cst {dimension_numbers = #tpu.dot_dimension_numbers<[1], [0], [0], [1], [0, 0, 1, 1], [], []>} : vector<384x4xf32>, vector<4x4xf32>, vector<384x4xf32> -> vector<384x4xf32>
    %c0_5 = arith.constant 0 : index
    %c0_6 = arith.constant 0 : index
    %10 = vector.load %arg7[%c0_5, %c0_6] : memref<384x4xf32, #tpu.memory_space<vmem>>, vector<384x4xf32>
    tpu.vector_store %arg7[%c0_5, %c0_6], %9 {strides = array<i32>} : memref<384x4xf32, #tpu.memory_space<vmem>>, vector<384x4xf32>,
    %c0_i32_7 = arith.constant 0 : i32
    %11 = arith.addi %1, %c0_i32_7 : i32
    %c1_i32 = arith.constant 1 : i32
    %12 = arith.addi %11, %c1_i32 : i32
    %c0_8 = arith.constant 0 : index
    %13 = arith.index_cast %12 : i32 to index
    %c0_9 = arith.constant 0 : index
    %14 = vector.load %arg2[%c0_8, %13, %c0_9] : memref<1x456x4xf32, #tpu.memory_space<vmem>>, vector<1x384x4xf32>
    %15 = vector.shape_cast %14 : vector<1x384x4xf32> to vector<384x4xf32>
    %c1 = arith.constant 1 : index
    %c0_10 = arith.constant 0 : index
    %c0_11 = arith.constant 0 : index
    %16 = vector.load %arg3[%c1, %c0_10, %c0_11] : memref<9x4x4xf32, #tpu.memory_space<vmem>>, vector<1x4x4xf32>
    %17 = vector.shape_cast %16 : vector<1x4x4xf32> to vector<4x4xf32>
    %cst_12 = arith.constant dense<0.000000e+00> : vector<384x4xf32>
    %18 = tpu.matmul %15, %17, %cst_12 {dimension_numbers = #tpu.dot_dimension_numbers<[1], [0], [0], [1], [0, 0, 1, 1], [], []>} : vector<384x4xf32>, vector<4x4xf32>, vector<384x4xf32> -> vector<384x4xf32>
    %c0_13 = arith.constant 0 : index
    %c0_14 = arith.constant 0 : index
    %19 = vector.load %arg7[%c0_13, %c0_14] : memref<384x4xf32, #tpu.memory_space<vmem>>, vector<384x4xf32>
    %20 = arith.addf %19, %18 : vector<384x4xf32>
    %c0_15 = arith.constant 0 : index
    %c0_16 = arith.constant 0 : index
    %21 = vector.load %arg7[%c0_15, %c0_16] : memref<384x4xf32, #tpu.memory_space<vmem>>, vector<384x4xf32>
    tpu.vector_store %arg7[%c0_15, %c0_16], %20 {strides = array<i32>} : memref<384x4xf32, #tpu.memory_space<vmem>>, vector<384x4xf32>,
    %c0_i32_17 = arith.constant 0 : i32
    %22 = arith.addi %1, %c0_i32_17 : i32
    %c2_i32 = arith.constant 2 : i32
    %23 = arith.addi %22, %c2_i32 : i32
    %c0_18 = arith.constant 0 : index
    %24 = arith.index_cast %23 : i32 to index
    %c0_19 = arith.constant 0 : index
    %25 = vector.load %arg2[%c0_18, %24, %c0_19] : memref<1x456x4xf32, #tpu.memory_space<vmem>>, vector<1x384x4xf32>
    %26 = vector.shape_cast %25 : vector<1x384x4xf32> to vector<384x4xf32>
    %c2 = arith.constant 2 : index
    %c0_20 = arith.constant 0 : index
    %c0_21 = arith.constant 0 : index
    %27 = vector.load %arg3[%c2, %c0_20, %c0_21] : memref<9x4x4xf32, #tpu.memory_space<vmem>>, vector<1x4x4xf32>
    %28 = vector.shape_cast %27 : vector<1x4x4xf32> to vector<4x4xf32>
    %cst_22 = arith.constant dense<0.000000e+00> : vector<384x4xf32>
    %29 = tpu.matmul %26, %28, %cst_22 {dimension_numbers = #tpu.dot_dimension_numbers<[1], [0], [0], [1], [0, 0, 1, 1], [], []>} : vector<384x4xf32>, vector<4x4xf32>, vector<384x4xf32> -> vector<384x4xf32>
    %c0_23 = arith.constant 0 : index
    %c0_24 = arith.constant 0 : index
    %30 = vector.load %arg7[%c0_23, %c0_24] : memref<384x4xf32, #tpu.memory_space<vmem>>, vector<384x4xf32>
    %31 = arith.addf %30, %29 : vector<384x4xf32>
    %c0_25 = arith.constant 0 : index
    %c0_26 = arith.constant 0 : index
    %32 = vector.load %arg7[%c0_25, %c0_26] : memref<384x4xf32, #tpu.memory_space<vmem>>, vector<384x4xf32>
    tpu.vector_store %arg7[%c0_25, %c0_26], %31 {strides = array<i32>} : memref<384x4xf32, #tpu.memory_space<vmem>>, vector<384x4xf32>,
    %c24_i32 = arith.constant 24 : i32
    %33 = arith.addi %1, %c24_i32 : i32
    %c0_i32_27 = arith.constant 0 : i32
    %34 = arith.addi %33, %c0_i32_27 : i32
    %c0_28 = arith.constant 0 : index
    %35 = arith.index_cast %34 : i32 to index
    %c0_29 = arith.constant 0 : index
    %36 = vector.load %arg2[%c0_28, %35, %c0_29] : memref<1x456x4xf32, #tpu.memory_space<vmem>>, vector<1x384x4xf32>
    %37 = vector.shape_cast %36 : vector<1x384x4xf32> to vector<384x4xf32>
    %c3 = arith.constant 3 : index
    %c0_30 = arith.constant 0 : index
    %c0_31 = arith.constant 0 : index
    %38 = vector.load %arg3[%c3, %c0_30, %c0_31] : memref<9x4x4xf32, #tpu.memory_space<vmem>>, vector<1x4x4xf32>
    %39 = vector.shape_cast %38 : vector<1x4x4xf32> to vector<4x4xf32>
    %cst_32 = arith.constant dense<0.000000e+00> : vector<384x4xf32>
    %40 = tpu.matmul %37, %39, %cst_32 {dimension_numbers = #tpu.dot_dimension_numbers<[1], [0], [0], [1], [0, 0, 1, 1], [], []>} : vector<384x4xf32>, vector<4x4xf32>, vector<384x4xf32> -> vector<384x4xf32>
    %c0_33 = arith.constant 0 : index
    %c0_34 = arith.constant 0 : index
    %41 = vector.load %arg7[%c0_33, %c0_34] : memref<384x4xf32, #tpu.memory_space<vmem>>, vector<384x4xf32>
    %42 = arith.addf %41, %40 : vector<384x4xf32>
    %c0_35 = arith.constant 0 : index
    %c0_36 = arith.constant 0 : index
    %43 = vector.load %arg7[%c0_35, %c0_36] : memref<384x4xf32, #tpu.memory_space<vmem>>, vector<384x4xf32>
    tpu.vector_store %arg7[%c0_35, %c0_36], %42 {strides = array<i32>} : memref<384x4xf32, #tpu.memory_space<vmem>>, vector<384x4xf32>,
    %c24_i32_37 = arith.constant 24 : i32
    %44 = arith.addi %1, %c24_i32_37 : i32
    %c1_i32_38 = arith.constant 1 : i32
    %45 = arith.addi %44, %c1_i32_38 : i32
    %c0_39 = arith.constant 0 : index
    %46 = arith.index_cast %45 : i32 to index
    %c0_40 = arith.constant 0 : index
    %47 = vector.load %arg2[%c0_39, %46, %c0_40] : memref<1x456x4xf32, #tpu.memory_space<vmem>>, vector<1x384x4xf32>
    %48 = vector.shape_cast %47 : vector<1x384x4xf32> to vector<384x4xf32>
    %c4 = arith.constant 4 : index
    %c0_41 = arith.constant 0 : index
    %c0_42 = arith.constant 0 : index
    %49 = vector.load %arg3[%c4, %c0_41, %c0_42] : memref<9x4x4xf32, #tpu.memory_space<vmem>>, vector<1x4x4xf32>
    %50 = vector.shape_cast %49 : vector<1x4x4xf32> to vector<4x4xf32>
    %cst_43 = arith.constant dense<0.000000e+00> : vector<384x4xf32>
    %51 = tpu.matmul %48, %50, %cst_43 {dimension_numbers = #tpu.dot_dimension_numbers<[1], [0], [0], [1], [0, 0, 1, 1], [], []>} : vector<384x4xf32>, vector<4x4xf32>, vector<384x4xf32> -> vector<384x4xf32>
    %c0_44 = arith.constant 0 : index
    %c0_45 = arith.constant 0 : index
    %52 = vector.load %arg7[%c0_44, %c0_45] : memref<384x4xf32, #tpu.memory_space<vmem>>, vector<384x4xf32>
    %53 = arith.addf %52, %51 : vector<384x4xf32>
    %c0_46 = arith.constant 0 : index
    %c0_47 = arith.constant 0 : index
    %54 = vector.load %arg7[%c0_46, %c0_47] : memref<384x4xf32, #tpu.memory_space<vmem>>, vector<384x4xf32>
    tpu.vector_store %arg7[%c0_46, %c0_47], %53 {strides = array<i32>} : memref<384x4xf32, #tpu.memory_space<vmem>>, vector<384x4xf32>,
    %c24_i32_48 = arith.constant 24 : i32
    %55 = arith.addi %1, %c24_i32_48 : i32
    %c2_i32_49 = arith.constant 2 : i32
    %56 = arith.addi %55, %c2_i32_49 : i32
    %c0_50 = arith.constant 0 : index
    %57 = arith.index_cast %56 : i32 to index
    %c0_51 = arith.constant 0 : index
    %58 = vector.load %arg2[%c0_50, %57, %c0_51] : memref<1x456x4xf32, #tpu.memory_space<vmem>>, vector<1x384x4xf32>
    %59 = vector.shape_cast %58 : vector<1x384x4xf32> to vector<384x4xf32>
    %c5 = arith.constant 5 : index
    %c0_52 = arith.constant 0 : index
    %c0_53 = arith.constant 0 : index
    %60 = vector.load %arg3[%c5, %c0_52, %c0_53] : memref<9x4x4xf32, #tpu.memory_space<vmem>>, vector<1x4x4xf32>
    %61 = vector.shape_cast %60 : vector<1x4x4xf32> to vector<4x4xf32>
    %cst_54 = arith.constant dense<0.000000e+00> : vector<384x4xf32>
    %62 = tpu.matmul %59, %61, %cst_54 {dimension_numbers = #tpu.dot_dimension_numbers<[1], [0], [0], [1], [0, 0, 1, 1], [], []>} : vector<384x4xf32>, vector<4x4xf32>, vector<384x4xf32> -> vector<384x4xf32>
    %c0_55 = arith.constant 0 : index
    %c0_56 = arith.constant 0 : index
    %63 = vector.load %arg7[%c0_55, %c0_56] : memref<384x4xf32, #tpu.memory_space<vmem>>, vector<384x4xf32>
    %64 = arith.addf %63, %62 : vector<384x4xf32>
    %c0_57 = arith.constant 0 : index
    %c0_58 = arith.constant 0 : index
    %65 = vector.load %arg7[%c0_57, %c0_58] : memref<384x4xf32, #tpu.memory_space<vmem>>, vector<384x4xf32>
    tpu.vector_store %arg7[%c0_57, %c0_58], %64 {strides = array<i32>} : memref<384x4xf32, #tpu.memory_space<vmem>>, vector<384x4xf32>,
    %c48_i32 = arith.constant 48 : i32
    %66 = arith.addi %1, %c48_i32 : i32
    %c0_i32_59 = arith.constant 0 : i32
    %67 = arith.addi %66, %c0_i32_59 : i32
    %c0_60 = arith.constant 0 : index
    %68 = arith.index_cast %67 : i32 to index
    %c0_61 = arith.constant 0 : index
    %69 = vector.load %arg2[%c0_60, %68, %c0_61] : memref<1x456x4xf32, #tpu.memory_space<vmem>>, vector<1x384x4xf32>
    %70 = vector.shape_cast %69 : vector<1x384x4xf32> to vector<384x4xf32>
    %c6 = arith.constant 6 : index
    %c0_62 = arith.constant 0 : index
    %c0_63 = arith.constant 0 : index
    %71 = vector.load %arg3[%c6, %c0_62, %c0_63] : memref<9x4x4xf32, #tpu.memory_space<vmem>>, vector<1x4x4xf32>
    %72 = vector.shape_cast %71 : vector<1x4x4xf32> to vector<4x4xf32>
    %cst_64 = arith.constant dense<0.000000e+00> : vector<384x4xf32>
    %73 = tpu.matmul %70, %72, %cst_64 {dimension_numbers = #tpu.dot_dimension_numbers<[1], [0], [0], [1], [0, 0, 1, 1], [], []>} : vector<384x4xf32>, vector<4x4xf32>, vector<384x4xf32> -> vector<384x4xf32>
    %c0_65 = arith.constant 0 : index
    %c0_66 = arith.constant 0 : index
    %74 = vector.load %arg7[%c0_65, %c0_66] : memref<384x4xf32, #tpu.memory_space<vmem>>, vector<384x4xf32>
    %75 = arith.addf %74, %73 : vector<384x4xf32>
    %c0_67 = arith.constant 0 : index
    %c0_68 = arith.constant 0 : index
    %76 = vector.load %arg7[%c0_67, %c0_68] : memref<384x4xf32, #tpu.memory_space<vmem>>, vector<384x4xf32>
    tpu.vector_store %arg7[%c0_67, %c0_68], %75 {strides = array<i32>} : memref<384x4xf32, #tpu.memory_space<vmem>>, vector<384x4xf32>,
    %c48_i32_69 = arith.constant 48 : i32
    %77 = arith.addi %1, %c48_i32_69 : i32
    %c1_i32_70 = arith.constant 1 : i32
    %78 = arith.addi %77, %c1_i32_70 : i32
    %c0_71 = arith.constant 0 : index
    %79 = arith.index_cast %78 : i32 to index
    %c0_72 = arith.constant 0 : index
    %80 = vector.load %arg2[%c0_71, %79, %c0_72] : memref<1x456x4xf32, #tpu.memory_space<vmem>>, vector<1x384x4xf32>
    %81 = vector.shape_cast %80 : vector<1x384x4xf32> to vector<384x4xf32>
    %c7 = arith.constant 7 : index
    %c0_73 = arith.constant 0 : index
    %c0_74 = arith.constant 0 : index
    %82 = vector.load %arg3[%c7, %c0_73, %c0_74] : memref<9x4x4xf32, #tpu.memory_space<vmem>>, vector<1x4x4xf32>
    %83 = vector.shape_cast %82 : vector<1x4x4xf32> to vector<4x4xf32>
    %cst_75 = arith.constant dense<0.000000e+00> : vector<384x4xf32>
    %84 = tpu.matmul %81, %83, %cst_75 {dimension_numbers = #tpu.dot_dimension_numbers<[1], [0], [0], [1], [0, 0, 1, 1], [], []>} : vector<384x4xf32>, vector<4x4xf32>, vector<384x4xf32> -> vector<384x4xf32>
    %c0_76 = arith.constant 0 : index
    %c0_77 = arith.constant 0 : index
    %85 = vector.load %arg7[%c0_76, %c0_77] : memref<384x4xf32, #tpu.memory_space<vmem>>, vector<384x4xf32>
    %86 = arith.addf %85, %84 : vector<384x4xf32>
    %c0_78 = arith.constant 0 : index
    %c0_79 = arith.constant 0 : index
    %87 = vector.load %arg7[%c0_78, %c0_79] : memref<384x4xf32, #tpu.memory_space<vmem>>, vector<384x4xf32>
    tpu.vector_store %arg7[%c0_78, %c0_79], %86 {strides = array<i32>} : memref<384x4xf32, #tpu.memory_space<vmem>>, vector<384x4xf32>,
    %c48_i32_80 = arith.constant 48 : i32
    %88 = arith.addi %1, %c48_i32_80 : i32
    %c2_i32_81 = arith.constant 2 : i32
    %89 = arith.addi %88, %c2_i32_81 : i32
    %c0_82 = arith.constant 0 : index
    %90 = arith.index_cast %89 : i32 to index
    %c0_83 = arith.constant 0 : index
    %91 = vector.load %arg2[%c0_82, %90, %c0_83] : memref<1x456x4xf32, #tpu.memory_space<vmem>>, vector<1x384x4xf32>
    %92 = vector.shape_cast %91 : vector<1x384x4xf32> to vector<384x4xf32>
    %c8 = arith.constant 8 : index
    %c0_84 = arith.constant 0 : index
    %c0_85 = arith.constant 0 : index
    %93 = vector.load %arg3[%c8, %c0_84, %c0_85] : memref<9x4x4xf32, #tpu.memory_space<vmem>>, vector<1x4x4xf32>
    %94 = vector.shape_cast %93 : vector<1x4x4xf32> to vector<4x4xf32>
    %cst_86 = arith.constant dense<0.000000e+00> : vector<384x4xf32>
    %95 = tpu.matmul %92, %94, %cst_86 {dimension_numbers = #tpu.dot_dimension_numbers<[1], [0], [0], [1], [0, 0, 1, 1], [], []>} : vector<384x4xf32>, vector<4x4xf32>, vector<384x4xf32> -> vector<384x4xf32>
    %c0_87 = arith.constant 0 : index
    %c0_88 = arith.constant 0 : index
    %96 = vector.load %arg7[%c0_87, %c0_88] : memref<384x4xf32, #tpu.memory_space<vmem>>, vector<384x4xf32>
    %97 = arith.addf %96, %95 : vector<384x4xf32>
    %c0_89 = arith.constant 0 : index
    %c0_90 = arith.constant 0 : index
    %98 = vector.load %arg7[%c0_89, %c0_90] : memref<384x4xf32, #tpu.memory_space<vmem>>, vector<384x4xf32>
    tpu.vector_store %arg7[%c0_89, %c0_90], %97 {strides = array<i32>} : memref<384x4xf32, #tpu.memory_space<vmem>>, vector<384x4xf32>,
    %c0_91 = arith.constant 0 : index
    %c0_92 = arith.constant 0 : index
    %99 = vector.load %arg7[%c0_91, %c0_92] : memref<384x4xf32, #tpu.memory_space<vmem>>, vector<384x4xf32>
    %c0_93 = arith.constant 0 : index
    %c0_94 = arith.constant 0 : index
    %100 = vector.load %arg4[%c0_93, %c0_94] : memref<1x4xf32, #tpu.memory_space<vmem>>, vector<1x4xf32>
    %101 = vector.broadcast %100 : vector<1x4xf32> to vector<384x4xf32>
    %102 = arith.addf %99, %101 : vector<384x4xf32>
    %c0_95 = arith.constant 0 : index
    %103 = memref.load %arg5[%c0_95] : memref<2xf32, #tpu.memory_space<smem>>
    %104 = vector.broadcast %103 : f32 to vector<384x4xf32>
    %105 = arith.mulf %104, %102 : vector<384x4xf32>
    %cst_96 = arith.constant 3.000000e+00 : f32
    %106 = vector.broadcast %cst_96 : f32 to vector<384x4xf32>
    %107 = arith.addf %102, %106 : vector<384x4xf32>
    %cst_97 = arith.constant 0.000000e+00 : f32
    %cst_98 = arith.constant 6.000000e+00 : f32
    %108 = vector.broadcast %cst_97 : f32 to vector<384x4xf32>
    %109 = arith.maximumf %108, %107 : vector<384x4xf32>
    %110 = vector.broadcast %cst_98 : f32 to vector<384x4xf32>
    %111 = arith.minimumf %110, %109 : vector<384x4xf32>
    %112 = arith.mulf %105, %111 : vector<384x4xf32>
    %c1_99 = arith.constant 1 : index
    %113 = memref.load %arg5[%c1_99] : memref<2xf32, #tpu.memory_space<smem>>
    %114 = vector.broadcast %113 : f32 to vector<384x4xf32>
    %115 = arith.addf %112, %114 : vector<384x4xf32>
    %116 = vector.shape_cast %115 : vector<384x4xf32> to vector<16x24x4xf32>
    %117 = vector.extract_strided_slice %116 {offsets = [0, 0, 0], sizes = [16, 16, 4], strides = [1, 1, 1]} : vector<16x24x4xf32> to vector<16x16x4xf32>
    %c0_100 = arith.constant 0 : index
    %c0_101 = arith.constant 0 : index
    %c0_102 = arith.constant 0 : index
    %c0_103 = arith.constant 0 : index
    %118 = vector.load %arg6[%c0_100, %c0_101, %c0_102, %c0_103] : memref<1x16x16x4xf32, #tpu.memory_space<vmem>>, vector<1x16x16x4xf32>
    %119 = vector.shape_cast %118 : vector<1x16x16x4xf32> to vector<16x16x4xf32>
    %120 = vector.shape_cast %117 : vector<16x16x4xf32> to vector<1x16x16x4xf32>
    tpu.vector_store %arg6[%c0_100, %c0_101, %c0_102, %c0_103], %120 {strides = array<i32>} : memref<1x16x16x4xf32, #tpu.memory_space<vmem>>, vector<1x16x16x4xf32>,
    return
  }
  func.func @transform_0(%arg0: i32, %arg1: i32) -> (i32, i32, i32) {
    %c0_i32 = arith.constant 0 : i32
    %c0_i32_0 = arith.constant 0 : i32
    %c0_i32_1 = arith.constant 0 : i32
    return %arg0, %c0_i32, %c0_i32_0 : i32, i32, i32
  }
  func.func @transform_1(%arg0: i32, %arg1: i32) -> (i32, i32, i32) {
    %c0_i32 = arith.constant 0 : i32
    %c0_i32_0 = arith.constant 0 : i32
    %c0_i32_1 = arith.constant 0 : i32
    %c0_i32_2 = arith.constant 0 : i32
    return %c0_i32, %c0_i32_0, %c0_i32_1 : i32, i32, i32
  }
  func.func @transform_2(%arg0: i32, %arg1: i32) -> (i32, i32) {
    %c0_i32 = arith.constant 0 : i32
    %c0_i32_0 = arith.constant 0 : i32
    %c0_i32_1 = arith.constant 0 : i32
    return %c0_i32, %c0_i32_0 : i32, i32
  }
  func.func @transform_3(%arg0: i32, %arg1: i32) -> i32 {
    %c0_i32 = arith.constant 0 : i32
    %c0_i32_0 = arith.constant 0 : i32
    return %c0_i32 : i32
  }
  func.func @transform_4(%arg0: i32, %arg1: i32) -> (i32, i32, i32, i32) {
    %c0_i32 = arith.constant 0 : i32
    %c0_i32_0 = arith.constant 0 : i32
    %c0_i32_1 = arith.constant 0 : i32
    return %arg0, %arg1, %c0_i32, %c0_i32_0 : i32, i32, i32, i32
  }
}

module attributes {stable_mosaic.version = 11 : i64} {
  func.func @_rep_layer_kernel(%arg0: i32, %arg1: i32, %arg2: memref<1x456x4xf32, #tpu.memory_space<vmem>>, %arg3: memref<9x4x4xf32, #tpu.memory_space<vmem>>, %arg4: memref<1x4xf32, #tpu.memory_space<vmem>>, %arg5: memref<2xf32, #tpu.memory_space<smem>>, %arg6: memref<1x16x16x4xf32, #tpu.memory_space<vmem>>, %arg7: memref<384x4xf32, #tpu.memory_space<vmem>>) attributes {dimension_semantics = [#tpu.dimension_semantics<parallel>, #tpu.dimension_semantics<parallel>], iteration_bounds = array<i64: 2, 1>, scalar_prefetch = 0 : i64, scratch_operands = 1 : i64, tpu.core_type = #tpu.core_type<tc>, window_params = [{transform_indices = @transform_0, window_bounds = array<i64: 1, 456, 4>}, {pipeline_mode = #tpu.pipeline_mode<synchronous>, transform_indices = @transform_1, window_bounds = array<i64: 9, 4, 4>}, {pipeline_mode = #tpu.pipeline_mode<synchronous>, transform_indices = @transform_2, window_bounds = array<i64: 1, 4>}, {transform_indices = @transform_3, window_bounds = array<i64: 2>}, {transform_indices = @transform_4, window_bounds = array<i64: 1, 16, 16, 4>}]} {
    %c384_i32 = arith.constant 384 : i32
    %0 = arith.muli %arg1, %c384_i32 : i32
    %1 = tpu.assume_multiple %0, 8 : i32
    %c0_i32 = arith.constant 0 : i32
    %2 = arith.addi %1, %c0_i32 : i32
    %c0_i32_0 = arith.constant 0 : i32
    %3 = arith.addi %2, %c0_i32_0 : i32
    %c0 = arith.constant 0 : index
    %4 = arith.index_cast %3 : i32 to index
    %c0_1 = arith.constant 0 : index
    %5 = vector.load %arg2[%c0, %4, %c0_1] : memref<1x456x4xf32, #tpu.memory_space<vmem>>, vector<1x384x4xf32>
    %6 = vector.shape_cast %5 : vector<1x384x4xf32> to vector<384x4xf32>
    %c0_2 = arith.constant 0 : index
    %c0_3 = arith.constant 0 : index
    %c0_4 = arith.constant 0 : index
    %7 = vector.load %arg3[%c0_2, %c0_3, %c0_4] : memref<9x4x4xf32, #tpu.memory_space<vmem>>, vector<1x4x4xf32>
    %8 = vector.shape_cast %7 : vector<1x4x4xf32> to vector<4x4xf32>
    %cst = arith.constant dense<0.000000e+00> : vector<384x4xf32>
    %9 = tpu.matmul %6, %8, %cst {dimension_numbers = #tpu.dot_dimension_numbers<[1], [0], [0], [1], [0, 0, 1, 1], [], []>} : vector<384x4xf32>, vector<4x4xf32>, vector<384x4xf32> -> vector<384x4xf32>
    %c0_5 = arith.constant 0 : index
    %c0_6 = arith.constant 0 : index
    %10 = vector.load %arg7[%c0_5, %c0_6] : memref<384x4xf32, #tpu.memory_space<vmem>>, vector<384x4xf32>
    tpu.vector_store %arg7[%c0_5, %c0_6], %9 {strides = array<i32>} : memref<384x4xf32, #tpu.memory_space<vmem>>, vector<384x4xf32>,
    %c0_i32_7 = arith.constant 0 : i32
    %11 = arith.addi %1, %c0_i32_7 : i32
    %c1_i32 = arith.constant 1 : i32
    %12 = arith.addi %11, %c1_i32 : i32
    %c0_8 = arith.constant 0 : index
    %13 = arith.index_cast %12 : i32 to index
    %c0_9 = arith.constant 0 : index
    %14 = vector.load %arg2[%c0_8, %13, %c0_9] : memref<1x456x4xf32, #tpu.memory_space<vmem>>, vector<1x384x4xf32>
    %15 = vector.shape_cast %14 : vector<1x384x4xf32> to vector<384x4xf32>
    %c1 = arith.constant 1 : index
    %c0_10 = arith.constant 0 : index
    %c0_11 = arith.constant 0 : index
    %16 = vector.load %arg3[%c1, %c0_10, %c0_11] : memref<9x4x4xf32, #tpu.memory_space<vmem>>, vector<1x4x4xf32>
    %17 = vector.shape_cast %16 : vector<1x4x4xf32> to vector<4x4xf32>
    %cst_12 = arith.constant dense<0.000000e+00> : vector<384x4xf32>
    %18 = tpu.matmul %15, %17, %cst_12 {dimension_numbers = #tpu.dot_dimension_numbers<[1], [0], [0], [1], [0, 0, 1, 1], [], []>} : vector<384x4xf32>, vector<4x4xf32>, vector<384x4xf32> -> vector<384x4xf32>
    %c0_13 = arith.constant 0 : index
    %c0_14 = arith.constant 0 : index
    %19 = vector.load %arg7[%c0_13, %c0_14] : memref<384x4xf32, #tpu.memory_space<vmem>>, vector<384x4xf32>
    %20 = arith.addf %19, %18 : vector<384x4xf32>
    %c0_15 = arith.constant 0 : index
    %c0_16 = arith.constant 0 : index
    %21 = vector.load %arg7[%c0_15, %c0_16] : memref<384x4xf32, #tpu.memory_space<vmem>>, vector<384x4xf32>
    tpu.vector_store %arg7[%c0_15, %c0_16], %20 {strides = array<i32>} : memref<384x4xf32, #tpu.memory_space<vmem>>, vector<384x4xf32>,
    %c0_i32_17 = arith.constant 0 : i32
    %22 = arith.addi %1, %c0_i32_17 : i32
    %c2_i32 = arith.constant 2 : i32
    %23 = arith.addi %22, %c2_i32 : i32
    %c0_18 = arith.constant 0 : index
    %24 = arith.index_cast %23 : i32 to index
    %c0_19 = arith.constant 0 : index
    %25 = vector.load %arg2[%c0_18, %24, %c0_19] : memref<1x456x4xf32, #tpu.memory_space<vmem>>, vector<1x384x4xf32>
    %26 = vector.shape_cast %25 : vector<1x384x4xf32> to vector<384x4xf32>
    %c2 = arith.constant 2 : index
    %c0_20 = arith.constant 0 : index
    %c0_21 = arith.constant 0 : index
    %27 = vector.load %arg3[%c2, %c0_20, %c0_21] : memref<9x4x4xf32, #tpu.memory_space<vmem>>, vector<1x4x4xf32>
    %28 = vector.shape_cast %27 : vector<1x4x4xf32> to vector<4x4xf32>
    %cst_22 = arith.constant dense<0.000000e+00> : vector<384x4xf32>
    %29 = tpu.matmul %26, %28, %cst_22 {dimension_numbers = #tpu.dot_dimension_numbers<[1], [0], [0], [1], [0, 0, 1, 1], [], []>} : vector<384x4xf32>, vector<4x4xf32>, vector<384x4xf32> -> vector<384x4xf32>
    %c0_23 = arith.constant 0 : index
    %c0_24 = arith.constant 0 : index
    %30 = vector.load %arg7[%c0_23, %c0_24] : memref<384x4xf32, #tpu.memory_space<vmem>>, vector<384x4xf32>
    %31 = arith.addf %30, %29 : vector<384x4xf32>
    %c0_25 = arith.constant 0 : index
    %c0_26 = arith.constant 0 : index
    %32 = vector.load %arg7[%c0_25, %c0_26] : memref<384x4xf32, #tpu.memory_space<vmem>>, vector<384x4xf32>
    tpu.vector_store %arg7[%c0_25, %c0_26], %31 {strides = array<i32>} : memref<384x4xf32, #tpu.memory_space<vmem>>, vector<384x4xf32>,
    %c24_i32 = arith.constant 24 : i32
    %33 = arith.addi %1, %c24_i32 : i32
    %c0_i32_27 = arith.constant 0 : i32
    %34 = arith.addi %33, %c0_i32_27 : i32
    %c0_28 = arith.constant 0 : index
    %35 = arith.index_cast %34 : i32 to index
    %c0_29 = arith.constant 0 : index
    %36 = vector.load %arg2[%c0_28, %35, %c0_29] : memref<1x456x4xf32, #tpu.memory_space<vmem>>, vector<1x384x4xf32>
    %37 = vector.shape_cast %36 : vector<1x384x4xf32> to vector<384x4xf32>
    %c3 = arith.constant 3 : index
    %c0_30 = arith.constant 0 : index
    %c0_31 = arith.constant 0 : index
    %38 = vector.load %arg3[%c3, %c0_30, %c0_31] : memref<9x4x4xf32, #tpu.memory_space<vmem>>, vector<1x4x4xf32>
    %39 = vector.shape_cast %38 : vector<1x4x4xf32> to vector<4x4xf32>
    %cst_32 = arith.constant dense<0.000000e+00> : vector<384x4xf32>
    %40 = tpu.matmul %37, %39, %cst_32 {dimension_numbers = #tpu.dot_dimension_numbers<[1], [0], [0], [1], [0, 0, 1, 1], [], []>} : vector<384x4xf32>, vector<4x4xf32>, vector<384x4xf32> -> vector<384x4xf32>
    %c0_33 = arith.constant 0 : index
    %c0_34 = arith.constant 0 : index
    %41 = vector.load %arg7[%c0_33, %c0_34] : memref<384x4xf32, #tpu.memory_space<vmem>>, vector<384x4xf32>
    %42 = arith.addf %41, %40 : vector<384x4xf32>
    %c0_35 = arith.constant 0 : index
    %c0_36 = arith.constant 0 : index
    %43 = vector.load %arg7[%c0_35, %c0_36] : memref<384x4xf32, #tpu.memory_space<vmem>>, vector<384x4xf32>
    tpu.vector_store %arg7[%c0_35, %c0_36], %42 {strides = array<i32>} : memref<384x4xf32, #tpu.memory_space<vmem>>, vector<384x4xf32>,
    %c24_i32_37 = arith.constant 24 : i32
    %44 = arith.addi %1, %c24_i32_37 : i32
    %c1_i32_38 = arith.constant 1 : i32
    %45 = arith.addi %44, %c1_i32_38 : i32
    %c0_39 = arith.constant 0 : index
    %46 = arith.index_cast %45 : i32 to index
    %c0_40 = arith.constant 0 : index
    %47 = vector.load %arg2[%c0_39, %46, %c0_40] : memref<1x456x4xf32, #tpu.memory_space<vmem>>, vector<1x384x4xf32>
    %48 = vector.shape_cast %47 : vector<1x384x4xf32> to vector<384x4xf32>
    %c4 = arith.constant 4 : index
    %c0_41 = arith.constant 0 : index
    %c0_42 = arith.constant 0 : index
    %49 = vector.load %arg3[%c4, %c0_41, %c0_42] : memref<9x4x4xf32, #tpu.memory_space<vmem>>, vector<1x4x4xf32>
    %50 = vector.shape_cast %49 : vector<1x4x4xf32> to vector<4x4xf32>
    %cst_43 = arith.constant dense<0.000000e+00> : vector<384x4xf32>
    %51 = tpu.matmul %48, %50, %cst_43 {dimension_numbers = #tpu.dot_dimension_numbers<[1], [0], [0], [1], [0, 0, 1, 1], [], []>} : vector<384x4xf32>, vector<4x4xf32>, vector<384x4xf32> -> vector<384x4xf32>
    %c0_44 = arith.constant 0 : index
    %c0_45 = arith.constant 0 : index
    %52 = vector.load %arg7[%c0_44, %c0_45] : memref<384x4xf32, #tpu.memory_space<vmem>>, vector<384x4xf32>
    %53 = arith.addf %52, %51 : vector<384x4xf32>
    %c0_46 = arith.constant 0 : index
    %c0_47 = arith.constant 0 : index
    %54 = vector.load %arg7[%c0_46, %c0_47] : memref<384x4xf32, #tpu.memory_space<vmem>>, vector<384x4xf32>
    tpu.vector_store %arg7[%c0_46, %c0_47], %53 {strides = array<i32>} : memref<384x4xf32, #tpu.memory_space<vmem>>, vector<384x4xf32>,
    %c24_i32_48 = arith.constant 24 : i32
    %55 = arith.addi %1, %c24_i32_48 : i32
    %c2_i32_49 = arith.constant 2 : i32
    %56 = arith.addi %55, %c2_i32_49 : i32
    %c0_50 = arith.constant 0 : index
    %57 = arith.index_cast %56 : i32 to index
    %c0_51 = arith.constant 0 : index
    %58 = vector.load %arg2[%c0_50, %57, %c0_51] : memref<1x456x4xf32, #tpu.memory_space<vmem>>, vector<1x384x4xf32>
    %59 = vector.shape_cast %58 : vector<1x384x4xf32> to vector<384x4xf32>
    %c5 = arith.constant 5 : index
    %c0_52 = arith.constant 0 : index
    %c0_53 = arith.constant 0 : index
    %60 = vector.load %arg3[%c5, %c0_52, %c0_53] : memref<9x4x4xf32, #tpu.memory_space<vmem>>, vector<1x4x4xf32>
    %61 = vector.shape_cast %60 : vector<1x4x4xf32> to vector<4x4xf32>
    %cst_54 = arith.constant dense<0.000000e+00> : vector<384x4xf32>
    %62 = tpu.matmul %59, %61, %cst_54 {dimension_numbers = #tpu.dot_dimension_numbers<[1], [0], [0], [1], [0, 0, 1, 1], [], []>} : vector<384x4xf32>, vector<4x4xf32>, vector<384x4xf32> -> vector<384x4xf32>
    %c0_55 = arith.constant 0 : index
    %c0_56 = arith.constant 0 : index
    %63 = vector.load %arg7[%c0_55, %c0_56] : memref<384x4xf32, #tpu.memory_space<vmem>>, vector<384x4xf32>
    %64 = arith.addf %63, %62 : vector<384x4xf32>
    %c0_57 = arith.constant 0 : index
    %c0_58 = arith.constant 0 : index
    %65 = vector.load %arg7[%c0_57, %c0_58] : memref<384x4xf32, #tpu.memory_space<vmem>>, vector<384x4xf32>
    tpu.vector_store %arg7[%c0_57, %c0_58], %64 {strides = array<i32>} : memref<384x4xf32, #tpu.memory_space<vmem>>, vector<384x4xf32>,
    %c48_i32 = arith.constant 48 : i32
    %66 = arith.addi %1, %c48_i32 : i32
    %c0_i32_59 = arith.constant 0 : i32
    %67 = arith.addi %66, %c0_i32_59 : i32
    %c0_60 = arith.constant 0 : index
    %68 = arith.index_cast %67 : i32 to index
    %c0_61 = arith.constant 0 : index
    %69 = vector.load %arg2[%c0_60, %68, %c0_61] : memref<1x456x4xf32, #tpu.memory_space<vmem>>, vector<1x384x4xf32>
    %70 = vector.shape_cast %69 : vector<1x384x4xf32> to vector<384x4xf32>
    %c6 = arith.constant 6 : index
    %c0_62 = arith.constant 0 : index
    %c0_63 = arith.constant 0 : index
    %71 = vector.load %arg3[%c6, %c0_62, %c0_63] : memref<9x4x4xf32, #tpu.memory_space<vmem>>, vector<1x4x4xf32>
    %72 = vector.shape_cast %71 : vector<1x4x4xf32> to vector<4x4xf32>
    %cst_64 = arith.constant dense<0.000000e+00> : vector<384x4xf32>
    %73 = tpu.matmul %70, %72, %cst_64 {dimension_numbers = #tpu.dot_dimension_numbers<[1], [0], [0], [1], [0, 0, 1, 1], [], []>} : vector<384x4xf32>, vector<4x4xf32>, vector<384x4xf32> -> vector<384x4xf32>
    %c0_65 = arith.constant 0 : index
    %c0_66 = arith.constant 0 : index
    %74 = vector.load %arg7[%c0_65, %c0_66] : memref<384x4xf32, #tpu.memory_space<vmem>>, vector<384x4xf32>
    %75 = arith.addf %74, %73 : vector<384x4xf32>
    %c0_67 = arith.constant 0 : index
    %c0_68 = arith.constant 0 : index
    %76 = vector.load %arg7[%c0_67, %c0_68] : memref<384x4xf32, #tpu.memory_space<vmem>>, vector<384x4xf32>
    tpu.vector_store %arg7[%c0_67, %c0_68], %75 {strides = array<i32>} : memref<384x4xf32, #tpu.memory_space<vmem>>, vector<384x4xf32>,
    %c48_i32_69 = arith.constant 48 : i32
    %77 = arith.addi %1, %c48_i32_69 : i32
    %c1_i32_70 = arith.constant 1 : i32
    %78 = arith.addi %77, %c1_i32_70 : i32
    %c0_71 = arith.constant 0 : index
    %79 = arith.index_cast %78 : i32 to index
    %c0_72 = arith.constant 0 : index
    %80 = vector.load %arg2[%c0_71, %79, %c0_72] : memref<1x456x4xf32, #tpu.memory_space<vmem>>, vector<1x384x4xf32>
    %81 = vector.shape_cast %80 : vector<1x384x4xf32> to vector<384x4xf32>
    %c7 = arith.constant 7 : index
    %c0_73 = arith.constant 0 : index
    %c0_74 = arith.constant 0 : index
    %82 = vector.load %arg3[%c7, %c0_73, %c0_74] : memref<9x4x4xf32, #tpu.memory_space<vmem>>, vector<1x4x4xf32>
    %83 = vector.shape_cast %82 : vector<1x4x4xf32> to vector<4x4xf32>
    %cst_75 = arith.constant dense<0.000000e+00> : vector<384x4xf32>
    %84 = tpu.matmul %81, %83, %cst_75 {dimension_numbers = #tpu.dot_dimension_numbers<[1], [0], [0], [1], [0, 0, 1, 1], [], []>} : vector<384x4xf32>, vector<4x4xf32>, vector<384x4xf32> -> vector<384x4xf32>
    %c0_76 = arith.constant 0 : index
    %c0_77 = arith.constant 0 : index
    %85 = vector.load %arg7[%c0_76, %c0_77] : memref<384x4xf32, #tpu.memory_space<vmem>>, vector<384x4xf32>
    %86 = arith.addf %85, %84 : vector<384x4xf32>
    %c0_78 = arith.constant 0 : index
    %c0_79 = arith.constant 0 : index
    %87 = vector.load %arg7[%c0_78, %c0_79] : memref<384x4xf32, #tpu.memory_space<vmem>>, vector<384x4xf32>
    tpu.vector_store %arg7[%c0_78, %c0_79], %86 {strides = array<i32>} : memref<384x4xf32, #tpu.memory_space<vmem>>, vector<384x4xf32>,
    %c48_i32_80 = arith.constant 48 : i32
    %88 = arith.addi %1, %c48_i32_80 : i32
    %c2_i32_81 = arith.constant 2 : i32
    %89 = arith.addi %88, %c2_i32_81 : i32
    %c0_82 = arith.constant 0 : index
    %90 = arith.index_cast %89 : i32 to index
    %c0_83 = arith.constant 0 : index
    %91 = vector.load %arg2[%c0_82, %90, %c0_83] : memref<1x456x4xf32, #tpu.memory_space<vmem>>, vector<1x384x4xf32>
    %92 = vector.shape_cast %91 : vector<1x384x4xf32> to vector<384x4xf32>
    %c8 = arith.constant 8 : index
    %c0_84 = arith.constant 0 : index
    %c0_85 = arith.constant 0 : index
    %93 = vector.load %arg3[%c8, %c0_84, %c0_85] : memref<9x4x4xf32, #tpu.memory_space<vmem>>, vector<1x4x4xf32>
    %94 = vector.shape_cast %93 : vector<1x4x4xf32> to vector<4x4xf32>
    %cst_86 = arith.constant dense<0.000000e+00> : vector<384x4xf32>
    %95 = tpu.matmul %92, %94, %cst_86 {dimension_numbers = #tpu.dot_dimension_numbers<[1], [0], [0], [1], [0, 0, 1, 1], [], []>} : vector<384x4xf32>, vector<4x4xf32>, vector<384x4xf32> -> vector<384x4xf32>
    %c0_87 = arith.constant 0 : index
    %c0_88 = arith.constant 0 : index
    %96 = vector.load %arg7[%c0_87, %c0_88] : memref<384x4xf32, #tpu.memory_space<vmem>>, vector<384x4xf32>
    %97 = arith.addf %96, %95 : vector<384x4xf32>
    %c0_89 = arith.constant 0 : index
    %c0_90 = arith.constant 0 : index
    %98 = vector.load %arg7[%c0_89, %c0_90] : memref<384x4xf32, #tpu.memory_space<vmem>>, vector<384x4xf32>
    tpu.vector_store %arg7[%c0_89, %c0_90], %97 {strides = array<i32>} : memref<384x4xf32, #tpu.memory_space<vmem>>, vector<384x4xf32>,
    %c0_91 = arith.constant 0 : index
    %c0_92 = arith.constant 0 : index
    %99 = vector.load %arg7[%c0_91, %c0_92] : memref<384x4xf32, #tpu.memory_space<vmem>>, vector<384x4xf32>
    %c0_93 = arith.constant 0 : index
    %c0_94 = arith.constant 0 : index
    %100 = vector.load %arg4[%c0_93, %c0_94] : memref<1x4xf32, #tpu.memory_space<vmem>>, vector<1x4xf32>
    %101 = vector.broadcast %100 : vector<1x4xf32> to vector<384x4xf32>
    %102 = arith.addf %99, %101 : vector<384x4xf32>
    %c0_95 = arith.constant 0 : index
    %103 = memref.load %arg5[%c0_95] : memref<2xf32, #tpu.memory_space<smem>>
    %104 = vector.broadcast %103 : f32 to vector<384x4xf32>
    %105 = arith.mulf %104, %102 : vector<384x4xf32>
    %cst_96 = arith.constant 3.000000e+00 : f32
    %106 = vector.broadcast %cst_96 : f32 to vector<384x4xf32>
    %107 = arith.addf %102, %106 : vector<384x4xf32>
    %cst_97 = arith.constant 0.000000e+00 : f32
    %cst_98 = arith.constant 6.000000e+00 : f32
    %108 = vector.broadcast %cst_97 : f32 to vector<384x4xf32>
    %109 = arith.maximumf %108, %107 : vector<384x4xf32>
    %110 = vector.broadcast %cst_98 : f32 to vector<384x4xf32>
    %111 = arith.minimumf %110, %109 : vector<384x4xf32>
    %112 = arith.mulf %105, %111 : vector<384x4xf32>
    %c1_99 = arith.constant 1 : index
    %113 = memref.load %arg5[%c1_99] : memref<2xf32, #tpu.memory_space<smem>>
    %114 = vector.broadcast %113 : f32 to vector<384x4xf32>
    %115 = arith.addf %112, %114 : vector<384x4xf32>
    %116 = vector.shape_cast %115 : vector<384x4xf32> to vector<16x24x4xf32>
    %117 = vector.extract_strided_slice %116 {offsets = [0, 0, 0], sizes = [16, 16, 4], strides = [1, 1, 1]} : vector<16x24x4xf32> to vector<16x16x4xf32>
    %c0_100 = arith.constant 0 : index
    %c0_101 = arith.constant 0 : index
    %c0_102 = arith.constant 0 : index
    %c0_103 = arith.constant 0 : index
    %118 = vector.load %arg6[%c0_100, %c0_101, %c0_102, %c0_103] : memref<1x16x16x4xf32, #tpu.memory_space<vmem>>, vector<1x16x16x4xf32>
    %119 = vector.shape_cast %118 : vector<1x16x16x4xf32> to vector<16x16x4xf32>
    %120 = vector.shape_cast %117 : vector<16x16x4xf32> to vector<1x16x16x4xf32>
    tpu.vector_store %arg6[%c0_100, %c0_101, %c0_102, %c0_103], %120 {strides = array<i32>} : memref<1x16x16x4xf32, #tpu.memory_space<vmem>>, vector<1x16x16x4xf32>,
    return
  }
  func.func @transform_0(%arg0: i32, %arg1: i32) -> (i32, i32, i32) {
    %c0_i32 = arith.constant 0 : i32
    %c0_i32_0 = arith.constant 0 : i32
    %c0_i32_1 = arith.constant 0 : i32
    return %arg0, %c0_i32, %c0_i32_0 : i32, i32, i32
  }
  func.func @transform_1(%arg0: i32, %arg1: i32) -> (i32, i32, i32) {
    %c0_i32 = arith.constant 0 : i32
    %c0_i32_0 = arith.constant 0 : i32
    %c0_i32_1 = arith.constant 0 : i32
    %c0_i32_2 = arith.constant 0 : i32
    return %c0_i32, %c0_i32_0, %c0_i32_1 : i32, i32, i32
  }
  func.func @transform_2(%arg0: i32, %arg1: i32) -> (i32, i32) {
    %c0_i32 = arith.constant 0 : i32
    %c0_i32_0 = arith.constant 0 : i32
    %c0_i32_1 = arith.constant 0 : i32
    return %c0_i32, %c0_i32_0 : i32, i32
  }
  func.func @transform_3(%arg0: i32, %arg1: i32) -> i32 {
    %c0_i32 = arith.constant 0 : i32
    %c0_i32_0 = arith.constant 0 : i32
    return %c0_i32 : i32
  }
  func.func @transform_4(%arg0: i32, %arg1: i32) -> (i32, i32, i32, i32) {
    %c0_i32 = arith.constant 0 : i32
    %c0_i32_0 = arith.constant 0 : i32
    %c0_i32_1 = arith.constant 0 : i32
    return %arg0, %arg1, %c0_i32, %c0_i32_0 : i32, i32, i32, i32
  }
}

</mosaic_0001>

<bundles_post_ra>
// kernel: tpu_custom_call.1
= control target key start
LH: loop header
LB: loop body
LE: loop exit
PB: predicated region body
PF: predicated region fallthrough
CT: control target
= control target key end

     0   :  { %9 = vsyncpa [#allocation4], 0  ;;  %s8461_s15 = smov 0   ;;  %s8463_s16 = smov 0   ;;  %s10402_s0 = inlined_call_operand.vmem [shape: f32[2,456,4], index: 0, kind: input, shape index: {}]   ;;  %s10403_s1 = inlined_call_operand.vmem [shape: f32[9,4,4], index: 1, kind: input, shape index: {}]   ;;  %s10404_s2 = inlined_call_operand.vmem [shape: f32[1,4], index: 2, kind: input, shape index: {}]   ;;  %s10405_s3 = inlined_call_operand.vmem [shape: f32[2], index: 3, kind: input, shape index: {}]   ;;  %s10406_s4 = inlined_call_operand.vmem [shape: f32[2,16,16,4], index: 4, kind: output, shape index: {}]  }
   0x1   :  { %s8465_s17 = smov 0  }
   0x2 LB: > { %s6398_s18 = sadd.s32 4294967295, %s8433_s17   ;;  %s27_s19 = sadd.s32 1, %s8429_s16  ;;  %s8433_s17 = sphi %s8465_s17, %s15_s17   ;;  %s8429_s16 = sphi %s8463_s16, %s10563_s16   ;;  %s8425_s15 = sphi %s8461_s15, %s10562_s15  }
   0x3   : > { %p29_p0 = scmp.ge.s32.totalorder %s27_s19, 2  ;;  %p6400_p1 = scmp.ge.s32.totalorder %s8433_s17, 1 }
   0x4   : > { %p149_p2 = scmp.lt.s32.totalorder %s8433_s17, 3  ;;  %p8486_p4 = scmp.eq.s32.totalorder %s6398_s18, 0 }
   0x5   : > { %s10565_s19 = smov (%p29_p0, %s27_s19), 0  ;;  %s168_s24 = sshll.u32 %s10405_s3, 4  ;;  %s169_s24 = int_to_ptr.vmem [resolvable:$true] %s168_s24 }
   0x6   : > { %p8482_p3 = pnand %p6400_p1, %p149_p2  ;;  %s8392_s25 = scalar_lea.vmem %s169_s24, 16 }
   0x7   : > { %p8393_p7 = scmp.ne.s32.totalorder %s169_s24, %s8392_s25  ;;  %p8400_p11 = scmp.lt.s32.totalorder %s169_s24, %s169_s24 }
   0x8   : > { %p8360_p5 = pneg %p8482_p3  ;;  %p8401_p12 = scmp.lt.s32.totalorder %s8392_s25, %s8392_s25 }
   0xa   : > { %p8361_p6 = pnand %p8486_p4, %p8360_p5  ;;  %p8402_p13 = por %p8401_p12, %p8400_p11 }
   0xc   : > { %p8394_p8 = pneg %p8361_p6 }
   0xe   : > { %p8395_p9 = pnand %p8394_p8, %p8393_p7 }
  0x10   : > { %p8396_p10 = pneg %p8395_p9 }
  0x12   : > { %p8403_p0 = pnand %p8402_p13, %p8396_p10 }
  0x14   : > { %8406 = shalt.err (!%p8403_p0)
}
  0x15   : > { %s8435_s26 = smov [#allocation3]   ;;  %189 = sbr.rel (%p8482_p3) target bundleno = 713 (0x2c9), region = 36 }
  0x16   : > { %8363 = dma.vmem_to_smem (!%p8361_p6), %s169_s24, 16, %s8435_s26, [#allocation4]  }
  0x1c   : > { %8420 = dma.done.wait (%p8486_p4), [#allocation4], 16  }
  0x1d   : > { %8422 = vsyncadd (%p8486_p4), [#allocation4], 4294967280 }
  0x1e   : > { %195 = sfence }
  0x1f   : > { %v287_v0 = vld [vmem:[%s10403_s1] sm:$0xf]  ;;  %vm433_vm0 = vcmask 1043456   ;;  %p221_p1 = scmp.lt.s32.totalorder %s8425_s15, 1  ;;  %v6505_v1 = vld [vmem:[%s10403_s1 + $0x4] sm:$0xf] }
  0x20   : > { %8353 = vmatprep.subr.msk.mxu1 %vm433_vm0, %v287_v0  ;;  %7687 = vmatprep.subr.msk.mxu0 %vm433_vm0, %v287_v0  ;;  %v6603_v2 = vld [vmem:[%s10403_s1 + $0x8] sm:$0xf]  ;;  %vm288_vm1 = vcmask 31744   ;;  %v8543_v7 = vld [vmem:[%s10403_s1 + $0xc] sm:$0xf]  ;;  %s10117_s27 = sld [smem:[#allocation3]] }
  0x21   : > { %8354 = vmatpush3.msk.msra.mxu1 %vm433_vm0, %v287_v0  ;;  %s10567_s15 = smov (!%p221_p1, %s8425_s15), 1  ;;  %7688 = vmatpush3.msk.msra.mxu0 %vm433_vm0, %v287_v0  ;;  %v8559_v11 = vld [vmem:[%s10403_s1 + $0x10] sm:$0xf]  ;;  %v8785_v58 = vld [vmem:[%s10403_s1 + $0x14] sm:$0xf]  ;;  %s10128_s30 = sld [smem:[#allocation3 + $0x1]] }
  0x22   : > { %7761 = vmatprep.subr.msk.mxu1 %vm433_vm0, %v6505_v1  ;;  %7835 = vmatprep.subr.msk.mxu0 %vm433_vm0, %v6603_v2  ;;  %s8355_s7 = smul.u32 456, %s10567_s15  ;;  %v8798_v61 = vld [vmem:[%s10403_s1 + $0x18] sm:$0xf]  ;;  %s7245_s5 = sshll.u32 %s10567_s15, 8 }
  0x24   : > { %s8526_s10 = scalar_lea.vmem %s10402_s0, %s8355_s7  ;;  %s10155_s7 = scalar_lea.vmem %s10406_s4, %s7245_s5 }
  0x25   : > { %v8529_v3 = vld [vmem:[%s8526_s10 + $0xc0] sm:$0xff]  ;;  %v8532_v4 = vld [vmem:[%s8526_s10 + $0xc8] sm:$0xff]  ;;  %v8535_v5 = vld [vmem:[%s8526_s10 + $0xd0] sm:$0xff] }
  0x26   : > { %7725 = vmatprep.mubr.msk.f32.mxu1 %vm288_vm1, %v8529_v3  ;;  %v239_v6 = vld [vmem:[%s8526_s10] sm:$0xff]  ;;  %v240_v8 = vld [vmem:[%s8526_s10 + $0x8] sm:$0xff]  ;;  %v8553_v9 = vld [vmem:[%s8526_s10 + $0xd8] sm:$0xff] }
  0x27   : > { %7726 = vmatmul.mubr.msk.f32.vlgmr.msra.gmra.mrb[0].mxu1 %vm288_vm1, %v8532_v4  ;;  %7689 = vmatprep.mubr.msk.f32.mxu0 %vm288_vm1, %v239_v6  ;;  %v241_v10 = vld [vmem:[%s8526_s10 + $0x10] sm:$0xff]  ;;  %v8562_v12 = vld [vmem:[%s8526_s10 + $0xe0] sm:$0xff]  ;;  %v8570_v13 = vld [vmem:[%s8526_s10 + $0x18] sm:$0xff] }
  0x28   : > { %7762 = vmatpush3.msk.msra.mxu1 %vm433_vm0, %v6505_v1  ;;  %7728 = vmatprep.mubr.msk.f32.mxu1 %vm288_vm1, %v8535_v5  ;;  %v8575_v14 = vld [vmem:[%s8526_s10 + $0x20] sm:$0xff]  ;;  %v8582_v15 = vld [vmem:[%s8526_s10 + $0xe8] sm:$0xff]  ;;  %v8585_v16 = vld [vmem:[%s8526_s10 + $0xf0] sm:$0xff] }
  0x29   : > { %7690 = vmatmul.mubr.msk.f32.vlgmr.msra.gmra.mrb[0].mxu0 %vm288_vm1, %v240_v8  ;;  %7909 = vmatprep.subr.msk.mxu1 %vm433_vm0, %v8543_v7  ;;  %10460 = vst [vmem:[#allocation6_spill] sm:$0xff] %v8585_v16  ;;  %v8592_v17 = vld [vmem:[%s8526_s10 + $0x28] sm:$0xff]  ;;  %v8597_v18 = vld [vmem:[%s8526_s10 + $0x30] sm:$0xff]  ;;  %v8602_v19 = vld [vmem:[%s8526_s10 + $0xf8] sm:$0xff] }
  0x2a   : > { %7836 = vmatpush3.msk.msra.mxu0 %vm433_vm0, %v6603_v2  ;;  %7692 = vmatprep.mubr.msk.f32.mxu0 %vm288_vm1, %v241_v10  ;;  %10461 = vst [vmem:[#allocation7_spill] sm:$0xff] %v8602_v19  ;;  %v8605_v20 = vld [vmem:[%s8526_s10 + $0x100] sm:$0xff]  ;;  %v8612_v21 = vld [vmem:[%s8526_s10 + $0x38] sm:$0xff]  ;;  %v8622_v23 = vld [vmem:[%s8526_s10 + $0x108] sm:$0xff] }
  0x2b   : > { %7729 = vmatmul.mubr.msk.f32.gmra.mrb[2].mxu1 %vm288_vm1, %v8553_v9  ;;  %7983 = vmatprep.subr.msk.mxu0 %vm433_vm0, %v8559_v11  ;;  %10462 = vst [vmem:[#allocation8_spill] sm:$0xff] %v8605_v20  ;;  %v8617_v22 = vld [vmem:[%s8526_s10 + $0x40] sm:$0xff]  ;;  %10463 = vst [vmem:[#allocation9_spill] sm:$0xff] %v8622_v23  ;;  %v8625_v24 = vld [vmem:[%s8526_s10 + $0x110] sm:$0xff] }
  0x2c   : > { %7731 = vmatprep.mubr.msk.f32.mxu1 %vm288_vm1, %v8562_v12  ;;  %10464 = vst [vmem:[#allocation10_spill] sm:$0xff] %v8625_v24  ;;  %v8632_v25 = vld [vmem:[%s8526_s10 + $0x48] sm:$0xff]  ;;  %v8637_v26 = vld [vmem:[%s8526_s10 + $0x50] sm:$0xff]  ;;  %v8642_v27 = vld [vmem:[%s8526_s10 + $0x118] sm:$0xff] }
  0x2d   : > { %7693 = vmatmul.mubr.msk.f32.gmra.mrb[2].mxu0 %vm288_vm1, %v8570_v13  ;;  %10465 = vst [vmem:[#allocation11_spill] sm:$0xff] %v8642_v27  ;;  %v8645_v28 = vld [vmem:[%s8526_s10 + $0x120] sm:$0xff]  ;;  %v8652_v29 = vld [vmem:[%s8526_s10 + $0x58] sm:$0xff]  ;;  %v8662_v31 = vld [vmem:[%s8526_s10 + $0x128] sm:$0xff] }
  0x2e   : > { %7695 = vmatprep.mubr.msk.f32.mxu0 %vm288_vm1, %v8575_v14  ;;  %10466 = vst [vmem:[#allocation12_spill] sm:$0xff] %v8645_v28  ;;  %v8657_v30 = vld [vmem:[%s8526_s10 + $0x60] sm:$0xff]  ;;  %10467 = vst [vmem:[#allocation13_spill] sm:$0xff] %v8662_v31  ;;  %v8665_v32 = vld [vmem:[%s8526_s10 + $0x130] sm:$0xff] }
  0x2f   : > { %7732 = vmatmul.mubr.msk.f32.gmra.mrb[4].mxu1 %vm288_vm1, %v8582_v15  ;;  %10468 = vst [vmem:[#allocation14_spill] sm:$0xff] %v8665_v32  ;;  %v8672_v33 = vld [vmem:[%s8526_s10 + $0x68] sm:$0xff]  ;;  %v8677_v34 = vld [vmem:[%s8526_s10 + $0x70] sm:$0xff]  ;;  %v8682_v35 = vld [vmem:[%s8526_s10 + $0x138] sm:$0xff] }
  0x30   : > { %7734 = vmatprep.mubr.msk.f32.mxu1 %vm288_vm1, %v8585_v16  ;;  %10469 = vst [vmem:[#allocation15_spill] sm:$0xff] %v8682_v35  ;;  %v8685_v36 = vld [vmem:[%s8526_s10 + $0x140] sm:$0xff]  ;;  %v8692_v37 = vld [vmem:[%s8526_s10 + $0x78] sm:$0xff]  ;;  %v8702_v39 = vld [vmem:[%s8526_s10 + $0x148] sm:$0xff] }
  0x31   : > { %7696 = vmatmul.mubr.msk.f32.gmra.mrb[4].mxu0 %vm288_vm1, %v8592_v17  ;;  %10470 = vst [vmem:[#allocation16_spill] sm:$0xff] %v8685_v36  ;;  %v8697_v38 = vld [vmem:[%s8526_s10 + $0x80] sm:$0xff]  ;;  %10471 = vst [vmem:[#allocation17_spill] sm:$0xff] %v8702_v39  ;;  %v8705_v40 = vld [vmem:[%s8526_s10 + $0x150] sm:$0xff] }
  0x32   : > { %7698 = vmatprep.mubr.msk.f32.mxu0 %vm288_vm1, %v8597_v18  ;;  %10472 = vst [vmem:[#allocation18_spill] sm:$0xff] %v8705_v40  ;;  %v8712_v41 = vld [vmem:[%s8526_s10 + $0x88] sm:$0xff]  ;;  %v8717_v42 = vld [vmem:[%s8526_s10 + $0x90] sm:$0xff]  ;;  %v8722_v43 = vld [vmem:[%s8526_s10 + $0x158] sm:$0xff] }
  0x33   : > { %7735 = vmatmul.mubr.msk.f32.gmra.mrb[6].mxu1 %vm288_vm1, %v8602_v19  ;;  %10473 = vst [vmem:[#allocation19_spill] sm:$0xff] %v8722_v43  ;;  %v8725_v44 = vld [vmem:[%s8526_s10 + $0x160] sm:$0xff]  ;;  %v8732_v45 = vld [vmem:[%s8526_s10 + $0x98] sm:$0xff]  ;;  %v8742_v47 = vld [vmem:[%s8526_s10 + $0x168] sm:$0xff] }
  0x34   : > { %7737 = vmatprep.mubr.msk.f32.mxu1 %vm288_vm1, %v8605_v20  ;;  %10474 = vst [vmem:[#allocation20_spill] sm:$0xff] %v8725_v44  ;;  %v8737_v46 = vld [vmem:[%s8526_s10 + $0xa0] sm:$0xff]  ;;  %10475 = vst [vmem:[#allocation21_spill] sm:$0xff] %v8742_v47  ;;  %v8745_v48 = vld [vmem:[%s8526_s10 + $0x170] sm:$0xff] }
  0x35   : > { %7699 = vmatmul.mubr.msk.f32.gmra.mrb[6].mxu0 %vm288_vm1, %v8612_v21  ;;  %10476 = vst [vmem:[#allocation22_spill] sm:$0xff] %v8745_v48  ;;  %v8752_v49 = vld [vmem:[%s8526_s10 + $0xa8] sm:$0xff]  ;;  %v8757_v50 = vld [vmem:[%s8526_s10 + $0xb0] sm:$0xff]  ;;  %v8762_v51 = vld [vmem:[%s8526_s10 + $0x178] sm:$0xff] }
  0x36   : > { %7701 = vmatprep.mubr.msk.f32.mxu0 %vm288_vm1, %v8617_v22  ;;  %10477 = vst [vmem:[#allocation23_spill] sm:$0xff] %v8762_v51  ;;  %v6457_v52 = vld [vmem:[%s8526_s10 + $0x1] sm:$0xff]  ;;  %v8770_v53 = vld [vmem:[%s8526_s10 + $0xb8] sm:$0xff]  ;;  %v6458_v55 = vld [vmem:[%s8526_s10 + $0x9] sm:$0xff] }
  0x37   : > { %7738 = vmatmul.mubr.msk.f32.gmra.mrb[8].mxu1 %vm288_vm1, %v8622_v23  ;;  %v6555_v54 = vld [vmem:[%s8526_s10 + $0x2] sm:$0xff]  ;;  %v6459_v56 = vld [vmem:[%s8526_s10 + $0x11] sm:$0xff]  ;;  %v8793_v60 = vld [vmem:[%s8526_s10 + $0x19] sm:$0xff] }
  0x38   : > { %7740 = vmatprep.mubr.msk.f32.mxu1 %vm288_vm1, %v8625_v24  ;;  %v6556_v57 = vld [vmem:[%s8526_s10 + $0xa] sm:$0xff]  ;;  %v6557_v59 = vld [vmem:[%s8526_s10 + $0x12] sm:$0xff]  ;;  %v8801_v62 = vld [vmem:[%s8526_s10 + $0x21] sm:$0xff] }
  0x39   : > { %7702 = vmatmul.mubr.msk.f32.gmra.mrb[8].mxu0 %vm288_vm1, %v8632_v25  ;;  %v8810_v63 = vld [vmem:[%s8526_s10 + $0x1a] sm:$0xff]  ;;  %v8815_v0 = vld [vmem:[%s8526_s10 + $0x22] sm:$0xff]  ;;  %v8825_v2 = vld [vmem:[%s8526_s10 + $0x31] sm:$0xff] }
  0x3a   : > { %7704 = vmatprep.mubr.msk.f32.mxu0 %vm288_vm1, %v8637_v26  ;;  %10478 = vst [vmem:[#allocation24_spill] sm:$0xff] %v8810_v63  ;;  %10479 = vst [vmem:[#allocation25_spill] sm:$0xff] %v8815_v0  ;;  %v8822_v1 = vld [vmem:[%s8526_s10 + $0x29] sm:$0xff]  ;;  %v8842_v8 = vld [vmem:[%s8526_s10 + $0x39] sm:$0xff] }
  0x3b   : > { %7741 = vmatmul.mubr.msk.f32.gmra.mrb[10].mxu1 %vm288_vm1, %v8642_v27  ;;  %v8832_v6 = vld [vmem:[%s8526_s10 + $0x2a] sm:$0xff]  ;;  %v8845_v10 = vld [vmem:[%s8526_s10 + $0x41] sm:$0xff]  ;;  %v9054_v20 = vld [vmem:[%s8526_s10 + $0xf9] sm:$0xff] }
  0x3c   : > { %7743 = vmatprep.mubr.msk.f32.mxu1 %vm288_vm1, %v8645_v28  ;;  %10480 = vst [vmem:[#allocation26_spill] sm:$0xff] %v8832_v6  ;;  %v9026_v28 = vld [vmem:[%s8526_s10 + $0xd9] sm:$0xff]  ;;  %v9029_v27 = vld [vmem:[%s8526_s10 + $0xe1] sm:$0xff]  ;;  %v9040_v24 = vld [vmem:[%s8526_s10 + $0xe9] sm:$0xff] }
  0x3d   : > { %7705 = vmatmul.mubr.msk.f32.gmra.mrb[10].mxu0 %vm288_vm1, %v8652_v29  ;;  %v9043_v23 = vld [vmem:[%s8526_s10 + $0xf1] sm:$0xff]  ;;  %10497 = vst [vmem:[#allocation43_spill] sm:$0xff] %v9054_v20  ;;  %v9057_v19 = vld [vmem:[%s8526_s10 + $0x101] sm:$0xff] }
  0x3e   : > { %7707 = vmatprep.mubr.msk.f32.mxu0 %vm288_vm1, %v8657_v30  ;;  %10496 = vst [vmem:[#allocation42_spill] sm:$0xff] %v9043_v23  ;;  %10498 = vst [vmem:[#allocation44_spill] sm:$0xff] %v9057_v19  ;;  %v9071_v16 = vld [vmem:[%s8526_s10 + $0x111] sm:$0xff] }
  0x3f   : > { %7744 = vmatmul.mubr.msk.f32.gmra.mrb[12].mxu1 %vm288_vm1, %v8662_v31  ;;  %v9015_v31 = vld [vmem:[%s8526_s10 + $0xd1] sm:$0xff]  ;;  %10500 = vst [vmem:[#allocation46_spill] sm:$0xff] %v9071_v16 }
  0x40   : > { %7746 = vmatprep.mubr.msk.f32.mxu1 %vm288_vm1, %v8665_v32  ;;  %v9012_v32 = vld [vmem:[%s8526_s10 + $0xc9] sm:$0xff] }
  0x41   : > { %7708 = vmatmul.mubr.msk.f32.gmra.mrb[12].mxu0 %vm288_vm1, %v8672_v33 }
  0x42   : > { %7710 = vmatprep.mubr.msk.f32.mxu0 %vm288_vm1, %v8677_v34 }
  0x43   : > { %7747 = vmatmul.mubr.msk.f32.gmra.mrb[14].mxu1 %vm288_vm1, %v8682_v35  ;;  %v9001_v35 = vld [vmem:[%s8526_s10 + $0xc1] sm:$0xff] }
  0x44   : > { %7749 = vmatprep.mubr.msk.f32.mxu1 %vm288_vm1, %v8685_v36  ;;  %v8998_v36 = vld [vmem:[%s8526_s10 + $0xb9] sm:$0xff] }
  0x45   : > { %7711 = vmatmul.mubr.msk.f32.gmra.mrb[14].mxu0 %vm288_vm1, %v8692_v37 }
  0x46   : > { %7713 = vmatprep.mubr.msk.f32.mxu0 %vm288_vm1, %v8697_v38 }
  0x47   : > { %7750 = vmatmul.mubr.msk.f32.gmra.mrb[16].mxu1 %vm288_vm1, %v8702_v39  ;;  %v8985_v39 = vld [vmem:[%s8526_s10 + $0xb1] sm:$0xff] }
  0x48   : > { %7752 = vmatprep.mubr.msk.f32.mxu1 %vm288_vm1, %v8705_v40  ;;  %v8982_v40 = vld [vmem:[%s8526_s10 + $0xa9] sm:$0xff] }
  0x49   : > { %7714 = vmatmul.mubr.msk.f32.gmra.mrb[16].mxu0 %vm288_vm1, %v8712_v41 }
  0x4a   : > { %7716 = vmatprep.mubr.msk.f32.mxu0 %vm288_vm1, %v8717_v42 }
  0x4b   : > { %7753 = vmatmul.mubr.msk.f32.gmra.mrb[18].mxu1 %vm288_vm1, %v8722_v43  ;;  %v8965_v43 = vld [vmem:[%s8526_s10 + $0xa1] sm:$0xff] }
  0x4c   : > { %7755 = vmatprep.mubr.msk.f32.mxu1 %vm288_vm1, %v8725_v44  ;;  %v8962_v44 = vld [vmem:[%s8526_s10 + $0x99] sm:$0xff] }
  0x4d   : > { %7717 = vmatmul.mubr.msk.f32.gmra.mrb[18].mxu0 %vm288_vm1, %v8732_v45 }
  0x4e   : > { %7719 = vmatprep.mubr.msk.f32.mxu0 %vm288_vm1, %v8737_v46 }
  0x4f   : > { %7756 = vmatmul.mubr.msk.f32.gmra.mrb[20].mxu1 %vm288_vm1, %v8742_v47  ;;  %v8945_v47 = vld [vmem:[%s8526_s10 + $0x91] sm:$0xff] }
  0x50   : > { %7758 = vmatprep.mubr.msk.f32.mxu1 %vm288_vm1, %v8745_v48  ;;  %v8942_v48 = vld [vmem:[%s8526_s10 + $0x89] sm:$0xff] }
  0x51   : > { %7720 = vmatmul.mubr.msk.f32.gmra.mrb[20].mxu0 %vm288_vm1, %v8752_v49 }
  0x52   : > { %7722 = vmatprep.mubr.msk.f32.mxu0 %vm288_vm1, %v8757_v50 }
  0x53   : > { %7759 = vmatmul.mubr.msk.f32.gmra.mrb[22].mxu1 %vm288_vm1, %v8762_v51  ;;  %v8925_v51 = vld [vmem:[%s8526_s10 + $0x81] sm:$0xff] }
  0x54   : > { %7763 = vmatprep.mubr.msk.f32.mxu1 %vm288_vm1, %v6457_v52  ;;  %v8857_v52 = vld [vmem:[%s8526_s10 + $0x42] sm:$0xff] }
  0x55   : > { %7723 = vmatmul.mubr.msk.f32.gmra.mrb[22].mxu0 %vm288_vm1, %v8770_v53  ;;  %10483 = vst [vmem:[#allocation29_spill] sm:$0xff] %v8857_v52 }
  0x56   : > { %7837 = vmatprep.mubr.msk.f32.mxu0 %vm288_vm1, %v6555_v54  ;;  %v8862_v54 = vld [vmem:[%s8526_s10 + $0x49] sm:$0xff] }
  0x57   : > { %7764 = vmatmul.mubr.msk.f32.vlgmr.msra.gmra.mrb[24].mxu1 %vm288_vm1, %v6458_v55  ;;  %v8865_v55 = vld [vmem:[%s8526_s10 + $0x51] sm:$0xff] }
  0x58   : > { %7910 = vmatpush3.msk.msra.mxu1 %vm433_vm0, %v8543_v7  ;;  %7766 = vmatprep.mubr.msk.f32.mxu1 %vm288_vm1, %v6459_v56  ;;  %v8837_v7 = vld [vmem:[%s8526_s10 + $0x32] sm:$0xff]  ;;  %v8872_v56 = vld [vmem:[%s8526_s10 + $0x4a] sm:$0xff] }
  0x59   : > { %7838 = vmatmul.mubr.msk.f32.vlgmr.msra.gmra.mrb[24].mxu0 %vm288_vm1, %v6556_v57  ;;  %8057 = vmatprep.subr.msk.mxu1 %vm433_vm0, %v8785_v58  ;;  %10481 = vst [vmem:[#allocation27_spill] sm:$0xff] %v8837_v7  ;;  %10484 = vst [vmem:[#allocation30_spill] sm:$0xff] %v8872_v56  ;;  %v8877_v57 = vld [vmem:[%s8526_s10 + $0x52] sm:$0xff] }
  0x5a   : > { %7984 = vmatpush3.msk.msra.mxu0 %vm433_vm0, %v8559_v11  ;;  %7840 = vmatprep.mubr.msk.f32.mxu0 %vm288_vm1, %v6557_v59  ;;  %v8852_v11 = vld [vmem:[%s8526_s10 + $0x3a] sm:$0xff]  ;;  %10485 = vst [vmem:[#allocation31_spill] sm:$0xff] %v8877_v57 }
  0x5b   : > { %7767 = vmatmul.mubr.msk.f32.gmra.mrb[26].mxu1 %vm288_vm1, %v8793_v60  ;;  %8131 = vmatprep.subr.msk.mxu0 %vm433_vm0, %v8798_v61  ;;  %10482 = vst [vmem:[#allocation28_spill] sm:$0xff] %v8852_v11  ;;  %v8882_v59 = vld [vmem:[%s8526_s10 + $0x59] sm:$0xff] }
  0x5c   : > { %7769 = vmatprep.mubr.msk.f32.mxu1 %vm288_vm1, %v8801_v62 }
  0x5d   : > { %7841 = vmatmul.mubr.msk.f32.gmra.mrb[26].mxu0 %vm288_vm1, %v8810_v63  ;;  %v8922_v63 = vld [vmem:[%s8526_s10 + $0x79] sm:$0xff] }
  0x5e   : > { %7843 = vmatprep.mubr.msk.f32.mxu0 %vm288_vm1, %v8815_v0  ;;  %v8905_v0 = vld [vmem:[%s8526_s10 + $0x71] sm:$0xff] }
  0x5f   : > { %7770 = vmatmul.mubr.msk.f32.gmra.mrb[28].mxu1 %vm288_vm1, %v8822_v1 }
  0x60   : > { %7772 = vmatprep.mubr.msk.f32.mxu1 %vm288_vm1, %v8825_v2 }
  0x61   : > { %7844 = vmatmul.mubr.msk.f32.gmra.mrb[28].mxu0 %vm288_vm1, %v8832_v6  ;;  %v8902_v6 = vld [vmem:[%s8526_s10 + $0x69] sm:$0xff] }
  0x62   : > { %7846 = vmatprep.mubr.msk.f32.mxu0 %vm288_vm1, %v8837_v7  ;;  %v8885_v7 = vld [vmem:[%s8526_s10 + $0x61] sm:$0xff] }
  0x63   : > { %7773 = vmatmul.mubr.msk.f32.gmra.mrb[30].mxu1 %vm288_vm1, %v8842_v8 }
  0x64   : > { %7775 = vmatprep.mubr.msk.f32.mxu1 %vm288_vm1, %v8845_v10 }
  0x65   : > { %7847 = vmatmul.mubr.msk.f32.gmra.mrb[30].mxu0 %vm288_vm1, %v8852_v11  ;;  %v8897_v11 = vld [vmem:[%s8526_s10 + $0x62] sm:$0xff] }
  0x66   : > { %7849 = vmatprep.mubr.msk.f32.mxu0 %vm288_vm1, %v8857_v52  ;;  %v8892_v52 = vld [vmem:[%s8526_s10 + $0x5a] sm:$0xff]  ;;  %10487 = vst [vmem:[#allocation33_spill] sm:$0xff] %v8897_v11 }
  0x67   : > { %7776 = vmatmul.mubr.msk.f32.gmra.mrb[32].mxu1 %vm288_vm1, %v8862_v54  ;;  %10486 = vst [vmem:[#allocation32_spill] sm:$0xff] %v8892_v52 }
  0x68   : > { %7778 = vmatprep.mubr.msk.f32.mxu1 %vm288_vm1, %v8865_v55 }
  0x69   : > { %7850 = vmatmul.mubr.msk.f32.gmra.mrb[32].mxu0 %vm288_vm1, %v8872_v56  ;;  %v8917_v56 = vld [vmem:[%s8526_s10 + $0x72] sm:$0xff] }
  0x6a   : > { %7852 = vmatprep.mubr.msk.f32.mxu0 %vm288_vm1, %v8877_v57  ;;  %v8912_v57 = vld [vmem:[%s8526_s10 + $0x6a] sm:$0xff]  ;;  %10489 = vst [vmem:[#allocation35_spill] sm:$0xff] %v8917_v56 }
  0x6b   : > { %7779 = vmatmul.mubr.msk.f32.gmra.mrb[34].mxu1 %vm288_vm1, %v8882_v59  ;;  %10488 = vst [vmem:[#allocation34_spill] sm:$0xff] %v8912_v57 }
  0x6c   : > { %7781 = vmatprep.mubr.msk.f32.mxu1 %vm288_vm1, %v8885_v7 }
  0x6d   : > { %7853 = vmatmul.mubr.msk.f32.gmra.mrb[34].mxu0 %vm288_vm1, %v8892_v52  ;;  %v8937_v52 = vld [vmem:[%s8526_s10 + $0x82] sm:$0xff] }
  0x6e   : > { %7855 = vmatprep.mubr.msk.f32.mxu0 %vm288_vm1, %v8897_v11  ;;  %v8932_v11 = vld [vmem:[%s8526_s10 + $0x7a] sm:$0xff]  ;;  %10491 = vst [vmem:[#allocation37_spill] sm:$0xff] %v8937_v52 }
  0x6f   : > { %7782 = vmatmul.mubr.msk.f32.gmra.mrb[36].mxu1 %vm288_vm1, %v8902_v6  ;;  %10490 = vst [vmem:[#allocation36_spill] sm:$0xff] %v8932_v11 }
  0x70   : > { %7784 = vmatprep.mubr.msk.f32.mxu1 %vm288_vm1, %v8905_v0 }
  0x71   : > { %7856 = vmatmul.mubr.msk.f32.gmra.mrb[36].mxu0 %vm288_vm1, %v8912_v57  ;;  %v8957_v57 = vld [vmem:[%s8526_s10 + $0x92] sm:$0xff] }
  0x72   : > { %7858 = vmatprep.mubr.msk.f32.mxu0 %vm288_vm1, %v8917_v56  ;;  %v8952_v56 = vld [vmem:[%s8526_s10 + $0x8a] sm:$0xff]  ;;  %10493 = vst [vmem:[#allocation39_spill] sm:$0xff] %v8957_v57 }
  0x73   : > { %7785 = vmatmul.mubr.msk.f32.gmra.mrb[38].mxu1 %vm288_vm1, %v8922_v63  ;;  %10492 = vst [vmem:[#allocation38_spill] sm:$0xff] %v8952_v56 }
  0x74   : > { %7787 = vmatprep.mubr.msk.f32.mxu1 %vm288_vm1, %v8925_v51 }
  0x75   : > { %7859 = vmatmul.mubr.msk.f32.gmra.mrb[38].mxu0 %vm288_vm1, %v8932_v11  ;;  %v8977_v11 = vld [vmem:[%s8526_s10 + $0xa2] sm:$0xff] }
  0x76   : > { %7861 = vmatprep.mubr.msk.f32.mxu0 %vm288_vm1, %v8937_v52  ;;  %v8972_v52 = vld [vmem:[%s8526_s10 + $0x9a] sm:$0xff]  ;;  %10495 = vst [vmem:[#allocation41_spill] sm:$0xff] %v8977_v11 }
  0x77   : > { %7788 = vmatmul.mubr.msk.f32.gmra.mrb[40].mxu1 %vm288_vm1, %v8942_v48  ;;  %10494 = vst [vmem:[#allocation40_spill] sm:$0xff] %v8972_v52 }
  0x78   : > { %7790 = vmatprep.mubr.msk.f32.mxu1 %vm288_vm1, %v8945_v47 }
  0x79   : > { %7862 = vmatmul.mubr.msk.f32.gmra.mrb[40].mxu0 %vm288_vm1, %v8952_v56  ;;  %v6577_v56 = vld [vmem:[%s8526_s10 + $0xb2] sm:$0xff] }
  0x7a   : > { %7864 = vmatprep.mubr.msk.f32.mxu0 %vm288_vm1, %v8957_v57  ;;  %v6576_v57 = vld [vmem:[%s8526_s10 + $0xaa] sm:$0xff] }
  0x7b   : > { %7791 = vmatmul.mubr.msk.f32.gmra.mrb[42].mxu1 %vm288_vm1, %v8962_v44 }
  0x7c   : > { %7793 = vmatprep.mubr.msk.f32.mxu1 %vm288_vm1, %v8965_v43 }
  0x7d   : > { %7865 = vmatmul.mubr.msk.f32.gmra.mrb[42].mxu0 %vm288_vm1, %v8972_v52  ;;  %v6579_v52 = vld [vmem:[%s8526_s10 + $0xc2] sm:$0xff] }
  0x7e   : > { %7867 = vmatprep.mubr.msk.f32.mxu0 %vm288_vm1, %v8977_v11  ;;  %v6578_v11 = vld [vmem:[%s8526_s10 + $0xba] sm:$0xff] }
  0x7f   : > { %7794 = vmatmul.mubr.msk.f32.gmra.mrb[44].mxu1 %vm288_vm1, %v8982_v40 }
  0x80   : > { %7796 = vmatprep.mubr.msk.f32.mxu1 %vm288_vm1, %v8985_v39 }
  0x81   : > { %7868 = vmatmul.mubr.msk.f32.gmra.mrb[44].mxu0 %vm288_vm1, %v6576_v57  ;;  %v6581_v57 = vld [vmem:[%s8526_s10 + $0xd2] sm:$0xff] }
  0x82   : > { %7870 = vmatprep.mubr.msk.f32.mxu0 %vm288_vm1, %v6577_v56  ;;  %v6580_v56 = vld [vmem:[%s8526_s10 + $0xca] sm:$0xff] }
  0x83   : > { %7797 = vmatmul.mubr.msk.f32.gmra.mrb[46].mxu1 %vm288_vm1, %v8998_v36 }
  0x84   : > { %7799 = vmatprep.mubr.msk.f32.mxu1 %vm288_vm1, %v9001_v35 }
  0x85   : > { %7871 = vmatmul.mubr.msk.f32.gmra.mrb[46].mxu0 %vm288_vm1, %v6578_v11  ;;  %v6582_v11 = vld [vmem:[%s8526_s10 + $0xda] sm:$0xff] }
  0x86   : > { %7873 = vmatprep.mubr.msk.f32.mxu0 %vm288_vm1, %v6579_v52  ;;  %v6583_v52 = vld [vmem:[%s8526_s10 + $0xe2] sm:$0xff] }
  0x87   : > { %7800 = vmatmul.mubr.msk.f32.gmra.mrb[48].mxu1 %vm288_vm1, %v9012_v32 }
  0x88   : > { %7802 = vmatprep.mubr.msk.f32.mxu1 %vm288_vm1, %v9015_v31 }
  0x89   : > { %7874 = vmatmul.mubr.msk.f32.gmra.mrb[48].mxu0 %vm288_vm1, %v6580_v56  ;;  %v6584_v56 = vld [vmem:[%s8526_s10 + $0xea] sm:$0xff] }
  0x8a   : > { %7876 = vmatprep.mubr.msk.f32.mxu0 %vm288_vm1, %v6581_v57  ;;  %v6585_v57 = vld [vmem:[%s8526_s10 + $0xf2] sm:$0xff] }
  0x8b   : > { %7803 = vmatmul.mubr.msk.f32.gmra.mrb[50].mxu1 %vm288_vm1, %v9026_v28 }
  0x8c   : > { %7805 = vmatprep.mubr.msk.f32.mxu1 %vm288_vm1, %v9029_v27 }
  0x8d   : > { %7877 = vmatmul.mubr.msk.f32.gmra.mrb[50].mxu0 %vm288_vm1, %v6582_v11  ;;  %v6586_v11 = vld [vmem:[%s8526_s10 + $0xfa] sm:$0xff] }
  0x8e   : > { %7879 = vmatprep.mubr.msk.f32.mxu0 %vm288_vm1, %v6583_v52  ;;  %v6587_v52 = vld [vmem:[%s8526_s10 + $0x102] sm:$0xff] }
  0x8f   : > { %7806 = vmatmul.mubr.msk.f32.gmra.mrb[52].mxu1 %vm288_vm1, %v9040_v24 }
  0x90   : > { %7808 = vmatprep.mubr.msk.f32.mxu1 %vm288_vm1, %v9043_v23  ;;  %v9068_v23 = vld [vmem:[%s8526_s10 + $0x109] sm:$0xff] }
  0x91   : > { %7880 = vmatmul.mubr.msk.f32.gmra.mrb[52].mxu0 %vm288_vm1, %v6584_v56  ;;  %10499 = vst [vmem:[#allocation45_spill] sm:$0xff] %v9068_v23  ;;  %v6588_v56 = vld [vmem:[%s8526_s10 + $0x10a] sm:$0xff] }
  0x92   : > { %7882 = vmatprep.mubr.msk.f32.mxu0 %vm288_vm1, %v6585_v57  ;;  %v6589_v57 = vld [vmem:[%s8526_s10 + $0x112] sm:$0xff] }
  0x93   : > { %7809 = vmatmul.mubr.msk.f32.gmra.mrb[54].mxu1 %vm288_vm1, %v9054_v20  ;;  %v9085_v20 = vld [vmem:[%s8526_s10 + $0x121] sm:$0xff] }
  0x94   : > { %7811 = vmatprep.mubr.msk.f32.mxu1 %vm288_vm1, %v9057_v19  ;;  %v9082_v19 = vld [vmem:[%s8526_s10 + $0x119] sm:$0xff]  ;;  %10502 = vst [vmem:[#allocation48_spill] sm:$0xff] %v9085_v20 }
  0x95   : > { %7883 = vmatmul.mubr.msk.f32.gmra.mrb[54].mxu0 %vm288_vm1, %v6586_v11  ;;  %10501 = vst [vmem:[#allocation47_spill] sm:$0xff] %v9082_v19  ;;  %v6590_v11 = vld [vmem:[%s8526_s10 + $0x11a] sm:$0xff] }
  0x96   : > { %7885 = vmatprep.mubr.msk.f32.mxu0 %vm288_vm1, %v6587_v52  ;;  %v6591_v52 = vld [vmem:[%s8526_s10 + $0x122] sm:$0xff] }
  0x97   : > { %7812 = vmatmul.mubr.msk.f32.gmra.mrb[56].mxu1 %vm288_vm1, %v9068_v23  ;;  %v9099_v23 = vld [vmem:[%s8526_s10 + $0x131] sm:$0xff] }
  0x98   : > { %7814 = vmatprep.mubr.msk.f32.mxu1 %vm288_vm1, %v9071_v16  ;;  %v9096_v16 = vld [vmem:[%s8526_s10 + $0x129] sm:$0xff]  ;;  %10504 = vst [vmem:[#allocation50_spill] sm:$0xff] %v9099_v23 }
  0x99   : > { %7886 = vmatmul.mubr.msk.f32.gmra.mrb[56].mxu0 %vm288_vm1, %v6588_v56  ;;  %10503 = vst [vmem:[#allocation49_spill] sm:$0xff] %v9096_v16  ;;  %v6592_v56 = vld [vmem:[%s8526_s10 + $0x12a] sm:$0xff] }
  0x9a   : > { %7888 = vmatprep.mubr.msk.f32.mxu0 %vm288_vm1, %v6589_v57  ;;  %v6593_v57 = vld [vmem:[%s8526_s10 + $0x132] sm:$0xff] }
  0x9b   : > { %7815 = vmatmul.mubr.msk.f32.gmra.mrb[58].mxu1 %vm288_vm1, %v9082_v19  ;;  %v9113_v19 = vld [vmem:[%s8526_s10 + $0x141] sm:$0xff] }
  0x9c   : > { %7817 = vmatprep.mubr.msk.f32.mxu1 %vm288_vm1, %v9085_v20  ;;  %v9110_v20 = vld [vmem:[%s8526_s10 + $0x139] sm:$0xff]  ;;  %10506 = vst [vmem:[#allocation52_spill] sm:$0xff] %v9113_v19 }
  0x9d   : > { %7889 = vmatmul.mubr.msk.f32.gmra.mrb[58].mxu0 %vm288_vm1, %v6590_v11  ;;  %10505 = vst [vmem:[#allocation51_spill] sm:$0xff] %v9110_v20  ;;  %v6594_v11 = vld [vmem:[%s8526_s10 + $0x13a] sm:$0xff] }
  0x9e   : > { %7891 = vmatprep.mubr.msk.f32.mxu0 %vm288_vm1, %v6591_v52  ;;  %v6595_v52 = vld [vmem:[%s8526_s10 + $0x142] sm:$0xff] }
  0x9f   : > { %7818 = vmatmul.mubr.msk.f32.gmra.mrb[60].mxu1 %vm288_vm1, %v9096_v16  ;;  %v9127_v16 = vld [vmem:[%s8526_s10 + $0x151] sm:$0xff] }
  0xa0   : > { %7820 = vmatprep.mubr.msk.f32.mxu1 %vm288_vm1, %v9099_v23  ;;  %v9124_v23 = vld [vmem:[%s8526_s10 + $0x149] sm:$0xff]  ;;  %10508 = vst [vmem:[#allocation54_spill] sm:$0xff] %v9127_v16 }
  0xa1   : > { %7892 = vmatmul.mubr.msk.f32.gmra.mrb[60].mxu0 %vm288_vm1, %v6592_v56  ;;  %10507 = vst [vmem:[#allocation53_spill] sm:$0xff] %v9124_v23  ;;  %v6596_v56 = vld [vmem:[%s8526_s10 + $0x14a] sm:$0xff] }
  0xa2   : > { %7894 = vmatprep.mubr.msk.f32.mxu0 %vm288_vm1, %v6593_v57  ;;  %v6597_v57 = vld [vmem:[%s8526_s10 + $0x152] sm:$0xff] }
  0xa3   : > { %7821 = vmatmul.mubr.msk.f32.gmra.mrb[62].mxu1 %vm288_vm1, %v9110_v20  ;;  %v9141_v20 = vld [vmem:[%s8526_s10 + $0x161] sm:$0xff] }
  0xa4   : > { %7823 = vmatprep.mubr.msk.f32.mxu1 %vm288_vm1, %v9113_v19  ;;  %v9138_v19 = vld [vmem:[%s8526_s10 + $0x159] sm:$0xff]  ;;  %10510 = vst [vmem:[#allocation56_spill] sm:$0xff] %v9141_v20 }
  0xa5   : > { %7895 = vmatmul.mubr.msk.f32.gmra.mrb[62].mxu0 %vm288_vm1, %v6594_v11  ;;  %10509 = vst [vmem:[#allocation55_spill] sm:$0xff] %v9138_v19  ;;  %v6598_v11 = vld [vmem:[%s8526_s10 + $0x15a] sm:$0xff] }
  0xa6   : > { %7897 = vmatprep.mubr.msk.f32.mxu0 %vm288_vm1, %v6595_v52  ;;  %v6599_v52 = vld [vmem:[%s8526_s10 + $0x162] sm:$0xff] }
  0xa7   : > { %7824 = vmatmul.mubr.msk.f32.gmra.mrb[64].mxu1 %vm288_vm1, %v9124_v23  ;;  %v9152_v23 = vld [vmem:[%s8526_s10 + $0x169] sm:$0xff] }
  0xa8   : > { %7826 = vmatprep.mubr.msk.f32.mxu1 %vm288_vm1, %v9127_v16  ;;  %v9155_v16 = vld [vmem:[%s8526_s10 + $0x171] sm:$0xff] }
  0xa9   : > { %7898 = vmatmul.mubr.msk.f32.gmra.mrb[64].mxu0 %vm288_vm1, %v6596_v56  ;;  %v6600_v56 = vld [vmem:[%s8526_s10 + $0x16a] sm:$0xff] }
  0xaa   : > { %7900 = vmatprep.mubr.msk.f32.mxu0 %vm288_vm1, %v6597_v57  ;;  %v6601_v57 = vld [vmem:[%s8526_s10 + $0x172] sm:$0xff] }
  0xab   : > { %7827 = vmatmul.mubr.msk.f32.gmra.mrb[66].mxu1 %vm288_vm1, %v9138_v19  ;;  %v9166_v19 = vld [vmem:[%s8526_s10 + $0x179] sm:$0xff] }
  0xac   : > { %7829 = vmatprep.mubr.msk.f32.mxu1 %vm288_vm1, %v9141_v20  ;;  %v6602_v20 = vld [vmem:[%s8526_s10 + $0x17a] sm:$0xff] }
  0xad   : > { %7901 = vmatmul.mubr.msk.f32.gmra.mrb[66].mxu0 %vm288_vm1, %v6598_v11  ;;  %v9181_v11 = vld [vmem:[%s10403_s1 + $0x1c] sm:$0xf] }
  0xae   : > { %7903 = vmatprep.mubr.msk.f32.mxu0 %vm288_vm1, %v6599_v52 }
  0xaf   : > { %7830 = vmatmul.mubr.msk.f32.gmra.mrb[68].mxu1 %vm288_vm1, %v9152_v23 }
  0xb0   : > { %7832 = vmatprep.mubr.msk.f32.mxu1 %vm288_vm1, %v9155_v16 }
  0xb1   : > { %7904 = vmatmul.mubr.msk.f32.gmra.mrb[68].mxu0 %vm288_vm1, %v6600_v56  ;;  %v6797_v56 = vld [vmem:[%s8526_s10 + $0x189] sm:$0xff] }
  0xb2   : > { %7906 = vmatprep.mubr.msk.f32.mxu0 %vm288_vm1, %v6601_v57 }
  0xb3   : > { %7833 = vmatmul.mubr.msk.f32.gmra.mrb[70].mxu1 %vm288_vm1, %v9166_v19 }
  0xb4   : > { %7911 = vmatprep.mubr.msk.f32.mxu1 %vm288_vm1, %v8570_v13  ;;  %v9192_v13 = vld [vmem:[%s10403_s1 + $0x20] sm:$0xf] }
  0xb5   : > { %7907 = vmatmul.mubr.msk.f32.gmra.mrb[70].mxu0 %vm288_vm1, %v6602_v20  ;;  %v10520_v20 = vld [vmem:[#allocation11_spill] sm:$0xff] }
  0xb6   : > { %7985 = vmatprep.mubr.msk.f32.mxu0 %vm288_vm1, %v8793_v60  ;;  %v10539_v60 = vld [vmem:[#allocation20_spill] sm:$0xff] }
  0xb7   : > { %7912 = vmatmul.mubr.msk.f32.vlgmr.msra.gmra.mrb[72].mxu1 %vm288_vm1, %v8575_v14  ;;  %v10516_v14 = vld [vmem:[#allocation9_spill] sm:$0xff] }
  0xb8   : > { %8058 = vmatpush3.msk.msra.mxu1 %vm433_vm0, %v8785_v58  ;;  %7914 = vmatprep.mubr.msk.f32.mxu1 %vm288_vm1, %v8592_v17  ;;  %v10518_v17 = vld [vmem:[#allocation45_spill] sm:$0xff] }
  0xb9   : > { %7986 = vmatmul.mubr.msk.f32.vlgmr.msra.gmra.mrb[72].mxu0 %vm288_vm1, %v8801_v62  ;;  %8205 = vmatprep.subr.msk.mxu1 %vm433_vm0, %v9181_v11 }
  0xba   : > { %8132 = vmatpush3.msk.msra.mxu0 %vm433_vm0, %v8798_v61  ;;  %7988 = vmatprep.mubr.msk.f32.mxu0 %vm288_vm1, %v8822_v1  ;;  %v10540_v61 = vld [vmem:[#allocation21_spill] sm:$0xff] }
  0xbb   : > { %7915 = vmatmul.mubr.msk.f32.gmra.mrb[74].mxu1 %vm288_vm1, %v8597_v18  ;;  %8279 = vmatprep.subr.msk.mxu0 %vm433_vm0, %v9192_v13  ;;  %v10519_v18 = vld [vmem:[#allocation10_spill] sm:$0xff] }
  0xbc   : > { %7917 = vmatprep.mubr.msk.f32.mxu1 %vm288_vm1, %v8612_v21  ;;  %v10521_v21 = vld [vmem:[#allocation46_spill] sm:$0xff] }
  0xbd   : > { %7989 = vmatmul.mubr.msk.f32.gmra.mrb[74].mxu0 %vm288_vm1, %v8825_v2 }
  0xbe   : > { %7991 = vmatprep.mubr.msk.f32.mxu0 %vm288_vm1, %v8842_v8  ;;  %v6698_v8 = vld [vmem:[%s8526_s10 + $0x180] sm:$0xff] }
  0xbf   : > { %7918 = vmatmul.mubr.msk.f32.gmra.mrb[76].mxu1 %vm288_vm1, %v8617_v22  ;;  %v10522_v22 = vld [vmem:[#allocation47_spill] sm:$0xff] }
  0xc0   : > { %7920 = vmatprep.mubr.msk.f32.mxu1 %vm288_vm1, %v8632_v25  ;;  %v10524_v25 = vld [vmem:[#allocation13_spill] sm:$0xff] }
  0xc1   : > { %7992 = vmatmul.mubr.msk.f32.gmra.mrb[76].mxu0 %vm288_vm1, %v8845_v10 }
  0xc2   : > { %7994 = vmatprep.mubr.msk.f32.mxu0 %vm288_vm1, %v8862_v54  ;;  %v6699_v54 = vld [vmem:[%s8526_s10 + $0x188] sm:$0xff] }
  0xc3   : > { %7921 = vmatmul.mubr.msk.f32.gmra.mrb[78].mxu1 %vm288_vm1, %v8637_v26  ;;  %v10525_v26 = vld [vmem:[#allocation48_spill] sm:$0xff] }
  0xc4   : > { %7923 = vmatprep.mubr.msk.f32.mxu1 %vm288_vm1, %v8652_v29 }
  0xc5   : > { %7995 = vmatmul.mubr.msk.f32.gmra.mrb[78].mxu0 %vm288_vm1, %v8865_v55 }
  0xc6   : > { %7997 = vmatprep.mubr.msk.f32.mxu0 %vm288_vm1, %v8882_v59  ;;  %v6796_v59 = vld [vmem:[%s8526_s10 + $0x181] sm:$0xff] }
  0xc7   : > { %7924 = vmatmul.mubr.msk.f32.gmra.mrb[80].mxu1 %vm288_vm1, %v8657_v30  ;;  %v10527_v30 = vld [vmem:[#allocation14_spill] sm:$0xff] }
  0xc8   : > { %7926 = vmatprep.mubr.msk.f32.mxu1 %vm288_vm1, %v8672_v33 }
  0xc9   : > { %7998 = vmatmul.mubr.msk.f32.gmra.mrb[80].mxu0 %vm288_vm1, %v8885_v7  ;;  %v10543_v7 = vld [vmem:[#allocation23_spill] sm:$0xff] }
  0xca   : > { %8000 = vmatprep.mubr.msk.f32.mxu0 %vm288_vm1, %v8902_v6  ;;  %v10542_v6 = vld [vmem:[#allocation22_spill] sm:$0xff] }
  0xcb   : > { %7927 = vmatmul.mubr.msk.f32.gmra.mrb[82].mxu1 %vm288_vm1, %v8677_v34  ;;  %v10529_v34 = vld [vmem:[#allocation50_spill] sm:$0xff] }
  0xcc   : > { %7929 = vmatprep.mubr.msk.f32.mxu1 %vm288_vm1, %v8692_v37 }
  0xcd   : > { %8001 = vmatmul.mubr.msk.f32.gmra.mrb[82].mxu0 %vm288_vm1, %v8905_v0  ;;  %v10541_v0 = vld [vmem:[#allocation56_spill] sm:$0xff] }
  0xce   : > { %8003 = vmatprep.mubr.msk.f32.mxu0 %vm288_vm1, %v8922_v63 }
  0xcf   : > { %7930 = vmatmul.mubr.msk.f32.gmra.mrb[84].mxu1 %vm288_vm1, %v8697_v38  ;;  %v10531_v38 = vld [vmem:[#allocation16_spill] sm:$0xff] }
  0xd0   : > { %7932 = vmatprep.mubr.msk.f32.mxu1 %vm288_vm1, %v8712_v41 }
  0xd1   : > { %8004 = vmatmul.mubr.msk.f32.gmra.mrb[84].mxu0 %vm288_vm1, %v8925_v51 }
  0xd2   : > { %8006 = vmatprep.mubr.msk.f32.mxu0 %vm288_vm1, %v8942_v48 }
  0xd3   : > { %7933 = vmatmul.mubr.msk.f32.gmra.mrb[86].mxu1 %vm288_vm1, %v8717_v42  ;;  %v10533_v42 = vld [vmem:[#allocation52_spill] sm:$0xff] }
  0xd4   : > { %7935 = vmatprep.mubr.msk.f32.mxu1 %vm288_vm1, %v8732_v45 }
  0xd5   : > { %8007 = vmatmul.mubr.msk.f32.gmra.mrb[86].mxu0 %vm288_vm1, %v8945_v47  ;;  %v10536_v47 = vld [vmem:[#allocation19_spill] sm:$0xff] }
  0xd6   : > { %8009 = vmatprep.mubr.msk.f32.mxu0 %vm288_vm1, %v8962_v44  ;;  %v10534_v44 = vld [vmem:[#allocation53_spill] sm:$0xff] }
  0xd7   : > { %7936 = vmatmul.mubr.msk.f32.gmra.mrb[88].mxu1 %vm288_vm1, %v8737_v46  ;;  %v10535_v46 = vld [vmem:[#allocation18_spill] sm:$0xff] }
  0xd8   : > { %7938 = vmatprep.mubr.msk.f32.mxu1 %vm288_vm1, %v8752_v49 }
  0xd9   : > { %8010 = vmatmul.mubr.msk.f32.gmra.mrb[88].mxu0 %vm288_vm1, %v8965_v43 }
  0xda   : > { %8012 = vmatprep.mubr.msk.f32.mxu0 %vm288_vm1, %v8982_v40 }
  0xdb   : > { %7939 = vmatmul.mubr.msk.f32.gmra.mrb[90].mxu1 %vm288_vm1, %v8757_v50  ;;  %v10537_v50 = vld [vmem:[#allocation54_spill] sm:$0xff] }
  0xdc   : > { %7941 = vmatprep.mubr.msk.f32.mxu1 %vm288_vm1, %v8770_v53  ;;  %v10538_v53 = vld [vmem:[#allocation55_spill] sm:$0xff] }
  0xdd   : > { %8013 = vmatmul.mubr.msk.f32.gmra.mrb[90].mxu0 %vm288_vm1, %v8985_v39  ;;  %v10532_v39 = vld [vmem:[#allocation17_spill] sm:$0xff] }
  0xde   : > { %8015 = vmatprep.mubr.msk.f32.mxu0 %vm288_vm1, %v8998_v36  ;;  %v10530_v36 = vld [vmem:[#allocation51_spill] sm:$0xff] }
  0xdf   : > { %7942 = vmatmul.mubr.msk.f32.gmra.mrb[92].mxu1 %vm288_vm1, %v8529_v3  ;;  %v10511_v3 = vld [vmem:[#allocation6_spill] sm:$0xff] }
  0xe0   : > { %7944 = vmatprep.mubr.msk.f32.mxu1 %vm288_vm1, %v8532_v4  ;;  %v10512_v4 = vld [vmem:[#allocation7_spill] sm:$0xff] }
  0xe1   : > { %8016 = vmatmul.mubr.msk.f32.gmra.mrb[92].mxu0 %vm288_vm1, %v9001_v35 }
  0xe2   : > { %8018 = vmatprep.mubr.msk.f32.mxu0 %vm288_vm1, %v9012_v32 }
  0xe3   : > { %7945 = vmatmul.mubr.msk.f32.gmra.mrb[94].mxu1 %vm288_vm1, %v8535_v5  ;;  %v10513_v5 = vld [vmem:[#allocation42_spill] sm:$0xff] }
  0xe4   : > { %7947 = vmatprep.mubr.msk.f32.mxu1 %vm288_vm1, %v8553_v9  ;;  %v10514_v9 = vld [vmem:[#allocation43_spill] sm:$0xff] }
  0xe5   : > { %8019 = vmatmul.mubr.msk.f32.gmra.mrb[94].mxu0 %vm288_vm1, %v9015_v31  ;;  %v10528_v31 = vld [vmem:[#allocation15_spill] sm:$0xff] }
  0xe6   : > { %8021 = vmatprep.mubr.msk.f32.mxu0 %vm288_vm1, %v9026_v28  ;;  %v10526_v28 = vld [vmem:[#allocation49_spill] sm:$0xff] }
  0xe7   : > { %7948 = vmatmul.mubr.msk.f32.gmra.mrb[96].mxu1 %vm288_vm1, %v8562_v12  ;;  %v10515_v12 = vld [vmem:[#allocation8_spill] sm:$0xff] }
  0xe8   : > { %7950 = vmatprep.mubr.msk.f32.mxu1 %vm288_vm1, %v8582_v15  ;;  %v10517_v15 = vld [vmem:[#allocation44_spill] sm:$0xff] }
  0xe9   : > { %8022 = vmatmul.mubr.msk.f32.gmra.mrb[96].mxu0 %vm288_vm1, %v9029_v27 }
  0xea   : > { %8024 = vmatprep.mubr.msk.f32.mxu0 %vm288_vm1, %v9040_v24  ;;  %v10523_v24 = vld [vmem:[#allocation12_spill] sm:$0xff] }
  0xeb   : > { %7951 = vmatmul.mubr.msk.f32.gmra.mrb[98].mxu1 %vm288_vm1, %v10511_v3 }
  0xec   : > { %7953 = vmatprep.mubr.msk.f32.mxu1 %vm288_vm1, %v10512_v4  ;;  %v6798_v4 = vld [vmem:[%s8526_s10 + $0x191] sm:$0xff] }
  0xed   : > { %8025 = vmatmul.mubr.msk.f32.gmra.mrb[98].mxu0 %vm288_vm1, %v10513_v5 }
  0xee   : > { %8027 = vmatprep.mubr.msk.f32.mxu0 %vm288_vm1, %v10514_v9  ;;  %v6947_v9 = vld [vmem:[%s8526_s10 + $0x30] sm:$0xff] }
  0xef   : > { %7954 = vmatmul.mubr.msk.f32.gmra.mrb[100].mxu1 %vm288_vm1, %v10515_v12  ;;  %v10544_v12 = vld [vmem:[#allocation24_spill] sm:$0xff] }
  0xf0   : > { %7956 = vmatprep.mubr.msk.f32.mxu1 %vm288_vm1, %v10516_v14 }
  0xf1   : > { %8028 = vmatmul.mubr.msk.f32.gmra.mrb[100].mxu0 %vm288_vm1, %v10517_v15 }
  0xf2   : > { %8030 = vmatprep.mubr.msk.f32.mxu0 %vm288_vm1, %v10518_v17 }
  0xf3   : > { %7957 = vmatmul.mubr.msk.f32.gmra.mrb[102].mxu1 %vm288_vm1, %v10519_v18  ;;  %v6948_v18 = vld [vmem:[%s8526_s10 + $0x38] sm:$0xff] }
  0xf4   : > { %7959 = vmatprep.mubr.msk.f32.mxu1 %vm288_vm1, %v10520_v20 }
  0xf5   : > { %8031 = vmatmul.mubr.msk.f32.gmra.mrb[102].mxu0 %vm288_vm1, %v10521_v21  ;;  %v10545_v21 = vld [vmem:[#allocation25_spill] sm:$0xff] }
  0xf6   : > { %8033 = vmatprep.mubr.msk.f32.mxu0 %vm288_vm1, %v10522_v22  ;;  %v6949_v22 = vld [vmem:[%s8526_s10 + $0x40] sm:$0xff] }
  0xf7   : > { %7960 = vmatmul.mubr.msk.f32.gmra.mrb[104].mxu1 %vm288_vm1, %v10523_v24  ;;  %v10546_v24 = vld [vmem:[#allocation26_spill] sm:$0xff] }
  0xf8   : > { %7962 = vmatprep.mubr.msk.f32.mxu1 %vm288_vm1, %v10524_v25 }
  0xf9   : > { %8034 = vmatmul.mubr.msk.f32.gmra.mrb[104].mxu0 %vm288_vm1, %v10525_v26 }
  0xfa   : > { %v7727_v27 = vpop.f32.mrb[0].mxu1  ;;  %8036 = vmatprep.mubr.msk.f32.mxu0 %vm288_vm1, %v10526_v28  ;;  %v6950_v28 = vld [vmem:[%s8526_s10 + $0x48] sm:$0xff] }
  0xfb   : > { %767 = vst.msk [vmem:[#allocation2 + $0xc8] sm:$0xff] %vm288_vm1, %v7727_v27  ;;  %v623_v29 = vpop.f32.mrb[1].mxu1  ;;  %7963 = vmatmul.mubr.msk.f32.gmra.mrb[106].mxu1 %vm288_vm1, %v10527_v30  ;;  %v6951_v30 = vld [vmem:[%s8526_s10 + $0x50] sm:$0xff] }
  0xfc   : > { %766 = vst.msk [vmem:[#allocation2 + $0xc0] sm:$0xff] %vm288_vm1, %v623_v29  ;;  %7965 = vmatprep.mubr.msk.f32.mxu1 %vm288_vm1, %v10528_v31  ;;  %v7691_v32 = vpop.f32.mrb[0].mxu0  ;;  %v10547_v29 = vld [vmem:[#allocation27_spill] sm:$0xff]  ;;  %v10548_v31 = vld [vmem:[#allocation28_spill] sm:$0xff] }
  0xfd   : > { %743 = vst.msk [vmem:[#allocation2 + $0x8] sm:$0xff] %vm288_vm1, %v7691_v32  ;;  %v503_v33 = vpop.f32.mrb[1].mxu0  ;;  %8037 = vmatmul.mubr.msk.f32.gmra.mrb[106].mxu0 %vm288_vm1, %v10529_v34  ;;  %v6952_v34 = vld [vmem:[%s8526_s10 + $0x58] sm:$0xff] }
  0xfe   : > { %v7730_v35 = vpop.f32.mrb[2].mxu1  ;;  %742 = vst.msk [vmem:[#allocation2] sm:$0xff] %vm288_vm1, %v503_v33  ;;  %8039 = vmatprep.mubr.msk.f32.mxu0 %vm288_vm1, %v10530_v36  ;;  %v10549_v36 = vld [vmem:[#allocation29_spill] sm:$0xff] }
  0xff   : > { %769 = vst.msk [vmem:[#allocation2 + $0xd8] sm:$0xff] %vm288_vm1, %v7730_v35  ;;  %v633_v37 = vpop.f32.mrb[3].mxu1  ;;  %7966 = vmatmul.mubr.msk.f32.gmra.mrb[108].mxu1 %vm288_vm1, %v10531_v38  ;;  %v10550_v38 = vld [vmem:[#allocation30_spill] sm:$0xff] }
 0x100   : > { %768 = vst.msk [vmem:[#allocation2 + $0xd0] sm:$0xff] %vm288_vm1, %v633_v37  ;;  %7968 = vmatprep.mubr.msk.f32.mxu1 %vm288_vm1, %v10532_v39  ;;  %v7694_v40 = vpop.f32.mrb[2].mxu0  ;;  %v6953_v37 = vld [vmem:[%s8526_s10 + $0x60] sm:$0xff] }
 0x101   : > { %745 = vst.msk [vmem:[#allocation2 + $0x18] sm:$0xff] %vm288_vm1, %v7694_v40  ;;  %v513_v41 = vpop.f32.mrb[3].mxu0  ;;  %8040 = vmatmul.mubr.msk.f32.gmra.mrb[108].mxu0 %vm288_vm1, %v10533_v42  ;;  %v6954_v42 = vld [vmem:[%s8526_s10 + $0x68] sm:$0xff] }
 0x102   : > { %v7733_v43 = vpop.f32.mrb[4].mxu1  ;;  %744 = vst.msk [vmem:[#allocation2 + $0x10] sm:$0xff] %vm288_vm1, %v513_v41  ;;  %8042 = vmatprep.mubr.msk.f32.mxu0 %vm288_vm1, %v10534_v44  ;;  %v10551_v44 = vld [vmem:[#allocation31_spill] sm:$0xff] }
 0x103   : > { %771 = vst.msk [vmem:[#allocation2 + $0xe8] sm:$0xff] %vm288_vm1, %v7733_v43  ;;  %v643_v45 = vpop.f32.mrb[5].mxu1  ;;  %7969 = vmatmul.mubr.msk.f32.gmra.mrb[110].mxu1 %vm288_vm1, %v10535_v46  ;;  %v10552_v46 = vld [vmem:[#allocation32_spill] sm:$0xff] }
 0x104   : > { %770 = vst.msk [vmem:[#allocation2 + $0xe0] sm:$0xff] %vm288_vm1, %v643_v45  ;;  %7971 = vmatprep.mubr.msk.f32.mxu1 %vm288_vm1, %v10536_v47  ;;  %v7697_v48 = vpop.f32.mrb[4].mxu0  ;;  %v6955_v45 = vld [vmem:[%s8526_s10 + $0x70] sm:$0xff] }
 0x105   : > { %747 = vst.msk [vmem:[#allocation2 + $0x28] sm:$0xff] %vm288_vm1, %v7697_v48  ;;  %v523_v49 = vpop.f32.mrb[5].mxu0  ;;  %8043 = vmatmul.mubr.msk.f32.gmra.mrb[110].mxu0 %vm288_vm1, %v10537_v50  ;;  %v6956_v50 = vld [vmem:[%s8526_s10 + $0x78] sm:$0xff] }
 0x106   : > { %v7736_v51 = vpop.f32.mrb[6].mxu1  ;;  %746 = vst.msk [vmem:[#allocation2 + $0x20] sm:$0xff] %vm288_vm1, %v523_v49  ;;  %8045 = vmatprep.mubr.msk.f32.mxu0 %vm288_vm1, %v10538_v53  ;;  %v10553_v53 = vld [vmem:[#allocation33_spill] sm:$0xff] }
 0x107   : > { %773 = vst.msk [vmem:[#allocation2 + $0xf8] sm:$0xff] %vm288_vm1, %v7736_v51  ;;  %v653_v58 = vpop.f32.mrb[7].mxu1  ;;  %7972 = vmatmul.mubr.msk.f32.gmra.mrb[112].mxu1 %vm288_vm1, %v10539_v60  ;;  %v10554_v60 = vld [vmem:[#allocation34_spill] sm:$0xff] }
 0x108   : > { %772 = vst.msk [vmem:[#allocation2 + $0xf0] sm:$0xff] %vm288_vm1, %v653_v58  ;;  %7974 = vmatprep.mubr.msk.f32.mxu1 %vm288_vm1, %v10540_v61  ;;  %v7700_v62 = vpop.f32.mrb[6].mxu0  ;;  %v6957_v58 = vld [vmem:[%s8526_s10 + $0x80] sm:$0xff] }
 0x109   : > { %749 = vst.msk [vmem:[#allocation2 + $0x38] sm:$0xff] %vm288_vm1, %v7700_v62  ;;  %v533_v63 = vpop.f32.mrb[7].mxu0  ;;  %8046 = vmatmul.mubr.msk.f32.gmra.mrb[112].mxu0 %vm288_vm1, %v10541_v0  ;;  %v1295_v0 = vld [vmem:[#allocation2 + $0x8] sm:$0xff] }
 0x10a   : > { %v7739_v1 = vpop.f32.mrb[8].mxu1  ;;  %748 = vst.msk [vmem:[#allocation2 + $0x30] sm:$0xff] %vm288_vm1, %v533_v63  ;;  %8048 = vmatprep.mubr.msk.f32.mxu0 %vm288_vm1, %v9152_v23 }
 0x10b   : > { %775 = vst.msk [vmem:[#allocation2 + $0x108] sm:$0xff] %vm288_vm1, %v7739_v1  ;;  %v663_v2 = vpop.f32.mrb[9].mxu1  ;;  %7975 = vmatmul.mubr.msk.f32.gmra.mrb[114].mxu1 %vm288_vm1, %v10542_v6  ;;  %v6958_v1 = vld [vmem:[%s8526_s10 + $0x88] sm:$0xff] }
 0x10c   : > { %774 = vst.msk [vmem:[#allocation2 + $0x100] sm:$0xff] %vm288_vm1, %v663_v2  ;;  %7977 = vmatprep.mubr.msk.f32.mxu1 %vm288_vm1, %v10543_v7  ;;  %v7703_v10 = vpop.f32.mrb[8].mxu0  ;;  %v1294_v7 = vld [vmem:[#allocation2] sm:$0xff] }
 0x10d   : > { %751 = vst.msk [vmem:[#allocation2 + $0x48] sm:$0xff] %vm288_vm1, %v7703_v10  ;;  %v543_v55 = vpop.f32.mrb[9].mxu0  ;;  %8049 = vmatmul.mubr.msk.f32.gmra.mrb[114].mxu0 %vm288_vm1, %v9155_v16  ;;  %v6700_v16 = vld [vmem:[%s8526_s10 + $0x190] sm:$0xff] }
 0x10e   : > { %v7742_v23 = vpop.f32.mrb[10].mxu1  ;;  %750 = vst.msk [vmem:[#allocation2 + $0x40] sm:$0xff] %vm288_vm1, %v543_v55  ;;  %8051 = vmatprep.mubr.msk.f32.mxu0 %vm288_vm1, %v9166_v19  ;;  %v6959_v10 = vld [vmem:[%s8526_s10 + $0x90] sm:$0xff] }
 0x10f   : > { %777 = vst.msk [vmem:[#allocation2 + $0x118] sm:$0xff] %vm288_vm1, %v7742_v23  ;;  %v673_v52 = vpop.f32.mrb[11].mxu1  ;;  %7978 = vmatmul.mubr.msk.f32.gmra.mrb[116].mxu1 %vm288_vm1, %v6698_v8  ;;  %v10555_v8 = vld [vmem:[#allocation35_spill] sm:$0xff]  ;;  %v10556_v55 = vld [vmem:[#allocation36_spill] sm:$0xff] }
 0x110   : > { %776 = vst.msk [vmem:[#allocation2 + $0x110] sm:$0xff] %vm288_vm1, %v673_v52  ;;  %7980 = vmatprep.mubr.msk.f32.mxu1 %vm288_vm1, %v6699_v54  ;;  %v7706_v57 = vpop.f32.mrb[10].mxu0 }
 0x111   : > { %753 = vst.msk [vmem:[#allocation2 + $0x58] sm:$0xff] %vm288_vm1, %v7706_v57  ;;  %v553_v3 = vpop.f32.mrb[11].mxu0  ;;  %8052 = vmatmul.mubr.msk.f32.gmra.mrb[116].mxu0 %vm288_vm1, %v6796_v59 }
 0x112   : > { %v7745_v19 = vpop.f32.mrb[12].mxu1  ;;  %752 = vst.msk [vmem:[#allocation2 + $0x50] sm:$0xff] %vm288_vm1, %v553_v3  ;;  %8054 = vmatprep.mubr.msk.f32.mxu0 %vm288_vm1, %v6797_v56  ;;  %v1297_v56 = vld [vmem:[#allocation2 + $0x18] sm:$0xff] }
 0x113   : > { %779 = vst.msk [vmem:[#allocation2 + $0x128] sm:$0xff] %vm288_vm1, %v7745_v19  ;;  %v683_v5 = vpop.f32.mrb[13].mxu1  ;;  %7981 = vmatmul.mubr.msk.f32.gmra.mrb[118].mxu1 %vm288_vm1, %v6700_v16  ;;  %v6960_v16 = vld [vmem:[%s8526_s10 + $0x98] sm:$0xff]  ;;  %v1296_v19 = vld [vmem:[#allocation2 + $0x10] sm:$0xff] }
 0x114   : > { %778 = vst.msk [vmem:[#allocation2 + $0x120] sm:$0xff] %vm288_vm1, %v683_v5  ;;  %8059 = vmatprep.mubr.msk.f32.mxu1 %vm288_vm1, %v10544_v12  ;;  %v7709_v14 = vpop.f32.mrb[12].mxu0  ;;  %v6961_v5 = vld [vmem:[%s8526_s10 + $0xa0] sm:$0xff] }
 0x115   : > { %755 = vst.msk [vmem:[#allocation2 + $0x68] sm:$0xff] %vm288_vm1, %v7709_v14  ;;  %v563_v15 = vpop.f32.mrb[13].mxu0  ;;  %8055 = vmatmul.mubr.msk.f32.gmra.mrb[118].mxu0 %vm288_vm1, %v6798_v4  ;;  %v10557_v4 = vld [vmem:[#allocation37_spill] sm:$0xff]  ;;  %v10558_v12 = vld [vmem:[#allocation38_spill] sm:$0xff] }
 0x116   : > { %v7748_v17 = vpop.f32.mrb[14].mxu1  ;;  %754 = vst.msk [vmem:[#allocation2 + $0x60] sm:$0xff] %vm288_vm1, %v563_v15  ;;  %8133 = vmatprep.mubr.msk.f32.mxu0 %vm288_vm1, %v6947_v9 }
 0x117   : > { %781 = vst.msk [vmem:[#allocation2 + $0x138] sm:$0xff] %vm288_vm1, %v7748_v17  ;;  %v693_v20 = vpop.f32.mrb[15].mxu1  ;;  %8060 = vmatmul.mubr.msk.f32.vlgmr.msra.gmra.mrb[120].mxu1 %vm288_vm1, %v10545_v21 }
 0x118   : > { %780 = vst.msk [vmem:[#allocation2 + $0x130] sm:$0xff] %vm288_vm1, %v693_v20  ;;  %8206 = vmatpush3.msk.msra.mxu1 %vm433_vm0, %v9181_v11  ;;  %8062 = vmatprep.mubr.msk.f32.mxu1 %vm288_vm1, %v10546_v24  ;;  %v7712_v25 = vpop.f32.mrb[14].mxu0  ;;  %v6962_v20 = vld [vmem:[%s8526_s10 + $0xa8] sm:$0xff]  ;;  %v1298_v24 = vld [vmem:[#allocation2 + $0x20] sm:$0xff] }
 0x119   : > { %757 = vst.msk [vmem:[#allocation2 + $0x78] sm:$0xff] %vm288_vm1, %v7712_v25  ;;  %v573_v26 = vpop.f32.mrb[15].mxu0  ;;  %8134 = vmatmul.mubr.msk.f32.vlgmr.msra.gmra.mrb[120].mxu0 %vm288_vm1, %v6948_v18  ;;  %v1299_v18 = vld [vmem:[#allocation2 + $0x28] sm:$0xff] }
 0x11a   : > { %v7751_v27 = vpop.f32.mrb[16].mxu1  ;;  %756 = vst.msk [vmem:[#allocation2 + $0x70] sm:$0xff] %vm288_vm1, %v573_v26  ;;  %8280 = vmatpush3.msk.msra.mxu0 %vm433_vm0, %v9192_v13  ;;  %8136 = vmatprep.mubr.msk.f32.mxu0 %vm288_vm1, %v6949_v22  ;;  %v10559_v25 = vld [vmem:[#allocation39_spill] sm:$0xff]  ;;  %v6963_v26 = vld [vmem:[%s8526_s10 + $0xb0] sm:$0xff] }
 0x11b   : > { %783 = vst.msk [vmem:[#allocation2 + $0x148] sm:$0xff] %vm288_vm1, %v7751_v27  ;;  %v703_v11 = vpop.f32.mrb[17].mxu1  ;;  %8063 = vmatmul.mubr.msk.f32.gmra.mrb[122].mxu1 %vm288_vm1, %v10547_v29 }
 0x11c   : > { %782 = vst.msk [vmem:[#allocation2 + $0x140] sm:$0xff] %vm288_vm1, %v703_v11  ;;  %8065 = vmatprep.mubr.msk.f32.mxu1 %vm288_vm1, %v10548_v31  ;;  %v7715_v32 = vpop.f32.mrb[16].mxu0  ;;  %v10560_v11 = vld [vmem:[#allocation40_spill] sm:$0xff] }
 0x11d   : > { %759 = vst.msk [vmem:[#allocation2 + $0x88] sm:$0xff] %vm288_vm1, %v7715_v32  ;;  %v583_v13 = vpop.f32.mrb[17].mxu0  ;;  %8137 = vmatmul.mubr.msk.f32.gmra.mrb[122].mxu0 %vm288_vm1, %v6950_v28  ;;  %v6867_v32 = vld [vmem:[%s8526_s10 + $0xaa] sm:$0xff] }
 0x11e   : > { %v7754_v33 = vpop.f32.mrb[18].mxu1  ;;  %758 = vst.msk [vmem:[#allocation2 + $0x80] sm:$0xff] %vm288_vm1, %v583_v13  ;;  %8139 = vmatprep.mubr.msk.f32.mxu0 %vm288_vm1, %v6951_v30 }
 0x11f   : > { %785 = vst.msk [vmem:[#allocation2 + $0x158] sm:$0xff] %vm288_vm1, %v7754_v33  ;;  %v713_v35 = vpop.f32.mrb[19].mxu1  ;;  %8066 = vmatmul.mubr.msk.f32.gmra.mrb[124].mxu1 %vm288_vm1, %v10549_v36  ;;  %v6964_v36 = vld [vmem:[%s8526_s10 + $0xb8] sm:$0xff] }
 0x120   : > { %784 = vst.msk [vmem:[#allocation2 + $0x150] sm:$0xff] %vm288_vm1, %v713_v35  ;;  %8068 = vmatprep.mubr.msk.f32.mxu1 %vm288_vm1, %v10550_v38  ;;  %v7718_v39 = vpop.f32.mrb[18].mxu0  ;;  %v1301_v35 = vld [vmem:[#allocation2 + $0x38] sm:$0xff] }
 0x121   : > { %761 = vst.msk [vmem:[#allocation2 + $0x98] sm:$0xff] %vm288_vm1, %v7718_v39  ;;  %v593_v40 = vpop.f32.mrb[19].mxu0  ;;  %8140 = vmatmul.mubr.msk.f32.gmra.mrb[124].mxu0 %vm288_vm1, %v6952_v34  ;;  %v1300_v39 = vld [vmem:[#allocation2 + $0x30] sm:$0xff] }
 0x122   : > { %v7757_v41 = vpop.f32.mrb[20].mxu1  ;;  %760 = vst.msk [vmem:[#allocation2 + $0x90] sm:$0xff] %vm288_vm1, %v593_v40  ;;  %8142 = vmatprep.mubr.msk.f32.mxu0 %vm288_vm1, %v6953_v37  ;;  %v10561_v40 = vld [vmem:[#allocation41_spill] sm:$0xff] }
 0x123   : > { %787 = vst.msk [vmem:[#allocation2 + $0x168] sm:$0xff] %vm288_vm1, %v7757_v41  ;;  %v723_v43 = vpop.f32.mrb[21].mxu1  ;;  %8069 = vmatmul.mubr.msk.f32.gmra.mrb[126].mxu1 %vm288_vm1, %v10551_v44  ;;  %v6965_v41 = vld [vmem:[%s8526_s10 + $0xc0] sm:$0xff]  ;;  %v6868_v44 = vld [vmem:[%s8526_s10 + $0xb2] sm:$0xff] }
 0x124   : > { %786 = vst.msk [vmem:[#allocation2 + $0x160] sm:$0xff] %vm288_vm1, %v723_v43  ;;  %8071 = vmatprep.mubr.msk.f32.mxu1 %vm288_vm1, %v10552_v46  ;;  %v7721_v47 = vpop.f32.mrb[20].mxu0 }
 0x125   : > { %763 = vst.msk [vmem:[#allocation2 + $0xa8] sm:$0xff] %vm288_vm1, %v7721_v47  ;;  %v603_v48 = vpop.f32.mrb[21].mxu0  ;;  %8143 = vmatmul.mubr.msk.f32.gmra.mrb[126].mxu0 %vm288_vm1, %v6954_v42 }
 0x126   : > { %v7760_v49 = vpop.f32.mrb[22].mxu1  ;;  %762 = vst.msk [vmem:[#allocation2 + $0xa0] sm:$0xff] %vm288_vm1, %v603_v48  ;;  %8145 = vmatprep.mubr.msk.f32.mxu0 %vm288_vm1, %v6955_v45  ;;  %v6869_v48 = vld [vmem:[%s8526_s10 + $0xba] sm:$0xff] }
 0x127   : > { %789 = vst.msk [vmem:[#allocation2 + $0x178] sm:$0xff] %vm288_vm1, %v7760_v49  ;;  %v733_v51 = vpop.f32.mrb[23].mxu1  ;;  %8072 = vmatmul.mubr.msk.f32.gmra.mrb[128].mxu1 %vm288_vm1, %v10553_v53  ;;  %v1303_v53 = vld [vmem:[#allocation2 + $0x48] sm:$0xff] }
 0x128   : > { %788 = vst.msk [vmem:[#allocation2 + $0x170] sm:$0xff] %vm288_vm1, %v733_v51  ;;  %8074 = vmatprep.mubr.msk.f32.mxu1 %vm288_vm1, %v10554_v60  ;;  %v7724_v61 = vpop.f32.mrb[22].mxu0 }
 0x129   : > { %765 = vst.msk [vmem:[#allocation2 + $0xb8] sm:$0xff] %vm288_vm1, %v7724_v61  ;;  %v613_v62 = vpop.f32.mrb[23].mxu0  ;;  %8146 = vmatmul.mubr.msk.f32.gmra.mrb[128].mxu0 %vm288_vm1, %v6956_v50 }
 0x12a   : > { %v7765_v63 = vpop.f32.mrb[24].mxu1  ;;  %764 = vst.msk [vmem:[#allocation2 + $0xb0] sm:$0xff] %vm288_vm1, %v613_v62  ;;  %8148 = vmatprep.mubr.msk.f32.mxu0 %vm288_vm1, %v6957_v58  ;;  %v6966_v58 = vld [vmem:[%s8526_s10 + $0xc8] sm:$0xff]  ;;  %v1302_v62 = vld [vmem:[#allocation2 + $0x40] sm:$0xff] }
 0x12b   : > { %v1343_v2 = vadd.f32 %v7765_v63, %v1295_v0  ;;  %v1055_v6 = vpop.f32.mrb[25].mxu1  ;;  %8075 = vmatmul.mubr.msk.f32.gmra.mrb[130].mxu1 %vm288_vm1, %v10555_v8  ;;  %v6967_v63 = vld [vmem:[%s8526_s10 + $0xd0] sm:$0xff] }
 0x12c   : > { %v1342_v54 = vadd.f32 %v1294_v7, %v1055_v6  ;;  %8077 = vmatprep.mubr.msk.f32.mxu1 %vm288_vm1, %v10556_v55  ;;  %v7839_v23 = vpop.f32.mrb[24].mxu0 }
 0x12d   : > { %1391 = vst.msk [vmem:[#allocation2 + $0x8] sm:$0xff] %vm288_vm1, %v1343_v2  ;;  %v1703_v59 = vpop.f32.mrb[25].mxu0  ;;  %8149 = vmatmul.mubr.msk.f32.gmra.mrb[130].mxu0 %vm288_vm1, %v6958_v1  ;;  %v6870_v2 = vld [vmem:[%s8526_s10 + $0xc2] sm:$0xff] }
 0x12e   : > { %1390 = vst.msk [vmem:[#allocation2] sm:$0xff] %vm288_vm1, %v1342_v54  ;;  %v7768_v52 = vpop.f32.mrb[26].mxu1  ;;  %8151 = vmatprep.mubr.msk.f32.mxu0 %vm288_vm1, %v6959_v10  ;;  %v6871_v10 = vld [vmem:[%s8526_s10 + $0xca] sm:$0xff] }
 0x12f   : > { %v1345_v57 = vadd.f32 %v7768_v52, %v1297_v56  ;;  %v1065_v3 = vpop.f32.mrb[27].mxu1  ;;  %8078 = vmatmul.mubr.msk.f32.gmra.mrb[132].mxu1 %vm288_vm1, %v10557_v4  ;;  %v6968_v52 = vld [vmem:[%s8526_s10 + $0xd8] sm:$0xff] }
 0x130   : > { %v1344_v9 = vadd.f32 %v1296_v19, %v1065_v3  ;;  %8080 = vmatprep.mubr.msk.f32.mxu1 %vm288_vm1, %v10558_v12  ;;  %v7842_v14 = vpop.f32.mrb[26].mxu0  ;;  %v6969_v3 = vld [vmem:[%s8526_s10 + $0xe0] sm:$0xff] }
 0x131   : > { %1393 = vst.msk [vmem:[#allocation2 + $0x18] sm:$0xff] %vm288_vm1, %v1345_v57  ;;  %v1713_v15 = vpop.f32.mrb[27].mxu0  ;;  %8152 = vmatmul.mubr.msk.f32.gmra.mrb[132].mxu0 %vm288_vm1, %v6960_v16  ;;  %v1304_v57 = vld [vmem:[#allocation2 + $0x50] sm:$0xff] }
 0x132   : > { %1392 = vst.msk [vmem:[#allocation2 + $0x10] sm:$0xff] %vm288_vm1, %v1344_v9  ;;  %v7771_v17 = vpop.f32.mrb[28].mxu1  ;;  %8154 = vmatprep.mubr.msk.f32.mxu0 %vm288_vm1, %v6961_v5  ;;  %v6872_v5 = vld [vmem:[%s8526_s10 + $0xd2] sm:$0xff] }
 0x133   : > { %v1347_v21 = vadd.f32 %v7771_v17, %v1299_v18  ;;  %v1075_v22 = vpop.f32.mrb[29].mxu1  ;;  %8081 = vmatmul.mubr.msk.f32.gmra.mrb[134].mxu1 %vm288_vm1, %v10559_v25 }
 0x134   : > { %v1346_v27 = vadd.f32 %v1298_v24, %v1075_v22  ;;  %v1943_v28 = vld [vmem:[#allocation2 + $0x8] sm:$0xff]  ;;  %8083 = vmatprep.mubr.msk.f32.mxu1 %vm288_vm1, %v10560_v11  ;;  %v7845_v29 = vpop.f32.mrb[28].mxu0 }
 0x135   : > { %1395 = vst.msk [vmem:[#allocation2 + $0x28] sm:$0xff] %vm288_vm1, %v1347_v21  ;;  %v1991_v30 = vadd.f32 %v7839_v23, %v1943_v28  ;;  %v1942_v31 = vld [vmem:[#allocation2] sm:$0xff]  ;;  %v1723_v13 = vpop.f32.mrb[29].mxu0  ;;  %8155 = vmatmul.mubr.msk.f32.gmra.mrb[134].mxu0 %vm288_vm1, %v6962_v20  ;;  %v1307_v21 = vld [vmem:[#allocation2 + $0x68] sm:$0xff] }
 0x136   : > { %1394 = vst.msk [vmem:[#allocation2 + $0x20] sm:$0xff] %vm288_vm1, %v1346_v27  ;;  %v1990_v33 = vadd.f32 %v1942_v31, %v1703_v59  ;;  %v7774_v34 = vpop.f32.mrb[30].mxu1  ;;  %8157 = vmatprep.mubr.msk.f32.mxu0 %vm288_vm1, %v6963_v26  ;;  %v1305_v59 = vld [vmem:[#allocation2 + $0x58] sm:$0xff]  ;;  %v6970_v22 = vld [vmem:[%s8526_s10 + $0xe8] sm:$0xff]  ;;  %v1306_v26 = vld [vmem:[#allocation2 + $0x60] sm:$0xff] }
 0x137   : > { %2039 = vst.msk [vmem:[#allocation2 + $0x8] sm:$0xff] %vm288_vm1, %v1991_v30  ;;  %v1349_v37 = vadd.f32 %v7774_v34, %v1301_v35  ;;  %v1085_v38 = vpop.f32.mrb[31].mxu1  ;;  %8084 = vmatmul.mubr.msk.f32.gmra.mrb[136].mxu1 %vm288_vm1, %v10561_v40  ;;  %v6971_v27 = vld [vmem:[%s8526_s10 + $0xf0] sm:$0xff] }
 0x138   : > { %2038 = vst.msk [vmem:[#allocation2] sm:$0xff] %vm288_vm1, %v1990_v33  ;;  %v1348_v42 = vadd.f32 %v1300_v39, %v1085_v38  ;;  %v1945_v43 = vld [vmem:[#allocation2 + $0x18] sm:$0xff]  ;;  %8086 = vmatprep.mubr.msk.f32.mxu1 %vm288_vm1, %v6867_v32  ;;  %v7848_v45 = vpop.f32.mrb[30].mxu0  ;;  %v1308_v40 = vld [vmem:[#allocation2 + $0x70] sm:$0xff] }
 0x139   : > { %1397 = vst.msk [vmem:[#allocation2 + $0x38] sm:$0xff] %vm288_vm1, %v1349_v37  ;;  %v1993_v46 = vadd.f32 %v7842_v14, %v1945_v43  ;;  %v1944_v47 = vld [vmem:[#allocation2 + $0x10] sm:$0xff]  ;;  %v1733_v49 = vpop.f32.mrb[31].mxu0  ;;  %8158 = vmatmul.mubr.msk.f32.gmra.mrb[136].mxu0 %vm288_vm1, %v6964_v36  ;;  %v1309_v36 = vld [vmem:[#allocation2 + $0x78] sm:$0xff] }
 0x13a   : > { %1396 = vst.msk [vmem:[#allocation2 + $0x30] sm:$0xff] %vm288_vm1, %v1348_v42  ;;  %v1992_v50 = vadd.f32 %v1944_v47, %v1713_v15  ;;  %v7777_v51 = vpop.f32.mrb[32].mxu1  ;;  %8160 = vmatprep.mubr.msk.f32.mxu0 %vm288_vm1, %v6965_v41  ;;  %v6873_v15 = vld [vmem:[%s8526_s10 + $0xda] sm:$0xff] }
 0x13b   : > { %2041 = vst.msk [vmem:[#allocation2 + $0x18] sm:$0xff] %vm288_vm1, %v1993_v46  ;;  %v1351_v60 = vadd.f32 %v7777_v51, %v1303_v53  ;;  %v1095_v61 = vpop.f32.mrb[33].mxu1  ;;  %8087 = vmatmul.mubr.msk.f32.gmra.mrb[138].mxu1 %vm288_vm1, %v6868_v44  ;;  %v6972_v37 = vld [vmem:[%s8526_s10 + $0xf8] sm:$0xff]  ;;  %v6973_v41 = vld [vmem:[%s8526_s10 + $0x100] sm:$0xff]  ;;  %v1311_v53 = vld [vmem:[#allocation2 + $0x88] sm:$0xff] }
 0x13c   : > { %2040 = vst.msk [vmem:[#allocation2 + $0x10] sm:$0xff] %vm288_vm1, %v1992_v50  ;;  %v1350_v0 = vadd.f32 %v1302_v62, %v1095_v61  ;;  %v1947_v1 = vld [vmem:[#allocation2 + $0x28] sm:$0xff]  ;;  %8089 = vmatprep.mubr.msk.f32.mxu1 %vm288_vm1, %v6869_v48  ;;  %v7851_v6 = vpop.f32.mrb[32].mxu0  ;;  %v6876_v44 = vld [vmem:[%s8526_s10 + $0xf2] sm:$0xff]  ;;  %v6877_v48 = vld [vmem:[%s8526_s10 + $0xfa] sm:$0xff] }
 0x13d   : > { %1399 = vst.msk [vmem:[#allocation2 + $0x48] sm:$0xff] %vm288_vm1, %v1351_v60  ;;  %v1995_v7 = vadd.f32 %v7845_v29, %v1947_v1  ;;  %v1946_v8 = vld [vmem:[#allocation2 + $0x20] sm:$0xff]  ;;  %v1743_v54 = vpop.f32.mrb[33].mxu0  ;;  %8161 = vmatmul.mubr.msk.f32.gmra.mrb[138].mxu0 %vm288_vm1, %v6966_v58  ;;  %v6974_v58 = vld [vmem:[%s8526_s10 + $0x108] sm:$0xff] }
 0x13e   : > { %1398 = vst.msk [vmem:[#allocation2 + $0x40] sm:$0xff] %vm288_vm1, %v1350_v0  ;;  %v1994_v55 = vadd.f32 %v1946_v8, %v1723_v13  ;;  %v7780_v23 = vpop.f32.mrb[34].mxu1  ;;  %8163 = vmatprep.mubr.msk.f32.mxu0 %vm288_vm1, %v6967_v63  ;;  %v6874_v29 = vld [vmem:[%s8526_s10 + $0xe2] sm:$0xff]  ;;  %v6875_v13 = vld [vmem:[%s8526_s10 + $0xea] sm:$0xff] }
 0x13f   : > { %2043 = vst.msk [vmem:[#allocation2 + $0x28] sm:$0xff] %vm288_vm1, %v1995_v7  ;;  %v1353_v56 = vadd.f32 %v7780_v23, %v1305_v59  ;;  %v1105_v16 = vpop.f32.mrb[35].mxu1  ;;  %8090 = vmatmul.mubr.msk.f32.gmra.mrb[140].mxu1 %vm288_vm1, %v6870_v2  ;;  %v1310_v62 = vld [vmem:[#allocation2 + $0x80] sm:$0xff]  ;;  %v6975_v63 = vld [vmem:[%s8526_s10 + $0x110] sm:$0xff]  ;;  %v1313_v59 = vld [vmem:[#allocation2 + $0x98] sm:$0xff] }
 0x140   : > { %2042 = vst.msk [vmem:[#allocation2 + $0x20] sm:$0xff] %vm288_vm1, %v1994_v55  ;;  %v1352_v19 = vadd.f32 %v1304_v57, %v1105_v16  ;;  %v1949_v4 = vld [vmem:[#allocation2 + $0x38] sm:$0xff]  ;;  %8092 = vmatprep.mubr.msk.f32.mxu1 %vm288_vm1, %v6871_v10  ;;  %v7854_v9 = vpop.f32.mrb[34].mxu0  ;;  %v6878_v2 = vld [vmem:[%s8526_s10 + $0x102] sm:$0xff]  ;;  %v6879_v10 = vld [vmem:[%s8526_s10 + $0x10a] sm:$0xff] }
 0x141   : > { %1401 = vst.msk [vmem:[#allocation2 + $0x58] sm:$0xff] %vm288_vm1, %v1353_v56  ;;  %v1997_v12 = vadd.f32 %v7848_v45, %v1949_v4  ;;  %v1948_v14 = vld [vmem:[#allocation2 + $0x30] sm:$0xff]  ;;  %v1753_v17 = vpop.f32.mrb[35].mxu0  ;;  %8164 = vmatmul.mubr.msk.f32.gmra.mrb[140].mxu0 %vm288_vm1, %v6968_v52  ;;  %v6976_v52 = vld [vmem:[%s8526_s10 + $0x118] sm:$0xff] }
 0x142   : > { %1400 = vst.msk [vmem:[#allocation2 + $0x50] sm:$0xff] %vm288_vm1, %v1352_v19  ;;  %v1996_v18 = vadd.f32 %v1948_v14, %v1733_v49  ;;  %v7783_v20 = vpop.f32.mrb[36].mxu1  ;;  %8166 = vmatprep.mubr.msk.f32.mxu0 %vm288_vm1, %v6969_v3  ;;  %v1312_v57 = vld [vmem:[#allocation2 + $0x90] sm:$0xff]  ;;  %v6977_v3 = vld [vmem:[%s8526_s10 + $0x120] sm:$0xff] }
 0x143   : > { %2045 = vst.msk [vmem:[#allocation2 + $0x38] sm:$0xff] %vm288_vm1, %v1997_v12  ;;  %v1355_v24 = vadd.f32 %v7783_v20, %v1307_v21  ;;  %v1115_v25 = vpop.f32.mrb[37].mxu1  ;;  %8093 = vmatmul.mubr.msk.f32.gmra.mrb[142].mxu1 %vm288_vm1, %v6872_v5  ;;  %v6880_v5 = vld [vmem:[%s8526_s10 + $0x112] sm:$0xff]  ;;  %v1315_v21 = vld [vmem:[#allocation2 + $0xa8] sm:$0xff] }
 0x144   : > { %2044 = vst.msk [vmem:[#allocation2 + $0x30] sm:$0xff] %vm288_vm1, %v1996_v18  ;;  %v1354_v28 = vadd.f32 %v1306_v26, %v1115_v25  ;;  %v1951_v11 = vld [vmem:[#allocation2 + $0x48] sm:$0xff]  ;;  %8095 = vmatprep.mubr.msk.f32.mxu1 %vm288_vm1, %v6873_v15  ;;  %v7857_v30 = vpop.f32.mrb[36].mxu0  ;;  %v6881_v15 = vld [vmem:[%s8526_s10 + $0x11a] sm:$0xff] }
 0x145   : > { %1403 = vst.msk [vmem:[#allocation2 + $0x68] sm:$0xff] %vm288_vm1, %v1355_v24  ;;  %v1999_v31 = vadd.f32 %v7851_v6, %v1951_v11  ;;  %v1950_v32 = vld [vmem:[#allocation2 + $0x40] sm:$0xff]  ;;  %v1763_v33 = vpop.f32.mrb[37].mxu0  ;;  %8167 = vmatmul.mubr.msk.f32.gmra.mrb[142].mxu0 %vm288_vm1, %v6970_v22  ;;  %v6978_v22 = vld [vmem:[%s8526_s10 + $0x128] sm:$0xff] }
 0x146   : > { %1402 = vst.msk [vmem:[#allocation2 + $0x60] sm:$0xff] %vm288_vm1, %v1354_v28  ;;  %v1998_v34 = vadd.f32 %v1950_v32, %v1743_v54  ;;  %v7786_v35 = vpop.f32.mrb[38].mxu1  ;;  %8169 = vmatprep.mubr.msk.f32.mxu0 %vm288_vm1, %v6971_v27  ;;  %v1314_v26 = vld [vmem:[#allocation2 + $0xa0] sm:$0xff]  ;;  %v6979_v27 = vld [vmem:[%s8526_s10 + $0x130] sm:$0xff] }
 0x147   : > { %2047 = vst.msk [vmem:[#allocation2 + $0x48] sm:$0xff] %vm288_vm1, %v1999_v31  ;;  %v1357_v38 = vadd.f32 %v7786_v35, %v1309_v36  ;;  %v1125_v39 = vpop.f32.mrb[39].mxu1  ;;  %8096 = vmatmul.mubr.msk.f32.gmra.mrb[144].mxu1 %vm288_vm1, %v6874_v29  ;;  %v6882_v29 = vld [vmem:[%s8526_s10 + $0x122] sm:$0xff]  ;;  %v1317_v36 = vld [vmem:[#allocation2 + $0xb8] sm:$0xff] }
 0x148   : > { %2046 = vst.msk [vmem:[#allocation2 + $0x40] sm:$0xff] %vm288_vm1, %v1998_v34  ;;  %v1356_v42 = vadd.f32 %v1308_v40, %v1125_v39  ;;  %v1953_v43 = vld [vmem:[#allocation2 + $0x58] sm:$0xff]  ;;  %8098 = vmatprep.mubr.msk.f32.mxu1 %vm288_vm1, %v6875_v13  ;;  %v7860_v45 = vpop.f32.mrb[38].mxu0  ;;  %v6883_v13 = vld [vmem:[%s8526_s10 + $0x12a] sm:$0xff] }
 0x149   : > { %1405 = vst.msk [vmem:[#allocation2 + $0x78] sm:$0xff] %vm288_vm1, %v1357_v38  ;;  %v2001_v46 = vadd.f32 %v7854_v9, %v1953_v43  ;;  %v1952_v47 = vld [vmem:[#allocation2 + $0x50] sm:$0xff]  ;;  %v1773_v49 = vpop.f32.mrb[39].mxu0  ;;  %8170 = vmatmul.mubr.msk.f32.gmra.mrb[144].mxu0 %vm288_vm1, %v6972_v37  ;;  %v6980_v37 = vld [vmem:[%s8526_s10 + $0x138] sm:$0xff] }
 0x14a   : > { %1404 = vst.msk [vmem:[#allocation2 + $0x70] sm:$0xff] %vm288_vm1, %v1356_v42  ;;  %v2000_v50 = vadd.f32 %v1952_v47, %v1753_v17  ;;  %v7789_v51 = vpop.f32.mrb[40].mxu1  ;;  %8172 = vmatprep.mubr.msk.f32.mxu0 %vm288_vm1, %v6973_v41  ;;  %v1316_v40 = vld [vmem:[#allocation2 + $0xb0] sm:$0xff]  ;;  %v6981_v41 = vld [vmem:[%s8526_s10 + $0x140] sm:$0xff] }
 0x14b   : > { %2049 = vst.msk [vmem:[#allocation2 + $0x58] sm:$0xff] %vm288_vm1, %v2001_v46  ;;  %v1359_v60 = vadd.f32 %v7789_v51, %v1311_v53  ;;  %v1135_v61 = vpop.f32.mrb[41].mxu1  ;;  %8099 = vmatmul.mubr.msk.f32.gmra.mrb[146].mxu1 %vm288_vm1, %v6876_v44  ;;  %v6884_v44 = vld [vmem:[%s8526_s10 + $0x132] sm:$0xff]  ;;  %v1319_v53 = vld [vmem:[#allocation2 + $0xc8] sm:$0xff] }
 0x14c   : > { %2048 = vst.msk [vmem:[#allocation2 + $0x50] sm:$0xff] %vm288_vm1, %v2000_v50  ;;  %v1358_v0 = vadd.f32 %v1310_v62, %v1135_v61  ;;  %v1955_v1 = vld [vmem:[#allocation2 + $0x68] sm:$0xff]  ;;  %8101 = vmatprep.mubr.msk.f32.mxu1 %vm288_vm1, %v6877_v48  ;;  %v7863_v6 = vpop.f32.mrb[40].mxu0  ;;  %v6885_v48 = vld [vmem:[%s8526_s10 + $0x13a] sm:$0xff] }
 0x14d   : > { %1407 = vst.msk [vmem:[#allocation2 + $0x88] sm:$0xff] %vm288_vm1, %v1359_v60  ;;  %v2003_v7 = vadd.f32 %v7857_v30, %v1955_v1  ;;  %v1954_v8 = vld [vmem:[#allocation2 + $0x60] sm:$0xff]  ;;  %v1783_v54 = vpop.f32.mrb[41].mxu0  ;;  %8173 = vmatmul.mubr.msk.f32.gmra.mrb[146].mxu0 %vm288_vm1, %v6974_v58  ;;  %v6982_v58 = vld [vmem:[%s8526_s10 + $0x148] sm:$0xff] }
 0x14e   : > { %1406 = vst.msk [vmem:[#allocation2 + $0x80] sm:$0xff] %vm288_vm1, %v1358_v0  ;;  %v2002_v55 = vadd.f32 %v1954_v8, %v1763_v33  ;;  %v7792_v23 = vpop.f32.mrb[42].mxu1  ;;  %8175 = vmatprep.mubr.msk.f32.mxu0 %vm288_vm1, %v6975_v63  ;;  %v1318_v62 = vld [vmem:[#allocation2 + $0xc0] sm:$0xff]  ;;  %v6983_v63 = vld [vmem:[%s8526_s10 + $0x150] sm:$0xff] }
 0x14f   : > { %2051 = vst.msk [vmem:[#allocation2 + $0x68] sm:$0xff] %vm288_vm1, %v2003_v7  ;;  %v1361_v56 = vadd.f32 %v7792_v23, %v1313_v59  ;;  %v1145_v16 = vpop.f32.mrb[43].mxu1  ;;  %8102 = vmatmul.mubr.msk.f32.gmra.mrb[148].mxu1 %vm288_vm1, %v6878_v2  ;;  %v6886_v2 = vld [vmem:[%s8526_s10 + $0x142] sm:$0xff]  ;;  %v1321_v59 = vld [vmem:[#allocation2 + $0xd8] sm:$0xff] }
 0x150   : > { %2050 = vst.msk [vmem:[#allocation2 + $0x60] sm:$0xff] %vm288_vm1, %v2002_v55  ;;  %v1360_v19 = vadd.f32 %v1312_v57, %v1145_v16  ;;  %v1957_v4 = vld [vmem:[#allocation2 + $0x78] sm:$0xff]  ;;  %8104 = vmatprep.mubr.msk.f32.mxu1 %vm288_vm1, %v6879_v10  ;;  %v7866_v9 = vpop.f32.mrb[42].mxu0  ;;  %v6887_v10 = vld [vmem:[%s8526_s10 + $0x14a] sm:$0xff] }
 0x151   : > { %1409 = vst.msk [vmem:[#allocation2 + $0x98] sm:$0xff] %vm288_vm1, %v1361_v56  ;;  %v2005_v12 = vadd.f32 %v7860_v45, %v1957_v4  ;;  %v1956_v14 = vld [vmem:[#allocation2 + $0x70] sm:$0xff]  ;;  %v1793_v17 = vpop.f32.mrb[43].mxu0  ;;  %8176 = vmatmul.mubr.msk.f32.gmra.mrb[148].mxu0 %vm288_vm1, %v6976_v52  ;;  %v6984_v52 = vld [vmem:[%s8526_s10 + $0x158] sm:$0xff] }
 0x152   : > { %1408 = vst.msk [vmem:[#allocation2 + $0x90] sm:$0xff] %vm288_vm1, %v1360_v19  ;;  %v2004_v18 = vadd.f32 %v1956_v14, %v1773_v49  ;;  %v7795_v20 = vpop.f32.mrb[44].mxu1  ;;  %8178 = vmatprep.mubr.msk.f32.mxu0 %vm288_vm1, %v6977_v3  ;;  %v1320_v57 = vld [vmem:[#allocation2 + $0xd0] sm:$0xff]  ;;  %v6985_v3 = vld [vmem:[%s8526_s10 + $0x160] sm:$0xff] }
 0x153   : > { %2053 = vst.msk [vmem:[#allocation2 + $0x78] sm:$0xff] %vm288_vm1, %v2005_v12  ;;  %v1363_v24 = vadd.f32 %v7795_v20, %v1315_v21  ;;  %v1155_v25 = vpop.f32.mrb[45].mxu1  ;;  %8105 = vmatmul.mubr.msk.f32.gmra.mrb[150].mxu1 %vm288_vm1, %v6880_v5  ;;  %v6888_v5 = vld [vmem:[%s8526_s10 + $0x152] sm:$0xff]  ;;  %v1323_v21 = vld [vmem:[#allocation2 + $0xe8] sm:$0xff] }
 0x154   : > { %2052 = vst.msk [vmem:[#allocation2 + $0x70] sm:$0xff] %vm288_vm1, %v2004_v18  ;;  %v1362_v28 = vadd.f32 %v1314_v26, %v1155_v25  ;;  %v1959_v11 = vld [vmem:[#allocation2 + $0x88] sm:$0xff]  ;;  %8107 = vmatprep.mubr.msk.f32.mxu1 %vm288_vm1, %v6881_v15  ;;  %v7869_v30 = vpop.f32.mrb[44].mxu0  ;;  %v6889_v15 = vld [vmem:[%s8526_s10 + $0x15a] sm:$0xff] }
 0x155   : > { %1411 = vst.msk [vmem:[#allocation2 + $0xa8] sm:$0xff] %vm288_vm1, %v1363_v24  ;;  %v2007_v31 = vadd.f32 %v7863_v6, %v1959_v11  ;;  %v1958_v32 = vld [vmem:[#allocation2 + $0x80] sm:$0xff]  ;;  %v1803_v33 = vpop.f32.mrb[45].mxu0  ;;  %8179 = vmatmul.mubr.msk.f32.gmra.mrb[150].mxu0 %vm288_vm1, %v6978_v22  ;;  %v6986_v22 = vld [vmem:[%s8526_s10 + $0x168] sm:$0xff] }
 0x156   : > { %1410 = vst.msk [vmem:[#allocation2 + $0xa0] sm:$0xff] %vm288_vm1, %v1362_v28  ;;  %v2006_v34 = vadd.f32 %v1958_v32, %v1783_v54  ;;  %v7798_v35 = vpop.f32.mrb[46].mxu1  ;;  %8181 = vmatprep.mubr.msk.f32.mxu0 %vm288_vm1, %v6979_v27  ;;  %v1322_v26 = vld [vmem:[#allocation2 + $0xe0] sm:$0xff]  ;;  %v6987_v27 = vld [vmem:[%s8526_s10 + $0x170] sm:$0xff] }
 0x157   : > { %2055 = vst.msk [vmem:[#allocation2 + $0x88] sm:$0xff] %vm288_vm1, %v2007_v31  ;;  %v1365_v38 = vadd.f32 %v7798_v35, %v1317_v36  ;;  %v1165_v39 = vpop.f32.mrb[47].mxu1  ;;  %8108 = vmatmul.mubr.msk.f32.gmra.mrb[152].mxu1 %vm288_vm1, %v6882_v29  ;;  %v6890_v29 = vld [vmem:[%s8526_s10 + $0x162] sm:$0xff]  ;;  %v1325_v36 = vld [vmem:[#allocation2 + $0xf8] sm:$0xff] }
 0x158   : > { %2054 = vst.msk [vmem:[#allocation2 + $0x80] sm:$0xff] %vm288_vm1, %v2006_v34  ;;  %v1364_v42 = vadd.f32 %v1316_v40, %v1165_v39  ;;  %v1961_v43 = vld [vmem:[#allocation2 + $0x98] sm:$0xff]  ;;  %8110 = vmatprep.mubr.msk.f32.mxu1 %vm288_vm1, %v6883_v13  ;;  %v7872_v45 = vpop.f32.mrb[46].mxu0  ;;  %v6891_v13 = vld [vmem:[%s8526_s10 + $0x16a] sm:$0xff] }
 0x159   : > { %1413 = vst.msk [vmem:[#allocation2 + $0xb8] sm:$0xff] %vm288_vm1, %v1365_v38  ;;  %v2009_v46 = vadd.f32 %v7866_v9, %v1961_v43  ;;  %v1960_v47 = vld [vmem:[#allocation2 + $0x90] sm:$0xff]  ;;  %v1813_v49 = vpop.f32.mrb[47].mxu0  ;;  %8182 = vmatmul.mubr.msk.f32.gmra.mrb[152].mxu0 %vm288_vm1, %v6980_v37  ;;  %v6988_v37 = vld [vmem:[%s8526_s10 + $0x178] sm:$0xff] }
 0x15a   : > { %1412 = vst.msk [vmem:[#allocation2 + $0xb0] sm:$0xff] %vm288_vm1, %v1364_v42  ;;  %v2008_v50 = vadd.f32 %v1960_v47, %v1793_v17  ;;  %v7801_v51 = vpop.f32.mrb[48].mxu1  ;;  %8184 = vmatprep.mubr.msk.f32.mxu0 %vm288_vm1, %v6981_v41  ;;  %v1324_v40 = vld [vmem:[#allocation2 + $0xf0] sm:$0xff]  ;;  %v6989_v41 = vld [vmem:[%s8526_s10 + $0x180] sm:$0xff] }
 0x15b   : > { %2057 = vst.msk [vmem:[#allocation2 + $0x98] sm:$0xff] %vm288_vm1, %v2009_v46  ;;  %v1367_v60 = vadd.f32 %v7801_v51, %v1319_v53  ;;  %v1175_v61 = vpop.f32.mrb[49].mxu1  ;;  %8111 = vmatmul.mubr.msk.f32.gmra.mrb[154].mxu1 %vm288_vm1, %v6884_v44  ;;  %v6892_v44 = vld [vmem:[%s8526_s10 + $0x172] sm:$0xff]  ;;  %v1327_v53 = vld [vmem:[#allocation2 + $0x108] sm:$0xff] }
 0x15c   : > { %2056 = vst.msk [vmem:[#allocation2 + $0x90] sm:$0xff] %vm288_vm1, %v2008_v50  ;;  %v1366_v0 = vadd.f32 %v1318_v62, %v1175_v61  ;;  %v1963_v1 = vld [vmem:[#allocation2 + $0xa8] sm:$0xff]  ;;  %8113 = vmatprep.mubr.msk.f32.mxu1 %vm288_vm1, %v6885_v48  ;;  %v7875_v6 = vpop.f32.mrb[48].mxu0  ;;  %v6893_v48 = vld [vmem:[%s8526_s10 + $0x17a] sm:$0xff] }
 0x15d   : > { %1415 = vst.msk [vmem:[#allocation2 + $0xc8] sm:$0xff] %vm288_vm1, %v1367_v60  ;;  %v2011_v7 = vadd.f32 %v7869_v30, %v1963_v1  ;;  %v1962_v8 = vld [vmem:[#allocation2 + $0xa0] sm:$0xff]  ;;  %v1823_v54 = vpop.f32.mrb[49].mxu0  ;;  %8185 = vmatmul.mubr.msk.f32.gmra.mrb[154].mxu0 %vm288_vm1, %v6982_v58  ;;  %v6990_v58 = vld [vmem:[%s8526_s10 + $0x188] sm:$0xff] }
 0x15e   : > { %1414 = vst.msk [vmem:[#allocation2 + $0xc0] sm:$0xff] %vm288_vm1, %v1366_v0  ;;  %v2010_v55 = vadd.f32 %v1962_v8, %v1803_v33  ;;  %v7804_v23 = vpop.f32.mrb[50].mxu1  ;;  %8187 = vmatprep.mubr.msk.f32.mxu0 %vm288_vm1, %v6983_v63  ;;  %v1326_v62 = vld [vmem:[#allocation2 + $0x100] sm:$0xff]  ;;  %v6991_v63 = vld [vmem:[%s8526_s10 + $0x190] sm:$0xff] }
 0x15f   : > { %2059 = vst.msk [vmem:[#allocation2 + $0xa8] sm:$0xff] %vm288_vm1, %v2011_v7  ;;  %v1369_v56 = vadd.f32 %v7804_v23, %v1321_v59  ;;  %v1185_v16 = vpop.f32.mrb[51].mxu1  ;;  %8114 = vmatmul.mubr.msk.f32.gmra.mrb[156].mxu1 %vm288_vm1, %v6886_v2  ;;  %v6894_v2 = vld [vmem:[%s8526_s10 + $0x182] sm:$0xff]  ;;  %v1329_v59 = vld [vmem:[#allocation2 + $0x118] sm:$0xff] }
 0x160   : > { %2058 = vst.msk [vmem:[#allocation2 + $0xa0] sm:$0xff] %vm288_vm1, %v2010_v55  ;;  %v1368_v19 = vadd.f32 %v1320_v57, %v1185_v16  ;;  %v1965_v4 = vld [vmem:[#allocation2 + $0xb8] sm:$0xff]  ;;  %8116 = vmatprep.mubr.msk.f32.mxu1 %vm288_vm1, %v6887_v10  ;;  %v7878_v9 = vpop.f32.mrb[50].mxu0  ;;  %v6895_v10 = vld [vmem:[%s8526_s10 + $0x18a] sm:$0xff] }
 0x161   : > { %1417 = vst.msk [vmem:[#allocation2 + $0xd8] sm:$0xff] %vm288_vm1, %v1369_v56  ;;  %v2013_v12 = vadd.f32 %v7872_v45, %v1965_v4  ;;  %v1964_v14 = vld [vmem:[#allocation2 + $0xb0] sm:$0xff]  ;;  %v1833_v17 = vpop.f32.mrb[51].mxu0  ;;  %8188 = vmatmul.mubr.msk.f32.gmra.mrb[156].mxu0 %vm288_vm1, %v6984_v52  ;;  %v6992_v52 = vld [vmem:[%s8526_s10 + $0x198] sm:$0xff] }
 0x162   : > { %1416 = vst.msk [vmem:[#allocation2 + $0xd0] sm:$0xff] %vm288_vm1, %v1368_v19  ;;  %v2012_v18 = vadd.f32 %v1964_v14, %v1813_v49  ;;  %v7807_v20 = vpop.f32.mrb[52].mxu1  ;;  %8190 = vmatprep.mubr.msk.f32.mxu0 %vm288_vm1, %v6985_v3  ;;  %v1328_v57 = vld [vmem:[#allocation2 + $0x110] sm:$0xff]  ;;  %v6993_v3 = vld [vmem:[%s8526_s10 + $0x1a0] sm:$0xff] }
 0x163   : > { %2061 = vst.msk [vmem:[#allocation2 + $0xb8] sm:$0xff] %vm288_vm1, %v2013_v12  ;;  %v1371_v24 = vadd.f32 %v7807_v20, %v1323_v21  ;;  %v1195_v25 = vpop.f32.mrb[53].mxu1  ;;  %8117 = vmatmul.mubr.msk.f32.gmra.mrb[158].mxu1 %vm288_vm1, %v6888_v5  ;;  %v6896_v5 = vld [vmem:[%s8526_s10 + $0x192] sm:$0xff]  ;;  %v1331_v21 = vld [vmem:[#allocation2 + $0x128] sm:$0xff] }
 0x164   : > { %2060 = vst.msk [vmem:[#allocation2 + $0xb0] sm:$0xff] %vm288_vm1, %v2012_v18  ;;  %v1370_v28 = vadd.f32 %v1322_v26, %v1195_v25  ;;  %v1967_v11 = vld [vmem:[#allocation2 + $0xc8] sm:$0xff]  ;;  %8119 = vmatprep.mubr.msk.f32.mxu1 %vm288_vm1, %v6889_v15  ;;  %v7881_v30 = vpop.f32.mrb[52].mxu0  ;;  %v7045_v15 = vld [vmem:[%s8526_s10 + $0x31] sm:$0xff]  ;;  %v1330_v26 = vld [vmem:[#allocation2 + $0x120] sm:$0xff] }
 0x165   : > { %1419 = vst.msk [vmem:[#allocation2 + $0xe8] sm:$0xff] %vm288_vm1, %v1371_v24  ;;  %v2015_v31 = vadd.f32 %v7875_v6, %v1967_v11  ;;  %v1966_v32 = vld [vmem:[#allocation2 + $0xc0] sm:$0xff]  ;;  %v1843_v33 = vpop.f32.mrb[53].mxu0  ;;  %8191 = vmatmul.mubr.msk.f32.gmra.mrb[158].mxu0 %vm288_vm1, %v6986_v22  ;;  %v6994_v22 = vld [vmem:[%s8526_s10 + $0x1a8] sm:$0xff] }
 0x166   : > { %1418 = vst.msk [vmem:[#allocation2 + $0xe0] sm:$0xff] %vm288_vm1, %v1370_v28  ;;  %v2014_v34 = vadd.f32 %v1966_v32, %v1823_v54  ;;  %v7810_v35 = vpop.f32.mrb[54].mxu1  ;;  %8193 = vmatprep.mubr.msk.f32.mxu0 %vm288_vm1, %v6987_v27  ;;  %v7143_v27 = vld [vmem:[%s8526_s10 + $0x32] sm:$0xff] }
 0x167   : > { %2063 = vst.msk [vmem:[#allocation2 + $0xc8] sm:$0xff] %vm288_vm1, %v2015_v31  ;;  %v1373_v38 = vadd.f32 %v7810_v35, %v1325_v36  ;;  %v1205_v39 = vpop.f32.mrb[55].mxu1  ;;  %8120 = vmatmul.mubr.msk.f32.gmra.mrb[160].mxu1 %vm288_vm1, %v6890_v29  ;;  %v7046_v29 = vld [vmem:[%s8526_s10 + $0x39] sm:$0xff] }
 0x168   : > { %2062 = vst.msk [vmem:[#allocation2 + $0xc0] sm:$0xff] %vm288_vm1, %v2014_v34  ;;  %v1372_v42 = vadd.f32 %v1324_v40, %v1205_v39  ;;  %v1969_v43 = vld [vmem:[#allocation2 + $0xd8] sm:$0xff]  ;;  %8122 = vmatprep.mubr.msk.f32.mxu1 %vm288_vm1, %v6891_v13  ;;  %v7884_v45 = vpop.f32.mrb[54].mxu0  ;;  %v7047_v13 = vld [vmem:[%s8526_s10 + $0x41] sm:$0xff]  ;;  %v1332_v40 = vld [vmem:[#allocation2 + $0x130] sm:$0xff] }
 0x169   : > { %1421 = vst.msk [vmem:[#allocation2 + $0xf8] sm:$0xff] %vm288_vm1, %v1373_v38  ;;  %v2017_v46 = vadd.f32 %v7878_v9, %v1969_v43  ;;  %v1968_v47 = vld [vmem:[#allocation2 + $0xd0] sm:$0xff]  ;;  %v1853_v49 = vpop.f32.mrb[55].mxu0  ;;  %8194 = vmatmul.mubr.msk.f32.gmra.mrb[160].mxu0 %vm288_vm1, %v6988_v37  ;;  %v1333_v36 = vld [vmem:[#allocation2 + $0x138] sm:$0xff] }
 0x16a   : > { %1420 = vst.msk [vmem:[#allocation2 + $0xf0] sm:$0xff] %vm288_vm1, %v1372_v42  ;;  %v2016_v50 = vadd.f32 %v1968_v47, %v1833_v17  ;;  %v7813_v51 = vpop.f32.mrb[56].mxu1  ;;  %8196 = vmatprep.mubr.msk.f32.mxu0 %vm288_vm1, %v6989_v41  ;;  %v7144_v37 = vld [vmem:[%s8526_s10 + $0x3a] sm:$0xff]  ;;  %v7145_v41 = vld [vmem:[%s8526_s10 + $0x42] sm:$0xff] }
 0x16b   : > { %2065 = vst.msk [vmem:[#allocation2 + $0xd8] sm:$0xff] %vm288_vm1, %v2017_v46  ;;  %v1375_v60 = vadd.f32 %v7813_v51, %v1327_v53  ;;  %v1215_v61 = vpop.f32.mrb[57].mxu1  ;;  %8123 = vmatmul.mubr.msk.f32.gmra.mrb[162].mxu1 %vm288_vm1, %v6892_v44  ;;  %v7048_v44 = vld [vmem:[%s8526_s10 + $0x49] sm:$0xff] }
 0x16c   : > { %2064 = vst.msk [vmem:[#allocation2 + $0xd0] sm:$0xff] %vm288_vm1, %v2016_v50  ;;  %v1374_v0 = vadd.f32 %v1326_v62, %v1215_v61  ;;  %v1971_v1 = vld [vmem:[#allocation2 + $0xe8] sm:$0xff]  ;;  %8125 = vmatprep.mubr.msk.f32.mxu1 %vm288_vm1, %v6893_v48  ;;  %v7887_v6 = vpop.f32.mrb[56].mxu0  ;;  %v7049_v48 = vld [vmem:[%s8526_s10 + $0x51] sm:$0xff]  ;;  %v1334_v62 = vld [vmem:[#allocation2 + $0x140] sm:$0xff] }
 0x16d   : > { %1423 = vst.msk [vmem:[#allocation2 + $0x108] sm:$0xff] %vm288_vm1, %v1375_v60  ;;  %v2019_v7 = vadd.f32 %v7881_v30, %v1971_v1  ;;  %v1970_v8 = vld [vmem:[#allocation2 + $0xe0] sm:$0xff]  ;;  %v1863_v54 = vpop.f32.mrb[57].mxu0  ;;  %8197 = vmatmul.mubr.msk.f32.gmra.mrb[162].mxu0 %vm288_vm1, %v6990_v58  ;;  %v1335_v53 = vld [vmem:[#allocation2 + $0x148] sm:$0xff] }
 0x16e   : > { %1422 = vst.msk [vmem:[#allocation2 + $0x100] sm:$0xff] %vm288_vm1, %v1374_v0  ;;  %v2018_v55 = vadd.f32 %v1970_v8, %v1843_v33  ;;  %v7816_v23 = vpop.f32.mrb[58].mxu1  ;;  %8199 = vmatprep.mubr.msk.f32.mxu0 %vm288_vm1, %v6991_v63  ;;  %v7146_v58 = vld [vmem:[%s8526_s10 + $0x4a] sm:$0xff]  ;;  %v7147_v63 = vld [vmem:[%s8526_s10 + $0x52] sm:$0xff] }
 0x16f   : > { %2067 = vst.msk [vmem:[#allocation2 + $0xe8] sm:$0xff] %vm288_vm1, %v2019_v7  ;;  %v1377_v56 = vadd.f32 %v7816_v23, %v1329_v59  ;;  %v1225_v16 = vpop.f32.mrb[59].mxu1  ;;  %8126 = vmatmul.mubr.msk.f32.gmra.mrb[164].mxu1 %vm288_vm1, %v6894_v2  ;;  %v7050_v2 = vld [vmem:[%s8526_s10 + $0x59] sm:$0xff] }
 0x170   : > { %2066 = vst.msk [vmem:[#allocation2 + $0xe0] sm:$0xff] %vm288_vm1, %v2018_v55  ;;  %v1376_v19 = vadd.f32 %v1328_v57, %v1225_v16  ;;  %v1973_v4 = vld [vmem:[#allocation2 + $0xf8] sm:$0xff]  ;;  %8128 = vmatprep.mubr.msk.f32.mxu1 %vm288_vm1, %v6895_v10  ;;  %v7890_v9 = vpop.f32.mrb[58].mxu0  ;;  %v7051_v10 = vld [vmem:[%s8526_s10 + $0x61] sm:$0xff]  ;;  %v1336_v57 = vld [vmem:[#allocation2 + $0x150] sm:$0xff] }
 0x171   : > { %1425 = vst.msk [vmem:[#allocation2 + $0x118] sm:$0xff] %vm288_vm1, %v1377_v56  ;;  %v2021_v12 = vadd.f32 %v7884_v45, %v1973_v4  ;;  %v1972_v14 = vld [vmem:[#allocation2 + $0xf0] sm:$0xff]  ;;  %v1873_v17 = vpop.f32.mrb[59].mxu0  ;;  %8200 = vmatmul.mubr.msk.f32.gmra.mrb[164].mxu0 %vm288_vm1, %v6992_v52  ;;  %v1337_v59 = vld [vmem:[#allocation2 + $0x158] sm:$0xff] }
 0x172   : > { %1424 = vst.msk [vmem:[#allocation2 + $0x110] sm:$0xff] %vm288_vm1, %v1376_v19  ;;  %v2020_v18 = vadd.f32 %v1972_v14, %v1853_v49  ;;  %v7819_v20 = vpop.f32.mrb[60].mxu1  ;;  %8202 = vmatprep.mubr.msk.f32.mxu0 %vm288_vm1, %v6993_v3  ;;  %v7148_v52 = vld [vmem:[%s8526_s10 + $0x5a] sm:$0xff]  ;;  %v7149_v3 = vld [vmem:[%s8526_s10 + $0x62] sm:$0xff] }
 0x173   : > { %2069 = vst.msk [vmem:[#allocation2 + $0xf8] sm:$0xff] %vm288_vm1, %v2021_v12  ;;  %v1379_v24 = vadd.f32 %v7819_v20, %v1331_v21  ;;  %v1235_v25 = vpop.f32.mrb[61].mxu1  ;;  %8129 = vmatmul.mubr.msk.f32.gmra.mrb[166].mxu1 %vm288_vm1, %v6896_v5  ;;  %v7052_v5 = vld [vmem:[%s8526_s10 + $0x69] sm:$0xff] }
 0x174   : > { %2068 = vst.msk [vmem:[#allocation2 + $0xf0] sm:$0xff] %vm288_vm1, %v2020_v18  ;;  %v1378_v28 = vadd.f32 %v1330_v26, %v1235_v25  ;;  %v1975_v11 = vld [vmem:[#allocation2 + $0x108] sm:$0xff]  ;;  %8207 = vmatprep.mubr.msk.f32.mxu1 %vm288_vm1, %v7045_v15  ;;  %v7893_v30 = vpop.f32.mrb[60].mxu0  ;;  %v7053_v15 = vld [vmem:[%s8526_s10 + $0x71] sm:$0xff]  ;;  %v1338_v26 = vld [vmem:[#allocation2 + $0x160] sm:$0xff] }
 0x175   : > { %1427 = vst.msk [vmem:[#allocation2 + $0x128] sm:$0xff] %vm288_vm1, %v1379_v24  ;;  %v2023_v31 = vadd.f32 %v7887_v6, %v1975_v11  ;;  %v1974_v32 = vld [vmem:[#allocation2 + $0x100] sm:$0xff]  ;;  %v1883_v33 = vpop.f32.mrb[61].mxu0  ;;  %8203 = vmatmul.mubr.msk.f32.gmra.mrb[166].mxu0 %vm288_vm1, %v6994_v22  ;;  %v1339_v21 = vld [vmem:[#allocation2 + $0x168] sm:$0xff] }
 0x176   : > { %1426 = vst.msk [vmem:[#allocation2 + $0x120] sm:$0xff] %vm288_vm1, %v1378_v28  ;;  %v2022_v34 = vadd.f32 %v1974_v32, %v1863_v54  ;;  %v7822_v35 = vpop.f32.mrb[62].mxu1  ;;  %8281 = vmatprep.mubr.msk.f32.mxu0 %vm288_vm1, %v7143_v27  ;;  %v7150_v22 = vld [vmem:[%s8526_s10 + $0x6a] sm:$0xff]  ;;  %v7151_v27 = vld [vmem:[%s8526_s10 + $0x72] sm:$0xff] }
 0x177   : > { %2071 = vst.msk [vmem:[#allocation2 + $0x108] sm:$0xff] %vm288_vm1, %v2023_v31  ;;  %v1381_v38 = vadd.f32 %v7822_v35, %v1333_v36  ;;  %v1245_v39 = vpop.f32.mrb[63].mxu1  ;;  %8208 = vmatmul.mubr.msk.f32.vlgmr.msra.gmra.mrb[168].mxu1 %vm288_vm1, %v7046_v29  ;;  %v7054_v29 = vld [vmem:[%s8526_s10 + $0x79] sm:$0xff] }
 0x178   : > { %2070 = vst.msk [vmem:[#allocation2 + $0x100] sm:$0xff] %vm288_vm1, %v2022_v34  ;;  %v1380_v42 = vadd.f32 %v1332_v40, %v1245_v39  ;;  %v1977_v43 = vld [vmem:[#allocation2 + $0x118] sm:$0xff]  ;;  %8210 = vmatprep.mubr.msk.f32.mxu1 %vm288_vm1, %v7047_v13  ;;  %v7896_v45 = vpop.f32.mrb[62].mxu0  ;;  %v7055_v13 = vld [vmem:[%s8526_s10 + $0x81] sm:$0xff]  ;;  %v1340_v40 = vld [vmem:[#allocation2 + $0x170] sm:$0xff] }
 0x179   : > { %1429 = vst.msk [vmem:[#allocation2 + $0x138] sm:$0xff] %vm288_vm1, %v1381_v38  ;;  %v2025_v46 = vadd.f32 %v7890_v9, %v1977_v43  ;;  %v1976_v47 = vld [vmem:[#allocation2 + $0x110] sm:$0xff]  ;;  %v1893_v49 = vpop.f32.mrb[63].mxu0  ;;  %8282 = vmatmul.mubr.msk.f32.vlgmr.msra.gmra.mrb[168].mxu0 %vm288_vm1, %v7144_v37  ;;  %v1341_v36 = vld [vmem:[#allocation2 + $0x178] sm:$0xff] }
 0x17a   : > { %1428 = vst.msk [vmem:[#allocation2 + $0x130] sm:$0xff] %vm288_vm1, %v1380_v42  ;;  %v2024_v50 = vadd.f32 %v1976_v47, %v1873_v17  ;;  %v7825_v51 = vpop.f32.mrb[64].mxu1  ;;  %8284 = vmatprep.mubr.msk.f32.mxu0 %vm288_vm1, %v7145_v41  ;;  %v7152_v37 = vld [vmem:[%s8526_s10 + $0x7a] sm:$0xff]  ;;  %v7153_v41 = vld [vmem:[%s8526_s10 + $0x82] sm:$0xff] }
 0x17b   : > { %2073 = vst.msk [vmem:[#allocation2 + $0x118] sm:$0xff] %vm288_vm1, %v2025_v46  ;;  %v1383_v60 = vadd.f32 %v7825_v51, %v1335_v53  ;;  %v1255_v61 = vpop.f32.mrb[65].mxu1  ;;  %8211 = vmatmul.mubr.msk.f32.gmra.mrb[170].mxu1 %vm288_vm1, %v7048_v44  ;;  %v7056_v44 = vld [vmem:[%s8526_s10 + $0x89] sm:$0xff] }
 0x17c   : > { %2072 = vst.msk [vmem:[#allocation2 + $0x110] sm:$0xff] %vm288_vm1, %v2024_v50  ;;  %v1382_v0 = vadd.f32 %v1334_v62, %v1255_v61  ;;  %v1979_v1 = vld [vmem:[#allocation2 + $0x128] sm:$0xff]  ;;  %8213 = vmatprep.mubr.msk.f32.mxu1 %vm288_vm1, %v7049_v48  ;;  %v7899_v6 = vpop.f32.mrb[64].mxu0  ;;  %v7057_v48 = vld [vmem:[%s8526_s10 + $0x91] sm:$0xff]  ;;  %v2590_v62 = vld [vmem:[#allocation2] sm:$0xff] }
 0x17d   : > { %1431 = vst.msk [vmem:[#allocation2 + $0x148] sm:$0xff] %vm288_vm1, %v1383_v60  ;;  %v2027_v7 = vadd.f32 %v7893_v30, %v1979_v1  ;;  %v1978_v8 = vld [vmem:[#allocation2 + $0x120] sm:$0xff]  ;;  %v1903_v54 = vpop.f32.mrb[65].mxu0  ;;  %8285 = vmatmul.mubr.msk.f32.gmra.mrb[170].mxu0 %vm288_vm1, %v7146_v58  ;;  %v2591_v53 = vld [vmem:[#allocation2 + $0x8] sm:$0xff] }
 0x17e   : > { %1430 = vst.msk [vmem:[#allocation2 + $0x140] sm:$0xff] %vm288_vm1, %v1382_v0  ;;  %v2026_v55 = vadd.f32 %v1978_v8, %v1883_v33  ;;  %v7828_v23 = vpop.f32.mrb[66].mxu1  ;;  %8287 = vmatprep.mubr.msk.f32.mxu0 %vm288_vm1, %v7147_v63  ;;  %v7154_v58 = vld [vmem:[%s8526_s10 + $0x8a] sm:$0xff]  ;;  %v7155_v63 = vld [vmem:[%s8526_s10 + $0x92] sm:$0xff] }
 0x17f   : > { %2075 = vst.msk [vmem:[#allocation2 + $0x128] sm:$0xff] %vm288_vm1, %v2027_v7  ;;  %v1385_v56 = vadd.f32 %v7828_v23, %v1337_v59  ;;  %v1265_v16 = vpop.f32.mrb[67].mxu1  ;;  %8214 = vmatmul.mubr.msk.f32.gmra.mrb[172].mxu1 %vm288_vm1, %v7050_v2  ;;  %v7058_v2 = vld [vmem:[%s8526_s10 + $0x99] sm:$0xff] }
 0x180   : > { %2074 = vst.msk [vmem:[#allocation2 + $0x120] sm:$0xff] %vm288_vm1, %v2026_v55  ;;  %v1384_v19 = vadd.f32 %v1336_v57, %v1265_v16  ;;  %v1981_v4 = vld [vmem:[#allocation2 + $0x138] sm:$0xff]  ;;  %8216 = vmatprep.mubr.msk.f32.mxu1 %vm288_vm1, %v7051_v10  ;;  %v7902_v9 = vpop.f32.mrb[66].mxu0  ;;  %v7059_v10 = vld [vmem:[%s8526_s10 + $0xa1] sm:$0xff]  ;;  %v2592_v57 = vld [vmem:[#allocation2 + $0x10] sm:$0xff] }
 0x181   : > { %1433 = vst.msk [vmem:[#allocation2 + $0x158] sm:$0xff] %vm288_vm1, %v1385_v56  ;;  %v2029_v12 = vadd.f32 %v7896_v45, %v1981_v4  ;;  %v1980_v14 = vld [vmem:[#allocation2 + $0x130] sm:$0xff]  ;;  %v1913_v17 = vpop.f32.mrb[67].mxu0  ;;  %8288 = vmatmul.mubr.msk.f32.gmra.mrb[172].mxu0 %vm288_vm1, %v7148_v52  ;;  %v2593_v59 = vld [vmem:[#allocation2 + $0x18] sm:$0xff] }
 0x182   : > { %1432 = vst.msk [vmem:[#allocation2 + $0x150] sm:$0xff] %vm288_vm1, %v1384_v19  ;;  %v2028_v18 = vadd.f32 %v1980_v14, %v1893_v49  ;;  %v7831_v20 = vpop.f32.mrb[68].mxu1  ;;  %8290 = vmatprep.mubr.msk.f32.mxu0 %vm288_vm1, %v7149_v3  ;;  %v7156_v52 = vld [vmem:[%s8526_s10 + $0x9a] sm:$0xff]  ;;  %v7157_v3 = vld [vmem:[%s8526_s10 + $0xa2] sm:$0xff] }
 0x183   : > { %2077 = vst.msk [vmem:[#allocation2 + $0x138] sm:$0xff] %vm288_vm1, %v2029_v12  ;;  %v1387_v24 = vadd.f32 %v7831_v20, %v1339_v21  ;;  %v1275_v25 = vpop.f32.mrb[69].mxu1  ;;  %8217 = vmatmul.mubr.msk.f32.gmra.mrb[174].mxu1 %vm288_vm1, %v7052_v5  ;;  %v7060_v5 = vld [vmem:[%s8526_s10 + $0xa9] sm:$0xff] }
 0x184   : > { %2076 = vst.msk [vmem:[#allocation2 + $0x130] sm:$0xff] %vm288_vm1, %v2028_v18  ;;  %v1386_v28 = vadd.f32 %v1338_v26, %v1275_v25  ;;  %v1983_v11 = vld [vmem:[#allocation2 + $0x148] sm:$0xff]  ;;  %8219 = vmatprep.mubr.msk.f32.mxu1 %vm288_vm1, %v7053_v15  ;;  %v7905_v30 = vpop.f32.mrb[68].mxu0  ;;  %v7061_v15 = vld [vmem:[%s8526_s10 + $0xb1] sm:$0xff]  ;;  %v2594_v26 = vld [vmem:[#allocation2 + $0x20] sm:$0xff] }
 0x185   : > { %1435 = vst.msk [vmem:[#allocation2 + $0x168] sm:$0xff] %vm288_vm1, %v1387_v24  ;;  %v2031_v31 = vadd.f32 %v7899_v6, %v1983_v11  ;;  %v1982_v32 = vld [vmem:[#allocation2 + $0x140] sm:$0xff]  ;;  %v1923_v33 = vpop.f32.mrb[69].mxu0  ;;  %8291 = vmatmul.mubr.msk.f32.gmra.mrb[174].mxu0 %vm288_vm1, %v7150_v22  ;;  %v2595_v21 = vld [vmem:[#allocation2 + $0x28] sm:$0xff] }
 0x186   : > { %1434 = vst.msk [vmem:[#allocation2 + $0x160] sm:$0xff] %vm288_vm1, %v1386_v28  ;;  %v2030_v34 = vadd.f32 %v1982_v32, %v1903_v54  ;;  %v7834_v35 = vpop.f32.mrb[70].mxu1  ;;  %8293 = vmatprep.mubr.msk.f32.mxu0 %vm288_vm1, %v7151_v27  ;;  %v7158_v22 = vld [vmem:[%s8526_s10 + $0xaa] sm:$0xff]  ;;  %v7159_v27 = vld [vmem:[%s8526_s10 + $0xb2] sm:$0xff] }
 0x187   : > { %2079 = vst.msk [vmem:[#allocation2 + $0x148] sm:$0xff] %vm288_vm1, %v2031_v31  ;;  %v1389_v38 = vadd.f32 %v7834_v35, %v1341_v36  ;;  %v1285_v39 = vpop.f32.mrb[71].mxu1  ;;  %8220 = vmatmul.mubr.msk.f32.gmra.mrb[176].mxu1 %vm288_vm1, %v7054_v29  ;;  %v7062_v29 = vld [vmem:[%s8526_s10 + $0xb9] sm:$0xff] }
 0x188   : > { %2078 = vst.msk [vmem:[#allocation2 + $0x140] sm:$0xff] %vm288_vm1, %v2030_v34  ;;  %v1388_v42 = vadd.f32 %v1340_v40, %v1285_v39  ;;  %v1985_v43 = vld [vmem:[#allocation2 + $0x158] sm:$0xff]  ;;  %8222 = vmatprep.mubr.msk.f32.mxu1 %vm288_vm1, %v7055_v13  ;;  %v7908_v45 = vpop.f32.mrb[70].mxu0  ;;  %v7063_v13 = vld [vmem:[%s8526_s10 + $0xc1] sm:$0xff]  ;;  %v2596_v40 = vld [vmem:[#allocation2 + $0x30] sm:$0xff] }
 0x189   : > { %1437 = vst.msk [vmem:[#allocation2 + $0x178] sm:$0xff] %vm288_vm1, %v1389_v38  ;;  %v2033_v46 = vadd.f32 %v7902_v9, %v1985_v43  ;;  %v1984_v47 = vld [vmem:[#allocation2 + $0x150] sm:$0xff]  ;;  %v1933_v49 = vpop.f32.mrb[71].mxu0  ;;  %8294 = vmatmul.mubr.msk.f32.gmra.mrb[176].mxu0 %vm288_vm1, %v7152_v37  ;;  %v2597_v36 = vld [vmem:[#allocation2 + $0x38] sm:$0xff] }
 0x18a   : > { %1436 = vst.msk [vmem:[#allocation2 + $0x170] sm:$0xff] %vm288_vm1, %v1388_v42  ;;  %v2032_v50 = vadd.f32 %v1984_v47, %v1913_v17  ;;  %v7913_v51 = vpop.f32.mrb[72].mxu1  ;;  %8296 = vmatprep.mubr.msk.f32.mxu0 %vm288_vm1, %v7153_v41  ;;  %v7160_v37 = vld [vmem:[%s8526_s10 + $0xba] sm:$0xff]  ;;  %v7161_v41 = vld [vmem:[%s8526_s10 + $0xc2] sm:$0xff] }
 0x18b   : > { %2081 = vst.msk [vmem:[#allocation2 + $0x158] sm:$0xff] %vm288_vm1, %v2033_v46  ;;  %v2639_v60 = vadd.f32 %v7913_v51, %v2591_v53  ;;  %v2351_v61 = vpop.f32.mrb[73].mxu1  ;;  %8223 = vmatmul.mubr.msk.f32.gmra.mrb[178].mxu1 %vm288_vm1, %v7056_v44  ;;  %v7064_v44 = vld [vmem:[%s8526_s10 + $0xc9] sm:$0xff] }
 0x18c   : > { %2080 = vst.msk [vmem:[#allocation2 + $0x150] sm:$0xff] %vm288_vm1, %v2032_v50  ;;  %v1987_v0 = vld [vmem:[#allocation2 + $0x168] sm:$0xff]  ;;  %v2638_v1 = vadd.f32 %v2590_v62, %v2351_v61  ;;  %8225 = vmatprep.mubr.msk.f32.mxu1 %vm288_vm1, %v7057_v48  ;;  %v7987_v6 = vpop.f32.mrb[72].mxu0  ;;  %v7065_v48 = vld [vmem:[%s8526_s10 + $0xd1] sm:$0xff]  ;;  %v2598_v62 = vld [vmem:[#allocation2 + $0x40] sm:$0xff] }
 0x18d   : > { %2687 = vst.msk [vmem:[#allocation2 + $0x8] sm:$0xff] %vm288_vm1, %v2639_v60  ;;  %v2035_v7 = vadd.f32 %v7905_v30, %v1987_v0  ;;  %v1986_v8 = vld [vmem:[#allocation2 + $0x160] sm:$0xff]  ;;  %v2999_v54 = vpop.f32.mrb[73].mxu0  ;;  %8297 = vmatmul.mubr.msk.f32.gmra.mrb[178].mxu0 %vm288_vm1, %v7154_v58  ;;  %v2599_v53 = vld [vmem:[#allocation2 + $0x48] sm:$0xff] }
 0x18e   : > { %2686 = vst.msk [vmem:[#allocation2] sm:$0xff] %vm288_vm1, %v2638_v1  ;;  %v2034_v55 = vadd.f32 %v1986_v8, %v1923_v33  ;;  %v7916_v23 = vpop.f32.mrb[74].mxu1  ;;  %8299 = vmatprep.mubr.msk.f32.mxu0 %vm288_vm1, %v7155_v63  ;;  %v7162_v58 = vld [vmem:[%s8526_s10 + $0xca] sm:$0xff]  ;;  %v7163_v63 = vld [vmem:[%s8526_s10 + $0xd2] sm:$0xff] }
 0x18f   : > { %2083 = vst.msk [vmem:[#allocation2 + $0x168] sm:$0xff] %vm288_vm1, %v2035_v7  ;;  %v2641_v56 = vadd.f32 %v7916_v23, %v2593_v59  ;;  %v2361_v16 = vpop.f32.mrb[75].mxu1  ;;  %8226 = vmatmul.mubr.msk.f32.gmra.mrb[180].mxu1 %vm288_vm1, %v7058_v2  ;;  %v7066_v2 = vld [vmem:[%s8526_s10 + $0xd9] sm:$0xff] }
 0x190   : > { %2082 = vst.msk [vmem:[#allocation2 + $0x160] sm:$0xff] %vm288_vm1, %v2034_v55  ;;  %v1989_v19 = vld [vmem:[#allocation2 + $0x178] sm:$0xff]  ;;  %v2640_v4 = vadd.f32 %v2592_v57, %v2361_v16  ;;  %8228 = vmatprep.mubr.msk.f32.mxu1 %vm288_vm1, %v7059_v10  ;;  %v7990_v9 = vpop.f32.mrb[74].mxu0  ;;  %v7067_v10 = vld [vmem:[%s8526_s10 + $0xe1] sm:$0xff]  ;;  %v2600_v57 = vld [vmem:[#allocation2 + $0x50] sm:$0xff] }
 0x191   : > { %2689 = vst.msk [vmem:[#allocation2 + $0x18] sm:$0xff] %vm288_vm1, %v2641_v56  ;;  %v2037_v12 = vadd.f32 %v7908_v45, %v1989_v19  ;;  %v1988_v14 = vld [vmem:[#allocation2 + $0x170] sm:$0xff]  ;;  %v3009_v17 = vpop.f32.mrb[75].mxu0  ;;  %8300 = vmatmul.mubr.msk.f32.gmra.mrb[180].mxu0 %vm288_vm1, %v7156_v52  ;;  %v2601_v59 = vld [vmem:[#allocation2 + $0x58] sm:$0xff] }
 0x192   : > { %2688 = vst.msk [vmem:[#allocation2 + $0x10] sm:$0xff] %vm288_vm1, %v2640_v4  ;;  %v2036_v18 = vadd.f32 %v1988_v14, %v1933_v49  ;;  %v7919_v20 = vpop.f32.mrb[76].mxu1  ;;  %8302 = vmatprep.mubr.msk.f32.mxu0 %vm288_vm1, %v7157_v3  ;;  %v7164_v52 = vld [vmem:[%s8526_s10 + $0xda] sm:$0xff]  ;;  %v7165_v3 = vld [vmem:[%s8526_s10 + $0xe2] sm:$0xff] }
 0x193   : > { %2085 = vst.msk [vmem:[#allocation2 + $0x178] sm:$0xff] %vm288_vm1, %v2037_v12  ;;  %v2643_v24 = vadd.f32 %v7919_v20, %v2595_v21  ;;  %v2371_v25 = vpop.f32.mrb[77].mxu1  ;;  %8229 = vmatmul.mubr.msk.f32.gmra.mrb[182].mxu1 %vm288_vm1, %v7060_v5  ;;  %v7068_v5 = vld [vmem:[%s8526_s10 + $0xe9] sm:$0xff] }
 0x194   : > { %2084 = vst.msk [vmem:[#allocation2 + $0x170] sm:$0xff] %vm288_vm1, %v2036_v18  ;;  %v2642_v28 = vadd.f32 %v2594_v26, %v2371_v25  ;;  %v3239_v11 = vld [vmem:[#allocation2 + $0x8] sm:$0xff]  ;;  %8231 = vmatprep.mubr.msk.f32.mxu1 %vm288_vm1, %v7061_v15  ;;  %v7993_v30 = vpop.f32.mrb[76].mxu0  ;;  %v7069_v15 = vld [vmem:[%s8526_s10 + $0xf1] sm:$0xff]  ;;  %v2602_v26 = vld [vmem:[#allocation2 + $0x60] sm:$0xff] }
 0x195   : > { %2691 = vst.msk [vmem:[#allocation2 + $0x28] sm:$0xff] %vm288_vm1, %v2643_v24  ;;  %v3287_v31 = vadd.f32 %v7987_v6, %v3239_v11  ;;  %v3238_v32 = vld [vmem:[#allocation2] sm:$0xff]  ;;  %v3019_v33 = vpop.f32.mrb[77].mxu0  ;;  %8303 = vmatmul.mubr.msk.f32.gmra.mrb[182].mxu0 %vm288_vm1, %v7158_v22  ;;  %v2603_v21 = vld [vmem:[#allocation2 + $0x68] sm:$0xff] }
 0x196   : > { %2690 = vst.msk [vmem:[#allocation2 + $0x20] sm:$0xff] %vm288_vm1, %v2642_v28  ;;  %v3286_v34 = vadd.f32 %v3238_v32, %v2999_v54  ;;  %v7922_v35 = vpop.f32.mrb[78].mxu1  ;;  %8305 = vmatprep.mubr.msk.f32.mxu0 %vm288_vm1, %v7159_v27  ;;  %v7166_v22 = vld [vmem:[%s8526_s10 + $0xea] sm:$0xff]  ;;  %v7167_v27 = vld [vmem:[%s8526_s10 + $0xf2] sm:$0xff] }
 0x197   : > { %3335 = vst.msk [vmem:[#allocation2 + $0x8] sm:$0xff] %vm288_vm1, %v3287_v31  ;;  %v2645_v38 = vadd.f32 %v7922_v35, %v2597_v36  ;;  %v2381_v39 = vpop.f32.mrb[79].mxu1  ;;  %8232 = vmatmul.mubr.msk.f32.gmra.mrb[184].mxu1 %vm288_vm1, %v7062_v29  ;;  %v7070_v29 = vld [vmem:[%s8526_s10 + $0xf9] sm:$0xff] }
 0x198   : > { %3334 = vst.msk [vmem:[#allocation2] sm:$0xff] %vm288_vm1, %v3286_v34  ;;  %v2644_v42 = vadd.f32 %v2596_v40, %v2381_v39  ;;  %v3241_v43 = vld [vmem:[#allocation2 + $0x18] sm:$0xff]  ;;  %8234 = vmatprep.mubr.msk.f32.mxu1 %vm288_vm1, %v7063_v13  ;;  %v7996_v45 = vpop.f32.mrb[78].mxu0  ;;  %v7071_v13 = vld [vmem:[%s8526_s10 + $0x101] sm:$0xff]  ;;  %v2604_v40 = vld [vmem:[#allocation2 + $0x70] sm:$0xff] }
 0x199   : > { %2693 = vst.msk [vmem:[#allocation2 + $0x38] sm:$0xff] %vm288_vm1, %v2645_v38  ;;  %v3289_v46 = vadd.f32 %v7990_v9, %v3241_v43  ;;  %v3240_v47 = vld [vmem:[#allocation2 + $0x10] sm:$0xff]  ;;  %v3029_v49 = vpop.f32.mrb[79].mxu0  ;;  %8306 = vmatmul.mubr.msk.f32.gmra.mrb[184].mxu0 %vm288_vm1, %v7160_v37  ;;  %v2605_v36 = vld [vmem:[#allocation2 + $0x78] sm:$0xff] }
 0x19a   : > { %2692 = vst.msk [vmem:[#allocation2 + $0x30] sm:$0xff] %vm288_vm1, %v2644_v42  ;;  %v3288_v50 = vadd.f32 %v3240_v47, %v3009_v17  ;;  %v7925_v51 = vpop.f32.mrb[80].mxu1  ;;  %8308 = vmatprep.mubr.msk.f32.mxu0 %vm288_vm1, %v7161_v41  ;;  %v7168_v37 = vld [vmem:[%s8526_s10 + $0xfa] sm:$0xff]  ;;  %v7169_v41 = vld [vmem:[%s8526_s10 + $0x102] sm:$0xff] }
 0x19b   : > { %3337 = vst.msk [vmem:[#allocation2 + $0x18] sm:$0xff] %vm288_vm1, %v3289_v46  ;;  %v2647_v60 = vadd.f32 %v7925_v51, %v2599_v53  ;;  %v2391_v61 = vpop.f32.mrb[81].mxu1  ;;  %8235 = vmatmul.mubr.msk.f32.gmra.mrb[186].mxu1 %vm288_vm1, %v7064_v44  ;;  %v7072_v44 = vld [vmem:[%s8526_s10 + $0x109] sm:$0xff] }
 0x19c   : > { %3336 = vst.msk [vmem:[#allocation2 + $0x10] sm:$0xff] %vm288_vm1, %v3288_v50  ;;  %v2646_v0 = vadd.f32 %v2598_v62, %v2391_v61  ;;  %v3243_v1 = vld [vmem:[#allocation2 + $0x28] sm:$0xff]  ;;  %8237 = vmatprep.mubr.msk.f32.mxu1 %vm288_vm1, %v7065_v48  ;;  %v7999_v6 = vpop.f32.mrb[80].mxu0  ;;  %v7073_v48 = vld [vmem:[%s8526_s10 + $0x111] sm:$0xff]  ;;  %v2606_v62 = vld [vmem:[#allocation2 + $0x80] sm:$0xff] }
 0x19d   : > { %2695 = vst.msk [vmem:[#allocation2 + $0x48] sm:$0xff] %vm288_vm1, %v2647_v60  ;;  %v3291_v7 = vadd.f32 %v7993_v30, %v3243_v1  ;;  %v3242_v8 = vld [vmem:[#allocation2 + $0x20] sm:$0xff]  ;;  %v3039_v54 = vpop.f32.mrb[81].mxu0  ;;  %8309 = vmatmul.mubr.msk.f32.gmra.mrb[186].mxu0 %vm288_vm1, %v7162_v58  ;;  %v2607_v53 = vld [vmem:[#allocation2 + $0x88] sm:$0xff] }
 0x19e   : > { %2694 = vst.msk [vmem:[#allocation2 + $0x40] sm:$0xff] %vm288_vm1, %v2646_v0  ;;  %v3290_v55 = vadd.f32 %v3242_v8, %v3019_v33  ;;  %v7928_v23 = vpop.f32.mrb[82].mxu1  ;;  %8311 = vmatprep.mubr.msk.f32.mxu0 %vm288_vm1, %v7163_v63  ;;  %v7170_v58 = vld [vmem:[%s8526_s10 + $0x10a] sm:$0xff]  ;;  %v7171_v63 = vld [vmem:[%s8526_s10 + $0x112] sm:$0xff] }
 0x19f   : > { %3339 = vst.msk [vmem:[#allocation2 + $0x28] sm:$0xff] %vm288_vm1, %v3291_v7  ;;  %v2649_v56 = vadd.f32 %v7928_v23, %v2601_v59  ;;  %v2401_v16 = vpop.f32.mrb[83].mxu1  ;;  %8238 = vmatmul.mubr.msk.f32.gmra.mrb[188].mxu1 %vm288_vm1, %v7066_v2  ;;  %v7074_v2 = vld [vmem:[%s8526_s10 + $0x119] sm:$0xff] }
 0x1a0   : > { %3338 = vst.msk [vmem:[#allocation2 + $0x20] sm:$0xff] %vm288_vm1, %v3290_v55  ;;  %v2648_v19 = vadd.f32 %v2600_v57, %v2401_v16  ;;  %v3245_v4 = vld [vmem:[#allocation2 + $0x38] sm:$0xff]  ;;  %8240 = vmatprep.mubr.msk.f32.mxu1 %vm288_vm1, %v7067_v10  ;;  %v8002_v9 = vpop.f32.mrb[82].mxu0  ;;  %v7075_v10 = vld [vmem:[%s8526_s10 + $0x121] sm:$0xff]  ;;  %v2608_v57 = vld [vmem:[#allocation2 + $0x90] sm:$0xff] }
 0x1a1   : > { %2697 = vst.msk [vmem:[#allocation2 + $0x58] sm:$0xff] %vm288_vm1, %v2649_v56  ;;  %v3293_v12 = vadd.f32 %v7996_v45, %v3245_v4  ;;  %v3244_v14 = vld [vmem:[#allocation2 + $0x30] sm:$0xff]  ;;  %v3049_v17 = vpop.f32.mrb[83].mxu0  ;;  %8312 = vmatmul.mubr.msk.f32.gmra.mrb[188].mxu0 %vm288_vm1, %v7164_v52  ;;  %v2609_v59 = vld [vmem:[#allocation2 + $0x98] sm:$0xff] }
 0x1a2   : > { %2696 = vst.msk [vmem:[#allocation2 + $0x50] sm:$0xff] %vm288_vm1, %v2648_v19  ;;  %v3292_v18 = vadd.f32 %v3244_v14, %v3029_v49  ;;  %v7931_v20 = vpop.f32.mrb[84].mxu1  ;;  %8314 = vmatprep.mubr.msk.f32.mxu0 %vm288_vm1, %v7165_v3  ;;  %v7172_v52 = vld [vmem:[%s8526_s10 + $0x11a] sm:$0xff]  ;;  %v7173_v3 = vld [vmem:[%s8526_s10 + $0x122] sm:$0xff] }
 0x1a3   : > { %3341 = vst.msk [vmem:[#allocation2 + $0x38] sm:$0xff] %vm288_vm1, %v3293_v12  ;;  %v2651_v24 = vadd.f32 %v7931_v20, %v2603_v21  ;;  %v2411_v25 = vpop.f32.mrb[85].mxu1  ;;  %8241 = vmatmul.mubr.msk.f32.gmra.mrb[190].mxu1 %vm288_vm1, %v7068_v5  ;;  %v7076_v5 = vld [vmem:[%s8526_s10 + $0x129] sm:$0xff] }
 0x1a4   : > { %3340 = vst.msk [vmem:[#allocation2 + $0x30] sm:$0xff] %vm288_vm1, %v3292_v18  ;;  %v2650_v28 = vadd.f32 %v2602_v26, %v2411_v25  ;;  %v3247_v11 = vld [vmem:[#allocation2 + $0x48] sm:$0xff]  ;;  %8243 = vmatprep.mubr.msk.f32.mxu1 %vm288_vm1, %v7069_v15  ;;  %v8005_v30 = vpop.f32.mrb[84].mxu0  ;;  %v7077_v15 = vld [vmem:[%s8526_s10 + $0x131] sm:$0xff]  ;;  %v2610_v26 = vld [vmem:[#allocation2 + $0xa0] sm:$0xff] }
 0x1a5   : > { %2699 = vst.msk [vmem:[#allocation2 + $0x68] sm:$0xff] %vm288_vm1, %v2651_v24  ;;  %v3295_v31 = vadd.f32 %v7999_v6, %v3247_v11  ;;  %v3246_v32 = vld [vmem:[#allocation2 + $0x40] sm:$0xff]  ;;  %v3059_v33 = vpop.f32.mrb[85].mxu0  ;;  %8315 = vmatmul.mubr.msk.f32.gmra.mrb[190].mxu0 %vm288_vm1, %v7166_v22  ;;  %v2611_v21 = vld [vmem:[#allocation2 + $0xa8] sm:$0xff] }
 0x1a6   : > { %2698 = vst.msk [vmem:[#allocation2 + $0x60] sm:$0xff] %vm288_vm1, %v2650_v28  ;;  %v3294_v34 = vadd.f32 %v3246_v32, %v3039_v54  ;;  %v7934_v35 = vpop.f32.mrb[86].mxu1  ;;  %8317 = vmatprep.mubr.msk.f32.mxu0 %vm288_vm1, %v7167_v27  ;;  %v7174_v22 = vld [vmem:[%s8526_s10 + $0x12a] sm:$0xff]  ;;  %v7175_v27 = vld [vmem:[%s8526_s10 + $0x132] sm:$0xff] }
 0x1a7   : > { %3343 = vst.msk [vmem:[#allocation2 + $0x48] sm:$0xff] %vm288_vm1, %v3295_v31  ;;  %v2653_v38 = vadd.f32 %v7934_v35, %v2605_v36  ;;  %v2421_v39 = vpop.f32.mrb[87].mxu1  ;;  %8244 = vmatmul.mubr.msk.f32.gmra.mrb[192].mxu1 %vm288_vm1, %v7070_v29  ;;  %v7078_v29 = vld [vmem:[%s8526_s10 + $0x139] sm:$0xff] }
 0x1a8   : > { %3342 = vst.msk [vmem:[#allocation2 + $0x40] sm:$0xff] %vm288_vm1, %v3294_v34  ;;  %v2652_v42 = vadd.f32 %v2604_v40, %v2421_v39  ;;  %v3249_v43 = vld [vmem:[#allocation2 + $0x58] sm:$0xff]  ;;  %8246 = vmatprep.mubr.msk.f32.mxu1 %vm288_vm1, %v7071_v13  ;;  %v8008_v45 = vpop.f32.mrb[86].mxu0  ;;  %v7079_v13 = vld [vmem:[%s8526_s10 + $0x141] sm:$0xff]  ;;  %v2612_v40 = vld [vmem:[#allocation2 + $0xb0] sm:$0xff] }
 0x1a9   : > { %2701 = vst.msk [vmem:[#allocation2 + $0x78] sm:$0xff] %vm288_vm1, %v2653_v38  ;;  %v3297_v46 = vadd.f32 %v8002_v9, %v3249_v43  ;;  %v3248_v47 = vld [vmem:[#allocation2 + $0x50] sm:$0xff]  ;;  %v3069_v49 = vpop.f32.mrb[87].mxu0  ;;  %8318 = vmatmul.mubr.msk.f32.gmra.mrb[192].mxu0 %vm288_vm1, %v7168_v37  ;;  %v2613_v36 = vld [vmem:[#allocation2 + $0xb8] sm:$0xff] }
 0x1aa   : > { %2700 = vst.msk [vmem:[#allocation2 + $0x70] sm:$0xff] %vm288_vm1, %v2652_v42  ;;  %v3296_v50 = vadd.f32 %v3248_v47, %v3049_v17  ;;  %v7937_v51 = vpop.f32.mrb[88].mxu1  ;;  %8320 = vmatprep.mubr.msk.f32.mxu0 %vm288_vm1, %v7169_v41  ;;  %v7176_v37 = vld [vmem:[%s8526_s10 + $0x13a] sm:$0xff]  ;;  %v7177_v41 = vld [vmem:[%s8526_s10 + $0x142] sm:$0xff] }
 0x1ab   : > { %3345 = vst.msk [vmem:[#allocation2 + $0x58] sm:$0xff] %vm288_vm1, %v3297_v46  ;;  %v2655_v60 = vadd.f32 %v7937_v51, %v2607_v53  ;;  %v2431_v61 = vpop.f32.mrb[89].mxu1  ;;  %8247 = vmatmul.mubr.msk.f32.gmra.mrb[194].mxu1 %vm288_vm1, %v7072_v44  ;;  %v7080_v44 = vld [vmem:[%s8526_s10 + $0x149] sm:$0xff] }
 0x1ac   : > { %3344 = vst.msk [vmem:[#allocation2 + $0x50] sm:$0xff] %vm288_vm1, %v3296_v50  ;;  %v2654_v0 = vadd.f32 %v2606_v62, %v2431_v61  ;;  %v3251_v1 = vld [vmem:[#allocation2 + $0x68] sm:$0xff]  ;;  %8249 = vmatprep.mubr.msk.f32.mxu1 %vm288_vm1, %v7073_v48  ;;  %v8011_v6 = vpop.f32.mrb[88].mxu0  ;;  %v7081_v48 = vld [vmem:[%s8526_s10 + $0x151] sm:$0xff]  ;;  %v2614_v62 = vld [vmem:[#allocation2 + $0xc0] sm:$0xff] }
 0x1ad   : > { %2703 = vst.msk [vmem:[#allocation2 + $0x88] sm:$0xff] %vm288_vm1, %v2655_v60  ;;  %v3299_v7 = vadd.f32 %v8005_v30, %v3251_v1  ;;  %v3250_v8 = vld [vmem:[#allocation2 + $0x60] sm:$0xff]  ;;  %v3079_v54 = vpop.f32.mrb[89].mxu0  ;;  %8321 = vmatmul.mubr.msk.f32.gmra.mrb[194].mxu0 %vm288_vm1, %v7170_v58  ;;  %v2615_v53 = vld [vmem:[#allocation2 + $0xc8] sm:$0xff] }
 0x1ae   : > { %2702 = vst.msk [vmem:[#allocation2 + $0x80] sm:$0xff] %vm288_vm1, %v2654_v0  ;;  %v3298_v55 = vadd.f32 %v3250_v8, %v3059_v33  ;;  %v7940_v23 = vpop.f32.mrb[90].mxu1  ;;  %8323 = vmatprep.mubr.msk.f32.mxu0 %vm288_vm1, %v7171_v63  ;;  %v7178_v58 = vld [vmem:[%s8526_s10 + $0x14a] sm:$0xff]  ;;  %v7179_v63 = vld [vmem:[%s8526_s10 + $0x152] sm:$0xff] }
 0x1af   : > { %3347 = vst.msk [vmem:[#allocation2 + $0x68] sm:$0xff] %vm288_vm1, %v3299_v7  ;;  %v2657_v56 = vadd.f32 %v7940_v23, %v2609_v59  ;;  %v2441_v16 = vpop.f32.mrb[91].mxu1  ;;  %8250 = vmatmul.mubr.msk.f32.gmra.mrb[196].mxu1 %vm288_vm1, %v7074_v2  ;;  %v7082_v2 = vld [vmem:[%s8526_s10 + $0x159] sm:$0xff] }
 0x1b0   : > { %3346 = vst.msk [vmem:[#allocation2 + $0x60] sm:$0xff] %vm288_vm1, %v3298_v55  ;;  %v2656_v19 = vadd.f32 %v2608_v57, %v2441_v16  ;;  %v3253_v4 = vld [vmem:[#allocation2 + $0x78] sm:$0xff]  ;;  %8252 = vmatprep.mubr.msk.f32.mxu1 %vm288_vm1, %v7075_v10  ;;  %v8014_v9 = vpop.f32.mrb[90].mxu0  ;;  %v7083_v10 = vld [vmem:[%s8526_s10 + $0x161] sm:$0xff]  ;;  %v2616_v57 = vld [vmem:[#allocation2 + $0xd0] sm:$0xff] }
 0x1b1   : > { %2705 = vst.msk [vmem:[#allocation2 + $0x98] sm:$0xff] %vm288_vm1, %v2657_v56  ;;  %v3301_v12 = vadd.f32 %v8008_v45, %v3253_v4  ;;  %v3252_v14 = vld [vmem:[#allocation2 + $0x70] sm:$0xff]  ;;  %v3089_v17 = vpop.f32.mrb[91].mxu0  ;;  %8324 = vmatmul.mubr.msk.f32.gmra.mrb[196].mxu0 %vm288_vm1, %v7172_v52  ;;  %v2617_v59 = vld [vmem:[#allocation2 + $0xd8] sm:$0xff] }
 0x1b2   : > { %2704 = vst.msk [vmem:[#allocation2 + $0x90] sm:$0xff] %vm288_vm1, %v2656_v19  ;;  %v3300_v18 = vadd.f32 %v3252_v14, %v3069_v49  ;;  %v7943_v20 = vpop.f32.mrb[92].mxu1  ;;  %8326 = vmatprep.mubr.msk.f32.mxu0 %vm288_vm1, %v7173_v3  ;;  %v7180_v52 = vld [vmem:[%s8526_s10 + $0x15a] sm:$0xff]  ;;  %v7181_v3 = vld [vmem:[%s8526_s10 + $0x162] sm:$0xff] }
 0x1b3   : > { %3349 = vst.msk [vmem:[#allocation2 + $0x78] sm:$0xff] %vm288_vm1, %v3301_v12  ;;  %v2659_v24 = vadd.f32 %v7943_v20, %v2611_v21  ;;  %v2451_v25 = vpop.f32.mrb[93].mxu1  ;;  %8253 = vmatmul.mubr.msk.f32.gmra.mrb[198].mxu1 %vm288_vm1, %v7076_v5  ;;  %v7084_v5 = vld [vmem:[%s8526_s10 + $0x169] sm:$0xff] }
 0x1b4   : > { %3348 = vst.msk [vmem:[#allocation2 + $0x70] sm:$0xff] %vm288_vm1, %v3300_v18  ;;  %v2658_v28 = vadd.f32 %v2610_v26, %v2451_v25  ;;  %v3255_v11 = vld [vmem:[#allocation2 + $0x88] sm:$0xff]  ;;  %8255 = vmatprep.mubr.msk.f32.mxu1 %vm288_vm1, %v7077_v15  ;;  %v8017_v30 = vpop.f32.mrb[92].mxu0  ;;  %v7085_v15 = vld [vmem:[%s8526_s10 + $0x171] sm:$0xff]  ;;  %v2618_v26 = vld [vmem:[#allocation2 + $0xe0] sm:$0xff] }
 0x1b5   : > { %2707 = vst.msk [vmem:[#allocation2 + $0xa8] sm:$0xff] %vm288_vm1, %v2659_v24  ;;  %v3303_v31 = vadd.f32 %v8011_v6, %v3255_v11  ;;  %v3254_v32 = vld [vmem:[#allocation2 + $0x80] sm:$0xff]  ;;  %v3099_v33 = vpop.f32.mrb[93].mxu0  ;;  %8327 = vmatmul.mubr.msk.f32.gmra.mrb[198].mxu0 %vm288_vm1, %v7174_v22  ;;  %v2619_v21 = vld [vmem:[#allocation2 + $0xe8] sm:$0xff] }
 0x1b6   : > { %2706 = vst.msk [vmem:[#allocation2 + $0xa0] sm:$0xff] %vm288_vm1, %v2658_v28  ;;  %v3302_v34 = vadd.f32 %v3254_v32, %v3079_v54  ;;  %v7946_v35 = vpop.f32.mrb[94].mxu1  ;;  %8329 = vmatprep.mubr.msk.f32.mxu0 %vm288_vm1, %v7175_v27  ;;  %v7182_v22 = vld [vmem:[%s8526_s10 + $0x16a] sm:$0xff]  ;;  %v7183_v27 = vld [vmem:[%s8526_s10 + $0x172] sm:$0xff] }
 0x1b7   : > { %3351 = vst.msk [vmem:[#allocation2 + $0x88] sm:$0xff] %vm288_vm1, %v3303_v31  ;;  %v2661_v38 = vadd.f32 %v7946_v35, %v2613_v36  ;;  %v2461_v39 = vpop.f32.mrb[95].mxu1  ;;  %8256 = vmatmul.mubr.msk.f32.gmra.mrb[200].mxu1 %vm288_vm1, %v7078_v29  ;;  %v7086_v29 = vld [vmem:[%s8526_s10 + $0x179] sm:$0xff] }
 0x1b8   : > { %3350 = vst.msk [vmem:[#allocation2 + $0x80] sm:$0xff] %vm288_vm1, %v3302_v34  ;;  %v2660_v42 = vadd.f32 %v2612_v40, %v2461_v39  ;;  %v3257_v43 = vld [vmem:[#allocation2 + $0x98] sm:$0xff]  ;;  %8258 = vmatprep.mubr.msk.f32.mxu1 %vm288_vm1, %v7079_v13  ;;  %v8020_v45 = vpop.f32.mrb[94].mxu0  ;;  %v7087_v13 = vld [vmem:[%s8526_s10 + $0x181] sm:$0xff]  ;;  %v2620_v40 = vld [vmem:[#allocation2 + $0xf0] sm:$0xff] }
 0x1b9   : > { %2709 = vst.msk [vmem:[#allocation2 + $0xb8] sm:$0xff] %vm288_vm1, %v2661_v38  ;;  %v3305_v46 = vadd.f32 %v8014_v9, %v3257_v43  ;;  %v3256_v47 = vld [vmem:[#allocation2 + $0x90] sm:$0xff]  ;;  %v3109_v49 = vpop.f32.mrb[95].mxu0  ;;  %8330 = vmatmul.mubr.msk.f32.gmra.mrb[200].mxu0 %vm288_vm1, %v7176_v37  ;;  %v2621_v36 = vld [vmem:[#allocation2 + $0xf8] sm:$0xff] }
 0x1ba   : > { %2708 = vst.msk [vmem:[#allocation2 + $0xb0] sm:$0xff] %vm288_vm1, %v2660_v42  ;;  %v3304_v50 = vadd.f32 %v3256_v47, %v3089_v17  ;;  %v7949_v51 = vpop.f32.mrb[96].mxu1  ;;  %8332 = vmatprep.mubr.msk.f32.mxu0 %vm288_vm1, %v7177_v41  ;;  %v7184_v37 = vld [vmem:[%s8526_s10 + $0x17a] sm:$0xff]  ;;  %v7185_v41 = vld [vmem:[%s8526_s10 + $0x182] sm:$0xff] }
 0x1bb   : > { %3353 = vst.msk [vmem:[#allocation2 + $0x98] sm:$0xff] %vm288_vm1, %v3305_v46  ;;  %v2663_v60 = vadd.f32 %v7949_v51, %v2615_v53  ;;  %v2471_v61 = vpop.f32.mrb[97].mxu1  ;;  %8259 = vmatmul.mubr.msk.f32.gmra.mrb[202].mxu1 %vm288_vm1, %v7080_v44  ;;  %v7088_v44 = vld [vmem:[%s8526_s10 + $0x189] sm:$0xff] }
 0x1bc   : > { %3352 = vst.msk [vmem:[#allocation2 + $0x90] sm:$0xff] %vm288_vm1, %v3304_v50  ;;  %v2662_v0 = vadd.f32 %v2614_v62, %v2471_v61  ;;  %v3259_v1 = vld [vmem:[#allocation2 + $0xa8] sm:$0xff]  ;;  %8261 = vmatprep.mubr.msk.f32.mxu1 %vm288_vm1, %v7081_v48  ;;  %v8023_v6 = vpop.f32.mrb[96].mxu0  ;;  %v7089_v48 = vld [vmem:[%s8526_s10 + $0x191] sm:$0xff]  ;;  %v2622_v62 = vld [vmem:[#allocation2 + $0x100] sm:$0xff] }
 0x1bd   : > { %2711 = vst.msk [vmem:[#allocation2 + $0xc8] sm:$0xff] %vm288_vm1, %v2663_v60  ;;  %v3307_v7 = vadd.f32 %v8017_v30, %v3259_v1  ;;  %v3258_v8 = vld [vmem:[#allocation2 + $0xa0] sm:$0xff]  ;;  %v3119_v54 = vpop.f32.mrb[97].mxu0  ;;  %8333 = vmatmul.mubr.msk.f32.gmra.mrb[202].mxu0 %vm288_vm1, %v7178_v58  ;;  %v2623_v53 = vld [vmem:[#allocation2 + $0x108] sm:$0xff] }
 0x1be   : > { %2710 = vst.msk [vmem:[#allocation2 + $0xc0] sm:$0xff] %vm288_vm1, %v2662_v0  ;;  %v3306_v55 = vadd.f32 %v3258_v8, %v3099_v33  ;;  %v7952_v23 = vpop.f32.mrb[98].mxu1  ;;  %8335 = vmatprep.mubr.msk.f32.mxu0 %vm288_vm1, %v7179_v63  ;;  %v7186_v58 = vld [vmem:[%s8526_s10 + $0x18a] sm:$0xff]  ;;  %v7187_v63 = vld [vmem:[%s8526_s10 + $0x192] sm:$0xff] }
 0x1bf   : > { %3355 = vst.msk [vmem:[#allocation2 + $0xa8] sm:$0xff] %vm288_vm1, %v3307_v7  ;;  %v2665_v56 = vadd.f32 %v7952_v23, %v2617_v59  ;;  %v2481_v16 = vpop.f32.mrb[99].mxu1  ;;  %8262 = vmatmul.mubr.msk.f32.gmra.mrb[204].mxu1 %vm288_vm1, %v7082_v2  ;;  %v7090_v2 = vld [vmem:[%s8526_s10 + $0x199] sm:$0xff] }
 0x1c0   : > { %3354 = vst.msk [vmem:[#allocation2 + $0xa0] sm:$0xff] %vm288_vm1, %v3306_v55  ;;  %v2664_v19 = vadd.f32 %v2616_v57, %v2481_v16  ;;  %v3261_v4 = vld [vmem:[#allocation2 + $0xb8] sm:$0xff]  ;;  %8264 = vmatprep.mubr.msk.f32.mxu1 %vm288_vm1, %v7083_v10  ;;  %v8026_v9 = vpop.f32.mrb[98].mxu0  ;;  %v7091_v10 = vld [vmem:[%s8526_s10 + $0x1a1] sm:$0xff]  ;;  %v2624_v57 = vld [vmem:[#allocation2 + $0x110] sm:$0xff] }
 0x1c1   : > { %2713 = vst.msk [vmem:[#allocation2 + $0xd8] sm:$0xff] %vm288_vm1, %v2665_v56  ;;  %v3309_v12 = vadd.f32 %v8020_v45, %v3261_v4  ;;  %v3260_v14 = vld [vmem:[#allocation2 + $0xb0] sm:$0xff]  ;;  %v3129_v17 = vpop.f32.mrb[99].mxu0  ;;  %8336 = vmatmul.mubr.msk.f32.gmra.mrb[204].mxu0 %vm288_vm1, %v7180_v52  ;;  %v2625_v59 = vld [vmem:[#allocation2 + $0x118] sm:$0xff] }
 0x1c2   : > { %2712 = vst.msk [vmem:[#allocation2 + $0xd0] sm:$0xff] %vm288_vm1, %v2664_v19  ;;  %v3308_v18 = vadd.f32 %v3260_v14, %v3109_v49  ;;  %v7955_v20 = vpop.f32.mrb[100].mxu1  ;;  %8338 = vmatprep.mubr.msk.f32.mxu0 %vm288_vm1, %v7181_v3  ;;  %v7188_v52 = vld [vmem:[%s8526_s10 + $0x19a] sm:$0xff]  ;;  %v7189_v3 = vld [vmem:[%s8526_s10 + $0x1a2] sm:$0xff] }
 0x1c3   : > { %3357 = vst.msk [vmem:[#allocation2 + $0xb8] sm:$0xff] %vm288_vm1, %v3309_v12  ;;  %v2667_v24 = vadd.f32 %v7955_v20, %v2619_v21  ;;  %v2491_v25 = vpop.f32.mrb[101].mxu1  ;;  %8265 = vmatmul.mubr.msk.f32.gmra.mrb[206].mxu1 %vm288_vm1, %v7084_v5  ;;  %v7092_v5 = vld [vmem:[%s8526_s10 + $0x1a9] sm:$0xff] }
 0x1c4   : > { %3356 = vst.msk [vmem:[#allocation2 + $0xb0] sm:$0xff] %vm288_vm1, %v3308_v18  ;;  %v2666_v28 = vadd.f32 %v2618_v26, %v2491_v25  ;;  %v3263_v11 = vld [vmem:[#allocation2 + $0xc8] sm:$0xff]  ;;  %8267 = vmatprep.mubr.msk.f32.mxu1 %vm288_vm1, %v7085_v15  ;;  %v8029_v30 = vpop.f32.mrb[100].mxu0  ;;  %v2626_v25 = vld [vmem:[#allocation2 + $0x120] sm:$0xff] }
 0x1c5   : > { %2715 = vst.msk [vmem:[#allocation2 + $0xe8] sm:$0xff] %vm288_vm1, %v2667_v24  ;;  %v3311_v31 = vadd.f32 %v8023_v6, %v3263_v11  ;;  %v3262_v32 = vld [vmem:[#allocation2 + $0xc0] sm:$0xff]  ;;  %v3139_v33 = vpop.f32.mrb[101].mxu0  ;;  %8339 = vmatmul.mubr.msk.f32.gmra.mrb[206].mxu0 %vm288_vm1, %v7182_v22  ;;  %v2627_v20 = vld [vmem:[#allocation2 + $0x128] sm:$0xff] }
 0x1c6   : > { %2714 = vst.msk [vmem:[#allocation2 + $0xe0] sm:$0xff] %vm288_vm1, %v2666_v28  ;;  %v3310_v34 = vadd.f32 %v3262_v32, %v3119_v54  ;;  %v7958_v35 = vpop.f32.mrb[102].mxu1  ;;  %8341 = vmatprep.mubr.msk.f32.mxu0 %vm288_vm1, %v7183_v27  ;;  %v7190_v21 = vld [vmem:[%s8526_s10 + $0x1aa] sm:$0xff] }
 0x1c7   : > { %3359 = vst.msk [vmem:[#allocation2 + $0xc8] sm:$0xff] %vm288_vm1, %v3311_v31  ;;  %v2669_v38 = vadd.f32 %v7958_v35, %v2621_v36  ;;  %v2501_v39 = vpop.f32.mrb[103].mxu1  ;;  %8268 = vmatmul.mubr.msk.f32.gmra.mrb[208].mxu1 %vm288_vm1, %v7086_v29  ;;  %v2628_v35 = vld [vmem:[#allocation2 + $0x130] sm:$0xff] }
 0x1c8   : > { %3358 = vst.msk [vmem:[#allocation2 + $0xc0] sm:$0xff] %vm288_vm1, %v3310_v34  ;;  %v2668_v42 = vadd.f32 %v2620_v40, %v2501_v39  ;;  %v3265_v43 = vld [vmem:[#allocation2 + $0xd8] sm:$0xff]  ;;  %8270 = vmatprep.mubr.msk.f32.mxu1 %vm288_vm1, %v7087_v13  ;;  %v8032_v45 = vpop.f32.mrb[102].mxu0 }
 0x1c9   : > { %2717 = vst.msk [vmem:[#allocation2 + $0xf8] sm:$0xff] %vm288_vm1, %v2669_v38  ;;  %v3313_v46 = vadd.f32 %v8026_v9, %v3265_v43  ;;  %v3264_v47 = vld [vmem:[#allocation2 + $0xd0] sm:$0xff]  ;;  %v3149_v49 = vpop.f32.mrb[103].mxu0  ;;  %8342 = vmatmul.mubr.msk.f32.gmra.mrb[208].mxu0 %vm288_vm1, %v7184_v37  ;;  %v2629_v13 = vld [vmem:[#allocation2 + $0x138] sm:$0xff] }
 0x1ca   : > { %2716 = vst.msk [vmem:[#allocation2 + $0xf0] sm:$0xff] %vm288_vm1, %v2668_v42  ;;  %v3312_v50 = vadd.f32 %v3264_v47, %v3129_v17  ;;  %v7961_v51 = vpop.f32.mrb[104].mxu1  ;;  %8344 = vmatprep.mubr.msk.f32.mxu0 %vm288_vm1, %v7185_v41  ;;  %v2630_v47 = vld [vmem:[#allocation2 + $0x140] sm:$0xff] }
 0x1cb   : > { %3361 = vst.msk [vmem:[#allocation2 + $0xd8] sm:$0xff] %vm288_vm1, %v3313_v46  ;;  %v2671_v60 = vadd.f32 %v7961_v51, %v2623_v53  ;;  %v2511_v61 = vpop.f32.mrb[105].mxu1  ;;  %8271 = vmatmul.mubr.msk.f32.gmra.mrb[210].mxu1 %vm288_vm1, %v7088_v44  ;;  %v2631_v44 = vld [vmem:[#allocation2 + $0x148] sm:$0xff] }
 0x1cc   : > { %3360 = vst.msk [vmem:[#allocation2 + $0xd0] sm:$0xff] %vm288_vm1, %v3312_v50  ;;  %v2670_v0 = vadd.f32 %v2622_v62, %v2511_v61  ;;  %v3267_v1 = vld [vmem:[#allocation2 + $0xe8] sm:$0xff]  ;;  %8273 = vmatprep.mubr.msk.f32.mxu1 %vm288_vm1, %v7089_v48  ;;  %v8035_v6 = vpop.f32.mrb[104].mxu0  ;;  %v2633_v62 = vld [vmem:[#allocation2 + $0x158] sm:$0xff] }
 0x1cd   : > { %2719 = vst.msk [vmem:[#allocation2 + $0x108] sm:$0xff] %vm288_vm1, %v2671_v60  ;;  %v3315_v7 = vadd.f32 %v8029_v30, %v3267_v1  ;;  %v3266_v8 = vld [vmem:[#allocation2 + $0xe0] sm:$0xff]  ;;  %v3159_v54 = vpop.f32.mrb[105].mxu0  ;;  %8345 = vmatmul.mubr.msk.f32.gmra.mrb[210].mxu0 %vm288_vm1, %v7186_v58  ;;  %v2632_v1 = vld [vmem:[#allocation2 + $0x150] sm:$0xff] }
 0x1ce   : > { %2718 = vst.msk [vmem:[#allocation2 + $0x100] sm:$0xff] %vm288_vm1, %v2670_v0  ;;  %v3314_v55 = vadd.f32 %v3266_v8, %v3139_v33  ;;  %v7964_v23 = vpop.f32.mrb[106].mxu1  ;;  %8347 = vmatprep.mubr.msk.f32.mxu0 %vm288_vm1, %v7187_v63 }
 0x1cf   : > { %3363 = vst.msk [vmem:[#allocation2 + $0xe8] sm:$0xff] %vm288_vm1, %v3315_v7  ;;  %v2673_v56 = vadd.f32 %v7964_v23, %v2625_v59  ;;  %v2521_v16 = vpop.f32.mrb[107].mxu1  ;;  %8274 = vmatmul.mubr.msk.f32.gmra.mrb[212].mxu1 %vm288_vm1, %v7090_v2  ;;  %v2635_v59 = vld [vmem:[#allocation2 + $0x168] sm:$0xff] }
 0x1d0   : > { %3362 = vst.msk [vmem:[#allocation2 + $0xe0] sm:$0xff] %vm288_vm1, %v3314_v55  ;;  %v2672_v19 = vadd.f32 %v2624_v57, %v2521_v16  ;;  %v3269_v4 = vld [vmem:[#allocation2 + $0xf8] sm:$0xff]  ;;  %8276 = vmatprep.mubr.msk.f32.mxu1 %vm288_vm1, %v7091_v10  ;;  %v8038_v9 = vpop.f32.mrb[106].mxu0  ;;  %v2634_v16 = vld [vmem:[#allocation2 + $0x160] sm:$0xff] }
 0x1d1   : > { %2721 = vst.msk [vmem:[#allocation2 + $0x118] sm:$0xff] %vm288_vm1, %v2673_v56  ;;  %v3317_v12 = vadd.f32 %v8032_v45, %v3269_v4  ;;  %v3268_v14 = vld [vmem:[#allocation2 + $0xf0] sm:$0xff]  ;;  %v3169_v15 = vpop.f32.mrb[107].mxu0  ;;  %8348 = vmatmul.mubr.msk.f32.gmra.mrb[212].mxu0 %vm288_vm1, %v7188_v52 }
 0x1d2   : > { %2720 = vst.msk [vmem:[#allocation2 + $0x110] sm:$0xff] %vm288_vm1, %v2672_v19  ;;  %v3316_v17 = vadd.f32 %v3268_v14, %v3149_v49  ;;  %v7967_v18 = vpop.f32.mrb[108].mxu1  ;;  %8350 = vmatprep.mubr.msk.f32.mxu0 %vm288_vm1, %v7189_v3 }
 0x1d3   : > { %3365 = vst.msk [vmem:[#allocation2 + $0xf8] sm:$0xff] %vm288_vm1, %v3317_v12  ;;  %v2675_v22 = vadd.f32 %v7967_v18, %v2627_v20  ;;  %v2531_v24 = vpop.f32.mrb[109].mxu1  ;;  %8277 = vmatmul.mubr.msk.f32.gmra.mrb[214].mxu1 %vm288_vm1, %v7092_v5  ;;  %v2636_v20 = vld [vmem:[#allocation2 + $0x170] sm:$0xff] }
 0x1d4   : > { %3364 = vst.msk [vmem:[#allocation2 + $0xf0] sm:$0xff] %vm288_vm1, %v3316_v17  ;;  %v2674_v26 = vadd.f32 %v2626_v25, %v2531_v24  ;;  %v3271_v27 = vld [vmem:[#allocation2 + $0x108] sm:$0xff]  ;;  %v8041_v28 = vpop.f32.mrb[108].mxu0 }
 0x1d5   : > { %2723 = vst.msk [vmem:[#allocation2 + $0x128] sm:$0xff] %vm288_vm1, %v2675_v22  ;;  %v3319_v11 = vadd.f32 %v8035_v6, %v3271_v27  ;;  %v3270_v29 = vld [vmem:[#allocation2 + $0x100] sm:$0xff]  ;;  %v3179_v30 = vpop.f32.mrb[109].mxu0  ;;  %8351 = vmatmul.mubr.msk.f32.gmra.mrb[214].mxu0 %vm288_vm1, %v7190_v21 }
 0x1d6   : > { %2722 = vst.msk [vmem:[#allocation2 + $0x120] sm:$0xff] %vm288_vm1, %v2674_v26  ;;  %v3318_v31 = vadd.f32 %v3270_v29, %v3159_v54  ;;  %v7970_v32 = vpop.f32.mrb[110].mxu1  ;;  %v3887_v29 = vld [vmem:[#allocation2 + $0x8] sm:$0xff] }
 0x1d7   : > { %3367 = vst.msk [vmem:[#allocation2 + $0x108] sm:$0xff] %vm288_vm1, %v3319_v11  ;;  %v2677_v33 = vadd.f32 %v7970_v32, %v2629_v13  ;;  %v2541_v34 = vpop.f32.mrb[111].mxu1  ;;  %v3886_v32 = vld [vmem:[#allocation2] sm:$0xff] }
 0x1d8   : > { %3366 = vst.msk [vmem:[#allocation2 + $0x100] sm:$0xff] %vm288_vm1, %v3318_v31  ;;  %v2676_v36 = vadd.f32 %v2628_v35, %v2541_v34  ;;  %v3273_v37 = vld [vmem:[#allocation2 + $0x118] sm:$0xff]  ;;  %v8044_v38 = vpop.f32.mrb[110].mxu0 }
 0x1d9   : > { %2725 = vst.msk [vmem:[#allocation2 + $0x138] sm:$0xff] %vm288_vm1, %v2677_v33  ;;  %v3321_v39 = vadd.f32 %v8038_v9, %v3273_v37  ;;  %v3272_v40 = vld [vmem:[#allocation2 + $0x110] sm:$0xff]  ;;  %v3189_v41 = vpop.f32.mrb[111].mxu0 }
 0x1da   : > { %2724 = vst.msk [vmem:[#allocation2 + $0x130] sm:$0xff] %vm288_vm1, %v2676_v36  ;;  %v3320_v42 = vadd.f32 %v3272_v40, %v3169_v15  ;;  %v7973_v43 = vpop.f32.mrb[112].mxu1  ;;  %v2637_v15 = vld [vmem:[#allocation2 + $0x178] sm:$0xff] }
 0x1db   : > { %3369 = vst.msk [vmem:[#allocation2 + $0x118] sm:$0xff] %vm288_vm1, %v3321_v39  ;;  %v2679_v45 = vadd.f32 %v7973_v43, %v2631_v44  ;;  %v2551_v46 = vpop.f32.mrb[113].mxu1  ;;  %v3889_v40 = vld [vmem:[#allocation2 + $0x18] sm:$0xff]  ;;  %v3888_v43 = vld [vmem:[#allocation2 + $0x10] sm:$0xff] }
 0x1dc   : > { %3368 = vst.msk [vmem:[#allocation2 + $0x110] sm:$0xff] %vm288_vm1, %v3320_v42  ;;  %v2678_v48 = vadd.f32 %v2630_v47, %v2551_v46  ;;  %v3275_v49 = vld [vmem:[#allocation2 + $0x128] sm:$0xff]  ;;  %v8047_v50 = vpop.f32.mrb[112].mxu0 }
 0x1dd   : > { %2727 = vst.msk [vmem:[#allocation2 + $0x148] sm:$0xff] %vm288_vm1, %v2679_v45  ;;  %v3323_v51 = vadd.f32 %v8041_v28, %v3275_v49  ;;  %v3274_v53 = vld [vmem:[#allocation2 + $0x120] sm:$0xff]  ;;  %v3199_v58 = vpop.f32.mrb[113].mxu0 }
 0x1de   : > { %2726 = vst.msk [vmem:[#allocation2 + $0x140] sm:$0xff] %vm288_vm1, %v2678_v48  ;;  %v3322_v60 = vadd.f32 %v3274_v53, %v3179_v30  ;;  %v7976_v61 = vpop.f32.mrb[114].mxu1  ;;  %v3891_v53 = vld [vmem:[#allocation2 + $0x28] sm:$0xff] }
 0x1df   : > { %3371 = vst.msk [vmem:[#allocation2 + $0x128] sm:$0xff] %vm288_vm1, %v3323_v51  ;;  %v2681_v63 = vadd.f32 %v7976_v61, %v2633_v62  ;;  %v2561_v0 = vpop.f32.mrb[115].mxu1  ;;  %v3890_v61 = vld [vmem:[#allocation2 + $0x20] sm:$0xff] }
 0x1e0   : > { %3370 = vst.msk [vmem:[#allocation2 + $0x120] sm:$0xff] %vm288_vm1, %v3322_v60  ;;  %v2680_v2 = vadd.f32 %v2632_v1, %v2561_v0  ;;  %v3277_v6 = vld [vmem:[#allocation2 + $0x138] sm:$0xff]  ;;  %v8050_v7 = vpop.f32.mrb[114].mxu0 }
 0x1e1   : > { %2729 = vst.msk [vmem:[#allocation2 + $0x158] sm:$0xff] %vm288_vm1, %v2681_v63  ;;  %v3325_v8 = vadd.f32 %v8044_v38, %v3277_v6  ;;  %v3276_v10 = vld [vmem:[#allocation2 + $0x130] sm:$0xff]  ;;  %v3209_v54 = vpop.f32.mrb[115].mxu0 }
 0x1e2   : > { %2728 = vst.msk [vmem:[#allocation2 + $0x150] sm:$0xff] %vm288_vm1, %v2680_v2  ;;  %v3324_v55 = vadd.f32 %v3276_v10, %v3189_v41  ;;  %v7979_v23 = vpop.f32.mrb[116].mxu1  ;;  %v3893_v10 = vld [vmem:[#allocation2 + $0x38] sm:$0xff] }
 0x1e3   : > { %3373 = vst.msk [vmem:[#allocation2 + $0x138] sm:$0xff] %vm288_vm1, %v3325_v8  ;;  %v2683_v52 = vadd.f32 %v7979_v23, %v2635_v59  ;;  %v2571_v56 = vpop.f32.mrb[117].mxu1  ;;  %v3892_v23 = vld [vmem:[#allocation2 + $0x30] sm:$0xff] }
 0x1e4   : > { %3372 = vst.msk [vmem:[#allocation2 + $0x130] sm:$0xff] %vm288_vm1, %v3324_v55  ;;  %v2682_v57 = vadd.f32 %v2634_v16, %v2571_v56  ;;  %v3279_v3 = vld [vmem:[#allocation2 + $0x148] sm:$0xff]  ;;  %v8053_v19 = vpop.f32.mrb[116].mxu0 }
 0x1e5   : > { %2731 = vst.msk [vmem:[#allocation2 + $0x168] sm:$0xff] %vm288_vm1, %v2683_v52  ;;  %v3327_v4 = vadd.f32 %v8047_v50, %v3279_v3  ;;  %v3278_v5 = vld [vmem:[#allocation2 + $0x140] sm:$0xff]  ;;  %v3219_v9 = vpop.f32.mrb[117].mxu0 }
 0x1e6   : > { %2730 = vst.msk [vmem:[#allocation2 + $0x160] sm:$0xff] %vm288_vm1, %v2682_v57  ;;  %v3326_v12 = vadd.f32 %v3278_v5, %v3199_v58  ;;  %v7982_v14 = vpop.f32.mrb[118].mxu1  ;;  %v3895_v5 = vld [vmem:[#allocation2 + $0x48] sm:$0xff] }
 0x1e7   : > { %3375 = vst.msk [vmem:[#allocation2 + $0x148] sm:$0xff] %vm288_vm1, %v3327_v4  ;;  %v2685_v17 = vadd.f32 %v7982_v14, %v2637_v15  ;;  %v2581_v18 = vpop.f32.mrb[119].mxu1  ;;  %v3894_v14 = vld [vmem:[#allocation2 + $0x40] sm:$0xff] }
 0x1e8   : > { %3374 = vst.msk [vmem:[#allocation2 + $0x140] sm:$0xff] %vm288_vm1, %v3326_v12  ;;  %v2684_v21 = vadd.f32 %v2636_v20, %v2581_v18  ;;  %v3281_v22 = vld [vmem:[#allocation2 + $0x158] sm:$0xff]  ;;  %v8056_v24 = vpop.f32.mrb[118].mxu0 }
 0x1e9   : > { %2733 = vst.msk [vmem:[#allocation2 + $0x178] sm:$0xff] %vm288_vm1, %v2685_v17  ;;  %v3329_v25 = vadd.f32 %v8050_v7, %v3281_v22  ;;  %v3280_v26 = vld [vmem:[#allocation2 + $0x150] sm:$0xff]  ;;  %v3229_v27 = vpop.f32.mrb[119].mxu0 }
 0x1ea   : > { %2732 = vst.msk [vmem:[#allocation2 + $0x170] sm:$0xff] %vm288_vm1, %v2684_v21  ;;  %v3328_v28 = vadd.f32 %v3280_v26, %v3209_v54  ;;  %v8061_v11 = vpop.f32.mrb[120].mxu1  ;;  %v3897_v26 = vld [vmem:[#allocation2 + $0x58] sm:$0xff] }
 0x1eb   : > { %3377 = vst.msk [vmem:[#allocation2 + $0x158] sm:$0xff] %vm288_vm1, %v3329_v25  ;;  %v3935_v30 = vadd.f32 %v8061_v11, %v3887_v29  ;;  %v3647_v31 = vpop.f32.mrb[121].mxu1  ;;  %v3896_v11 = vld [vmem:[#allocation2 + $0x50] sm:$0xff] }
 0x1ec   : > { %3376 = vst.msk [vmem:[#allocation2 + $0x150] sm:$0xff] %vm288_vm1, %v3328_v28  ;;  %v3283_v13 = vld [vmem:[#allocation2 + $0x168] sm:$0xff]  ;;  %v3934_v33 = vadd.f32 %v3886_v32, %v3647_v31  ;;  %v8135_v34 = vpop.f32.mrb[120].mxu0 }
 0x1ed   : > { %3983 = vst.msk [vmem:[#allocation2 + $0x8] sm:$0xff] %vm288_vm1, %v3935_v30  ;;  %v3331_v35 = vadd.f32 %v8053_v19, %v3283_v13  ;;  %v3282_v36 = vld [vmem:[#allocation2 + $0x160] sm:$0xff]  ;;  %v4295_v37 = vpop.f32.mrb[121].mxu0 }
 0x1ee   : > { %3982 = vst.msk [vmem:[#allocation2] sm:$0xff] %vm288_vm1, %v3934_v33  ;;  %v3330_v38 = vadd.f32 %v3282_v36, %v3219_v9  ;;  %v8064_v39 = vpop.f32.mrb[122].mxu1  ;;  %v3899_v36 = vld [vmem:[#allocation2 + $0x68] sm:$0xff] }
 0x1ef   : > { %3379 = vst.msk [vmem:[#allocation2 + $0x168] sm:$0xff] %vm288_vm1, %v3331_v35  ;;  %v3937_v41 = vadd.f32 %v8064_v39, %v3889_v40  ;;  %v3657_v42 = vpop.f32.mrb[123].mxu1  ;;  %v3898_v39 = vld [vmem:[#allocation2 + $0x60] sm:$0xff] }
 0x1f0   : > { %3378 = vst.msk [vmem:[#allocation2 + $0x160] sm:$0xff] %vm288_vm1, %v3330_v38  ;;  %v3285_v44 = vld [vmem:[#allocation2 + $0x178] sm:$0xff]  ;;  %v3936_v45 = vadd.f32 %v3888_v43, %v3657_v42  ;;  %v8138_v46 = vpop.f32.mrb[122].mxu0 }
 0x1f1   : > { %3985 = vst.msk [vmem:[#allocation2 + $0x18] sm:$0xff] %vm288_vm1, %v3937_v41  ;;  %v3333_v47 = vadd.f32 %v8056_v24, %v3285_v44  ;;  %v3284_v48 = vld [vmem:[#allocation2 + $0x170] sm:$0xff]  ;;  %v4305_v49 = vpop.f32.mrb[123].mxu0 }
 0x1f2   : > { %3984 = vst.msk [vmem:[#allocation2 + $0x10] sm:$0xff] %vm288_vm1, %v3936_v45  ;;  %v3332_v50 = vadd.f32 %v3284_v48, %v3229_v27  ;;  %v8067_v51 = vpop.f32.mrb[124].mxu1  ;;  %v3901_v48 = vld [vmem:[#allocation2 + $0x78] sm:$0xff] }
 0x1f3   : > { %3381 = vst.msk [vmem:[#allocation2 + $0x178] sm:$0xff] %vm288_vm1, %v3333_v47  ;;  %v3939_v58 = vadd.f32 %v8067_v51, %v3891_v53  ;;  %v3667_v60 = vpop.f32.mrb[125].mxu1  ;;  %v3900_v51 = vld [vmem:[#allocation2 + $0x70] sm:$0xff] }
 0x1f4   : > { %3380 = vst.msk [vmem:[#allocation2 + $0x170] sm:$0xff] %vm288_vm1, %v3332_v50  ;;  %v3938_v62 = vadd.f32 %v3890_v61, %v3667_v60  ;;  %v4535_v63 = vld [vmem:[#allocation2 + $0x8] sm:$0xff]  ;;  %v8141_v0 = vpop.f32.mrb[124].mxu0 }
 0x1f5   : > { %3987 = vst.msk [vmem:[#allocation2 + $0x28] sm:$0xff] %vm288_vm1, %v3939_v58  ;;  %v4583_v1 = vadd.f32 %v8135_v34, %v4535_v63  ;;  %v4534_v2 = vld [vmem:[#allocation2] sm:$0xff]  ;;  %v4315_v6 = vpop.f32.mrb[125].mxu0 }
 0x1f6   : > { %3986 = vst.msk [vmem:[#allocation2 + $0x20] sm:$0xff] %vm288_vm1, %v3938_v62  ;;  %v4582_v7 = vadd.f32 %v4534_v2, %v4295_v37  ;;  %v8070_v8 = vpop.f32.mrb[126].mxu1  ;;  %v3903_v2 = vld [vmem:[#allocation2 + $0x88] sm:$0xff] }
 0x1f7   : > { %4631 = vst.msk [vmem:[#allocation2 + $0x8] sm:$0xff] %vm288_vm1, %v4583_v1  ;;  %v3941_v54 = vadd.f32 %v8070_v8, %v3893_v10  ;;  %v3677_v55 = vpop.f32.mrb[127].mxu1  ;;  %v3902_v8 = vld [vmem:[#allocation2 + $0x80] sm:$0xff] }
 0x1f8   : > { %4630 = vst.msk [vmem:[#allocation2] sm:$0xff] %vm288_vm1, %v4582_v7  ;;  %v3940_v59 = vadd.f32 %v3892_v23, %v3677_v55  ;;  %v4537_v52 = vld [vmem:[#allocation2 + $0x18] sm:$0xff]  ;;  %v8144_v56 = vpop.f32.mrb[126].mxu0 }
 0x1f9   : > { %3989 = vst.msk [vmem:[#allocation2 + $0x38] sm:$0xff] %vm288_vm1, %v3941_v54  ;;  %v4585_v16 = vadd.f32 %v8138_v46, %v4537_v52  ;;  %v4536_v57 = vld [vmem:[#allocation2 + $0x10] sm:$0xff]  ;;  %v4325_v3 = vpop.f32.mrb[127].mxu0 }
 0x1fa   : > { %3988 = vst.msk [vmem:[#allocation2 + $0x30] sm:$0xff] %vm288_vm1, %v3940_v59  ;;  %v4584_v19 = vadd.f32 %v4536_v57, %v4305_v49  ;;  %v8073_v4 = vpop.f32.mrb[128].mxu1  ;;  %v3905_v57 = vld [vmem:[#allocation2 + $0x98] sm:$0xff] }
 0x1fb   : > { %4633 = vst.msk [vmem:[#allocation2 + $0x18] sm:$0xff] %vm288_vm1, %v4585_v16  ;;  %v3943_v9 = vadd.f32 %v8073_v4, %v3895_v5  ;;  %v3687_v12 = vpop.f32.mrb[129].mxu1  ;;  %v3904_v4 = vld [vmem:[#allocation2 + $0x90] sm:$0xff] }
 0x1fc   : > { %4632 = vst.msk [vmem:[#allocation2 + $0x10] sm:$0xff] %vm288_vm1, %v4584_v19  ;;  %v3942_v15 = vadd.f32 %v3894_v14, %v3687_v12  ;;  %v4539_v17 = vld [vmem:[#allocation2 + $0x28] sm:$0xff]  ;;  %v8147_v18 = vpop.f32.mrb[128].mxu0 }
 0x1fd   : > { %3991 = vst.msk [vmem:[#allocation2 + $0x48] sm:$0xff] %vm288_vm1, %v3943_v9  ;;  %v4587_v20 = vadd.f32 %v8141_v0, %v4539_v17  ;;  %v4538_v21 = vld [vmem:[#allocation2 + $0x20] sm:$0xff]  ;;  %v4335_v22 = vpop.f32.mrb[129].mxu0 }
 0x1fe   : > { %3990 = vst.msk [vmem:[#allocation2 + $0x40] sm:$0xff] %vm288_vm1, %v3942_v15  ;;  %v4586_v24 = vadd.f32 %v4538_v21, %v4315_v6  ;;  %v8076_v25 = vpop.f32.mrb[130].mxu1  ;;  %v3907_v21 = vld [vmem:[#allocation2 + $0xa8] sm:$0xff] }
 0x1ff   : > { %4635 = vst.msk [vmem:[#allocation2 + $0x28] sm:$0xff] %vm288_vm1, %v4587_v20  ;;  %v3945_v27 = vadd.f32 %v8076_v25, %v3897_v26  ;;  %v3697_v28 = vpop.f32.mrb[131].mxu1  ;;  %v3906_v25 = vld [vmem:[#allocation2 + $0xa0] sm:$0xff] }
 0x200   : > { %4634 = vst.msk [vmem:[#allocation2 + $0x20] sm:$0xff] %vm288_vm1, %v4586_v24  ;;  %v3944_v29 = vadd.f32 %v3896_v11, %v3697_v28  ;;  %v4541_v30 = vld [vmem:[#allocation2 + $0x38] sm:$0xff]  ;;  %v8150_v31 = vpop.f32.mrb[130].mxu0 }
 0x201   : > { %3993 = vst.msk [vmem:[#allocation2 + $0x58] sm:$0xff] %vm288_vm1, %v3945_v27  ;;  %v4589_v32 = vadd.f32 %v8144_v56, %v4541_v30  ;;  %v4540_v13 = vld [vmem:[#allocation2 + $0x30] sm:$0xff]  ;;  %v4345_v33 = vpop.f32.mrb[131].mxu0 }
 0x202   : > { %3992 = vst.msk [vmem:[#allocation2 + $0x50] sm:$0xff] %vm288_vm1, %v3944_v29  ;;  %v4588_v34 = vadd.f32 %v4540_v13, %v4325_v3  ;;  %v8079_v35 = vpop.f32.mrb[132].mxu1  ;;  %v3909_v13 = vld [vmem:[#allocation2 + $0xb8] sm:$0xff] }
 0x203   : > { %4637 = vst.msk [vmem:[#allocation2 + $0x38] sm:$0xff] %vm288_vm1, %v4589_v32  ;;  %v3947_v37 = vadd.f32 %v8079_v35, %v3899_v36  ;;  %v3707_v38 = vpop.f32.mrb[133].mxu1  ;;  %v3908_v35 = vld [vmem:[#allocation2 + $0xb0] sm:$0xff] }
 0x204   : > { %4636 = vst.msk [vmem:[#allocation2 + $0x30] sm:$0xff] %vm288_vm1, %v4588_v34  ;;  %v3946_v40 = vadd.f32 %v3898_v39, %v3707_v38  ;;  %v4543_v41 = vld [vmem:[#allocation2 + $0x48] sm:$0xff]  ;;  %v8153_v42 = vpop.f32.mrb[132].mxu0 }
 0x205   : > { %3995 = vst.msk [vmem:[#allocation2 + $0x68] sm:$0xff] %vm288_vm1, %v3947_v37  ;;  %v4591_v43 = vadd.f32 %v8147_v18, %v4543_v41  ;;  %v4542_v44 = vld [vmem:[#allocation2 + $0x40] sm:$0xff]  ;;  %v4355_v45 = vpop.f32.mrb[133].mxu0 }
 0x206   : > { %3994 = vst.msk [vmem:[#allocation2 + $0x60] sm:$0xff] %vm288_vm1, %v3946_v40  ;;  %v4590_v46 = vadd.f32 %v4542_v44, %v4335_v22  ;;  %v8082_v47 = vpop.f32.mrb[134].mxu1  ;;  %v3911_v44 = vld [vmem:[#allocation2 + $0xc8] sm:$0xff] }
 0x207   : > { %4639 = vst.msk [vmem:[#allocation2 + $0x48] sm:$0xff] %vm288_vm1, %v4591_v43  ;;  %v3949_v49 = vadd.f32 %v8082_v47, %v3901_v48  ;;  %v3717_v50 = vpop.f32.mrb[135].mxu1  ;;  %v3910_v47 = vld [vmem:[#allocation2 + $0xc0] sm:$0xff] }
 0x208   : > { %4638 = vst.msk [vmem:[#allocation2 + $0x40] sm:$0xff] %vm288_vm1, %v4590_v46  ;;  %v3948_v53 = vadd.f32 %v3900_v51, %v3717_v50  ;;  %v4545_v58 = vld [vmem:[#allocation2 + $0x58] sm:$0xff]  ;;  %v8156_v60 = vpop.f32.mrb[134].mxu0 }
 0x209   : > { %3997 = vst.msk [vmem:[#allocation2 + $0x78] sm:$0xff] %vm288_vm1, %v3949_v49  ;;  %v4593_v61 = vadd.f32 %v8150_v31, %v4545_v58  ;;  %v4544_v62 = vld [vmem:[#allocation2 + $0x50] sm:$0xff]  ;;  %v4365_v63 = vpop.f32.mrb[135].mxu0 }
 0x20a   : > { %3996 = vst.msk [vmem:[#allocation2 + $0x70] sm:$0xff] %vm288_vm1, %v3948_v53  ;;  %v4592_v0 = vadd.f32 %v4544_v62, %v4345_v33  ;;  %v8085_v1 = vpop.f32.mrb[136].mxu1  ;;  %v3913_v62 = vld [vmem:[#allocation2 + $0xd8] sm:$0xff] }
 0x20b   : > { %4641 = vst.msk [vmem:[#allocation2 + $0x58] sm:$0xff] %vm288_vm1, %v4593_v61  ;;  %v3951_v6 = vadd.f32 %v8085_v1, %v3903_v2  ;;  %v3727_v7 = vpop.f32.mrb[137].mxu1  ;;  %v3912_v1 = vld [vmem:[#allocation2 + $0xd0] sm:$0xff] }
 0x20c   : > { %4640 = vst.msk [vmem:[#allocation2 + $0x50] sm:$0xff] %vm288_vm1, %v4592_v0  ;;  %v3950_v10 = vadd.f32 %v3902_v8, %v3727_v7  ;;  %v4547_v54 = vld [vmem:[#allocation2 + $0x68] sm:$0xff]  ;;  %v8159_v55 = vpop.f32.mrb[136].mxu0 }
 0x20d   : > { %3999 = vst.msk [vmem:[#allocation2 + $0x88] sm:$0xff] %vm288_vm1, %v3951_v6  ;;  %v4595_v23 = vadd.f32 %v8153_v42, %v4547_v54  ;;  %v4546_v59 = vld [vmem:[#allocation2 + $0x60] sm:$0xff]  ;;  %v4375_v52 = vpop.f32.mrb[137].mxu0 }
 0x20e   : > { %3998 = vst.msk [vmem:[#allocation2 + $0x80] sm:$0xff] %vm288_vm1, %v3950_v10  ;;  %v4594_v56 = vadd.f32 %v4546_v59, %v4355_v45  ;;  %v8088_v16 = vpop.f32.mrb[138].mxu1  ;;  %v3915_v59 = vld [vmem:[#allocation2 + $0xe8] sm:$0xff] }
 0x20f   : > { %4643 = vst.msk [vmem:[#allocation2 + $0x68] sm:$0xff] %vm288_vm1, %v4595_v23  ;;  %v3953_v3 = vadd.f32 %v8088_v16, %v3905_v57  ;;  %v3737_v19 = vpop.f32.mrb[139].mxu1  ;;  %v3914_v16 = vld [vmem:[#allocation2 + $0xe0] sm:$0xff] }
 0x210   : > { %4642 = vst.msk [vmem:[#allocation2 + $0x60] sm:$0xff] %vm288_vm1, %v4594_v56  ;;  %v3952_v5 = vadd.f32 %v3904_v4, %v3737_v19  ;;  %v4549_v9 = vld [vmem:[#allocation2 + $0x78] sm:$0xff]  ;;  %v8162_v12 = vpop.f32.mrb[138].mxu0 }
 0x211   : > { %4001 = vst.msk [vmem:[#allocation2 + $0x98] sm:$0xff] %vm288_vm1, %v3953_v3  ;;  %v4597_v14 = vadd.f32 %v8156_v60, %v4549_v9  ;;  %v4548_v15 = vld [vmem:[#allocation2 + $0x70] sm:$0xff]  ;;  %v4385_v17 = vpop.f32.mrb[139].mxu0 }
 0x212   : > { %4000 = vst.msk [vmem:[#allocation2 + $0x90] sm:$0xff] %vm288_vm1, %v3952_v5  ;;  %v4596_v18 = vadd.f32 %v4548_v15, %v4365_v63  ;;  %v8091_v20 = vpop.f32.mrb[140].mxu1  ;;  %v3917_v15 = vld [vmem:[#allocation2 + $0xf8] sm:$0xff] }
 0x213   : > { %4645 = vst.msk [vmem:[#allocation2 + $0x78] sm:$0xff] %vm288_vm1, %v4597_v14  ;;  %v3955_v22 = vadd.f32 %v8091_v20, %v3907_v21  ;;  %v3747_v24 = vpop.f32.mrb[141].mxu1  ;;  %v3916_v20 = vld [vmem:[#allocation2 + $0xf0] sm:$0xff] }
 0x214   : > { %4644 = vst.msk [vmem:[#allocation2 + $0x70] sm:$0xff] %vm288_vm1, %v4596_v18  ;;  %v3954_v26 = vadd.f32 %v3906_v25, %v3747_v24  ;;  %v4551_v27 = vld [vmem:[#allocation2 + $0x88] sm:$0xff]  ;;  %v8165_v28 = vpop.f32.mrb[140].mxu0 }
 0x215   : > { %4003 = vst.msk [vmem:[#allocation2 + $0xa8] sm:$0xff] %vm288_vm1, %v3955_v22  ;;  %v4599_v11 = vadd.f32 %v8159_v55, %v4551_v27  ;;  %v4550_v29 = vld [vmem:[#allocation2 + $0x80] sm:$0xff]  ;;  %v4395_v30 = vpop.f32.mrb[141].mxu0 }
 0x216   : > { %4002 = vst.msk [vmem:[#allocation2 + $0xa0] sm:$0xff] %vm288_vm1, %v3954_v26  ;;  %v4598_v31 = vadd.f32 %v4550_v29, %v4375_v52  ;;  %v8094_v32 = vpop.f32.mrb[142].mxu1  ;;  %v3919_v29 = vld [vmem:[#allocation2 + $0x108] sm:$0xff] }
 0x217   : > { %4647 = vst.msk [vmem:[#allocation2 + $0x88] sm:$0xff] %vm288_vm1, %v4599_v11  ;;  %v3957_v33 = vadd.f32 %v8094_v32, %v3909_v13  ;;  %v3757_v34 = vpop.f32.mrb[143].mxu1  ;;  %v3918_v32 = vld [vmem:[#allocation2 + $0x100] sm:$0xff] }
 0x218   : > { %4646 = vst.msk [vmem:[#allocation2 + $0x80] sm:$0xff] %vm288_vm1, %v4598_v31  ;;  %v3956_v36 = vadd.f32 %v3908_v35, %v3757_v34  ;;  %v4553_v37 = vld [vmem:[#allocation2 + $0x98] sm:$0xff]  ;;  %v8168_v38 = vpop.f32.mrb[142].mxu0 }
 0x219   : > { %4005 = vst.msk [vmem:[#allocation2 + $0xb8] sm:$0xff] %vm288_vm1, %v3957_v33  ;;  %v4601_v39 = vadd.f32 %v8162_v12, %v4553_v37  ;;  %v4552_v40 = vld [vmem:[#allocation2 + $0x90] sm:$0xff]  ;;  %v4405_v41 = vpop.f32.mrb[143].mxu0 }
 0x21a   : > { %4004 = vst.msk [vmem:[#allocation2 + $0xb0] sm:$0xff] %vm288_vm1, %v3956_v36  ;;  %v4600_v42 = vadd.f32 %v4552_v40, %v4385_v17  ;;  %v8097_v43 = vpop.f32.mrb[144].mxu1  ;;  %v3921_v40 = vld [vmem:[#allocation2 + $0x118] sm:$0xff] }
 0x21b   : > { %4649 = vst.msk [vmem:[#allocation2 + $0x98] sm:$0xff] %vm288_vm1, %v4601_v39  ;;  %v3959_v45 = vadd.f32 %v8097_v43, %v3911_v44  ;;  %v3767_v46 = vpop.f32.mrb[145].mxu1  ;;  %v3920_v43 = vld [vmem:[#allocation2 + $0x110] sm:$0xff] }
 0x21c   : > { %4648 = vst.msk [vmem:[#allocation2 + $0x90] sm:$0xff] %vm288_vm1, %v4600_v42  ;;  %v3958_v48 = vadd.f32 %v3910_v47, %v3767_v46  ;;  %v4555_v49 = vld [vmem:[#allocation2 + $0xa8] sm:$0xff]  ;;  %v8171_v50 = vpop.f32.mrb[144].mxu0 }
 0x21d   : > { %4007 = vst.msk [vmem:[#allocation2 + $0xc8] sm:$0xff] %vm288_vm1, %v3959_v45  ;;  %v4603_v51 = vadd.f32 %v8165_v28, %v4555_v49  ;;  %v4554_v53 = vld [vmem:[#allocation2 + $0xa0] sm:$0xff]  ;;  %v4415_v58 = vpop.f32.mrb[145].mxu0 }
 0x21e   : > { %4006 = vst.msk [vmem:[#allocation2 + $0xc0] sm:$0xff] %vm288_vm1, %v3958_v48  ;;  %v4602_v60 = vadd.f32 %v4554_v53, %v4395_v30  ;;  %v8100_v61 = vpop.f32.mrb[146].mxu1  ;;  %v3923_v53 = vld [vmem:[#allocation2 + $0x128] sm:$0xff] }
 0x21f   : > { %4651 = vst.msk [vmem:[#allocation2 + $0xa8] sm:$0xff] %vm288_vm1, %v4603_v51  ;;  %v3961_v63 = vadd.f32 %v8100_v61, %v3913_v62  ;;  %v3777_v0 = vpop.f32.mrb[147].mxu1  ;;  %v3922_v61 = vld [vmem:[#allocation2 + $0x120] sm:$0xff] }
 0x220   : > { %4650 = vst.msk [vmem:[#allocation2 + $0xa0] sm:$0xff] %vm288_vm1, %v4602_v60  ;;  %v3960_v2 = vadd.f32 %v3912_v1, %v3777_v0  ;;  %v4557_v6 = vld [vmem:[#allocation2 + $0xb8] sm:$0xff]  ;;  %v8174_v7 = vpop.f32.mrb[146].mxu0 }
 0x221   : > { %4009 = vst.msk [vmem:[#allocation2 + $0xd8] sm:$0xff] %vm288_vm1, %v3961_v63  ;;  %v4605_v8 = vadd.f32 %v8168_v38, %v4557_v6  ;;  %v4556_v10 = vld [vmem:[#allocation2 + $0xb0] sm:$0xff]  ;;  %v4425_v54 = vpop.f32.mrb[147].mxu0 }
 0x222   : > { %4008 = vst.msk [vmem:[#allocation2 + $0xd0] sm:$0xff] %vm288_vm1, %v3960_v2  ;;  %v4604_v55 = vadd.f32 %v4556_v10, %v4405_v41  ;;  %v8103_v23 = vpop.f32.mrb[148].mxu1  ;;  %v3925_v10 = vld [vmem:[#allocation2 + $0x138] sm:$0xff] }
 0x223   : > { %4653 = vst.msk [vmem:[#allocation2 + $0xb8] sm:$0xff] %vm288_vm1, %v4605_v8  ;;  %v3963_v52 = vadd.f32 %v8103_v23, %v3915_v59  ;;  %v3787_v56 = vpop.f32.mrb[149].mxu1  ;;  %v3924_v23 = vld [vmem:[#allocation2 + $0x130] sm:$0xff] }
 0x224   : > { %4652 = vst.msk [vmem:[#allocation2 + $0xb0] sm:$0xff] %vm288_vm1, %v4604_v55  ;;  %v3962_v57 = vadd.f32 %v3914_v16, %v3787_v56  ;;  %v4559_v3 = vld [vmem:[#allocation2 + $0xc8] sm:$0xff]  ;;  %v8177_v19 = vpop.f32.mrb[148].mxu0 }
 0x225   : > { %4011 = vst.msk [vmem:[#allocation2 + $0xe8] sm:$0xff] %vm288_vm1, %v3963_v52  ;;  %v4607_v4 = vadd.f32 %v8171_v50, %v4559_v3  ;;  %v4558_v5 = vld [vmem:[#allocation2 + $0xc0] sm:$0xff]  ;;  %v4435_v9 = vpop.f32.mrb[149].mxu0 }
 0x226   : > { %4010 = vst.msk [vmem:[#allocation2 + $0xe0] sm:$0xff] %vm288_vm1, %v3962_v57  ;;  %v4606_v12 = vadd.f32 %v4558_v5, %v4415_v58  ;;  %v8106_v14 = vpop.f32.mrb[150].mxu1  ;;  %v3927_v5 = vld [vmem:[#allocation2 + $0x148] sm:$0xff] }
 0x227   : > { %4655 = vst.msk [vmem:[#allocation2 + $0xc8] sm:$0xff] %vm288_vm1, %v4607_v4  ;;  %v3965_v17 = vadd.f32 %v8106_v14, %v3917_v15  ;;  %v3797_v18 = vpop.f32.mrb[151].mxu1  ;;  %v3926_v14 = vld [vmem:[#allocation2 + $0x140] sm:$0xff] }
 0x228   : > { %4654 = vst.msk [vmem:[#allocation2 + $0xc0] sm:$0xff] %vm288_vm1, %v4606_v12  ;;  %v3964_v21 = vadd.f32 %v3916_v20, %v3797_v18  ;;  %v4561_v22 = vld [vmem:[#allocation2 + $0xd8] sm:$0xff]  ;;  %v8180_v24 = vpop.f32.mrb[150].mxu0 }
 0x229   : > { %4013 = vst.msk [vmem:[#allocation2 + $0xf8] sm:$0xff] %vm288_vm1, %v3965_v17  ;;  %v4609_v25 = vadd.f32 %v8174_v7, %v4561_v22  ;;  %v4560_v26 = vld [vmem:[#allocation2 + $0xd0] sm:$0xff]  ;;  %v4445_v27 = vpop.f32.mrb[151].mxu0 }
 0x22a   : > { %4012 = vst.msk [vmem:[#allocation2 + $0xf0] sm:$0xff] %vm288_vm1, %v3964_v21  ;;  %v4608_v28 = vadd.f32 %v4560_v26, %v4425_v54  ;;  %v8109_v11 = vpop.f32.mrb[152].mxu1  ;;  %v3929_v26 = vld [vmem:[#allocation2 + $0x158] sm:$0xff] }
 0x22b   : > { %4657 = vst.msk [vmem:[#allocation2 + $0xd8] sm:$0xff] %vm288_vm1, %v4609_v25  ;;  %v3967_v30 = vadd.f32 %v8109_v11, %v3919_v29  ;;  %v3807_v31 = vpop.f32.mrb[153].mxu1  ;;  %v3928_v11 = vld [vmem:[#allocation2 + $0x150] sm:$0xff] }
 0x22c   : > { %4656 = vst.msk [vmem:[#allocation2 + $0xd0] sm:$0xff] %vm288_vm1, %v4608_v28  ;;  %v3966_v13 = vadd.f32 %v3918_v32, %v3807_v31  ;;  %v4563_v33 = vld [vmem:[#allocation2 + $0xe8] sm:$0xff]  ;;  %v8183_v34 = vpop.f32.mrb[152].mxu0 }
 0x22d   : > { %4015 = vst.msk [vmem:[#allocation2 + $0x108] sm:$0xff] %vm288_vm1, %v3967_v30  ;;  %v4611_v35 = vadd.f32 %v8177_v19, %v4563_v33  ;;  %v4562_v36 = vld [vmem:[#allocation2 + $0xe0] sm:$0xff]  ;;  %v4455_v37 = vpop.f32.mrb[153].mxu0 }
 0x22e   : > { %4014 = vst.msk [vmem:[#allocation2 + $0x100] sm:$0xff] %vm288_vm1, %v3966_v13  ;;  %v4610_v38 = vadd.f32 %v4562_v36, %v4435_v9  ;;  %v8112_v39 = vpop.f32.mrb[154].mxu1  ;;  %v3931_v36 = vld [vmem:[#allocation2 + $0x168] sm:$0xff] }
 0x22f   : > { %4659 = vst.msk [vmem:[#allocation2 + $0xe8] sm:$0xff] %vm288_vm1, %v4611_v35  ;;  %v3969_v41 = vadd.f32 %v8112_v39, %v3921_v40  ;;  %v3817_v42 = vpop.f32.mrb[155].mxu1  ;;  %v3930_v39 = vld [vmem:[#allocation2 + $0x160] sm:$0xff] }
 0x230   : > { %4658 = vst.msk [vmem:[#allocation2 + $0xe0] sm:$0xff] %vm288_vm1, %v4610_v38  ;;  %v3968_v44 = vadd.f32 %v3920_v43, %v3817_v42  ;;  %v4565_v45 = vld [vmem:[#allocation2 + $0xf8] sm:$0xff]  ;;  %v8186_v46 = vpop.f32.mrb[154].mxu0 }
 0x231   : > { %4017 = vst.msk [vmem:[#allocation2 + $0x118] sm:$0xff] %vm288_vm1, %v3969_v41  ;;  %v4613_v47 = vadd.f32 %v8180_v24, %v4565_v45  ;;  %v4564_v48 = vld [vmem:[#allocation2 + $0xf0] sm:$0xff]  ;;  %v4465_v49 = vpop.f32.mrb[155].mxu0 }
 0x232   : > { %4016 = vst.msk [vmem:[#allocation2 + $0x110] sm:$0xff] %vm288_vm1, %v3968_v44  ;;  %v4612_v50 = vadd.f32 %v4564_v48, %v4445_v27  ;;  %v8115_v51 = vpop.f32.mrb[156].mxu1  ;;  %v3933_v48 = vld [vmem:[#allocation2 + $0x178] sm:$0xff] }
 0x233   : > { %4661 = vst.msk [vmem:[#allocation2 + $0xf8] sm:$0xff] %vm288_vm1, %v4613_v47  ;;  %v3971_v58 = vadd.f32 %v8115_v51, %v3923_v53  ;;  %v3827_v60 = vpop.f32.mrb[157].mxu1  ;;  %v3932_v51 = vld [vmem:[#allocation2 + $0x170] sm:$0xff] }
 0x234   : > { %4660 = vst.msk [vmem:[#allocation2 + $0xf0] sm:$0xff] %vm288_vm1, %v4612_v50  ;;  %v3970_v62 = vadd.f32 %v3922_v61, %v3827_v60  ;;  %v4567_v63 = vld [vmem:[#allocation2 + $0x108] sm:$0xff]  ;;  %v8189_v0 = vpop.f32.mrb[156].mxu0 }
 0x235   : > { %4019 = vst.msk [vmem:[#allocation2 + $0x128] sm:$0xff] %vm288_vm1, %v3971_v58  ;;  %v4615_v1 = vadd.f32 %v8183_v34, %v4567_v63  ;;  %v4566_v2 = vld [vmem:[#allocation2 + $0x100] sm:$0xff]  ;;  %v4475_v6 = vpop.f32.mrb[157].mxu0 }
 0x236   : > { %4018 = vst.msk [vmem:[#allocation2 + $0x120] sm:$0xff] %vm288_vm1, %v3970_v62  ;;  %v4614_v7 = vadd.f32 %v4566_v2, %v4455_v37  ;;  %v8118_v8 = vpop.f32.mrb[158].mxu1  ;;  %v5183_v2 = vld [vmem:[#allocation2 + $0x8] sm:$0xff] }
 0x237   : > { %4663 = vst.msk [vmem:[#allocation2 + $0x108] sm:$0xff] %vm288_vm1, %v4615_v1  ;;  %v3973_v54 = vadd.f32 %v8118_v8, %v3925_v10  ;;  %v3837_v55 = vpop.f32.mrb[159].mxu1  ;;  %v5182_v8 = vld [vmem:[#allocation2] sm:$0xff] }
 0x238   : > { %4662 = vst.msk [vmem:[#allocation2 + $0x100] sm:$0xff] %vm288_vm1, %v4614_v7  ;;  %v3972_v59 = vadd.f32 %v3924_v23, %v3837_v55  ;;  %v4569_v52 = vld [vmem:[#allocation2 + $0x118] sm:$0xff]  ;;  %v8192_v56 = vpop.f32.mrb[158].mxu0 }
 0x239   : > { %4021 = vst.msk [vmem:[#allocation2 + $0x138] sm:$0xff] %vm288_vm1, %v3973_v54  ;;  %v4617_v16 = vadd.f32 %v8186_v46, %v4569_v52  ;;  %v4568_v57 = vld [vmem:[#allocation2 + $0x110] sm:$0xff]  ;;  %v4485_v3 = vpop.f32.mrb[159].mxu0 }
 0x23a   : > { %4020 = vst.msk [vmem:[#allocation2 + $0x130] sm:$0xff] %vm288_vm1, %v3972_v59  ;;  %v4616_v19 = vadd.f32 %v4568_v57, %v4465_v49  ;;  %v8121_v4 = vpop.f32.mrb[160].mxu1  ;;  %v5185_v57 = vld [vmem:[#allocation2 + $0x18] sm:$0xff] }
 0x23b   : > { %4665 = vst.msk [vmem:[#allocation2 + $0x118] sm:$0xff] %vm288_vm1, %v4617_v16  ;;  %v3975_v9 = vadd.f32 %v8121_v4, %v3927_v5  ;;  %v3847_v12 = vpop.f32.mrb[161].mxu1  ;;  %v5184_v4 = vld [vmem:[#allocation2 + $0x10] sm:$0xff] }
 0x23c   : > { %4664 = vst.msk [vmem:[#allocation2 + $0x110] sm:$0xff] %vm288_vm1, %v4616_v19  ;;  %v3974_v15 = vadd.f32 %v3926_v14, %v3847_v12  ;;  %v4571_v17 = vld [vmem:[#allocation2 + $0x128] sm:$0xff]  ;;  %v8195_v18 = vpop.f32.mrb[160].mxu0 }
 0x23d   : > { %4023 = vst.msk [vmem:[#allocation2 + $0x148] sm:$0xff] %vm288_vm1, %v3975_v9  ;;  %v4619_v20 = vadd.f32 %v8189_v0, %v4571_v17  ;;  %v4570_v21 = vld [vmem:[#allocation2 + $0x120] sm:$0xff]  ;;  %v4495_v22 = vpop.f32.mrb[161].mxu0 }
 0x23e   : > { %4022 = vst.msk [vmem:[#allocation2 + $0x140] sm:$0xff] %vm288_vm1, %v3974_v15  ;;  %v4618_v24 = vadd.f32 %v4570_v21, %v4475_v6  ;;  %v8124_v25 = vpop.f32.mrb[162].mxu1  ;;  %v5187_v21 = vld [vmem:[#allocation2 + $0x28] sm:$0xff] }
 0x23f   : > { %4667 = vst.msk [vmem:[#allocation2 + $0x128] sm:$0xff] %vm288_vm1, %v4619_v20  ;;  %v3977_v27 = vadd.f32 %v8124_v25, %v3929_v26  ;;  %v3857_v28 = vpop.f32.mrb[163].mxu1  ;;  %v5186_v25 = vld [vmem:[#allocation2 + $0x20] sm:$0xff] }
 0x240   : > { %4666 = vst.msk [vmem:[#allocation2 + $0x120] sm:$0xff] %vm288_vm1, %v4618_v24  ;;  %v3976_v29 = vadd.f32 %v3928_v11, %v3857_v28  ;;  %v4573_v30 = vld [vmem:[#allocation2 + $0x138] sm:$0xff]  ;;  %v8198_v31 = vpop.f32.mrb[162].mxu0 }
 0x241   : > { %4025 = vst.msk [vmem:[#allocation2 + $0x158] sm:$0xff] %vm288_vm1, %v3977_v27  ;;  %v4621_v32 = vadd.f32 %v8192_v56, %v4573_v30  ;;  %v4572_v13 = vld [vmem:[#allocation2 + $0x130] sm:$0xff]  ;;  %v4505_v33 = vpop.f32.mrb[163].mxu0 }
 0x242   : > { %4024 = vst.msk [vmem:[#allocation2 + $0x150] sm:$0xff] %vm288_vm1, %v3976_v29  ;;  %v4620_v34 = vadd.f32 %v4572_v13, %v4485_v3  ;;  %v8127_v35 = vpop.f32.mrb[164].mxu1  ;;  %v5189_v13 = vld [vmem:[#allocation2 + $0x38] sm:$0xff] }
 0x243   : > { %4669 = vst.msk [vmem:[#allocation2 + $0x138] sm:$0xff] %vm288_vm1, %v4621_v32  ;;  %v3979_v37 = vadd.f32 %v8127_v35, %v3931_v36  ;;  %v3867_v38 = vpop.f32.mrb[165].mxu1  ;;  %v5188_v35 = vld [vmem:[#allocation2 + $0x30] sm:$0xff] }
 0x244   : > { %4668 = vst.msk [vmem:[#allocation2 + $0x130] sm:$0xff] %vm288_vm1, %v4620_v34  ;;  %v3978_v40 = vadd.f32 %v3930_v39, %v3867_v38  ;;  %v4575_v41 = vld [vmem:[#allocation2 + $0x148] sm:$0xff]  ;;  %v8201_v42 = vpop.f32.mrb[164].mxu0 }
 0x245   : > { %4027 = vst.msk [vmem:[#allocation2 + $0x168] sm:$0xff] %vm288_vm1, %v3979_v37  ;;  %v4623_v43 = vadd.f32 %v8195_v18, %v4575_v41  ;;  %v4574_v44 = vld [vmem:[#allocation2 + $0x140] sm:$0xff]  ;;  %v4515_v45 = vpop.f32.mrb[165].mxu0 }
 0x246   : > { %4026 = vst.msk [vmem:[#allocation2 + $0x160] sm:$0xff] %vm288_vm1, %v3978_v40  ;;  %v4622_v46 = vadd.f32 %v4574_v44, %v4495_v22  ;;  %v8130_v47 = vpop.f32.mrb[166].mxu1  ;;  %v5191_v44 = vld [vmem:[#allocation2 + $0x48] sm:$0xff] }
 0x247   : > { %4671 = vst.msk [vmem:[#allocation2 + $0x148] sm:$0xff] %vm288_vm1, %v4623_v43  ;;  %v3981_v49 = vadd.f32 %v8130_v47, %v3933_v48  ;;  %v3877_v50 = vpop.f32.mrb[167].mxu1  ;;  %v5190_v47 = vld [vmem:[#allocation2 + $0x40] sm:$0xff] }
 0x248   : > { %4670 = vst.msk [vmem:[#allocation2 + $0x140] sm:$0xff] %vm288_vm1, %v4622_v46  ;;  %v3980_v53 = vadd.f32 %v3932_v51, %v3877_v50  ;;  %v4577_v58 = vld [vmem:[#allocation2 + $0x158] sm:$0xff]  ;;  %v8204_v60 = vpop.f32.mrb[166].mxu0  ;;  %v10124_v48 = vld [vmem:[%s10404_s2] ss:$0 sm:$0xff] }
 0x249   : > { %4029 = vst.msk [vmem:[#allocation2 + $0x178] sm:$0xff] %vm288_vm1, %v3981_v49  ;;  %v4625_v61 = vadd.f32 %v8198_v31, %v4577_v58  ;;  %v4576_v62 = vld [vmem:[#allocation2 + $0x150] sm:$0xff]  ;;  %v4525_v63 = vpop.f32.mrb[167].mxu0 }
 0x24a   : > { %4028 = vst.msk [vmem:[#allocation2 + $0x170] sm:$0xff] %vm288_vm1, %v3980_v53  ;;  %v4624_v0 = vadd.f32 %v4576_v62, %v4505_v33  ;;  %v8209_v1 = vpop.f32.mrb[168].mxu1 }
 0x24b   : > { %4673 = vst.msk [vmem:[#allocation2 + $0x158] sm:$0xff] %vm288_vm1, %v4625_v61  ;;  %v5231_v6 = vadd.f32 %v8209_v1, %v5183_v2  ;;  %v4943_v7 = vpop.f32.mrb[169].mxu1 }
 0x24c   : > { %4672 = vst.msk [vmem:[#allocation2 + $0x150] sm:$0xff] %vm288_vm1, %v4624_v0  ;;  %v4579_v10 = vld [vmem:[#allocation2 + $0x168] sm:$0xff]  ;;  %v5230_v54 = vadd.f32 %v5182_v8, %v4943_v7  ;;  %v8283_v55 = vpop.f32.mrb[168].mxu0  ;;  %v5193_v0 = vld [vmem:[#allocation2 + $0x58] sm:$0xff]  ;;  %v5192_v8 = vld [vmem:[#allocation2 + $0x50] sm:$0xff] }
 0x24d   : > { %5279 = vst.msk [vmem:[#allocation2 + $0x8] sm:$0xff] %vm288_vm1, %v5231_v6  ;;  %v4627_v23 = vadd.f32 %v8201_v42, %v4579_v10  ;;  %v4578_v59 = vld [vmem:[#allocation2 + $0x160] sm:$0xff]  ;;  %v5591_v52 = vpop.f32.mrb[169].mxu0 }
 0x24e   : > { %5278 = vst.msk [vmem:[#allocation2] sm:$0xff] %vm288_vm1, %v5230_v54  ;;  %v4626_v56 = vadd.f32 %v4578_v59, %v4515_v45  ;;  %v8212_v16 = vpop.f32.mrb[170].mxu1 }
 0x24f   : > { %4675 = vst.msk [vmem:[#allocation2 + $0x168] sm:$0xff] %vm288_vm1, %v4627_v23  ;;  %v5233_v3 = vadd.f32 %v8212_v16, %v5185_v57  ;;  %v4953_v19 = vpop.f32.mrb[171].mxu1  ;;  %v10137_v57 = vstv %s10117_s27 }
 0x250   : > { %4674 = vst.msk [vmem:[#allocation2 + $0x160] sm:$0xff] %vm288_vm1, %v4626_v56  ;;  %v4581_v5 = vld [vmem:[#allocation2 + $0x178] sm:$0xff]  ;;  %v5232_v9 = vadd.f32 %v5184_v4, %v4953_v19  ;;  %v8286_v12 = vpop.f32.mrb[170].mxu0 }
 0x251   : > { %5281 = vst.msk [vmem:[#allocation2 + $0x18] sm:$0xff] %vm288_vm1, %v5233_v3  ;;  %v4629_v14 = vadd.f32 %v8204_v60, %v4581_v5  ;;  %v4580_v15 = vld [vmem:[#allocation2 + $0x170] sm:$0xff]  ;;  %v5601_v17 = vpop.f32.mrb[171].mxu0 }
 0x252   : > { %5280 = vst.msk [vmem:[#allocation2 + $0x10] sm:$0xff] %vm288_vm1, %v5232_v9  ;;  %v4628_v18 = vadd.f32 %v4580_v15, %v4525_v63  ;;  %v8215_v20 = vpop.f32.mrb[172].mxu1  ;;  %v5195_v9 = vld [vmem:[#allocation2 + $0x68] sm:$0xff] }
 0x253   : > { %4677 = vst.msk [vmem:[#allocation2 + $0x178] sm:$0xff] %vm288_vm1, %v4629_v14  ;;  %v5235_v22 = vadd.f32 %v8215_v20, %v5187_v21  ;;  %v4963_v24 = vpop.f32.mrb[173].mxu1 }
 0x254   : > { %4676 = vst.msk [vmem:[#allocation2 + $0x170] sm:$0xff] %vm288_vm1, %v4628_v18  ;;  %v5234_v26 = vadd.f32 %v5186_v25, %v4963_v24  ;;  %v5831_v27 = vld [vmem:[#allocation2 + $0x8] sm:$0xff]  ;;  %v8289_v28 = vpop.f32.mrb[172].mxu0  ;;  %v5194_v18 = vld [vmem:[#allocation2 + $0x60] sm:$0xff] }
 0x255   : > { %5283 = vst.msk [vmem:[#allocation2 + $0x28] sm:$0xff] %vm288_vm1, %v5235_v22  ;;  %v5879_v11 = vadd.f32 %v8283_v55, %v5831_v27  ;;  %v5830_v29 = vld [vmem:[#allocation2] sm:$0xff]  ;;  %v5611_v30 = vpop.f32.mrb[173].mxu0 }
 0x256   : > { %5282 = vst.msk [vmem:[#allocation2 + $0x20] sm:$0xff] %vm288_vm1, %v5234_v26  ;;  %v5878_v31 = vadd.f32 %v5830_v29, %v5591_v52  ;;  %v8218_v32 = vpop.f32.mrb[174].mxu1 }
 0x257   : > { %5927 = vst.msk [vmem:[#allocation2 + $0x8] sm:$0xff] %vm288_vm1, %v5879_v11  ;;  %v5237_v33 = vadd.f32 %v8218_v32, %v5189_v13  ;;  %v4973_v34 = vpop.f32.mrb[175].mxu1 }
 0x258   : > { %5926 = vst.msk [vmem:[#allocation2] sm:$0xff] %vm288_vm1, %v5878_v31  ;;  %v5236_v36 = vadd.f32 %v5188_v35, %v4973_v34  ;;  %v5833_v37 = vld [vmem:[#allocation2 + $0x18] sm:$0xff]  ;;  %v8292_v38 = vpop.f32.mrb[174].mxu0 }
 0x259   : > { %5285 = vst.msk [vmem:[#allocation2 + $0x38] sm:$0xff] %vm288_vm1, %v5237_v33  ;;  %v5881_v39 = vadd.f32 %v8286_v12, %v5833_v37  ;;  %v5832_v40 = vld [vmem:[#allocation2 + $0x10] sm:$0xff]  ;;  %v5621_v41 = vpop.f32.mrb[175].mxu0  ;;  %v5197_v34 = vld [vmem:[#allocation2 + $0x78] sm:$0xff] }
 0x25a   : > { %5284 = vst.msk [vmem:[#allocation2 + $0x30] sm:$0xff] %vm288_vm1, %v5236_v36  ;;  %v5880_v42 = vadd.f32 %v5832_v40, %v5601_v17  ;;  %v8221_v43 = vpop.f32.mrb[176].mxu1  ;;  %v5196_v40 = vld [vmem:[#allocation2 + $0x70] sm:$0xff] }
 0x25b   : > { %5929 = vst.msk [vmem:[#allocation2 + $0x18] sm:$0xff] %vm288_vm1, %v5881_v39  ;;  %v5239_v45 = vadd.f32 %v8221_v43, %v5191_v44  ;;  %v4983_v46 = vpop.f32.mrb[177].mxu1 }
 0x25c   : > { %5928 = vst.msk [vmem:[#allocation2 + $0x10] sm:$0xff] %vm288_vm1, %v5880_v42  ;;  %v5238_v49 = vadd.f32 %v5190_v47, %v4983_v46  ;;  %v5835_v50 = vld [vmem:[#allocation2 + $0x28] sm:$0xff]  ;;  %v8295_v51 = vpop.f32.mrb[176].mxu0 }
 0x25d   : > { %5287 = vst.msk [vmem:[#allocation2 + $0x48] sm:$0xff] %vm288_vm1, %v5239_v45  ;;  %v5883_v53 = vadd.f32 %v8289_v28, %v5835_v50  ;;  %v5834_v58 = vld [vmem:[#allocation2 + $0x20] sm:$0xff]  ;;  %v5631_v60 = vpop.f32.mrb[177].mxu0 }
 0x25e   : > { %v5975_v61 = vld [vmem:[#allocation2 + $0x8] sm:$0xff]  ;;  %5286 = vst.msk [vmem:[#allocation2 + $0x40] sm:$0xff] %vm288_vm1, %v5238_v49  ;;  %v5882_v62 = vadd.f32 %v5834_v58, %v5611_v30  ;;  %v8224_v63 = vpop.f32.mrb[178].mxu1  ;;  %v10147_v30 = vstv %s10128_s30 }
 0x25f   : > { %v6014_v1 = vadd.f32 %v10124_v48, %v5975_v61  ;;  %v5974_v2 = vld [vmem:[#allocation2] sm:$0xff]  ;;  %5931 = vst.msk [vmem:[#allocation2 + $0x28] sm:$0xff] %vm288_vm1, %v5883_v53  ;;  %v5241_v6 = vadd.f32 %v8224_v63, %v5193_v0  ;;  %v4993_v7 = vpop.f32.mrb[179].mxu1  ;;  %v5199_v0 = vld [vmem:[#allocation2 + $0x88] sm:$0xff] }
 0x260   : > { %v6013_v10 = vadd.f32 %v10124_v48, %v5974_v2  ;;  %5930 = vst.msk [vmem:[#allocation2 + $0x20] sm:$0xff] %vm288_vm1, %v5882_v62  ;;  %v5240_v54 = vadd.f32 %v5192_v8, %v4993_v7  ;;  %v5837_v55 = vld [vmem:[#allocation2 + $0x38] sm:$0xff]  ;;  %v8298_v23 = vpop.f32.mrb[178].mxu0 }
 0x261   : > { %v6080_v59 = vadd.f32 3.0, %v6014_v1  ;;  %5289 = vst.msk [vmem:[#allocation2 + $0x58] sm:$0xff] %vm288_vm1, %v5241_v6  ;;  %v5885_v52 = vadd.f32 %v8292_v38, %v5837_v55  ;;  %v5836_v56 = vld [vmem:[#allocation2 + $0x30] sm:$0xff]  ;;  %v5641_v16 = vpop.f32.mrb[179].mxu0  ;;  %v6048_v25 = vmul.f32 %v10137_v57, %v6014_v1 }
 0x262   : > { %v6079_v3 = vadd.f32 3.0, %v6013_v10  ;;  %v5976_v19 = vld [vmem:[#allocation2 + $0x18] sm:$0xff]  ;;  %5288 = vst.msk [vmem:[#allocation2 + $0x50] sm:$0xff] %vm288_vm1, %v5240_v54  ;;  %v5884_v4 = vadd.f32 %v5836_v56, %v5621_v41  ;;  %v8227_v5 = vpop.f32.mrb[180].mxu1  ;;  %v6047_v31 = vmul.f32 %v10137_v57, %v6013_v10  ;;  %v5198_v10 = vld [vmem:[#allocation2 + $0x80] sm:$0xff] }
 0x263   : > { %v6112_v12 = vmax.f32 %v6080_v59, 0.0  ;;  %v6015_v14 = vadd.f32 %v10124_v48, %v5976_v19  ;;  %5933 = vst.msk [vmem:[#allocation2 + $0x38] sm:$0xff] %vm288_vm1, %v5885_v52  ;;  %v5243_v15 = vadd.f32 %v8227_v5, %v5195_v9  ;;  %v5003_v17 = vpop.f32.mrb[181].mxu1 }
 0x264   : > { %v6111_v20 = vmax.f32 %v6079_v3, 0.0  ;;  %5932 = vst.msk [vmem:[#allocation2 + $0x30] sm:$0xff] %vm288_vm1, %v5884_v4  ;;  %v5242_v21 = vadd.f32 %v5194_v18, %v5003_v17  ;;  %v5839_v22 = vld [vmem:[#allocation2 + $0x48] sm:$0xff]  ;;  %v8301_v24 = vpop.f32.mrb[180].mxu0  ;;  %v5201_v18 = vld [vmem:[#allocation2 + $0x98] sm:$0xff] }
 0x265   : > { %v6144_v26 = vmin.f32 %v6112_v12, 6.0  ;;  %v6081_v27 = vadd.f32 3.0, %v6015_v14  ;;  %5291 = vst.msk [vmem:[#allocation2 + $0x68] sm:$0xff] %vm288_vm1, %v5243_v15  ;;  %v5887_v28 = vadd.f32 %v8295_v51, %v5839_v22  ;;  %v5838_v11 = vld [vmem:[#allocation2 + $0x40] sm:$0xff]  ;;  %v5651_v29 = vpop.f32.mrb[181].mxu0  ;;  %v6049_v47 = vmul.f32 %v10137_v57, %v6015_v14 }
 0x266   : > { %v6143_v32 = vmin.f32 %v6111_v20, 6.0  ;;  %5290 = vst.msk [vmem:[#allocation2 + $0x60] sm:$0xff] %vm288_vm1, %v5242_v21  ;;  %v5886_v13 = vadd.f32 %v5838_v11, %v5631_v60  ;;  %v8230_v33 = vpop.f32.mrb[182].mxu1 }
 0x267   : > { %v6176_v35 = vmul.f32 %v6144_v26, %v6048_v25  ;;  %v6113_v36 = vmax.f32 %v6081_v27, 0.0  ;;  %v5977_v37 = vld [vmem:[#allocation2 + $0x20] sm:$0xff]  ;;  %5935 = vst.msk [vmem:[#allocation2 + $0x48] sm:$0xff] %vm288_vm1, %v5887_v28  ;;  %v5245_v38 = vadd.f32 %v8230_v33, %v5197_v34  ;;  %v5013_v39 = vpop.f32.mrb[183].mxu1  ;;  %v5200_v25 = vld [vmem:[#allocation2 + $0x90] sm:$0xff] }
 0x268   : > { %v6175_v41 = vmul.f32 %v6143_v32, %v6047_v31  ;;  %v6016_v42 = vadd.f32 %v10124_v48, %v5977_v37  ;;  %5934 = vst.msk [vmem:[#allocation2 + $0x40] sm:$0xff] %vm288_vm1, %v5886_v13  ;;  %v5244_v43 = vadd.f32 %v5196_v40, %v5013_v39  ;;  %v5841_v44 = vld [vmem:[#allocation2 + $0x58] sm:$0xff]  ;;  %v8304_v45 = vpop.f32.mrb[182].mxu0 }
 0x269   : > { %v6210_v46 = vadd.f32 %v10147_v30, %v6176_v35  ;;  %v6145_v49 = vmin.f32 %v6113_v36, 6.0  ;;  %5293 = vst.msk [vmem:[#allocation2 + $0x78] sm:$0xff] %vm288_vm1, %v5245_v38  ;;  %v5889_v50 = vadd.f32 %v8298_v23, %v5841_v44  ;;  %v5840_v51 = vld [vmem:[#allocation2 + $0x50] sm:$0xff]  ;;  %v5661_v53 = vpop.f32.mrb[183].mxu0 }
 0x26a   : > { %v6209_v58 = vadd.f32 %v10147_v30, %v6175_v41  ;;  %v6082_v60 = vadd.f32 3.0, %v6016_v42  ;;  %v5979_v61 = vld [vmem:[#allocation2 + $0x38] sm:$0xff]  ;;  %5292 = vst.msk [vmem:[#allocation2 + $0x70] sm:$0xff] %vm288_vm1, %v5244_v43  ;;  %v5888_v62 = vadd.f32 %v5840_v51, %v5641_v16  ;;  %v8233_v63 = vpop.f32.mrb[184].mxu1  ;;  %v6050_v5 = vmul.f32 %v10137_v57, %v6016_v42  ;;  %v5203_v41 = vld [vmem:[#allocation2 + $0xa8] sm:$0xff] }
 0x26b   : > { %6242 = vst.msk [vmem:[%s10155_s7 + $0x8] sm:$0xff] %vm288_vm1, %v6210_v46  ;;  %v6177_v1 = vmul.f32 %v6145_v49, %v6049_v47  ;;  %v6018_v2 = vadd.f32 %v10124_v48, %v5979_v61  ;;  %v5978_v6 = vld [vmem:[#allocation2 + $0x30] sm:$0xff]  ;;  %5937 = vst.msk [vmem:[#allocation2 + $0x58] sm:$0xff] %vm288_vm1, %v5889_v50  ;;  %v5247_v7 = vadd.f32 %v8233_v63, %v5199_v0  ;;  %v5023_v8 = vpop.f32.mrb[185].mxu1  ;;  %v5202_v47 = vld [vmem:[#allocation2 + $0xa0] sm:$0xff] }
 0x26c   : > { %6241 = vst.msk [vmem:[%s10155_s7] sm:$0xff] %vm288_vm1, %v6209_v58  ;;  %v6114_v54 = vmax.f32 %v6082_v60, 0.0  ;;  %v6017_v55 = vadd.f32 %v10124_v48, %v5978_v6  ;;  %5936 = vst.msk [vmem:[#allocation2 + $0x50] sm:$0xff] %vm288_vm1, %v5888_v62  ;;  %v5246_v23 = vadd.f32 %v5198_v10, %v5023_v8  ;;  %v5843_v59 = vld [vmem:[#allocation2 + $0x68] sm:$0xff]  ;;  %v8307_v52 = vpop.f32.mrb[184].mxu0 }
 0x26d   : > { %v6211_v56 = vadd.f32 %v10147_v30, %v6177_v1  ;;  %v6084_v16 = vadd.f32 3.0, %v6018_v2  ;;  %5295 = vst.msk [vmem:[#allocation2 + $0x88] sm:$0xff] %vm288_vm1, %v5247_v7  ;;  %v5891_v3 = vadd.f32 %v8301_v24, %v5843_v59  ;;  %v5842_v19 = vld [vmem:[#allocation2 + $0x60] sm:$0xff]  ;;  %v5671_v4 = vpop.f32.mrb[185].mxu0 }
 0x26e   : > { %v6146_v9 = vmin.f32 %v6114_v54, 6.0  ;;  %v6083_v12 = vadd.f32 3.0, %v6017_v55  ;;  %v5980_v14 = vld [vmem:[#allocation2 + $0x48] sm:$0xff]  ;;  %5294 = vst.msk [vmem:[#allocation2 + $0x80] sm:$0xff] %vm288_vm1, %v5246_v23  ;;  %v5890_v15 = vadd.f32 %v5842_v19, %v5651_v29  ;;  %v8236_v17 = vpop.f32.mrb[186].mxu1  ;;  %v6052_v29 = vmul.f32 %v10137_v57, %v6018_v2  ;;  %v5205_v54 = vld [vmem:[#allocation2 + $0xb8] sm:$0xff] }
 0x26f   : > { %6243 = vst.msk [vmem:[%s10155_s7 + $0x10] sm:$0xff] %vm288_vm1, %v6211_v56  ;;  %v6116_v20 = vmax.f32 %v6084_v16, 0.0  ;;  %v6019_v21 = vadd.f32 %v10124_v48, %v5980_v14  ;;  %5939 = vst.msk [vmem:[#allocation2 + $0x68] sm:$0xff] %vm288_vm1, %v5891_v3  ;;  %v5249_v22 = vadd.f32 %v8236_v17, %v5201_v18  ;;  %v5033_v24 = vpop.f32.mrb[187].mxu1  ;;  %v6051_v37 = vmul.f32 %v10137_v57, %v6017_v55  ;;  %v5204_v16 = vld [vmem:[#allocation2 + $0xb0] sm:$0xff] }
 0x270   : > { %v6178_v26 = vmul.f32 %v6146_v9, %v6050_v5  ;;  %v6115_v27 = vmax.f32 %v6083_v12, 0.0  ;;  %5938 = vst.msk [vmem:[#allocation2 + $0x60] sm:$0xff] %vm288_vm1, %v5890_v15  ;;  %v5248_v28 = vadd.f32 %v5200_v25, %v5033_v24  ;;  %v5845_v11 = vld [vmem:[#allocation2 + $0x78] sm:$0xff]  ;;  %v8310_v31 = vpop.f32.mrb[186].mxu0 }
 0x271   : > { %v6148_v32 = vmin.f32 %v6116_v20, 6.0  ;;  %v6085_v13 = vadd.f32 3.0, %v6019_v21  ;;  %5297 = vst.msk [vmem:[#allocation2 + $0x98] sm:$0xff] %vm288_vm1, %v5249_v22  ;;  %v5893_v33 = vadd.f32 %v8304_v45, %v5845_v11  ;;  %v5844_v34 = vld [vmem:[#allocation2 + $0x70] sm:$0xff]  ;;  %v5681_v35 = vpop.f32.mrb[187].mxu0  ;;  %v6053_v61 = vmul.f32 %v10137_v57, %v6019_v21 }
 0x272   : > { %v6212_v36 = vadd.f32 %v10147_v30, %v6178_v26  ;;  %v6147_v38 = vmin.f32 %v6115_v27, 6.0  ;;  %5296 = vst.msk [vmem:[#allocation2 + $0x90] sm:$0xff] %vm288_vm1, %v5248_v28  ;;  %v5892_v39 = vadd.f32 %v5844_v34, %v5661_v53  ;;  %v8239_v40 = vpop.f32.mrb[188].mxu1  ;;  %v5207_v27 = vld [vmem:[#allocation2 + $0xc8] sm:$0xff] }
 0x273   : > { %v6180_v42 = vmul.f32 %v6148_v32, %v6052_v29  ;;  %v6117_v43 = vmax.f32 %v6085_v13, 0.0  ;;  %v5981_v44 = vld [vmem:[#allocation2 + $0x50] sm:$0xff]  ;;  %5941 = vst.msk [vmem:[#allocation2 + $0x78] sm:$0xff] %vm288_vm1, %v5893_v33  ;;  %v5251_v46 = vadd.f32 %v8239_v40, %v5203_v41  ;;  %v5043_v45 = vpop.f32.mrb[189].mxu1  ;;  %v5206_v32 = vld [vmem:[#allocation2 + $0xc0] sm:$0xff] }
 0x274   : > { %6244 = vst.msk [vmem:[%s10155_s7 + $0x18] sm:$0xff] %vm288_vm1, %v6212_v36  ;;  %v6179_v49 = vmul.f32 %v6147_v38, %v6051_v37  ;;  %v6020_v50 = vadd.f32 %v10124_v48, %v5981_v44  ;;  %5940 = vst.msk [vmem:[#allocation2 + $0x70] sm:$0xff] %vm288_vm1, %v5892_v39  ;;  %v5250_v51 = vadd.f32 %v5202_v47, %v5043_v45  ;;  %v5847_v58 = vld [vmem:[#allocation2 + $0x88] sm:$0xff]  ;;  %v8313_v53 = vpop.f32.mrb[188].mxu0 }
 0x275   : > { %v6214_v60 = vadd.f32 %v10147_v30, %v6180_v42  ;;  %v6149_v62 = vmin.f32 %v6117_v43, 6.0  ;;  %5299 = vst.msk [vmem:[#allocation2 + $0xa8] sm:$0xff] %vm288_vm1, %v5251_v46  ;;  %v5895_v63 = vadd.f32 %v8307_v52, %v5847_v58  ;;  %v5846_v0 = vld [vmem:[#allocation2 + $0x80] sm:$0xff]  ;;  %v5691_v1 = vpop.f32.mrb[189].mxu0 }
 0x276   : > { %v6213_v2 = vadd.f32 %v10147_v30, %v6179_v49  ;;  %v6086_v6 = vadd.f32 3.0, %v6020_v50  ;;  %v5983_v7 = vld [vmem:[#allocation2 + $0x68] sm:$0xff]  ;;  %5298 = vst.msk [vmem:[#allocation2 + $0xa0] sm:$0xff] %vm288_vm1, %v5250_v51  ;;  %v5894_v8 = vadd.f32 %v5846_v0, %v5671_v4  ;;  %v8242_v10 = vpop.f32.mrb[190].mxu1  ;;  %v6054_v20 = vmul.f32 %v10137_v57, %v6020_v50  ;;  %v5209_v49 = vld [vmem:[#allocation2 + $0xd8] sm:$0xff] }
 0x277   : > { %6246 = vst.msk [vmem:[%s10155_s7 + $0x28] sm:$0xff] %vm288_vm1, %v6214_v60  ;;  %v6181_v55 = vmul.f32 %v6149_v62, %v6053_v61  ;;  %v6022_v23 = vadd.f32 %v10124_v48, %v5983_v7  ;;  %v5982_v59 = vld [vmem:[#allocation2 + $0x60] sm:$0xff]  ;;  %5943 = vst.msk [vmem:[#allocation2 + $0x88] sm:$0xff] %vm288_vm1, %v5895_v63  ;;  %v5253_v52 = vadd.f32 %v8242_v10, %v5205_v54  ;;  %v5053_v56 = vpop.f32.mrb[191].mxu1  ;;  %v5208_v61 = vld [vmem:[#allocation2 + $0xd0] sm:$0xff] }
 0x278   : > { %6245 = vst.msk [vmem:[%s10155_s7 + $0x20] sm:$0xff] %vm288_vm1, %v6213_v2  ;;  %v6118_v3 = vmax.f32 %v6086_v6, 0.0  ;;  %v6021_v19 = vadd.f32 %v10124_v48, %v5982_v59  ;;  %5942 = vst.msk [vmem:[#allocation2 + $0x80] sm:$0xff] %vm288_vm1, %v5894_v8  ;;  %v5252_v4 = vadd.f32 %v5204_v16, %v5053_v56  ;;  %v5849_v5 = vld [vmem:[#allocation2 + $0x98] sm:$0xff]  ;;  %v8316_v9 = vpop.f32.mrb[190].mxu0 }
 0x279   : > { %v6215_v12 = vadd.f32 %v10147_v30, %v6181_v55  ;;  %v6088_v14 = vadd.f32 3.0, %v6022_v23  ;;  %5301 = vst.msk [vmem:[#allocation2 + $0xb8] sm:$0xff] %vm288_vm1, %v5253_v52  ;;  %v5897_v15 = vadd.f32 %v8310_v31, %v5849_v5  ;;  %v5848_v17 = vld [vmem:[#allocation2 + $0x90] sm:$0xff]  ;;  %v5701_v18 = vpop.f32.mrb[191].mxu0 }
 0x27a   : > { %v6150_v21 = vmin.f32 %v6118_v3, 6.0  ;;  %v6087_v22 = vadd.f32 3.0, %v6021_v19  ;;  %v5984_v24 = vld [vmem:[#allocation2 + $0x78] sm:$0xff]  ;;  %5300 = vst.msk [vmem:[#allocation2 + $0xb0] sm:$0xff] %vm288_vm1, %v5252_v4  ;;  %v5896_v25 = vadd.f32 %v5848_v17, %v5681_v35  ;;  %v8245_v26 = vpop.f32.mrb[192].mxu1  ;;  %v6056_v35 = vmul.f32 %v10137_v57, %v6022_v23  ;;  %v5211_v3 = vld [vmem:[#allocation2 + $0xe8] sm:$0xff] }
 0x27b   : > { %6247 = vst.msk [vmem:[%s10155_s7 + $0x30] sm:$0xff] %vm288_vm1, %v6215_v12  ;;  %v6120_v28 = vmax.f32 %v6088_v14, 0.0  ;;  %v6023_v11 = vadd.f32 %v10124_v48, %v5984_v24  ;;  %5945 = vst.msk [vmem:[#allocation2 + $0x98] sm:$0xff] %vm288_vm1, %v5897_v15  ;;  %v5255_v31 = vadd.f32 %v8245_v26, %v5207_v27  ;;  %v5063_v29 = vpop.f32.mrb[193].mxu1  ;;  %v6055_v44 = vmul.f32 %v10137_v57, %v6021_v19  ;;  %v5210_v14 = vld [vmem:[#allocation2 + $0xe0] sm:$0xff] }
 0x27c   : > { %v6182_v13 = vmul.f32 %v6150_v21, %v6054_v20  ;;  %v6119_v33 = vmax.f32 %v6087_v22, 0.0  ;;  %5944 = vst.msk [vmem:[#allocation2 + $0x90] sm:$0xff] %vm288_vm1, %v5896_v25  ;;  %v5254_v34 = vadd.f32 %v5206_v32, %v5063_v29  ;;  %v5851_v36 = vld [vmem:[#allocation2 + $0xa8] sm:$0xff]  ;;  %v8319_v37 = vpop.f32.mrb[192].mxu0 }
 0x27d   : > { %v6152_v38 = vmin.f32 %v6120_v28, 6.0  ;;  %v6089_v39 = vadd.f32 3.0, %v6023_v11  ;;  %5303 = vst.msk [vmem:[#allocation2 + $0xc8] sm:$0xff] %vm288_vm1, %v5255_v31  ;;  %v5899_v40 = vadd.f32 %v8313_v53, %v5851_v36  ;;  %v5850_v41 = vld [vmem:[#allocation2 + $0xa0] sm:$0xff]  ;;  %v5711_v42 = vpop.f32.mrb[193].mxu0  ;;  %v6057_v7 = vmul.f32 %v10137_v57, %v6023_v11 }
 0x27e   : > { %v6216_v43 = vadd.f32 %v10147_v30, %v6182_v13  ;;  %v6151_v46 = vmin.f32 %v6119_v33, 6.0  ;;  %5302 = vst.msk [vmem:[#allocation2 + $0xc0] sm:$0xff] %vm288_vm1, %v5254_v34  ;;  %v5898_v45 = vadd.f32 %v5850_v41, %v5691_v1  ;;  %v8248_v47 = vpop.f32.mrb[194].mxu1  ;;  %v5213_v33 = vld [vmem:[#allocation2 + $0xf8] sm:$0xff] }
 0x27f   : > { %v6184_v50 = vmul.f32 %v6152_v38, %v6056_v35  ;;  %v6121_v51 = vmax.f32 %v6089_v39, 0.0  ;;  %v5985_v58 = vld [vmem:[#allocation2 + $0x80] sm:$0xff]  ;;  %5947 = vst.msk [vmem:[#allocation2 + $0xa8] sm:$0xff] %vm288_vm1, %v5899_v40  ;;  %v5257_v60 = vadd.f32 %v8248_v47, %v5209_v49  ;;  %v5073_v53 = vpop.f32.mrb[195].mxu1  ;;  %v5212_v38 = vld [vmem:[#allocation2 + $0xf0] sm:$0xff] }
 0x280   : > { %6248 = vst.msk [vmem:[%s10155_s7 + $0x38] sm:$0xff] %vm288_vm1, %v6216_v43  ;;  %v6183_v62 = vmul.f32 %v6151_v46, %v6055_v44  ;;  %v6024_v63 = vadd.f32 %v10124_v48, %v5985_v58  ;;  %5946 = vst.msk [vmem:[#allocation2 + $0xa0] sm:$0xff] %vm288_vm1, %v5898_v45  ;;  %v5256_v0 = vadd.f32 %v5208_v61, %v5073_v53  ;;  %v5853_v2 = vld [vmem:[#allocation2 + $0xb8] sm:$0xff]  ;;  %v8322_v1 = vpop.f32.mrb[194].mxu0 }
 0x281   : > { %v6218_v6 = vadd.f32 %v10147_v30, %v6184_v50  ;;  %v6153_v8 = vmin.f32 %v6121_v51, 6.0  ;;  %5305 = vst.msk [vmem:[#allocation2 + $0xd8] sm:$0xff] %vm288_vm1, %v5257_v60  ;;  %v5901_v10 = vadd.f32 %v8316_v9, %v5853_v2  ;;  %v5852_v54 = vld [vmem:[#allocation2 + $0xb0] sm:$0xff]  ;;  %v5721_v55 = vpop.f32.mrb[195].mxu0 }
 0x282   : > { %v6217_v23 = vadd.f32 %v10147_v30, %v6183_v62  ;;  %v6090_v59 = vadd.f32 3.0, %v6024_v63  ;;  %v5987_v52 = vld [vmem:[#allocation2 + $0x98] sm:$0xff]  ;;  %5304 = vst.msk [vmem:[#allocation2 + $0xd0] sm:$0xff] %vm288_vm1, %v5256_v0  ;;  %v5900_v56 = vadd.f32 %v5852_v54, %v5701_v18  ;;  %v8251_v16 = vpop.f32.mrb[196].mxu1  ;;  %v6058_v28 = vmul.f32 %v10137_v57, %v6024_v63  ;;  %v5215_v62 = vld [vmem:[#allocation2 + $0x108] sm:$0xff] }
 0x283   : > { %6250 = vst.msk [vmem:[%s10155_s7 + $0x48] sm:$0xff] %vm288_vm1, %v6218_v6  ;;  %v6185_v19 = vmul.f32 %v6153_v8, %v6057_v7  ;;  %v6026_v4 = vadd.f32 %v10124_v48, %v5987_v52  ;;  %v5986_v5 = vld [vmem:[#allocation2 + $0x90] sm:$0xff]  ;;  %5949 = vst.msk [vmem:[#allocation2 + $0xb8] sm:$0xff] %vm288_vm1, %v5901_v10  ;;  %v5259_v9 = vadd.f32 %v8251_v16, %v5211_v3  ;;  %v5083_v12 = vpop.f32.mrb[197].mxu1  ;;  %v5214_v7 = vld [vmem:[#allocation2 + $0x100] sm:$0xff] }
 0x284   : > { %6249 = vst.msk [vmem:[%s10155_s7 + $0x40] sm:$0xff] %vm288_vm1, %v6217_v23  ;;  %v6122_v15 = vmax.f32 %v6090_v59, 0.0  ;;  %v6025_v17 = vadd.f32 %v10124_v48, %v5986_v5  ;;  %5948 = vst.msk [vmem:[#allocation2 + $0xb0] sm:$0xff] %vm288_vm1, %v5900_v56  ;;  %v5258_v18 = vadd.f32 %v5210_v14, %v5083_v12  ;;  %v5855_v20 = vld [vmem:[#allocation2 + $0xc8] sm:$0xff]  ;;  %v8325_v21 = vpop.f32.mrb[196].mxu0 }
 0x285   : > { %v6219_v22 = vadd.f32 %v10147_v30, %v6185_v19  ;;  %v6092_v24 = vadd.f32 3.0, %v6026_v4  ;;  %5307 = vst.msk [vmem:[#allocation2 + $0xe8] sm:$0xff] %vm288_vm1, %v5259_v9  ;;  %v5903_v25 = vadd.f32 %v8319_v37, %v5855_v20  ;;  %v5854_v26 = vld [vmem:[#allocation2 + $0xc0] sm:$0xff]  ;;  %v5731_v27 = vpop.f32.mrb[197].mxu0 }
 0x286   : > { %v6154_v11 = vmin.f32 %v6122_v15, 6.0  ;;  %v6091_v31 = vadd.f32 3.0, %v6025_v17  ;;  %v5988_v29 = vld [vmem:[#allocation2 + $0xa8] sm:$0xff]  ;;  %5306 = vst.msk [vmem:[#allocation2 + $0xe0] sm:$0xff] %vm288_vm1, %v5258_v18  ;;  %v5902_v32 = vadd.f32 %v5854_v26, %v5711_v42  ;;  %v8254_v13 = vpop.f32.mrb[198].mxu1  ;;  %v6060_v42 = vmul.f32 %v10137_v57, %v6026_v4  ;;  %v5217_v15 = vld [vmem:[#allocation2 + $0x118] sm:$0xff] }
 0x287   : > { %6251 = vst.msk [vmem:[%s10155_s7 + $0x50] sm:$0xff] %vm288_vm1, %v6219_v22  ;;  %v6124_v34 = vmax.f32 %v6092_v24, 0.0  ;;  %v6027_v36 = vadd.f32 %v10124_v48, %v5988_v29  ;;  %5951 = vst.msk [vmem:[#allocation2 + $0xc8] sm:$0xff] %vm288_vm1, %v5903_v25  ;;  %v5261_v37 = vadd.f32 %v8254_v13, %v5213_v33  ;;  %v5093_v35 = vpop.f32.mrb[199].mxu1  ;;  %v6059_v58 = vmul.f32 %v10137_v57, %v6025_v17  ;;  %v5216_v24 = vld [vmem:[#allocation2 + $0x110] sm:$0xff] }
 0x288   : > { %v6186_v39 = vmul.f32 %v6154_v11, %v6058_v28  ;;  %v6123_v40 = vmax.f32 %v6091_v31, 0.0  ;;  %5950 = vst.msk [vmem:[#allocation2 + $0xc0] sm:$0xff] %vm288_vm1, %v5902_v32  ;;  %v5260_v41 = vadd.f32 %v5212_v38, %v5093_v35  ;;  %v5857_v43 = vld [vmem:[#allocation2 + $0xd8] sm:$0xff]  ;;  %v8328_v44 = vpop.f32.mrb[198].mxu0 }
 0x289   : > { %v6156_v46 = vmin.f32 %v6124_v34, 6.0  ;;  %v6093_v45 = vadd.f32 3.0, %v6027_v36  ;;  %5309 = vst.msk [vmem:[#allocation2 + $0xf8] sm:$0xff] %vm288_vm1, %v5261_v37  ;;  %v5905_v47 = vadd.f32 %v8322_v1, %v5857_v43  ;;  %v5856_v49 = vld [vmem:[#allocation2 + $0xd0] sm:$0xff]  ;;  %v5741_v50 = vpop.f32.mrb[199].mxu0  ;;  %v6061_v52 = vmul.f32 %v10137_v57, %v6027_v36 }
 0x28a   : > { %v6220_v51 = vadd.f32 %v10147_v30, %v6186_v39  ;;  %v6155_v60 = vmin.f32 %v6123_v40, 6.0  ;;  %5308 = vst.msk [vmem:[#allocation2 + $0xf0] sm:$0xff] %vm288_vm1, %v5260_v41  ;;  %v5904_v53 = vadd.f32 %v5856_v49, %v5721_v55  ;;  %v8257_v61 = vpop.f32.mrb[200].mxu1  ;;  %v5219_v40 = vld [vmem:[#allocation2 + $0x128] sm:$0xff] }
 0x28b   : > { %v6188_v63 = vmul.f32 %v6156_v46, %v6060_v42  ;;  %v6125_v0 = vmax.f32 %v6093_v45, 0.0  ;;  %v5989_v2 = vld [vmem:[#allocation2 + $0xb0] sm:$0xff]  ;;  %5953 = vst.msk [vmem:[#allocation2 + $0xd8] sm:$0xff] %vm288_vm1, %v5905_v47  ;;  %v5263_v6 = vadd.f32 %v8257_v61, %v5215_v62  ;;  %v5103_v1 = vpop.f32.mrb[201].mxu1  ;;  %v5218_v46 = vld [vmem:[#allocation2 + $0x120] sm:$0xff] }
 0x28c   : > { %6252 = vst.msk [vmem:[%s10155_s7 + $0x58] sm:$0xff] %vm288_vm1, %v6220_v51  ;;  %v6187_v8 = vmul.f32 %v6155_v60, %v6059_v58  ;;  %v6028_v10 = vadd.f32 %v10124_v48, %v5989_v2  ;;  %5952 = vst.msk [vmem:[#allocation2 + $0xd0] sm:$0xff] %vm288_vm1, %v5904_v53  ;;  %v5262_v54 = vadd.f32 %v5214_v7, %v5103_v1  ;;  %v5859_v23 = vld [vmem:[#allocation2 + $0xe8] sm:$0xff]  ;;  %v8331_v55 = vpop.f32.mrb[200].mxu0 }
 0x28d   : > { %v6222_v59 = vadd.f32 %v10147_v30, %v6188_v63  ;;  %v6157_v56 = vmin.f32 %v6125_v0, 6.0  ;;  %5311 = vst.msk [vmem:[#allocation2 + $0x108] sm:$0xff] %vm288_vm1, %v5263_v6  ;;  %v5907_v16 = vadd.f32 %v8325_v21, %v5859_v23  ;;  %v5858_v3 = vld [vmem:[#allocation2 + $0xe0] sm:$0xff]  ;;  %v5751_v19 = vpop.f32.mrb[201].mxu0 }
 0x28e   : > { %v6221_v4 = vadd.f32 %v10147_v30, %v6187_v8  ;;  %v6094_v5 = vadd.f32 3.0, %v6028_v10  ;;  %v5991_v9 = vld [vmem:[#allocation2 + $0xc8] sm:$0xff]  ;;  %5310 = vst.msk [vmem:[#allocation2 + $0x100] sm:$0xff] %vm288_vm1, %v5262_v54  ;;  %v5906_v12 = vadd.f32 %v5858_v3, %v5731_v27  ;;  %v8260_v14 = vpop.f32.mrb[202].mxu1  ;;  %v6062_v34 = vmul.f32 %v10137_v57, %v6028_v10  ;;  %v5221_v8 = vld [vmem:[#allocation2 + $0x138] sm:$0xff] }
 0x28f   : > { %6254 = vst.msk [vmem:[%s10155_s7 + $0x68] sm:$0xff] %vm288_vm1, %v6222_v59  ;;  %v6189_v17 = vmul.f32 %v6157_v56, %v6061_v52  ;;  %v6030_v18 = vadd.f32 %v10124_v48, %v5991_v9  ;;  %v5990_v20 = vld [vmem:[#allocation2 + $0xc0] sm:$0xff]  ;;  %5955 = vst.msk [vmem:[#allocation2 + $0xe8] sm:$0xff] %vm288_vm1, %v5907_v16  ;;  %v5265_v21 = vadd.f32 %v8260_v14, %v5217_v15  ;;  %v5113_v22 = vpop.f32.mrb[203].mxu1  ;;  %v5220_v52 = vld [vmem:[#allocation2 + $0x130] sm:$0xff] }
 0x290   : > { %6253 = vst.msk [vmem:[%s10155_s7 + $0x60] sm:$0xff] %vm288_vm1, %v6221_v4  ;;  %v6126_v25 = vmax.f32 %v6094_v5, 0.0  ;;  %v6029_v26 = vadd.f32 %v10124_v48, %v5990_v20  ;;  %5954 = vst.msk [vmem:[#allocation2 + $0xe0] sm:$0xff] %vm288_vm1, %v5906_v12  ;;  %v5264_v27 = vadd.f32 %v5216_v24, %v5113_v22  ;;  %v5861_v28 = vld [vmem:[#allocation2 + $0xf8] sm:$0xff]  ;;  %v8334_v11 = vpop.f32.mrb[202].mxu0 }
 0x291   : > { %v6223_v31 = vadd.f32 %v10147_v30, %v6189_v17  ;;  %v6096_v29 = vadd.f32 3.0, %v6030_v18  ;;  %5313 = vst.msk [vmem:[#allocation2 + $0x118] sm:$0xff] %vm288_vm1, %v5265_v21  ;;  %v5909_v32 = vadd.f32 %v8328_v44, %v5861_v28  ;;  %v5860_v13 = vld [vmem:[#allocation2 + $0xf0] sm:$0xff]  ;;  %v5761_v33 = vpop.f32.mrb[203].mxu0 }
 0x292   : > { %v6158_v36 = vmin.f32 %v6126_v25, 6.0  ;;  %v6095_v37 = vadd.f32 3.0, %v6029_v26  ;;  %v5992_v35 = vld [vmem:[#allocation2 + $0xd8] sm:$0xff]  ;;  %5312 = vst.msk [vmem:[#allocation2 + $0x110] sm:$0xff] %vm288_vm1, %v5264_v27  ;;  %v5908_v38 = vadd.f32 %v5860_v13, %v5741_v50  ;;  %v8263_v39 = vpop.f32.mrb[204].mxu1  ;;  %v6064_v50 = vmul.f32 %v10137_v57, %v6030_v18  ;;  %v5223_v25 = vld [vmem:[#allocation2 + $0x148] sm:$0xff] }
 0x293   : > { %6255 = vst.msk [vmem:[%s10155_s7 + $0x70] sm:$0xff] %vm288_vm1, %v6223_v31  ;;  %v6128_v41 = vmax.f32 %v6096_v29, 0.0  ;;  %v6031_v43 = vadd.f32 %v10124_v48, %v5992_v35  ;;  %5957 = vst.msk [vmem:[#allocation2 + $0xf8] sm:$0xff] %vm288_vm1, %v5909_v32  ;;  %v5267_v44 = vadd.f32 %v8263_v39, %v5219_v40  ;;  %v5123_v42 = vpop.f32.mrb[205].mxu1  ;;  %v6063_v2 = vmul.f32 %v10137_v57, %v6029_v26  ;;  %v5222_v29 = vld [vmem:[#allocation2 + $0x140] sm:$0xff] }
 0x294   : > { %v6190_v45 = vmul.f32 %v6158_v36, %v6062_v34  ;;  %v6127_v47 = vmax.f32 %v6095_v37, 0.0  ;;  %5956 = vst.msk [vmem:[#allocation2 + $0xf0] sm:$0xff] %vm288_vm1, %v5908_v38  ;;  %v5266_v49 = vadd.f32 %v5218_v46, %v5123_v42  ;;  %v5863_v51 = vld [vmem:[#allocation2 + $0x108] sm:$0xff]  ;;  %v8337_v58 = vpop.f32.mrb[204].mxu0 }
 0x295   : > { %v6160_v60 = vmin.f32 %v6128_v41, 6.0  ;;  %v6097_v53 = vadd.f32 3.0, %v6031_v43  ;;  %5315 = vst.msk [vmem:[#allocation2 + $0x128] sm:$0xff] %vm288_vm1, %v5267_v44  ;;  %v5911_v61 = vadd.f32 %v8331_v55, %v5863_v51  ;;  %v5862_v62 = vld [vmem:[#allocation2 + $0x100] sm:$0xff]  ;;  %v5771_v63 = vpop.f32.mrb[205].mxu0  ;;  %v6065_v9 = vmul.f32 %v10137_v57, %v6031_v43 }
 0x296   : > { %v6224_v0 = vadd.f32 %v10147_v30, %v6190_v45  ;;  %v6159_v6 = vmin.f32 %v6127_v47, 6.0  ;;  %5314 = vst.msk [vmem:[#allocation2 + $0x120] sm:$0xff] %vm288_vm1, %v5266_v49  ;;  %v5910_v1 = vadd.f32 %v5862_v62, %v5751_v19  ;;  %v8266_v7 = vpop.f32.mrb[206].mxu1  ;;  %v5225_v47 = vld [vmem:[#allocation2 + $0x158] sm:$0xff] }
 0x297   : > { %v6192_v10 = vmul.f32 %v6160_v60, %v6064_v50  ;;  %v6129_v54 = vmax.f32 %v6097_v53, 0.0  ;;  %v5993_v23 = vld [vmem:[#allocation2 + $0xe0] sm:$0xff]  ;;  %5959 = vst.msk [vmem:[#allocation2 + $0x108] sm:$0xff] %vm288_vm1, %v5911_v61  ;;  %v5269_v59 = vadd.f32 %v8266_v7, %v5221_v8  ;;  %v5133_v55 = vpop.f32.mrb[207].mxu1  ;;  %v5224_v60 = vld [vmem:[#allocation2 + $0x150] sm:$0xff] }
 0x298   : > { %6256 = vst.msk [vmem:[%s10155_s7 + $0x78] sm:$0xff] %vm288_vm1, %v6224_v0  ;;  %v6191_v56 = vmul.f32 %v6159_v6, %v6063_v2  ;;  %v6032_v16 = vadd.f32 %v10124_v48, %v5993_v23  ;;  %5958 = vst.msk [vmem:[#allocation2 + $0x100] sm:$0xff] %vm288_vm1, %v5910_v1  ;;  %v5268_v3 = vadd.f32 %v5220_v52, %v5133_v55  ;;  %v5865_v4 = vld [vmem:[#allocation2 + $0x118] sm:$0xff]  ;;  %v8340_v19 = vpop.f32.mrb[206].mxu0 }
 0x299   : > { %v6226_v5 = vadd.f32 %v10147_v30, %v6192_v10  ;;  %v6161_v12 = vmin.f32 %v6129_v54, 6.0  ;;  %5317 = vst.msk [vmem:[#allocation2 + $0x138] sm:$0xff] %vm288_vm1, %v5269_v59  ;;  %v5913_v14 = vadd.f32 %v8334_v11, %v5865_v4  ;;  %v5864_v15 = vld [vmem:[#allocation2 + $0x110] sm:$0xff]  ;;  %v5781_v17 = vpop.f32.mrb[207].mxu0 }
 0x29a   : > { %v6225_v18 = vadd.f32 %v10147_v30, %v6191_v56  ;;  %v6098_v20 = vadd.f32 3.0, %v6032_v16  ;;  %v5995_v21 = vld [vmem:[#allocation2 + $0xf8] sm:$0xff]  ;;  %5316 = vst.msk [vmem:[#allocation2 + $0x130] sm:$0xff] %vm288_vm1, %v5268_v3  ;;  %v5912_v22 = vadd.f32 %v5864_v15, %v5761_v33  ;;  %v8269_v24 = vpop.f32.mrb[208].mxu1  ;;  %v6066_v41 = vmul.f32 %v10137_v57, %v6032_v16  ;;  %v5227_v56 = vld [vmem:[#allocation2 + $0x168] sm:$0xff] }
 0x29b   : > { %6258 = vst.msk [vmem:[%s10155_s7 + $0x88] sm:$0xff] %vm288_vm1, %v6226_v5  ;;  %v6193_v26 = vmul.f32 %v6161_v12, %v6065_v9  ;;  %v6034_v27 = vadd.f32 %v10124_v48, %v5995_v21  ;;  %v5994_v28 = vld [vmem:[#allocation2 + $0xf0] sm:$0xff]  ;;  %5961 = vst.msk [vmem:[#allocation2 + $0x118] sm:$0xff] %vm288_vm1, %v5913_v14  ;;  %v5271_v11 = vadd.f32 %v8269_v24, %v5223_v25  ;;  %v5143_v31 = vpop.f32.mrb[209].mxu1  ;;  %v5226_v9 = vld [vmem:[#allocation2 + $0x160] sm:$0xff] }
 0x29c   : > { %6257 = vst.msk [vmem:[%s10155_s7 + $0x80] sm:$0xff] %vm288_vm1, %v6225_v18  ;;  %v6130_v32 = vmax.f32 %v6098_v20, 0.0  ;;  %v6033_v13 = vadd.f32 %v10124_v48, %v5994_v28  ;;  %5960 = vst.msk [vmem:[#allocation2 + $0x110] sm:$0xff] %vm288_vm1, %v5912_v22  ;;  %v5270_v33 = vadd.f32 %v5222_v29, %v5143_v31  ;;  %v5867_v34 = vld [vmem:[#allocation2 + $0x128] sm:$0xff]  ;;  %v8343_v36 = vpop.f32.mrb[208].mxu0  ;;  %v5229_v29 = vld [vmem:[#allocation2 + $0x178] sm:$0xff] }
 0x29d   : > { %v6227_v37 = vadd.f32 %v10147_v30, %v6193_v26  ;;  %v6100_v35 = vadd.f32 3.0, %v6034_v27  ;;  %5319 = vst.msk [vmem:[#allocation2 + $0x148] sm:$0xff] %vm288_vm1, %v5271_v11  ;;  %v5915_v38 = vadd.f32 %v8337_v58, %v5867_v34  ;;  %v5866_v39 = vld [vmem:[#allocation2 + $0x120] sm:$0xff]  ;;  %v5791_v40 = vpop.f32.mrb[209].mxu0 }
 0x29e   : > { %v6162_v43 = vmin.f32 %v6130_v32, 6.0  ;;  %v6099_v44 = vadd.f32 3.0, %v6033_v13  ;;  %v5996_v42 = vld [vmem:[#allocation2 + $0x108] sm:$0xff]  ;;  %5318 = vst.msk [vmem:[#allocation2 + $0x140] sm:$0xff] %vm288_vm1, %v5270_v33  ;;  %v5914_v46 = vadd.f32 %v5866_v39, %v5771_v63  ;;  %v8272_v45 = vpop.f32.mrb[210].mxu1  ;;  %v6068_v63 = vmul.f32 %v10137_v57, %v6034_v27 }
 0x29f   : > { %6259 = vst.msk [vmem:[%s10155_s7 + $0x90] sm:$0xff] %vm288_vm1, %v6227_v37  ;;  %v6132_v49 = vmax.f32 %v6100_v35, 0.0  ;;  %v6035_v51 = vadd.f32 %v10124_v48, %v5996_v42  ;;  %5963 = vst.msk [vmem:[#allocation2 + $0x128] sm:$0xff] %vm288_vm1, %v5915_v38  ;;  %v5273_v58 = vadd.f32 %v8272_v45, %v5225_v47  ;;  %v5153_v50 = vpop.f32.mrb[211].mxu1  ;;  %v6067_v23 = vmul.f32 %v10137_v57, %v6033_v13  ;;  %v10331_v13 = vld [vmem:[%s10404_s2] ss:$0 sm:$0xff] }
 0x2a0   : > { %v6194_v53 = vmul.f32 %v6162_v43, %v6066_v41  ;;  %v6131_v61 = vmax.f32 %v6099_v44, 0.0  ;;  %5962 = vst.msk [vmem:[#allocation2 + $0x120] sm:$0xff] %vm288_vm1, %v5914_v46  ;;  %v5272_v62 = vadd.f32 %v5224_v60, %v5153_v50  ;;  %v5869_v0 = vld [vmem:[#allocation2 + $0x138] sm:$0xff]  ;;  %v8346_v2 = vpop.f32.mrb[210].mxu0  ;;  %v5228_v35 = vld [vmem:[#allocation2 + $0x170] sm:$0xff] }
 0x2a1   : > { %v6164_v6 = vmin.f32 %v6132_v49, 6.0  ;;  %v6101_v1 = vadd.f32 3.0, %v6035_v51  ;;  %5321 = vst.msk [vmem:[#allocation2 + $0x158] sm:$0xff] %vm288_vm1, %v5273_v58  ;;  %v5917_v7 = vadd.f32 %v8340_v19, %v5869_v0  ;;  %v5868_v8 = vld [vmem:[#allocation2 + $0x130] sm:$0xff]  ;;  %v10311_v10 = vpop.f32.mrb[211].mxu0  ;;  %v6069_v21 = vmul.f32 %v10137_v57, %v6035_v51 }
 0x2a2   : > { %v6228_v54 = vadd.f32 %v10147_v30, %v6194_v53  ;;  %v6163_v59 = vmin.f32 %v6131_v61, 6.0  ;;  %5320 = vst.msk [vmem:[#allocation2 + $0x150] sm:$0xff] %vm288_vm1, %v5272_v62  ;;  %v5916_v55 = vadd.f32 %v5868_v8, %v5781_v17  ;;  %v8275_v52 = vpop.f32.mrb[212].mxu1 }
 0x2a3   : > { %v6196_v16 = vmul.f32 %v6164_v6, %v6068_v63  ;;  %v6133_v3 = vmax.f32 %v6101_v1, 0.0  ;;  %v5997_v4 = vld [vmem:[#allocation2 + $0x110] sm:$0xff]  ;;  %5965 = vst.msk [vmem:[#allocation2 + $0x138] sm:$0xff] %vm288_vm1, %v5917_v7  ;;  %v5275_v19 = vadd.f32 %v8275_v52, %v5227_v56  ;;  %v5163_v5 = vpop.f32.mrb[213].mxu1 }
 0x2a4   : > { %6260 = vst.msk [vmem:[%s10155_s7 + $0x98] sm:$0xff] %vm288_vm1, %v6228_v54  ;;  %v6195_v12 = vmul.f32 %v6163_v59, %v6067_v23  ;;  %v6036_v14 = vadd.f32 %v10124_v48, %v5997_v4  ;;  %5964 = vst.msk [vmem:[#allocation2 + $0x130] sm:$0xff] %vm288_vm1, %v5916_v55  ;;  %v5274_v15 = vadd.f32 %v5226_v9, %v5163_v5  ;;  %v5871_v18 = vld [vmem:[#allocation2 + $0x148] sm:$0xff]  ;;  %v8349_v17 = vpop.f32.mrb[212].mxu0 }
 0x2a5   : > { %v6230_v20 = vadd.f32 %v10147_v30, %v6196_v16  ;;  %v6165_v22 = vmin.f32 %v6133_v3, 6.0  ;;  %5323 = vst.msk [vmem:[#allocation2 + $0x168] sm:$0xff] %vm288_vm1, %v5275_v19  ;;  %v5919_v24 = vadd.f32 %v8343_v36, %v5871_v18  ;;  %v5870_v25 = vld [vmem:[#allocation2 + $0x140] sm:$0xff]  ;;  %v5811_v26 = vpop.f32.mrb[213].mxu0 }
 0x2a6   : > { %v6229_v27 = vadd.f32 %v10147_v30, %v6195_v12  ;;  %v6102_v48 = vadd.f32 3.0, %v6036_v14  ;;  %v5999_v28 = vld [vmem:[#allocation2 + $0x128] sm:$0xff]  ;;  %5322 = vst.msk [vmem:[#allocation2 + $0x160] sm:$0xff] %vm288_vm1, %v5274_v15  ;;  %v5918_v11 = vadd.f32 %v5870_v25, %v5791_v40  ;;  %v8278_v31 = vpop.f32.mrb[214].mxu1  ;;  %v6070_v49 = vmul.f32 %v10137_v57, %v6036_v14 }
 0x2a7   : > { %6262 = vst.msk [vmem:[%s10155_s7 + $0xa8] sm:$0xff] %vm288_vm1, %v6230_v20  ;;  %v6197_v32 = vmul.f32 %v6165_v22, %v6069_v21  ;;  %v6038_v33 = vadd.f32 %v10331_v13, %v5999_v28  ;;  %v5998_v34 = vld [vmem:[#allocation2 + $0x120] sm:$0xff]  ;;  %5967 = vst.msk [vmem:[#allocation2 + $0x148] sm:$0xff] %vm288_vm1, %v5919_v24  ;;  %v5277_v36 = vadd.f32 %v8278_v31, %v5229_v29  ;;  %v5173_v37 = vpop.f32.mrb[215].mxu1 }
 0x2a8   : > { %6261 = vst.msk [vmem:[%s10155_s7 + $0xa0] sm:$0xff] %vm288_vm1, %v6229_v27  ;;  %v6134_v38 = vmax.f32 %v6102_v48, 0.0  ;;  %v6037_v39 = vadd.f32 %v10331_v13, %v5998_v34  ;;  %5966 = vst.msk [vmem:[#allocation2 + $0x140] sm:$0xff] %vm288_vm1, %v5918_v11  ;;  %v5276_v40 = vadd.f32 %v5228_v35, %v5173_v37  ;;  %v5873_v41 = vld [vmem:[#allocation2 + $0x158] sm:$0xff]  ;;  %v8352_v43 = vpop.f32.mrb[214].mxu0 }
 0x2a9   : > { %v6231_v44 = vadd.f32 %v10147_v30, %v6197_v32  ;;  %v6104_v42 = vadd.f32 3.0, %v6038_v33  ;;  %5325 = vst.msk [vmem:[#allocation2 + $0x178] sm:$0xff] %vm288_vm1, %v5277_v36  ;;  %v5921_v46 = vadd.f32 %v8346_v2, %v5873_v41  ;;  %v5872_v45 = vld [vmem:[#allocation2 + $0x150] sm:$0xff]  ;;  %v5821_v47 = vpop.f32.mrb[215].mxu0  ;;  %v6072_v63 = vmul.f32 %v10137_v57, %v6038_v33 }
 0x2aa   : > { %v6166_v51 = vmin.f32 %v6134_v38, 6.0  ;;  %v6103_v58 = vadd.f32 3.0, %v6037_v39  ;;  %v6000_v50 = vld [vmem:[#allocation2 + $0x138] sm:$0xff]  ;;  %5324 = vst.msk [vmem:[#allocation2 + $0x170] sm:$0xff] %vm288_vm1, %v5276_v40  ;;  %v5920_v60 = vadd.f32 %v5872_v45, %v10311_v10  ;;  %v6071_v54 = vmul.f32 %v10137_v57, %v6037_v39 }
 0x2ab   : > { %6263 = vst.msk [vmem:[%s10155_s7 + $0xb0] sm:$0xff] %vm288_vm1, %v6231_v44  ;;  %v6136_v53 = vmax.f32 %v6104_v42, 0.0  ;;  %v6039_v61 = vadd.f32 %v10331_v13, %v6000_v50  ;;  %5969 = vst.msk [vmem:[#allocation2 + $0x158] sm:$0xff] %vm288_vm1, %v5921_v46 }
 0x2ac   : > { %v6198_v62 = vmul.f32 %v6166_v51, %v6070_v49  ;;  %v6135_v0 = vmax.f32 %v6103_v58, 0.0  ;;  %5968 = vst.msk [vmem:[#allocation2 + $0x150] sm:$0xff] %vm288_vm1, %v5920_v60  ;;  %v5875_v2 = vld [vmem:[#allocation2 + $0x168] sm:$0xff] }
 0x2ad   : > { %v6168_v6 = vmin.f32 %v6136_v53, 6.0  ;;  %v6105_v1 = vadd.f32 3.0, %v6039_v61  ;;  %v5923_v7 = vadd.f32 %v8349_v17, %v5875_v2  ;;  %v5874_v8 = vld [vmem:[#allocation2 + $0x160] sm:$0xff]  ;;  %v6073_v5 = vmul.f32 %v10137_v57, %v6039_v61 }
 0x2ae   : > { %v6232_v10 = vadd.f32 %v10147_v30, %v6198_v62  ;;  %v6167_v23 = vmin.f32 %v6135_v0, 6.0  ;;  %v5922_v59 = vadd.f32 %v5874_v8, %v5811_v26 }
 0x2af   : > { %v6200_v55 = vmul.f32 %v6168_v6, %v6072_v63  ;;  %v6137_v52 = vmax.f32 %v6105_v1, 0.0  ;;  %v6001_v56 = vld [vmem:[#allocation2 + $0x140] sm:$0xff]  ;;  %5971 = vst.msk [vmem:[#allocation2 + $0x168] sm:$0xff] %vm288_vm1, %v5923_v7 }
 0x2b0   : > { %6264 = vst.msk [vmem:[%s10155_s7 + $0xb8] sm:$0xff] %vm288_vm1, %v6232_v10  ;;  %v6199_v16 = vmul.f32 %v6167_v23, %v6071_v54  ;;  %v6040_v3 = vadd.f32 %v10331_v13, %v6001_v56  ;;  %5970 = vst.msk [vmem:[#allocation2 + $0x160] sm:$0xff] %vm288_vm1, %v5922_v59  ;;  %v5877_v4 = vld [vmem:[#allocation2 + $0x178] sm:$0xff] }
 0x2b1   : > { %v6234_v19 = vadd.f32 %v10147_v30, %v6200_v55  ;;  %v6169_v9 = vmin.f32 %v6137_v52, 6.0  ;;  %v5925_v12 = vadd.f32 %v8352_v43, %v5877_v4  ;;  %v5876_v14 = vld [vmem:[#allocation2 + $0x170] sm:$0xff] }
 0x2b2   : > { %v6233_v15 = vadd.f32 %v10147_v30, %v6199_v16  ;;  %v6106_v18 = vadd.f32 3.0, %v6040_v3  ;;  %v6003_v17 = vld [vmem:[#allocation2 + $0x158] sm:$0xff]  ;;  %v5924_v20 = vadd.f32 %v5876_v14, %v5821_v47  ;;  %v6074_v28 = vmul.f32 %v10137_v57, %v6040_v3 }
 0x2b3   : > { %6266 = vst.msk [vmem:[%s10155_s7 + $0xc8] sm:$0xff] %vm288_vm1, %v6234_v19  ;;  %v6201_v21 = vmul.f32 %v6169_v9, %v6073_v5  ;;  %v6042_v22 = vadd.f32 %v10331_v13, %v6003_v17  ;;  %v6002_v24 = vld [vmem:[#allocation2 + $0x150] sm:$0xff]  ;;  %5973 = vst.msk [vmem:[#allocation2 + $0x178] sm:$0xff] %vm288_vm1, %v5925_v12 }
 0x2b4   : > { %6265 = vst.msk [vmem:[%s10155_s7 + $0xc0] sm:$0xff] %vm288_vm1, %v6233_v15  ;;  %v6138_v25 = vmax.f32 %v6106_v18, 0.0  ;;  %v6041_v26 = vadd.f32 %v10331_v13, %v6002_v24  ;;  %5972 = vst.msk [vmem:[#allocation2 + $0x170] sm:$0xff] %vm288_vm1, %v5924_v20 }
 0x2b5   : > { %v6235_v27 = vadd.f32 %v10147_v30, %v6201_v21  ;;  %v6108_v48 = vadd.f32 3.0, %v6042_v22  ;;  %v6076_v37 = vmul.f32 %v10137_v57, %v6042_v22 }
 0x2b6   : > { %v6170_v11 = vmin.f32 %v6138_v25, 6.0  ;;  %v6107_v31 = vadd.f32 3.0, %v6041_v26  ;;  %v6004_v29 = vld [vmem:[#allocation2 + $0x168] sm:$0xff]  ;;  %v6075_v40 = vmul.f32 %v10137_v57, %v6041_v26 }
 0x2b7   : > { %6267 = vst.msk [vmem:[%s10155_s7 + $0xd0] sm:$0xff] %vm288_vm1, %v6235_v27  ;;  %v6140_v32 = vmax.f32 %v6108_v48, 0.0  ;;  %v6043_v33 = vadd.f32 %v10331_v13, %v6004_v29 }
 0x2b8   : > { %v6202_v34 = vmul.f32 %v6170_v11, %v6074_v28  ;;  %v6139_v36 = vmax.f32 %v6107_v31, 0.0 }
 0x2b9   : > { %v6172_v35 = vmin.f32 %v6140_v32, 6.0  ;;  %v6109_v38 = vadd.f32 3.0, %v6043_v33  ;;  %v6077_v49 = vmul.f32 %v10137_v57, %v6043_v33 }
 0x2ba   : > { %v6236_v39 = vadd.f32 %v10147_v30, %v6202_v34  ;;  %v6171_v41 = vmin.f32 %v6139_v36, 6.0 }
 0x2bb   : > { %v6204_v43 = vmul.f32 %v6172_v35, %v6076_v37  ;;  %v6141_v44 = vmax.f32 %v6109_v38, 0.0  ;;  %v6005_v42 = vld [vmem:[#allocation2 + $0x170] sm:$0xff] }
 0x2bc   : > { %6268 = vst.msk [vmem:[%s10155_s7 + $0xd8] sm:$0xff] %vm288_vm1, %v6236_v39  ;;  %v6203_v46 = vmul.f32 %v6171_v41, %v6075_v40  ;;  %v6044_v45 = vadd.f32 %v10331_v13, %v6005_v42 }
 0x2bd   : > { %v6238_v47 = vadd.f32 %v10147_v30, %v6204_v43  ;;  %v6173_v51 = vmin.f32 %v6141_v44, 6.0 }
 0x2be   : > { %v6237_v58 = vadd.f32 %v10147_v30, %v6203_v46  ;;  %v6110_v50 = vadd.f32 3.0, %v6044_v45  ;;  %v6078_v62 = vmul.f32 %v10137_v57, %v6044_v45 }
 0x2bf   : > { %6270 = vst.msk [vmem:[%s10155_s7 + $0xe8] sm:$0xff] %vm288_vm1, %v6238_v47  ;;  %v6205_v60 = vmul.f32 %v6173_v51, %v6077_v49 }
 0x2c0   : > { %6269 = vst.msk [vmem:[%s10155_s7 + $0xe0] sm:$0xff] %vm288_vm1, %v6237_v58  ;;  %v6142_v53 = vmax.f32 %v6110_v50, 0.0 }
 0x2c1   : > { %v6239_v61 = vadd.f32 %v10147_v30, %v6205_v60 }
 0x2c2   : > { %v6174_v13 = vmin.f32 %v6142_v53, 6.0 }
 0x2c3   : > { %6271 = vst.msk [vmem:[%s10155_s7 + $0xf0] sm:$0xff] %vm288_vm1, %v6239_v61 }
 0x2c4   : > { %v6206_v0 = vmul.f32 %v6174_v13, %v6078_v62 }
 0x2c6   : > { %v6240_v2 = vadd.f32 %v10147_v30, %v6206_v0 }
 0x2c8   : > { %6272 = vst.msk [vmem:[%s10155_s7 + $0xf8] sm:$0xff] %vm288_vm1, %v6240_v2 }
 0x2c9 PF: > { %s15_s17 = sadd.s32 1, %s8433_s17   ;;  %s10562_s15 = smov %s8429_s16 }
 0x2ca   : > { %p12_p2 = scmp.ge.s32.totalorder %s15_s17, 4   ;;  %s10563_s16 = smov %s10565_s19 }
 0x2cc   :  { %14 = sbr.rel (!%p12_p2) target bundleno = 2 (0x2), region = 88 }
 0x2d3   :  { %6305 = vsyncpa [#allocation4], 1 }
 0x2d4   :  { %6307 = vsyncpa [#allocation4 + $0x1], 1 }

// kernel: tpu_custom_call.1
= control target key start
LH: loop header
LB: loop body
LE: loop exit
PB: predicated region body
PF: predicated region fallthrough
CT: control target
= control target key end

     0   :  { %9 = vsyncpa [#allocation4], 0  ;;  %s8461_s15 = smov 0   ;;  %s8463_s16 = smov 0   ;;  %s10402_s0 = inlined_call_operand.vmem [shape: f32[2,456,4], index: 0, kind: input, shape index: {}]   ;;  %s10403_s1 = inlined_call_operand.vmem [shape: f32[9,4,4], index: 1, kind: input, shape index: {}]   ;;  %s10404_s2 = inlined_call_operand.vmem [shape: f32[1,4], index: 2, kind: input, shape index: {}]   ;;  %s10405_s3 = inlined_call_operand.vmem [shape: f32[2], index: 3, kind: input, shape index: {}]   ;;  %s10406_s4 = inlined_call_operand.vmem [shape: f32[2,16,16,4], index: 4, kind: output, shape index: {}]  }
   0x1   :  { %s8465_s17 = smov 0  }
   0x2 LB: > { %s6398_s18 = sadd.s32 4294967295, %s8433_s17   ;;  %s27_s19 = sadd.s32 1, %s8429_s16  ;;  %s8433_s17 = sphi %s8465_s17, %s15_s17   ;;  %s8429_s16 = sphi %s8463_s16, %s10563_s16   ;;  %s8425_s15 = sphi %s8461_s15, %s10562_s15  }
   0x3   : > { %p29_p0 = scmp.ge.s32.totalorder %s27_s19, 2  ;;  %p6400_p1 = scmp.ge.s32.totalorder %s8433_s17, 1 }
   0x4   : > { %p149_p2 = scmp.lt.s32.totalorder %s8433_s17, 3  ;;  %p8486_p4 = scmp.eq.s32.totalorder %s6398_s18, 0 }
   0x5   : > { %s10565_s19 = smov (%p29_p0, %s27_s19), 0  ;;  %s168_s24 = sshll.u32 %s10405_s3, 4  ;;  %s169_s24 = int_to_ptr.vmem [resolvable:$true] %s168_s24 }
   0x6   : > { %p8482_p3 = pnand %p6400_p1, %p149_p2  ;;  %s8392_s25 = scalar_lea.vmem %s169_s24, 16 }
   0x7   : > { %p8393_p7 = scmp.ne.s32.totalorder %s169_s24, %s8392_s25  ;;  %p8400_p11 = scmp.lt.s32.totalorder %s169_s24, %s169_s24 }
   0x8   : > { %p8360_p5 = pneg %p8482_p3  ;;  %p8401_p12 = scmp.lt.s32.totalorder %s8392_s25, %s8392_s25 }
   0xa   : > { %p8361_p6 = pnand %p8486_p4, %p8360_p5  ;;  %p8402_p13 = por %p8401_p12, %p8400_p11 }
   0xc   : > { %p8394_p8 = pneg %p8361_p6 }
   0xe   : > { %p8395_p9 = pnand %p8394_p8, %p8393_p7 }
  0x10   : > { %p8396_p10 = pneg %p8395_p9 }
  0x12   : > { %p8403_p0 = pnand %p8402_p13, %p8396_p10 }
  0x14   : > { %8406 = shalt.err (!%p8403_p0)
}
  0x15   : > { %s8435_s26 = smov [#allocation3]   ;;  %189 = sbr.rel (%p8482_p3) target bundleno = 713 (0x2c9), region = 36 }
  0x16   : > { %8363 = dma.vmem_to_smem (!%p8361_p6), %s169_s24, 16, %s8435_s26, [#allocation4]  }
  0x1c   : > { %8420 = dma.done.wait (%p8486_p4), [#allocation4], 16  }
  0x1d   : > { %8422 = vsyncadd (%p8486_p4), [#allocation4], 4294967280 }
  0x1e   : > { %195 = sfence }
  0x1f   : > { %v287_v0 = vld [vmem:[%s10403_s1] sm:$0xf]  ;;  %vm433_vm0 = vcmask 1043456   ;;  %p221_p1 = scmp.lt.s32.totalorder %s8425_s15, 1  ;;  %v6505_v1 = vld [vmem:[%s10403_s1 + $0x4] sm:$0xf] }
  0x20   : > { %8353 = vmatprep.subr.msk.mxu1 %vm433_vm0, %v287_v0  ;;  %7687 = vmatprep.subr.msk.mxu0 %vm433_vm0, %v287_v0  ;;  %v6603_v2 = vld [vmem:[%s10403_s1 + $0x8] sm:$0xf]  ;;  %vm288_vm1 = vcmask 31744   ;;  %v8543_v7 = vld [vmem:[%s10403_s1 + $0xc] sm:$0xf]  ;;  %s10117_s27 = sld [smem:[#allocation3]] }
  0x21   : > { %8354 = vmatpush3.msk.msra.mxu1 %vm433_vm0, %v287_v0  ;;  %s10567_s15 = smov (!%p221_p1, %s8425_s15), 1  ;;  %7688 = vmatpush3.msk.msra.mxu0 %vm433_vm0, %v287_v0  ;;  %v8559_v11 = vld [vmem:[%s10403_s1 + $0x10] sm:$0xf]  ;;  %v8785_v58 = vld [vmem:[%s10403_s1 + $0x14] sm:$0xf]  ;;  %s10128_s30 = sld [smem:[#allocation3 + $0x1]] }
  0x22   : > { %7761 = vmatprep.subr.msk.mxu1 %vm433_vm0, %v6505_v1  ;;  %7835 = vmatprep.subr.msk.mxu0 %vm433_vm0, %v6603_v2  ;;  %s8355_s7 = smul.u32 456, %s10567_s15  ;;  %v8798_v61 = vld [vmem:[%s10403_s1 + $0x18] sm:$0xf]  ;;  %s7245_s5 = sshll.u32 %s10567_s15, 8 }
  0x24   : > { %s8526_s10 = scalar_lea.vmem %s10402_s0, %s8355_s7  ;;  %s10155_s7 = scalar_lea.vmem %s10406_s4, %s7245_s5 }
  0x25   : > { %v8529_v3 = vld [vmem:[%s8526_s10 + $0xc0] sm:$0xff]  ;;  %v8532_v4 = vld [vmem:[%s8526_s10 + $0xc8] sm:$0xff]  ;;  %v8535_v5 = vld [vmem:[%s8526_s10 + $0xd0] sm:$0xff] }
  0x26   : > { %7725 = vmatprep.mubr.msk.f32.mxu1 %vm288_vm1, %v8529_v3  ;;  %v239_v6 = vld [vmem:[%s8526_s10] sm:$0xff]  ;;  %v240_v8 = vld [vmem:[%s8526_s10 + $0x8] sm:$0xff]  ;;  %v8553_v9 = vld [vmem:[%s8526_s10 + $0xd8] sm:$0xff] }
  0x27   : > { %7726 = vmatmul.mubr.msk.f32.vlgmr.msra.gmra.mrb[0].mxu1 %vm288_vm1, %v8532_v4  ;;  %7689 = vmatprep.mubr.msk.f32.mxu0 %vm288_vm1, %v239_v6  ;;  %v241_v10 = vld [vmem:[%s8526_s10 + $0x10] sm:$0xff]  ;;  %v8562_v12 = vld [vmem:[%s8526_s10 + $0xe0] sm:$0xff]  ;;  %v8570_v13 = vld [vmem:[%s8526_s10 + $0x18] sm:$0xff] }
  0x28   : > { %7762 = vmatpush3.msk.msra.mxu1 %vm433_vm0, %v6505_v1  ;;  %7728 = vmatprep.mubr.msk.f32.mxu1 %vm288_vm1, %v8535_v5  ;;  %v8575_v14 = vld [vmem:[%s8526_s10 + $0x20] sm:$0xff]  ;;  %v8582_v15 = vld [vmem:[%s8526_s10 + $0xe8] sm:$0xff]  ;;  %v8585_v16 = vld [vmem:[%s8526_s10 + $0xf0] sm:$0xff] }
  0x29   : > { %7690 = vmatmul.mubr.msk.f32.vlgmr.msra.gmra.mrb[0].mxu0 %vm288_vm1, %v240_v8  ;;  %7909 = vmatprep.subr.msk.mxu1 %vm433_vm0, %v8543_v7  ;;  %10460 = vst [vmem:[#allocation6_spill] sm:$0xff] %v8585_v16  ;;  %v8592_v17 = vld [vmem:[%s8526_s10 + $0x28] sm:$0xff]  ;;  %v8597_v18 = vld [vmem:[%s8526_s10 + $0x30] sm:$0xff]  ;;  %v8602_v19 = vld [vmem:[%s8526_s10 + $0xf8] sm:$0xff] }
  0x2a   : > { %7836 = vmatpush3.msk.msra.mxu0 %vm433_vm0, %v6603_v2  ;;  %7692 = vmatprep.mubr.msk.f32.mxu0 %vm288_vm1, %v241_v10  ;;  %10461 = vst [vmem:[#allocation7_spill] sm:$0xff] %v8602_v19  ;;  %v8605_v20 = vld [vmem:[%s8526_s10 + $0x100] sm:$0xff]  ;;  %v8612_v21 = vld [vmem:[%s8526_s10 + $0x38] sm:$0xff]  ;;  %v8622_v23 = vld [vmem:[%s8526_s10 + $0x108] sm:$0xff] }
  0x2b   : > { %7729 = vmatmul.mubr.msk.f32.gmra.mrb[2].mxu1 %vm288_vm1, %v8553_v9  ;;  %7983 = vmatprep.subr.msk.mxu0 %vm433_vm0, %v8559_v11  ;;  %10462 = vst [vmem:[#allocation8_spill] sm:$0xff] %v8605_v20  ;;  %v8617_v22 = vld [vmem:[%s8526_s10 + $0x40] sm:$0xff]  ;;  %10463 = vst [vmem:[#allocation9_spill] sm:$0xff] %v8622_v23  ;;  %v8625_v24 = vld [vmem:[%s8526_s10 + $0x110] sm:$0xff] }
  0x2c   : > { %7731 = vmatprep.mubr.msk.f32.mxu1 %vm288_vm1, %v8562_v12  ;;  %10464 = vst [vmem:[#allocation10_spill] sm:$0xff] %v8625_v24  ;;  %v8632_v25 = vld [vmem:[%s8526_s10 + $0x48] sm:$0xff]  ;;  %v8637_v26 = vld [vmem:[%s8526_s10 + $0x50] sm:$0xff]  ;;  %v8642_v27 = vld [vmem:[%s8526_s10 + $0x118] sm:$0xff] }
  0x2d   : > { %7693 = vmatmul.mubr.msk.f32.gmra.mrb[2].mxu0 %vm288_vm1, %v8570_v13  ;;  %10465 = vst [vmem:[#allocation11_spill] sm:$0xff] %v8642_v27  ;;  %v8645_v28 = vld [vmem:[%s8526_s10 + $0x120] sm:$0xff]  ;;  %v8652_v29 = vld [vmem:[%s8526_s10 + $0x58] sm:$0xff]  ;;  %v8662_v31 = vld [vmem:[%s8526_s10 + $0x128] sm:$0xff] }
  0x2e   : > { %7695 = vmatprep.mubr.msk.f32.mxu0 %vm288_vm1, %v8575_v14  ;;  %10466 = vst [vmem:[#allocation12_spill] sm:$0xff] %v8645_v28  ;;  %v8657_v30 = vld [vmem:[%s8526_s10 + $0x60] sm:$0xff]  ;;  %10467 = vst [vmem:[#allocation13_spill] sm:$0xff] %v8662_v31  ;;  %v8665_v32 = vld [vmem:[%s8526_s10 + $0x130] sm:$0xff] }
  0x2f   : > { %7732 = vmatmul.mubr.msk.f32.gmra.mrb[4].mxu1 %vm288_vm1, %v8582_v15  ;;  %10468 = vst [vmem:[#allocation14_spill] sm:$0xff] %v8665_v32  ;;  %v8672_v33 = vld [vmem:[%s8526_s10 + $0x68] sm:$0xff]  ;;  %v8677_v34 = vld [vmem:[%s8526_s10 + $0x70] sm:$0xff]  ;;  %v8682_v35 = vld [vmem:[%s8526_s10 + $0x138] sm:$0xff] }
  0x30   : > { %7734 = vmatprep.mubr.msk.f32.mxu1 %vm288_vm1, %v8585_v16  ;;  %10469 = vst [vmem:[#allocation15_spill] sm:$0xff] %v8682_v35  ;;  %v8685_v36 = vld [vmem:[%s8526_s10 + $0x140] sm:$0xff]  ;;  %v8692_v37 = vld [vmem:[%s8526_s10 + $0x78] sm:$0xff]  ;;  %v8702_v39 = vld [vmem:[%s8526_s10 + $0x148] sm:$0xff] }
  0x31   : > { %7696 = vmatmul.mubr.msk.f32.gmra.mrb[4].mxu0 %vm288_vm1, %v8592_v17  ;;  %10470 = vst [vmem:[#allocation16_spill] sm:$0xff] %v8685_v36  ;;  %v8697_v38 = vld [vmem:[%s8526_s10 + $0x80] sm:$0xff]  ;;  %10471 = vst [vmem:[#allocation17_spill] sm:$0xff] %v8702_v39  ;;  %v8705_v40 = vld [vmem:[%s8526_s10 + $0x150] sm:$0xff] }
  0x32   : > { %7698 = vmatprep.mubr.msk.f32.mxu0 %vm288_vm1, %v8597_v18  ;;  %10472 = vst [vmem:[#allocation18_spill] sm:$0xff] %v8705_v40  ;;  %v8712_v41 = vld [vmem:[%s8526_s10 + $0x88] sm:$0xff]  ;;  %v8717_v42 = vld [vmem:[%s8526_s10 + $0x90] sm:$0xff]  ;;  %v8722_v43 = vld [vmem:[%s8526_s10 + $0x158] sm:$0xff] }
  0x33   : > { %7735 = vmatmul.mubr.msk.f32.gmra.mrb[6].mxu1 %vm288_vm1, %v8602_v19  ;;  %10473 = vst [vmem:[#allocation19_spill] sm:$0xff] %v8722_v43  ;;  %v8725_v44 = vld [vmem:[%s8526_s10 + $0x160] sm:$0xff]  ;;  %v8732_v45 = vld [vmem:[%s8526_s10 + $0x98] sm:$0xff]  ;;  %v8742_v47 = vld [vmem:[%s8526_s10 + $0x168] sm:$0xff] }
  0x34   : > { %7737 = vmatprep.mubr.msk.f32.mxu1 %vm288_vm1, %v8605_v20  ;;  %10474 = vst [vmem:[#allocation20_spill] sm:$0xff] %v8725_v44  ;;  %v8737_v46 = vld [vmem:[%s8526_s10 + $0xa0] sm:$0xff]  ;;  %10475 = vst [vmem:[#allocation21_spill] sm:$0xff] %v8742_v47  ;;  %v8745_v48 = vld [vmem:[%s8526_s10 + $0x170] sm:$0xff] }
  0x35   : > { %7699 = vmatmul.mubr.msk.f32.gmra.mrb[6].mxu0 %vm288_vm1, %v8612_v21  ;;  %10476 = vst [vmem:[#allocation22_spill] sm:$0xff] %v8745_v48  ;;  %v8752_v49 = vld [vmem:[%s8526_s10 + $0xa8] sm:$0xff]  ;;  %v8757_v50 = vld [vmem:[%s8526_s10 + $0xb0] sm:$0xff]  ;;  %v8762_v51 = vld [vmem:[%s8526_s10 + $0x178] sm:$0xff] }
  0x36   : > { %7701 = vmatprep.mubr.msk.f32.mxu0 %vm288_vm1, %v8617_v22  ;;  %10477 = vst [vmem:[#allocation23_spill] sm:$0xff] %v8762_v51  ;;  %v6457_v52 = vld [vmem:[%s8526_s10 + $0x1] sm:$0xff]  ;;  %v8770_v53 = vld [vmem:[%s8526_s10 + $0xb8] sm:$0xff]  ;;  %v6458_v55 = vld [vmem:[%s8526_s10 + $0x9] sm:$0xff] }
  0x37   : > { %7738 = vmatmul.mubr.msk.f32.gmra.mrb[8].mxu1 %vm288_vm1, %v8622_v23  ;;  %v6555_v54 = vld [vmem:[%s8526_s10 + $0x2] sm:$0xff]  ;;  %v6459_v56 = vld [vmem:[%s8526_s10 + $0x11] sm:$0xff]  ;;  %v8793_v60 = vld [vmem:[%s8526_s10 + $0x19] sm:$0xff] }
  0x38   : > { %7740 = vmatprep.mubr.msk.f32.mxu1 %vm288_vm1, %v8625_v24  ;;  %v6556_v57 = vld [vmem:[%s8526_s10 + $0xa] sm:$0xff]  ;;  %v6557_v59 = vld [vmem:[%s8526_s10 + $0x12] sm:$0xff]  ;;  %v8801_v62 = vld [vmem:[%s8526_s10 + $0x21] sm:$0xff] }
  0x39   : > { %7702 = vmatmul.mubr.msk.f32.gmra.mrb[8].mxu0 %vm288_vm1, %v8632_v25  ;;  %v8810_v63 = vld [vmem:[%s8526_s10 + $0x1a] sm:$0xff]  ;;  %v8815_v0 = vld [vmem:[%s8526_s10 + $0x22] sm:$0xff]  ;;  %v8825_v2 = vld [vmem:[%s8526_s10 + $0x31] sm:$0xff] }
  0x3a   : > { %7704 = vmatprep.mubr.msk.f32.mxu0 %vm288_vm1, %v8637_v26  ;;  %10478 = vst [vmem:[#allocation24_spill] sm:$0xff] %v8810_v63  ;;  %10479 = vst [vmem:[#allocation25_spill] sm:$0xff] %v8815_v0  ;;  %v8822_v1 = vld [vmem:[%s8526_s10 + $0x29] sm:$0xff]  ;;  %v8842_v8 = vld [vmem:[%s8526_s10 + $0x39] sm:$0xff] }
  0x3b   : > { %7741 = vmatmul.mubr.msk.f32.gmra.mrb[10].mxu1 %vm288_vm1, %v8642_v27  ;;  %v8832_v6 = vld [vmem:[%s8526_s10 + $0x2a] sm:$0xff]  ;;  %v8845_v10 = vld [vmem:[%s8526_s10 + $0x41] sm:$0xff]  ;;  %v9054_v20 = vld [vmem:[%s8526_s10 + $0xf9] sm:$0xff] }
  0x3c   : > { %7743 = vmatprep.mubr.msk.f32.mxu1 %vm288_vm1, %v8645_v28  ;;  %10480 = vst [vmem:[#allocation26_spill] sm:$0xff] %v8832_v6  ;;  %v9026_v28 = vld [vmem:[%s8526_s10 + $0xd9] sm:$0xff]  ;;  %v9029_v27 = vld [vmem:[%s8526_s10 + $0xe1] sm:$0xff]  ;;  %v9040_v24 = vld [vmem:[%s8526_s10 + $0xe9] sm:$0xff] }
  0x3d   : > { %7705 = vmatmul.mubr.msk.f32.gmra.mrb[10].mxu0 %vm288_vm1, %v8652_v29  ;;  %v9043_v23 = vld [vmem:[%s8526_s10 + $0xf1] sm:$0xff]  ;;  %10497 = vst [vmem:[#allocation43_spill] sm:$0xff] %v9054_v20  ;;  %v9057_v19 = vld [vmem:[%s8526_s10 + $0x101] sm:$0xff] }
  0x3e   : > { %7707 = vmatprep.mubr.msk.f32.mxu0 %vm288_vm1, %v8657_v30  ;;  %10496 = vst [vmem:[#allocation42_spill] sm:$0xff] %v9043_v23  ;;  %10498 = vst [vmem:[#allocation44_spill] sm:$0xff] %v9057_v19  ;;  %v9071_v16 = vld [vmem:[%s8526_s10 + $0x111] sm:$0xff] }
  0x3f   : > { %7744 = vmatmul.mubr.msk.f32.gmra.mrb[12].mxu1 %vm288_vm1, %v8662_v31  ;;  %v9015_v31 = vld [vmem:[%s8526_s10 + $0xd1] sm:$0xff]  ;;  %10500 = vst [vmem:[#allocation46_spill] sm:$0xff] %v9071_v16 }
  0x40   : > { %7746 = vmatprep.mubr.msk.f32.mxu1 %vm288_vm1, %v8665_v32  ;;  %v9012_v32 = vld [vmem:[%s8526_s10 + $0xc9] sm:$0xff] }
  0x41   : > { %7708 = vmatmul.mubr.msk.f32.gmra.mrb[12].mxu0 %vm288_vm1, %v8672_v33 }
  0x42   : > { %7710 = vmatprep.mubr.msk.f32.mxu0 %vm288_vm1, %v8677_v34 }
  0x43   : > { %7747 = vmatmul.mubr.msk.f32.gmra.mrb[14].mxu1 %vm288_vm1, %v8682_v35  ;;  %v9001_v35 = vld [vmem:[%s8526_s10 + $0xc1] sm:$0xff] }
  0x44   : > { %7749 = vmatprep.mubr.msk.f32.mxu1 %vm288_vm1, %v8685_v36  ;;  %v8998_v36 = vld [vmem:[%s8526_s10 + $0xb9] sm:$0xff] }
  0x45   : > { %7711 = vmatmul.mubr.msk.f32.gmra.mrb[14].mxu0 %vm288_vm1, %v8692_v37 }
  0x46   : > { %7713 = vmatprep.mubr.msk.f32.mxu0 %vm288_vm1, %v8697_v38 }
  0x47   : > { %7750 = vmatmul.mubr.msk.f32.gmra.mrb[16].mxu1 %vm288_vm1, %v8702_v39  ;;  %v8985_v39 = vld [vmem:[%s8526_s10 + $0xb1] sm:$0xff] }
  0x48   : > { %7752 = vmatprep.mubr.msk.f32.mxu1 %vm288_vm1, %v8705_v40  ;;  %v8982_v40 = vld [vmem:[%s8526_s10 + $0xa9] sm:$0xff] }
  0x49   : > { %7714 = vmatmul.mubr.msk.f32.gmra.mrb[16].mxu0 %vm288_vm1, %v8712_v41 }
  0x4a   : > { %7716 = vmatprep.mubr.msk.f32.mxu0 %vm288_vm1, %v8717_v42 }
  0x4b   : > { %7753 = vmatmul.mubr.msk.f32.gmra.mrb[18].mxu1 %vm288_vm1, %v8722_v43  ;;  %v8965_v43 = vld [vmem:[%s8526_s10 + $0xa1] sm:$0xff] }
  0x4c   : > { %7755 = vmatprep.mubr.msk.f32.mxu1 %vm288_vm1, %v8725_v44  ;;  %v8962_v44 = vld [vmem:[%s8526_s10 + $0x99] sm:$0xff] }
  0x4d   : > { %7717 = vmatmul.mubr.msk.f32.gmra.mrb[18].mxu0 %vm288_vm1, %v8732_v45 }
  0x4e   : > { %7719 = vmatprep.mubr.msk.f32.mxu0 %vm288_vm1, %v8737_v46 }
  0x4f   : > { %7756 = vmatmul.mubr.msk.f32.gmra.mrb[20].mxu1 %vm288_vm1, %v8742_v47  ;;  %v8945_v47 = vld [vmem:[%s8526_s10 + $0x91] sm:$0xff] }
  0x50   : > { %7758 = vmatprep.mubr.msk.f32.mxu1 %vm288_vm1, %v8745_v48  ;;  %v8942_v48 = vld [vmem:[%s8526_s10 + $0x89] sm:$0xff] }
  0x51   : > { %7720 = vmatmul.mubr.msk.f32.gmra.mrb[20].mxu0 %vm288_vm1, %v8752_v49 }
  0x52   : > { %7722 = vmatprep.mubr.msk.f32.mxu0 %vm288_vm1, %v8757_v50 }
  0x53   : > { %7759 = vmatmul.mubr.msk.f32.gmra.mrb[22].mxu1 %vm288_vm1, %v8762_v51  ;;  %v8925_v51 = vld [vmem:[%s8526_s10 + $0x81] sm:$0xff] }
  0x54   : > { %7763 = vmatprep.mubr.msk.f32.mxu1 %vm288_vm1, %v6457_v52  ;;  %v8857_v52 = vld [vmem:[%s8526_s10 + $0x42] sm:$0xff] }
  0x55   : > { %7723 = vmatmul.mubr.msk.f32.gmra.mrb[22].mxu0 %vm288_vm1, %v8770_v53  ;;  %10483 = vst [vmem:[#allocation29_spill] sm:$0xff] %v8857_v52 }
  0x56   : > { %7837 = vmatprep.mubr.msk.f32.mxu0 %vm288_vm1, %v6555_v54  ;;  %v8862_v54 = vld [vmem:[%s8526_s10 + $0x49] sm:$0xff] }
  0x57   : > { %7764 = vmatmul.mubr.msk.f32.vlgmr.msra.gmra.mrb[24].mxu1 %vm288_vm1, %v6458_v55  ;;  %v8865_v55 = vld [vmem:[%s8526_s10 + $0x51] sm:$0xff] }
  0x58   : > { %7910 = vmatpush3.msk.msra.mxu1 %vm433_vm0, %v8543_v7  ;;  %7766 = vmatprep.mubr.msk.f32.mxu1 %vm288_vm1, %v6459_v56  ;;  %v8837_v7 = vld [vmem:[%s8526_s10 + $0x32] sm:$0xff]  ;;  %v8872_v56 = vld [vmem:[%s8526_s10 + $0x4a] sm:$0xff] }
  0x59   : > { %7838 = vmatmul.mubr.msk.f32.vlgmr.msra.gmra.mrb[24].mxu0 %vm288_vm1, %v6556_v57  ;;  %8057 = vmatprep.subr.msk.mxu1 %vm433_vm0, %v8785_v58  ;;  %10481 = vst [vmem:[#allocation27_spill] sm:$0xff] %v8837_v7  ;;  %10484 = vst [vmem:[#allocation30_spill] sm:$0xff] %v8872_v56  ;;  %v8877_v57 = vld [vmem:[%s8526_s10 + $0x52] sm:$0xff] }
  0x5a   : > { %7984 = vmatpush3.msk.msra.mxu0 %vm433_vm0, %v8559_v11  ;;  %7840 = vmatprep.mubr.msk.f32.mxu0 %vm288_vm1, %v6557_v59  ;;  %v8852_v11 = vld [vmem:[%s8526_s10 + $0x3a] sm:$0xff]  ;;  %10485 = vst [vmem:[#allocation31_spill] sm:$0xff] %v8877_v57 }
  0x5b   : > { %7767 = vmatmul.mubr.msk.f32.gmra.mrb[26].mxu1 %vm288_vm1, %v8793_v60  ;;  %8131 = vmatprep.subr.msk.mxu0 %vm433_vm0, %v8798_v61  ;;  %10482 = vst [vmem:[#allocation28_spill] sm:$0xff] %v8852_v11  ;;  %v8882_v59 = vld [vmem:[%s8526_s10 + $0x59] sm:$0xff] }
  0x5c   : > { %7769 = vmatprep.mubr.msk.f32.mxu1 %vm288_vm1, %v8801_v62 }
  0x5d   : > { %7841 = vmatmul.mubr.msk.f32.gmra.mrb[26].mxu0 %vm288_vm1, %v8810_v63  ;;  %v8922_v63 = vld [vmem:[%s8526_s10 + $0x79] sm:$0xff] }
  0x5e   : > { %7843 = vmatprep.mubr.msk.f32.mxu0 %vm288_vm1, %v8815_v0  ;;  %v8905_v0 = vld [vmem:[%s8526_s10 + $0x71] sm:$0xff] }
  0x5f   : > { %7770 = vmatmul.mubr.msk.f32.gmra.mrb[28].mxu1 %vm288_vm1, %v8822_v1 }
  0x60   : > { %7772 = vmatprep.mubr.msk.f32.mxu1 %vm288_vm1, %v8825_v2 }
  0x61   : > { %7844 = vmatmul.mubr.msk.f32.gmra.mrb[28].mxu0 %vm288_vm1, %v8832_v6  ;;  %v8902_v6 = vld [vmem:[%s8526_s10 + $0x69] sm:$0xff] }
  0x62   : > { %7846 = vmatprep.mubr.msk.f32.mxu0 %vm288_vm1, %v8837_v7  ;;  %v8885_v7 = vld [vmem:[%s8526_s10 + $0x61] sm:$0xff] }
  0x63   : > { %7773 = vmatmul.mubr.msk.f32.gmra.mrb[30].mxu1 %vm288_vm1, %v8842_v8 }
  0x64   : > { %7775 = vmatprep.mubr.msk.f32.mxu1 %vm288_vm1, %v8845_v10 }
  0x65   : > { %7847 = vmatmul.mubr.msk.f32.gmra.mrb[30].mxu0 %vm288_vm1, %v8852_v11  ;;  %v8897_v11 = vld [vmem:[%s8526_s10 + $0x62] sm:$0xff] }
  0x66   : > { %7849 = vmatprep.mubr.msk.f32.mxu0 %vm288_vm1, %v8857_v52  ;;  %v8892_v52 = vld [vmem:[%s8526_s10 + $0x5a] sm:$0xff]  ;;  %10487 = vst [vmem:[#allocation33_spill] sm:$0xff] %v8897_v11 }
  0x67   : > { %7776 = vmatmul.mubr.msk.f32.gmra.mrb[32].mxu1 %vm288_vm1, %v8862_v54  ;;  %10486 = vst [vmem:[#allocation32_spill] sm:$0xff] %v8892_v52 }
  0x68   : > { %7778 = vmatprep.mubr.msk.f32.mxu1 %vm288_vm1, %v8865_v55 }
  0x69   : > { %7850 = vmatmul.mubr.msk.f32.gmra.mrb[32].mxu0 %vm288_vm1, %v8872_v56  ;;  %v8917_v56 = vld [vmem:[%s8526_s10 + $0x72] sm:$0xff] }
  0x6a   : > { %7852 = vmatprep.mubr.msk.f32.mxu0 %vm288_vm1, %v8877_v57  ;;  %v8912_v57 = vld [vmem:[%s8526_s10 + $0x6a] sm:$0xff]  ;;  %10489 = vst [vmem:[#allocation35_spill] sm:$0xff] %v8917_v56 }
  0x6b   : > { %7779 = vmatmul.mubr.msk.f32.gmra.mrb[34].mxu1 %vm288_vm1, %v8882_v59  ;;  %10488 = vst [vmem:[#allocation34_spill] sm:$0xff] %v8912_v57 }
  0x6c   : > { %7781 = vmatprep.mubr.msk.f32.mxu1 %vm288_vm1, %v8885_v7 }
  0x6d   : > { %7853 = vmatmul.mubr.msk.f32.gmra.mrb[34].mxu0 %vm288_vm1, %v8892_v52  ;;  %v8937_v52 = vld [vmem:[%s8526_s10 + $0x82] sm:$0xff] }
  0x6e   : > { %7855 = vmatprep.mubr.msk.f32.mxu0 %vm288_vm1, %v8897_v11  ;;  %v8932_v11 = vld [vmem:[%s8526_s10 + $0x7a] sm:$0xff]  ;;  %10491 = vst [vmem:[#allocation37_spill] sm:$0xff] %v8937_v52 }
  0x6f   : > { %7782 = vmatmul.mubr.msk.f32.gmra.mrb[36].mxu1 %vm288_vm1, %v8902_v6  ;;  %10490 = vst [vmem:[#allocation36_spill] sm:$0xff] %v8932_v11 }
  0x70   : > { %7784 = vmatprep.mubr.msk.f32.mxu1 %vm288_vm1, %v8905_v0 }
  0x71   : > { %7856 = vmatmul.mubr.msk.f32.gmra.mrb[36].mxu0 %vm288_vm1, %v8912_v57  ;;  %v8957_v57 = vld [vmem:[%s8526_s10 + $0x92] sm:$0xff] }
  0x72   : > { %7858 = vmatprep.mubr.msk.f32.mxu0 %vm288_vm1, %v8917_v56  ;;  %v8952_v56 = vld [vmem:[%s8526_s10 + $0x8a] sm:$0xff]  ;;  %10493 = vst [vmem:[#allocation39_spill] sm:$0xff] %v8957_v57 }
  0x73   : > { %7785 = vmatmul.mubr.msk.f32.gmra.mrb[38].mxu1 %vm288_vm1, %v8922_v63  ;;  %10492 = vst [vmem:[#allocation38_spill] sm:$0xff] %v8952_v56 }
  0x74   : > { %7787 = vmatprep.mubr.msk.f32.mxu1 %vm288_vm1, %v8925_v51 }
  0x75   : > { %7859 = vmatmul.mubr.msk.f32.gmra.mrb[38].mxu0 %vm288_vm1, %v8932_v11  ;;  %v8977_v11 = vld [vmem:[%s8526_s10 + $0xa2] sm:$0xff] }
  0x76   : > { %7861 = vmatprep.mubr.msk.f32.mxu0 %vm288_vm1, %v8937_v52  ;;  %v8972_v52 = vld [vmem:[%s8526_s10 + $0x9a] sm:$0xff]  ;;  %10495 = vst [vmem:[#allocation41_spill] sm:$0xff] %v8977_v11 }
  0x77   : > { %7788 = vmatmul.mubr.msk.f32.gmra.mrb[40].mxu1 %vm288_vm1, %v8942_v48  ;;  %10494 = vst [vmem:[#allocation40_spill] sm:$0xff] %v8972_v52 }
  0x78   : > { %7790 = vmatprep.mubr.msk.f32.mxu1 %vm288_vm1, %v8945_v47 }
  0x79   : > { %7862 = vmatmul.mubr.msk.f32.gmra.mrb[40].mxu0 %vm288_vm1, %v8952_v56  ;;  %v6577_v56 = vld [vmem:[%s8526_s10 + $0xb2] sm:$0xff] }
  0x7a   : > { %7864 = vmatprep.mubr.msk.f32.mxu0 %vm288_vm1, %v8957_v57  ;;  %v6576_v57 = vld [vmem:[%s8526_s10 + $0xaa] sm:$0xff] }
  0x7b   : > { %7791 = vmatmul.mubr.msk.f32.gmra.mrb[42].mxu1 %vm288_vm1, %v8962_v44 }
  0x7c   : > { %7793 = vmatprep.mubr.msk.f32.mxu1 %vm288_vm1, %v8965_v43 }
  0x7d   : > { %7865 = vmatmul.mubr.msk.f32.gmra.mrb[42].mxu0 %vm288_vm1, %v8972_v52  ;;  %v6579_v52 = vld [vmem:[%s8526_s10 + $0xc2] sm:$0xff] }
  0x7e   : > { %7867 = vmatprep.mubr.msk.f32.mxu0 %vm288_vm1, %v8977_v11  ;;  %v6578_v11 = vld [vmem:[%s8526_s10 + $0xba] sm:$0xff] }
  0x7f   : > { %7794 = vmatmul.mubr.msk.f32.gmra.mrb[44].mxu1 %vm288_vm1, %v8982_v40 }
  0x80   : > { %7796 = vmatprep.mubr.msk.f32.mxu1 %vm288_vm1, %v8985_v39 }
  0x81   : > { %7868 = vmatmul.mubr.msk.f32.gmra.mrb[44].mxu0 %vm288_vm1, %v6576_v57  ;;  %v6581_v57 = vld [vmem:[%s8526_s10 + $0xd2] sm:$0xff] }
  0x82   : > { %7870 = vmatprep.mubr.msk.f32.mxu0 %vm288_vm1, %v6577_v56  ;;  %v6580_v56 = vld [vmem:[%s8526_s10 + $0xca] sm:$0xff] }
  0x83   : > { %7797 = vmatmul.mubr.msk.f32.gmra.mrb[46].mxu1 %vm288_vm1, %v8998_v36 }
  0x84   : > { %7799 = vmatprep.mubr.msk.f32.mxu1 %vm288_vm1, %v9001_v35 }
  0x85   : > { %7871 = vmatmul.mubr.msk.f32.gmra.mrb[46].mxu0 %vm288_vm1, %v6578_v11  ;;  %v6582_v11 = vld [vmem:[%s8526_s10 + $0xda] sm:$0xff] }
  0x86   : > { %7873 = vmatprep.mubr.msk.f32.mxu0 %vm288_vm1, %v6579_v52  ;;  %v6583_v52 = vld [vmem:[%s8526_s10 + $0xe2] sm:$0xff] }
  0x87   : > { %7800 = vmatmul.mubr.msk.f32.gmra.mrb[48].mxu1 %vm288_vm1, %v9012_v32 }
  0x88   : > { %7802 = vmatprep.mubr.msk.f32.mxu1 %vm288_vm1, %v9015_v31 }
  0x89   : > { %7874 = vmatmul.mubr.msk.f32.gmra.mrb[48].mxu0 %vm288_vm1, %v6580_v56  ;;  %v6584_v56 = vld [vmem:[%s8526_s10 + $0xea] sm:$0xff] }
  0x8a   : > { %7876 = vmatprep.mubr.msk.f32.mxu0 %vm288_vm1, %v6581_v57  ;;  %v6585_v57 = vld [vmem:[%s8526_s10 + $0xf2] sm:$0xff] }
  0x8b   : > { %7803 = vmatmul.mubr.msk.f32.gmra.mrb[50].mxu1 %vm288_vm1, %v9026_v28 }
  0x8c   : > { %7805 = vmatprep.mubr.msk.f32.mxu1 %vm288_vm1, %v9029_v27 }
  0x8d   : > { %7877 = vmatmul.mubr.msk.f32.gmra.mrb[50].mxu0 %vm288_vm1, %v6582_v11  ;;  %v6586_v11 = vld [vmem:[%s8526_s10 + $0xfa] sm:$0xff] }
  0x8e   : > { %7879 = vmatprep.mubr.msk.f32.mxu0 %vm288_vm1, %v6583_v52  ;;  %v6587_v52 = vld [vmem:[%s8526_s10 + $0x102] sm:$0xff] }
  0x8f   : > { %7806 = vmatmul.mubr.msk.f32.gmra.mrb[52].mxu1 %vm288_vm1, %v9040_v24 }
  0x90   : > { %7808 = vmatprep.mubr.msk.f32.mxu1 %vm288_vm1, %v9043_v23  ;;  %v9068_v23 = vld [vmem:[%s8526_s10 + $0x109] sm:$0xff] }
  0x91   : > { %7880 = vmatmul.mubr.msk.f32.gmra.mrb[52].mxu0 %vm288_vm1, %v6584_v56  ;;  %10499 = vst [vmem:[#allocation45_spill] sm:$0xff] %v9068_v23  ;;  %v6588_v56 = vld [vmem:[%s8526_s10 + $0x10a] sm:$0xff] }
  0x92   : > { %7882 = vmatprep.mubr.msk.f32.mxu0 %vm288_vm1, %v6585_v57  ;;  %v6589_v57 = vld [vmem:[%s8526_s10 + $0x112] sm:$0xff] }
  0x93   : > { %7809 = vmatmul.mubr.msk.f32.gmra.mrb[54].mxu1 %vm288_vm1, %v9054_v20  ;;  %v9085_v20 = vld [vmem:[%s8526_s10 + $0x121] sm:$0xff] }
  0x94   : > { %7811 = vmatprep.mubr.msk.f32.mxu1 %vm288_vm1, %v9057_v19  ;;  %v9082_v19 = vld [vmem:[%s8526_s10 + $0x119] sm:$0xff]  ;;  %10502 = vst [vmem:[#allocation48_spill] sm:$0xff] %v9085_v20 }
  0x95   : > { %7883 = vmatmul.mubr.msk.f32.gmra.mrb[54].mxu0 %vm288_vm1, %v6586_v11  ;;  %10501 = vst [vmem:[#allocation47_spill] sm:$0xff] %v9082_v19  ;;  %v6590_v11 = vld [vmem:[%s8526_s10 + $0x11a] sm:$0xff] }
  0x96   : > { %7885 = vmatprep.mubr.msk.f32.mxu0 %vm288_vm1, %v6587_v52  ;;  %v6591_v52 = vld [vmem:[%s8526_s10 + $0x122] sm:$0xff] }
  0x97   : > { %7812 = vmatmul.mubr.msk.f32.gmra.mrb[56].mxu1 %vm288_vm1, %v9068_v23  ;;  %v9099_v23 = vld [vmem:[%s8526_s10 + $0x131] sm:$0xff] }
  0x98   : > { %7814 = vmatprep.mubr.msk.f32.mxu1 %vm288_vm1, %v9071_v16  ;;  %v9096_v16 = vld [vmem:[%s8526_s10 + $0x129] sm:$0xff]  ;;  %10504 = vst [vmem:[#allocation50_spill] sm:$0xff] %v9099_v23 }
  0x99   : > { %7886 = vmatmul.mubr.msk.f32.gmra.mrb[56].mxu0 %vm288_vm1, %v6588_v56  ;;  %10503 = vst [vmem:[#allocation49_spill] sm:$0xff] %v9096_v16  ;;  %v6592_v56 = vld [vmem:[%s8526_s10 + $0x12a] sm:$0xff] }
  0x9a   : > { %7888 = vmatprep.mubr.msk.f32.mxu0 %vm288_vm1, %v6589_v57  ;;  %v6593_v57 = vld [vmem:[%s8526_s10 + $0x132] sm:$0xff] }
  0x9b   : > { %7815 = vmatmul.mubr.msk.f32.gmra.mrb[58].mxu1 %vm288_vm1, %v9082_v19  ;;  %v9113_v19 = vld [vmem:[%s8526_s10 + $0x141] sm:$0xff] }
  0x9c   : > { %7817 = vmatprep.mubr.msk.f32.mxu1 %vm288_vm1, %v9085_v20  ;;  %v9110_v20 = vld [vmem:[%s8526_s10 + $0x139] sm:$0xff]  ;;  %10506 = vst [vmem:[#allocation52_spill] sm:$0xff] %v9113_v19 }
  0x9d   : > { %7889 = vmatmul.mubr.msk.f32.gmra.mrb[58].mxu0 %vm288_vm1, %v6590_v11  ;;  %10505 = vst [vmem:[#allocation51_spill] sm:$0xff] %v9110_v20  ;;  %v6594_v11 = vld [vmem:[%s8526_s10 + $0x13a] sm:$0xff] }
  0x9e   : > { %7891 = vmatprep.mubr.msk.f32.mxu0 %vm288_vm1, %v6591_v52  ;;  %v6595_v52 = vld [vmem:[%s8526_s10 + $0x142] sm:$0xff] }
  0x9f   : > { %7818 = vmatmul.mubr.msk.f32.gmra.mrb[60].mxu1 %vm288_vm1, %v9096_v16  ;;  %v9127_v16 = vld [vmem:[%s8526_s10 + $0x151] sm:$0xff] }
  0xa0   : > { %7820 = vmatprep.mubr.msk.f32.mxu1 %vm288_vm1, %v9099_v23  ;;  %v9124_v23 = vld [vmem:[%s8526_s10 + $0x149] sm:$0xff]  ;;  %10508 = vst [vmem:[#allocation54_spill] sm:$0xff] %v9127_v16 }
  0xa1   : > { %7892 = vmatmul.mubr.msk.f32.gmra.mrb[60].mxu0 %vm288_vm1, %v6592_v56  ;;  %10507 = vst [vmem:[#allocation53_spill] sm:$0xff] %v9124_v23  ;;  %v6596_v56 = vld [vmem:[%s8526_s10 + $0x14a] sm:$0xff] }
  0xa2   : > { %7894 = vmatprep.mubr.msk.f32.mxu0 %vm288_vm1, %v6593_v57  ;;  %v6597_v57 = vld [vmem:[%s8526_s10 + $0x152] sm:$0xff] }
  0xa3   : > { %7821 = vmatmul.mubr.msk.f32.gmra.mrb[62].mxu1 %vm288_vm1, %v9110_v20  ;;  %v9141_v20 = vld [vmem:[%s8526_s10 + $0x161] sm:$0xff] }
  0xa4   : > { %7823 = vmatprep.mubr.msk.f32.mxu1 %vm288_vm1, %v9113_v19  ;;  %v9138_v19 = vld [vmem:[%s8526_s10 + $0x159] sm:$0xff]  ;;  %10510 = vst [vmem:[#allocation56_spill] sm:$0xff] %v9141_v20 }
  0xa5   : > { %7895 = vmatmul.mubr.msk.f32.gmra.mrb[62].mxu0 %vm288_vm1, %v6594_v11  ;;  %10509 = vst [vmem:[#allocation55_spill] sm:$0xff] %v9138_v19  ;;  %v6598_v11 = vld [vmem:[%s8526_s10 + $0x15a] sm:$0xff] }
  0xa6   : > { %7897 = vmatprep.mubr.msk.f32.mxu0 %vm288_vm1, %v6595_v52  ;;  %v6599_v52 = vld [vmem:[%s8526_s10 + $0x162] sm:$0xff] }
  0xa7   : > { %7824 = vmatmul.mubr.msk.f32.gmra.mrb[64].mxu1 %vm288_vm1, %v9124_v23  ;;  %v9152_v23 = vld [vmem:[%s8526_s10 + $0x169] sm:$0xff] }
  0xa8   : > { %7826 = vmatprep.mubr.msk.f32.mxu1 %vm288_vm1, %v9127_v16  ;;  %v9155_v16 = vld [vmem:[%s8526_s10 + $0x171] sm:$0xff] }
  0xa9   : > { %7898 = vmatmul.mubr.msk.f32.gmra.mrb[64].mxu0 %vm288_vm1, %v6596_v56  ;;  %v6600_v56 = vld [vmem:[%s8526_s10 + $0x16a] sm:$0xff] }
  0xaa   : > { %7900 = vmatprep.mubr.msk.f32.mxu0 %vm288_vm1, %v6597_v57  ;;  %v6601_v57 = vld [vmem:[%s8526_s10 + $0x172] sm:$0xff] }
  0xab   : > { %7827 = vmatmul.mubr.msk.f32.gmra.mrb[66].mxu1 %vm288_vm1, %v9138_v19  ;;  %v9166_v19 = vld [vmem:[%s8526_s10 + $0x179] sm:$0xff] }
  0xac   : > { %7829 = vmatprep.mubr.msk.f32.mxu1 %vm288_vm1, %v9141_v20  ;;  %v6602_v20 = vld [vmem:[%s8526_s10 + $0x17a] sm:$0xff] }
  0xad   : > { %7901 = vmatmul.mubr.msk.f32.gmra.mrb[66].mxu0 %vm288_vm1, %v6598_v11  ;;  %v9181_v11 = vld [vmem:[%s10403_s1 + $0x1c] sm:$0xf] }
  0xae   : > { %7903 = vmatprep.mubr.msk.f32.mxu0 %vm288_vm1, %v6599_v52 }
  0xaf   : > { %7830 = vmatmul.mubr.msk.f32.gmra.mrb[68].mxu1 %vm288_vm1, %v9152_v23 }
  0xb0   : > { %7832 = vmatprep.mubr.msk.f32.mxu1 %vm288_vm1, %v9155_v16 }
  0xb1   : > { %7904 = vmatmul.mubr.msk.f32.gmra.mrb[68].mxu0 %vm288_vm1, %v6600_v56  ;;  %v6797_v56 = vld [vmem:[%s8526_s10 + $0x189] sm:$0xff] }
  0xb2   : > { %7906 = vmatprep.mubr.msk.f32.mxu0 %vm288_vm1, %v6601_v57 }
  0xb3   : > { %7833 = vmatmul.mubr.msk.f32.gmra.mrb[70].mxu1 %vm288_vm1, %v9166_v19 }
  0xb4   : > { %7911 = vmatprep.mubr.msk.f32.mxu1 %vm288_vm1, %v8570_v13  ;;  %v9192_v13 = vld [vmem:[%s10403_s1 + $0x20] sm:$0xf] }
  0xb5   : > { %7907 = vmatmul.mubr.msk.f32.gmra.mrb[70].mxu0 %vm288_vm1, %v6602_v20  ;;  %v10520_v20 = vld [vmem:[#allocation11_spill] sm:$0xff] }
  0xb6   : > { %7985 = vmatprep.mubr.msk.f32.mxu0 %vm288_vm1, %v8793_v60  ;;  %v10539_v60 = vld [vmem:[#allocation20_spill] sm:$0xff] }
  0xb7   : > { %7912 = vmatmul.mubr.msk.f32.vlgmr.msra.gmra.mrb[72].mxu1 %vm288_vm1, %v8575_v14  ;;  %v10516_v14 = vld [vmem:[#allocation9_spill] sm:$0xff] }
  0xb8   : > { %8058 = vmatpush3.msk.msra.mxu1 %vm433_vm0, %v8785_v58  ;;  %7914 = vmatprep.mubr.msk.f32.mxu1 %vm288_vm1, %v8592_v17  ;;  %v10518_v17 = vld [vmem:[#allocation45_spill] sm:$0xff] }
  0xb9   : > { %7986 = vmatmul.mubr.msk.f32.vlgmr.msra.gmra.mrb[72].mxu0 %vm288_vm1, %v8801_v62  ;;  %8205 = vmatprep.subr.msk.mxu1 %vm433_vm0, %v9181_v11 }
  0xba   : > { %8132 = vmatpush3.msk.msra.mxu0 %vm433_vm0, %v8798_v61  ;;  %7988 = vmatprep.mubr.msk.f32.mxu0 %vm288_vm1, %v8822_v1  ;;  %v10540_v61 = vld [vmem:[#allocation21_spill] sm:$0xff] }
  0xbb   : > { %7915 = vmatmul.mubr.msk.f32.gmra.mrb[74].mxu1 %vm288_vm1, %v8597_v18  ;;  %8279 = vmatprep.subr.msk.mxu0 %vm433_vm0, %v9192_v13  ;;  %v10519_v18 = vld [vmem:[#allocation10_spill] sm:$0xff] }
  0xbc   : > { %7917 = vmatprep.mubr.msk.f32.mxu1 %vm288_vm1, %v8612_v21  ;;  %v10521_v21 = vld [vmem:[#allocation46_spill] sm:$0xff] }
  0xbd   : > { %7989 = vmatmul.mubr.msk.f32.gmra.mrb[74].mxu0 %vm288_vm1, %v8825_v2 }
  0xbe   : > { %7991 = vmatprep.mubr.msk.f32.mxu0 %vm288_vm1, %v8842_v8  ;;  %v6698_v8 = vld [vmem:[%s8526_s10 + $0x180] sm:$0xff] }
  0xbf   : > { %7918 = vmatmul.mubr.msk.f32.gmra.mrb[76].mxu1 %vm288_vm1, %v8617_v22  ;;  %v10522_v22 = vld [vmem:[#allocation47_spill] sm:$0xff] }
  0xc0   : > { %7920 = vmatprep.mubr.msk.f32.mxu1 %vm288_vm1, %v8632_v25  ;;  %v10524_v25 = vld [vmem:[#allocation13_spill] sm:$0xff] }
  0xc1   : > { %7992 = vmatmul.mubr.msk.f32.gmra.mrb[76].mxu0 %vm288_vm1, %v8845_v10 }
  0xc2   : > { %7994 = vmatprep.mubr.msk.f32.mxu0 %vm288_vm1, %v8862_v54  ;;  %v6699_v54 = vld [vmem:[%s8526_s10 + $0x188] sm:$0xff] }
  0xc3   : > { %7921 = vmatmul.mubr.msk.f32.gmra.mrb[78].mxu1 %vm288_vm1, %v8637_v26  ;;  %v10525_v26 = vld [vmem:[#allocation48_spill] sm:$0xff] }
  0xc4   : > { %7923 = vmatprep.mubr.msk.f32.mxu1 %vm288_vm1, %v8652_v29 }
  0xc5   : > { %7995 = vmatmul.mubr.msk.f32.gmra.mrb[78].mxu0 %vm288_vm1, %v8865_v55 }
  0xc6   : > { %7997 = vmatprep.mubr.msk.f32.mxu0 %vm288_vm1, %v8882_v59  ;;  %v6796_v59 = vld [vmem:[%s8526_s10 + $0x181] sm:$0xff] }
  0xc7   : > { %7924 = vmatmul.mubr.msk.f32.gmra.mrb[80].mxu1 %vm288_vm1, %v8657_v30  ;;  %v10527_v30 = vld [vmem:[#allocation14_spill] sm:$0xff] }
  0xc8   : > { %7926 = vmatprep.mubr.msk.f32.mxu1 %vm288_vm1, %v8672_v33 }
  0xc9   : > { %7998 = vmatmul.mubr.msk.f32.gmra.mrb[80].mxu0 %vm288_vm1, %v8885_v7  ;;  %v10543_v7 = vld [vmem:[#allocation23_spill] sm:$0xff] }
  0xca   : > { %8000 = vmatprep.mubr.msk.f32.mxu0 %vm288_vm1, %v8902_v6  ;;  %v10542_v6 = vld [vmem:[#allocation22_spill] sm:$0xff] }
  0xcb   : > { %7927 = vmatmul.mubr.msk.f32.gmra.mrb[82].mxu1 %vm288_vm1, %v8677_v34  ;;  %v10529_v34 = vld [vmem:[#allocation50_spill] sm:$0xff] }
  0xcc   : > { %7929 = vmatprep.mubr.msk.f32.mxu1 %vm288_vm1, %v8692_v37 }
  0xcd   : > { %8001 = vmatmul.mubr.msk.f32.gmra.mrb[82].mxu0 %vm288_vm1, %v8905_v0  ;;  %v10541_v0 = vld [vmem:[#allocation56_spill] sm:$0xff] }
  0xce   : > { %8003 = vmatprep.mubr.msk.f32.mxu0 %vm288_vm1, %v8922_v63 }
  0xcf   : > { %7930 = vmatmul.mubr.msk.f32.gmra.mrb[84].mxu1 %vm288_vm1, %v8697_v38  ;;  %v10531_v38 = vld [vmem:[#allocation16_spill] sm:$0xff] }
  0xd0   : > { %7932 = vmatprep.mubr.msk.f32.mxu1 %vm288_vm1, %v8712_v41 }
  0xd1   : > { %8004 = vmatmul.mubr.msk.f32.gmra.mrb[84].mxu0 %vm288_vm1, %v8925_v51 }
  0xd2   : > { %8006 = vmatprep.mubr.msk.f32.mxu0 %vm288_vm1, %v8942_v48 }
  0xd3   : > { %7933 = vmatmul.mubr.msk.f32.gmra.mrb[86].mxu1 %vm288_vm1, %v8717_v42  ;;  %v10533_v42 = vld [vmem:[#allocation52_spill] sm:$0xff] }
  0xd4   : > { %7935 = vmatprep.mubr.msk.f32.mxu1 %vm288_vm1, %v8732_v45 }
  0xd5   : > { %8007 = vmatmul.mubr.msk.f32.gmra.mrb[86].mxu0 %vm288_vm1, %v8945_v47  ;;  %v10536_v47 = vld [vmem:[#allocation19_spill] sm:$0xff] }
  0xd6   : > { %8009 = vmatprep.mubr.msk.f32.mxu0 %vm288_vm1, %v8962_v44  ;;  %v10534_v44 = vld [vmem:[#allocation53_spill] sm:$0xff] }
  0xd7   : > { %7936 = vmatmul.mubr.msk.f32.gmra.mrb[88].mxu1 %vm288_vm1, %v8737_v46  ;;  %v10535_v46 = vld [vmem:[#allocation18_spill] sm:$0xff] }
  0xd8   : > { %7938 = vmatprep.mubr.msk.f32.mxu1 %vm288_vm1, %v8752_v49 }
  0xd9   : > { %8010 = vmatmul.mubr.msk.f32.gmra.mrb[88].mxu0 %vm288_vm1, %v8965_v43 }
  0xda   : > { %8012 = vmatprep.mubr.msk.f32.mxu0 %vm288_vm1, %v8982_v40 }
  0xdb   : > { %7939 = vmatmul.mubr.msk.f32.gmra.mrb[90].mxu1 %vm288_vm1, %v8757_v50  ;;  %v10537_v50 = vld [vmem:[#allocation54_spill] sm:$0xff] }
  0xdc   : > { %7941 = vmatprep.mubr.msk.f32.mxu1 %vm288_vm1, %v8770_v53  ;;  %v10538_v53 = vld [vmem:[#allocation55_spill] sm:$0xff] }
  0xdd   : > { %8013 = vmatmul.mubr.msk.f32.gmra.mrb[90].mxu0 %vm288_vm1, %v8985_v39  ;;  %v10532_v39 = vld [vmem:[#allocation17_spill] sm:$0xff] }
  0xde   : > { %8015 = vmatprep.mubr.msk.f32.mxu0 %vm288_vm1, %v8998_v36  ;;  %v10530_v36 = vld [vmem:[#allocation51_spill] sm:$0xff] }
  0xdf   : > { %7942 = vmatmul.mubr.msk.f32.gmra.mrb[92].mxu1 %vm288_vm1, %v8529_v3  ;;  %v10511_v3 = vld [vmem:[#allocation6_spill] sm:$0xff] }
  0xe0   : > { %7944 = vmatprep.mubr.msk.f32.mxu1 %vm288_vm1, %v8532_v4  ;;  %v10512_v4 = vld [vmem:[#allocation7_spill] sm:$0xff] }
  0xe1   : > { %8016 = vmatmul.mubr.msk.f32.gmra.mrb[92].mxu0 %vm288_vm1, %v9001_v35 }
  0xe2   : > { %8018 = vmatprep.mubr.msk.f32.mxu0 %vm288_vm1, %v9012_v32 }
  0xe3   : > { %7945 = vmatmul.mubr.msk.f32.gmra.mrb[94].mxu1 %vm288_vm1, %v8535_v5  ;;  %v10513_v5 = vld [vmem:[#allocation42_spill] sm:$0xff] }
  0xe4   : > { %7947 = vmatprep.mubr.msk.f32.mxu1 %vm288_vm1, %v8553_v9  ;;  %v10514_v9 = vld [vmem:[#allocation43_spill] sm:$0xff] }
  0xe5   : > { %8019 = vmatmul.mubr.msk.f32.gmra.mrb[94].mxu0 %vm288_vm1, %v9015_v31  ;;  %v10528_v31 = vld [vmem:[#allocation15_spill] sm:$0xff] }
  0xe6   : > { %8021 = vmatprep.mubr.msk.f32.mxu0 %vm288_vm1, %v9026_v28  ;;  %v10526_v28 = vld [vmem:[#allocation49_spill] sm:$0xff] }
  0xe7   : > { %7948 = vmatmul.mubr.msk.f32.gmra.mrb[96].mxu1 %vm288_vm1, %v8562_v12  ;;  %v10515_v12 = vld [vmem:[#allocation8_spill] sm:$0xff] }
  0xe8   : > { %7950 = vmatprep.mubr.msk.f32.mxu1 %vm288_vm1, %v8582_v15  ;;  %v10517_v15 = vld [vmem:[#allocation44_spill] sm:$0xff] }
  0xe9   : > { %8022 = vmatmul.mubr.msk.f32.gmra.mrb[96].mxu0 %vm288_vm1, %v9029_v27 }
  0xea   : > { %8024 = vmatprep.mubr.msk.f32.mxu0 %vm288_vm1, %v9040_v24  ;;  %v10523_v24 = vld [vmem:[#allocation12_spill] sm:$0xff] }
  0xeb   : > { %7951 = vmatmul.mubr.msk.f32.gmra.mrb[98].mxu1 %vm288_vm1, %v10511_v3 }
  0xec   : > { %7953 = vmatprep.mubr.msk.f32.mxu1 %vm288_vm1, %v10512_v4  ;;  %v6798_v4 = vld [vmem:[%s8526_s10 + $0x191] sm:$0xff] }
  0xed   : > { %8025 = vmatmul.mubr.msk.f32.gmra.mrb[98].mxu0 %vm288_vm1, %v10513_v5 }
  0xee   : > { %8027 = vmatprep.mubr.msk.f32.mxu0 %vm288_vm1, %v10514_v9  ;;  %v6947_v9 = vld [vmem:[%s8526_s10 + $0x30] sm:$0xff] }
  0xef   : > { %7954 = vmatmul.mubr.msk.f32.gmra.mrb[100].mxu1 %vm288_vm1, %v10515_v12  ;;  %v10544_v12 = vld [vmem:[#allocation24_spill] sm:$0xff] }
  0xf0   : > { %7956 = vmatprep.mubr.msk.f32.mxu1 %vm288_vm1, %v10516_v14 }
  0xf1   : > { %8028 = vmatmul.mubr.msk.f32.gmra.mrb[100].mxu0 %vm288_vm1, %v10517_v15 }
  0xf2   : > { %8030 = vmatprep.mubr.msk.f32.mxu0 %vm288_vm1, %v10518_v17 }
  0xf3   : > { %7957 = vmatmul.mubr.msk.f32.gmra.mrb[102].mxu1 %vm288_vm1, %v10519_v18  ;;  %v6948_v18 = vld [vmem:[%s8526_s10 + $0x38] sm:$0xff] }
  0xf4   : > { %7959 = vmatprep.mubr.msk.f32.mxu1 %vm288_vm1, %v10520_v20 }
  0xf5   : > { %8031 = vmatmul.mubr.msk.f32.gmra.mrb[102].mxu0 %vm288_vm1, %v10521_v21  ;;  %v10545_v21 = vld [vmem:[#allocation25_spill] sm:$0xff] }
  0xf6   : > { %8033 = vmatprep.mubr.msk.f32.mxu0 %vm288_vm1, %v10522_v22  ;;  %v6949_v22 = vld [vmem:[%s8526_s10 + $0x40] sm:$0xff] }
  0xf7   : > { %7960 = vmatmul.mubr.msk.f32.gmra.mrb[104].mxu1 %vm288_vm1, %v10523_v24  ;;  %v10546_v24 = vld [vmem:[#allocation26_spill] sm:$0xff] }
  0xf8   : > { %7962 = vmatprep.mubr.msk.f32.mxu1 %vm288_vm1, %v10524_v25 }
  0xf9   : > { %8034 = vmatmul.mubr.msk.f32.gmra.mrb[104].mxu0 %vm288_vm1, %v10525_v26 }
  0xfa   : > { %v7727_v27 = vpop.f32.mrb[0].mxu1  ;;  %8036 = vmatprep.mubr.msk.f32.mxu0 %vm288_vm1, %v10526_v28  ;;  %v6950_v28 = vld [vmem:[%s8526_s10 + $0x48] sm:$0xff] }
  0xfb   : > { %767 = vst.msk [vmem:[#allocation2 + $0xc8] sm:$0xff] %vm288_vm1, %v7727_v27  ;;  %v623_v29 = vpop.f32.mrb[1].mxu1  ;;  %7963 = vmatmul.mubr.msk.f32.gmra.mrb[106].mxu1 %vm288_vm1, %v10527_v30  ;;  %v6951_v30 = vld [vmem:[%s8526_s10 + $0x50] sm:$0xff] }
  0xfc   : > { %766 = vst.msk [vmem:[#allocation2 + $0xc0] sm:$0xff] %vm288_vm1, %v623_v29  ;;  %7965 = vmatprep.mubr.msk.f32.mxu1 %vm288_vm1, %v10528_v31  ;;  %v7691_v32 = vpop.f32.mrb[0].mxu0  ;;  %v10547_v29 = vld [vmem:[#allocation27_spill] sm:$0xff]  ;;  %v10548_v31 = vld [vmem:[#allocation28_spill] sm:$0xff] }
  0xfd   : > { %743 = vst.msk [vmem:[#allocation2 + $0x8] sm:$0xff] %vm288_vm1, %v7691_v32  ;;  %v503_v33 = vpop.f32.mrb[1].mxu0  ;;  %8037 = vmatmul.mubr.msk.f32.gmra.mrb[106].mxu0 %vm288_vm1, %v10529_v34  ;;  %v6952_v34 = vld [vmem:[%s8526_s10 + $0x58] sm:$0xff] }
  0xfe   : > { %v7730_v35 = vpop.f32.mrb[2].mxu1  ;;  %742 = vst.msk [vmem:[#allocation2] sm:$0xff] %vm288_vm1, %v503_v33  ;;  %8039 = vmatprep.mubr.msk.f32.mxu0 %vm288_vm1, %v10530_v36  ;;  %v10549_v36 = vld [vmem:[#allocation29_spill] sm:$0xff] }
  0xff   : > { %769 = vst.msk [vmem:[#allocation2 + $0xd8] sm:$0xff] %vm288_vm1, %v7730_v35  ;;  %v633_v37 = vpop.f32.mrb[3].mxu1  ;;  %7966 = vmatmul.mubr.msk.f32.gmra.mrb[108].mxu1 %vm288_vm1, %v10531_v38  ;;  %v10550_v38 = vld [vmem:[#allocation30_spill] sm:$0xff] }
 0x100   : > { %768 = vst.msk [vmem:[#allocation2 + $0xd0] sm:$0xff] %vm288_vm1, %v633_v37  ;;  %7968 = vmatprep.mubr.msk.f32.mxu1 %vm288_vm1, %v10532_v39  ;;  %v7694_v40 = vpop.f32.mrb[2].mxu0  ;;  %v6953_v37 = vld [vmem:[%s8526_s10 + $0x60] sm:$0xff] }
 0x101   : > { %745 = vst.msk [vmem:[#allocation2 + $0x18] sm:$0xff] %vm288_vm1, %v7694_v40  ;;  %v513_v41 = vpop.f32.mrb[3].mxu0  ;;  %8040 = vmatmul.mubr.msk.f32.gmra.mrb[108].mxu0 %vm288_vm1, %v10533_v42  ;;  %v6954_v42 = vld [vmem:[%s8526_s10 + $0x68] sm:$0xff] }
 0x102   : > { %v7733_v43 = vpop.f32.mrb[4].mxu1  ;;  %744 = vst.msk [vmem:[#allocation2 + $0x10] sm:$0xff] %vm288_vm1, %v513_v41  ;;  %8042 = vmatprep.mubr.msk.f32.mxu0 %vm288_vm1, %v10534_v44  ;;  %v10551_v44 = vld [vmem:[#allocation31_spill] sm:$0xff] }
 0x103   : > { %771 = vst.msk [vmem:[#allocation2 + $0xe8] sm:$0xff] %vm288_vm1, %v7733_v43  ;;  %v643_v45 = vpop.f32.mrb[5].mxu1  ;;  %7969 = vmatmul.mubr.msk.f32.gmra.mrb[110].mxu1 %vm288_vm1, %v10535_v46  ;;  %v10552_v46 = vld [vmem:[#allocation32_spill] sm:$0xff] }
 0x104   : > { %770 = vst.msk [vmem:[#allocation2 + $0xe0] sm:$0xff] %vm288_vm1, %v643_v45  ;;  %7971 = vmatprep.mubr.msk.f32.mxu1 %vm288_vm1, %v10536_v47  ;;  %v7697_v48 = vpop.f32.mrb[4].mxu0  ;;  %v6955_v45 = vld [vmem:[%s8526_s10 + $0x70] sm:$0xff] }
 0x105   : > { %747 = vst.msk [vmem:[#allocation2 + $0x28] sm:$0xff] %vm288_vm1, %v7697_v48  ;;  %v523_v49 = vpop.f32.mrb[5].mxu0  ;;  %8043 = vmatmul.mubr.msk.f32.gmra.mrb[110].mxu0 %vm288_vm1, %v10537_v50  ;;  %v6956_v50 = vld [vmem:[%s8526_s10 + $0x78] sm:$0xff] }
 0x106   : > { %v7736_v51 = vpop.f32.mrb[6].mxu1  ;;  %746 = vst.msk [vmem:[#allocation2 + $0x20] sm:$0xff] %vm288_vm1, %v523_v49  ;;  %8045 = vmatprep.mubr.msk.f32.mxu0 %vm288_vm1, %v10538_v53  ;;  %v10553_v53 = vld [vmem:[#allocation33_spill] sm:$0xff] }
 0x107   : > { %773 = vst.msk [vmem:[#allocation2 + $0xf8] sm:$0xff] %vm288_vm1, %v7736_v51  ;;  %v653_v58 = vpop.f32.mrb[7].mxu1  ;;  %7972 = vmatmul.mubr.msk.f32.gmra.mrb[112].mxu1 %vm288_vm1, %v10539_v60  ;;  %v10554_v60 = vld [vmem:[#allocation34_spill] sm:$0xff] }
 0x108   : > { %772 = vst.msk [vmem:[#allocation2 + $0xf0] sm:$0xff] %vm288_vm1, %v653_v58  ;;  %7974 = vmatprep.mubr.msk.f32.mxu1 %vm288_vm1, %v10540_v61  ;;  %v7700_v62 = vpop.f32.mrb[6].mxu0  ;;  %v6957_v58 = vld [vmem:[%s8526_s10 + $0x80] sm:$0xff] }
 0x109   : > { %749 = vst.msk [vmem:[#allocation2 + $0x38] sm:$0xff] %vm288_vm1, %v7700_v62  ;;  %v533_v63 = vpop.f32.mrb[7].mxu0  ;;  %8046 = vmatmul.mubr.msk.f32.gmra.mrb[112].mxu0 %vm288_vm1, %v10541_v0  ;;  %v1295_v0 = vld [vmem:[#allocation2 + $0x8] sm:$0xff] }
 0x10a   : > { %v7739_v1 = vpop.f32.mrb[8].mxu1  ;;  %748 = vst.msk [vmem:[#allocation2 + $0x30] sm:$0xff] %vm288_vm1, %v533_v63  ;;  %8048 = vmatprep.mubr.msk.f32.mxu0 %vm288_vm1, %v9152_v23 }
 0x10b   : > { %775 = vst.msk [vmem:[#allocation2 + $0x108] sm:$0xff] %vm288_vm1, %v7739_v1  ;;  %v663_v2 = vpop.f32.mrb[9].mxu1  ;;  %7975 = vmatmul.mubr.msk.f32.gmra.mrb[114].mxu1 %vm288_vm1, %v10542_v6  ;;  %v6958_v1 = vld [vmem:[%s8526_s10 + $0x88] sm:$0xff] }
 0x10c   : > { %774 = vst.msk [vmem:[#allocation2 + $0x100] sm:$0xff] %vm288_vm1, %v663_v2  ;;  %7977 = vmatprep.mubr.msk.f32.mxu1 %vm288_vm1, %v10543_v7  ;;  %v7703_v10 = vpop.f32.mrb[8].mxu0  ;;  %v1294_v7 = vld [vmem:[#allocation2] sm:$0xff] }
 0x10d   : > { %751 = vst.msk [vmem:[#allocation2 + $0x48] sm:$0xff] %vm288_vm1, %v7703_v10  ;;  %v543_v55 = vpop.f32.mrb[9].mxu0  ;;  %8049 = vmatmul.mubr.msk.f32.gmra.mrb[114].mxu0 %vm288_vm1, %v9155_v16  ;;  %v6700_v16 = vld [vmem:[%s8526_s10 + $0x190] sm:$0xff] }
 0x10e   : > { %v7742_v23 = vpop.f32.mrb[10].mxu1  ;;  %750 = vst.msk [vmem:[#allocation2 + $0x40] sm:$0xff] %vm288_vm1, %v543_v55  ;;  %8051 = vmatprep.mubr.msk.f32.mxu0 %vm288_vm1, %v9166_v19  ;;  %v6959_v10 = vld [vmem:[%s8526_s10 + $0x90] sm:$0xff] }
 0x10f   : > { %777 = vst.msk [vmem:[#allocation2 + $0x118] sm:$0xff] %vm288_vm1, %v7742_v23  ;;  %v673_v52 = vpop.f32.mrb[11].mxu1  ;;  %7978 = vmatmul.mubr.msk.f32.gmra.mrb[116].mxu1 %vm288_vm1, %v6698_v8  ;;  %v10555_v8 = vld [vmem:[#allocation35_spill] sm:$0xff]  ;;  %v10556_v55 = vld [vmem:[#allocation36_spill] sm:$0xff] }
 0x110   : > { %776 = vst.msk [vmem:[#allocation2 + $0x110] sm:$0xff] %vm288_vm1, %v673_v52  ;;  %7980 = vmatprep.mubr.msk.f32.mxu1 %vm288_vm1, %v6699_v54  ;;  %v7706_v57 = vpop.f32.mrb[10].mxu0 }
 0x111   : > { %753 = vst.msk [vmem:[#allocation2 + $0x58] sm:$0xff] %vm288_vm1, %v7706_v57  ;;  %v553_v3 = vpop.f32.mrb[11].mxu0  ;;  %8052 = vmatmul.mubr.msk.f32.gmra.mrb[116].mxu0 %vm288_vm1, %v6796_v59 }
 0x112   : > { %v7745_v19 = vpop.f32.mrb[12].mxu1  ;;  %752 = vst.msk [vmem:[#allocation2 + $0x50] sm:$0xff] %vm288_vm1, %v553_v3  ;;  %8054 = vmatprep.mubr.msk.f32.mxu0 %vm288_vm1, %v6797_v56  ;;  %v1297_v56 = vld [vmem:[#allocation2 + $0x18] sm:$0xff] }
 0x113   : > { %779 = vst.msk [vmem:[#allocation2 + $0x128] sm:$0xff] %vm288_vm1, %v7745_v19  ;;  %v683_v5 = vpop.f32.mrb[13].mxu1  ;;  %7981 = vmatmul.mubr.msk.f32.gmra.mrb[118].mxu1 %vm288_vm1, %v6700_v16  ;;  %v6960_v16 = vld [vmem:[%s8526_s10 + $0x98] sm:$0xff]  ;;  %v1296_v19 = vld [vmem:[#allocation2 + $0x10] sm:$0xff] }
 0x114   : > { %778 = vst.msk [vmem:[#allocation2 + $0x120] sm:$0xff] %vm288_vm1, %v683_v5  ;;  %8059 = vmatprep.mubr.msk.f32.mxu1 %vm288_vm1, %v10544_v12  ;;  %v7709_v14 = vpop.f32.mrb[12].mxu0  ;;  %v6961_v5 = vld [vmem:[%s8526_s10 + $0xa0] sm:$0xff] }
 0x115   : > { %755 = vst.msk [vmem:[#allocation2 + $0x68] sm:$0xff] %vm288_vm1, %v7709_v14  ;;  %v563_v15 = vpop.f32.mrb[13].mxu0  ;;  %8055 = vmatmul.mubr.msk.f32.gmra.mrb[118].mxu0 %vm288_vm1, %v6798_v4  ;;  %v10557_v4 = vld [vmem:[#allocation37_spill] sm:$0xff]  ;;  %v10558_v12 = vld [vmem:[#allocation38_spill] sm:$0xff] }
 0x116   : > { %v7748_v17 = vpop.f32.mrb[14].mxu1  ;;  %754 = vst.msk [vmem:[#allocation2 + $0x60] sm:$0xff] %vm288_vm1, %v563_v15  ;;  %8133 = vmatprep.mubr.msk.f32.mxu0 %vm288_vm1, %v6947_v9 }
 0x117   : > { %781 = vst.msk [vmem:[#allocation2 + $0x138] sm:$0xff] %vm288_vm1, %v7748_v17  ;;  %v693_v20 = vpop.f32.mrb[15].mxu1  ;;  %8060 = vmatmul.mubr.msk.f32.vlgmr.msra.gmra.mrb[120].mxu1 %vm288_vm1, %v10545_v21 }
 0x118   : > { %780 = vst.msk [vmem:[#allocation2 + $0x130] sm:$0xff] %vm288_vm1, %v693_v20  ;;  %8206 = vmatpush3.msk.msra.mxu1 %vm433_vm0, %v9181_v11  ;;  %8062 = vmatprep.mubr.msk.f32.mxu1 %vm288_vm1, %v10546_v24  ;;  %v7712_v25 = vpop.f32.mrb[14].mxu0  ;;  %v6962_v20 = vld [vmem:[%s8526_s10 + $0xa8] sm:$0xff]  ;;  %v1298_v24 = vld [vmem:[#allocation2 + $0x20] sm:$0xff] }
 0x119   : > { %757 = vst.msk [vmem:[#allocation2 + $0x78] sm:$0xff] %vm288_vm1, %v7712_v25  ;;  %v573_v26 = vpop.f32.mrb[15].mxu0  ;;  %8134 = vmatmul.mubr.msk.f32.vlgmr.msra.gmra.mrb[120].mxu0 %vm288_vm1, %v6948_v18  ;;  %v1299_v18 = vld [vmem:[#allocation2 + $0x28] sm:$0xff] }
 0x11a   : > { %v7751_v27 = vpop.f32.mrb[16].mxu1  ;;  %756 = vst.msk [vmem:[#allocation2 + $0x70] sm:$0xff] %vm288_vm1, %v573_v26  ;;  %8280 = vmatpush3.msk.msra.mxu0 %vm433_vm0, %v9192_v13  ;;  %8136 = vmatprep.mubr.msk.f32.mxu0 %vm288_vm1, %v6949_v22  ;;  %v10559_v25 = vld [vmem:[#allocation39_spill] sm:$0xff]  ;;  %v6963_v26 = vld [vmem:[%s8526_s10 + $0xb0] sm:$0xff] }
 0x11b   : > { %783 = vst.msk [vmem:[#allocation2 + $0x148] sm:$0xff] %vm288_vm1, %v7751_v27  ;;  %v703_v11 = vpop.f32.mrb[17].mxu1  ;;  %8063 = vmatmul.mubr.msk.f32.gmra.mrb[122].mxu1 %vm288_vm1, %v10547_v29 }
 0x11c   : > { %782 = vst.msk [vmem:[#allocation2 + $0x140] sm:$0xff] %vm288_vm1, %v703_v11  ;;  %8065 = vmatprep.mubr.msk.f32.mxu1 %vm288_vm1, %v10548_v31  ;;  %v7715_v32 = vpop.f32.mrb[16].mxu0  ;;  %v10560_v11 = vld [vmem:[#allocation40_spill] sm:$0xff] }
 0x11d   : > { %759 = vst.msk [vmem:[#allocation2 + $0x88] sm:$0xff] %vm288_vm1, %v7715_v32  ;;  %v583_v13 = vpop.f32.mrb[17].mxu0  ;;  %8137 = vmatmul.mubr.msk.f32.gmra.mrb[122].mxu0 %vm288_vm1, %v6950_v28  ;;  %v6867_v32 = vld [vmem:[%s8526_s10 + $0xaa] sm:$0xff] }
 0x11e   : > { %v7754_v33 = vpop.f32.mrb[18].mxu1  ;;  %758 = vst.msk [vmem:[#allocation2 + $0x80] sm:$0xff] %vm288_vm1, %v583_v13  ;;  %8139 = vmatprep.mubr.msk.f32.mxu0 %vm288_vm1, %v6951_v30 }
 0x11f   : > { %785 = vst.msk [vmem:[#allocation2 + $0x158] sm:$0xff] %vm288_vm1, %v7754_v33  ;;  %v713_v35 = vpop.f32.mrb[19].mxu1  ;;  %8066 = vmatmul.mubr.msk.f32.gmra.mrb[124].mxu1 %vm288_vm1, %v10549_v36  ;;  %v6964_v36 = vld [vmem:[%s8526_s10 + $0xb8] sm:$0xff] }
 0x120   : > { %784 = vst.msk [vmem:[#allocation2 + $0x150] sm:$0xff] %vm288_vm1, %v713_v35  ;;  %8068 = vmatprep.mubr.msk.f32.mxu1 %vm288_vm1, %v10550_v38  ;;  %v7718_v39 = vpop.f32.mrb[18].mxu0  ;;  %v1301_v35 = vld [vmem:[#allocation2 + $0x38] sm:$0xff] }
 0x121   : > { %761 = vst.msk [vmem:[#allocation2 + $0x98] sm:$0xff] %vm288_vm1, %v7718_v39  ;;  %v593_v40 = vpop.f32.mrb[19].mxu0  ;;  %8140 = vmatmul.mubr.msk.f32.gmra.mrb[124].mxu0 %vm288_vm1, %v6952_v34  ;;  %v1300_v39 = vld [vmem:[#allocation2 + $0x30] sm:$0xff] }
 0x122   : > { %v7757_v41 = vpop.f32.mrb[20].mxu1  ;;  %760 = vst.msk [vmem:[#allocation2 + $0x90] sm:$0xff] %vm288_vm1, %v593_v40  ;;  %8142 = vmatprep.mubr.msk.f32.mxu0 %vm288_vm1, %v6953_v37  ;;  %v10561_v40 = vld [vmem:[#allocation41_spill] sm:$0xff] }
 0x123   : > { %787 = vst.msk [vmem:[#allocation2 + $0x168] sm:$0xff] %vm288_vm1, %v7757_v41  ;;  %v723_v43 = vpop.f32.mrb[21].mxu1  ;;  %8069 = vmatmul.mubr.msk.f32.gmra.mrb[126].mxu1 %vm288_vm1, %v10551_v44  ;;  %v6965_v41 = vld [vmem:[%s8526_s10 + $0xc0] sm:$0xff]  ;;  %v6868_v44 = vld [vmem:[%s8526_s10 + $0xb2] sm:$0xff] }
 0x124   : > { %786 = vst.msk [vmem:[#allocation2 + $0x160] sm:$0xff] %vm288_vm1, %v723_v43  ;;  %8071 = vmatprep.mubr.msk.f32.mxu1 %vm288_vm1, %v10552_v46  ;;  %v7721_v47 = vpop.f32.mrb[20].mxu0 }
 0x125   : > { %763 = vst.msk [vmem:[#allocation2 + $0xa8] sm:$0xff] %vm288_vm1, %v7721_v47  ;;  %v603_v48 = vpop.f32.mrb[21].mxu0  ;;  %8143 = vmatmul.mubr.msk.f32.gmra.mrb[126].mxu0 %vm288_vm1, %v6954_v42 }
 0x126   : > { %v7760_v49 = vpop.f32.mrb[22].mxu1  ;;  %762 = vst.msk [vmem:[#allocation2 + $0xa0] sm:$0xff] %vm288_vm1, %v603_v48  ;;  %8145 = vmatprep.mubr.msk.f32.mxu0 %vm288_vm1, %v6955_v45  ;;  %v6869_v48 = vld [vmem:[%s8526_s10 + $0xba] sm:$0xff] }
 0x127   : > { %789 = vst.msk [vmem:[#allocation2 + $0x178] sm:$0xff] %vm288_vm1, %v7760_v49  ;;  %v733_v51 = vpop.f32.mrb[23].mxu1  ;;  %8072 = vmatmul.mubr.msk.f32.gmra.mrb[128].mxu1 %vm288_vm1, %v10553_v53  ;;  %v1303_v53 = vld [vmem:[#allocation2 + $0x48] sm:$0xff] }
 0x128   : > { %788 = vst.msk [vmem:[#allocation2 + $0x170] sm:$0xff] %vm288_vm1, %v733_v51  ;;  %8074 = vmatprep.mubr.msk.f32.mxu1 %vm288_vm1, %v10554_v60  ;;  %v7724_v61 = vpop.f32.mrb[22].mxu0 }
 0x129   : > { %765 = vst.msk [vmem:[#allocation2 + $0xb8] sm:$0xff] %vm288_vm1, %v7724_v61  ;;  %v613_v62 = vpop.f32.mrb[23].mxu0  ;;  %8146 = vmatmul.mubr.msk.f32.gmra.mrb[128].mxu0 %vm288_vm1, %v6956_v50 }
 0x12a   : > { %v7765_v63 = vpop.f32.mrb[24].mxu1  ;;  %764 = vst.msk [vmem:[#allocation2 + $0xb0] sm:$0xff] %vm288_vm1, %v613_v62  ;;  %8148 = vmatprep.mubr.msk.f32.mxu0 %vm288_vm1, %v6957_v58  ;;  %v6966_v58 = vld [vmem:[%s8526_s10 + $0xc8] sm:$0xff]  ;;  %v1302_v62 = vld [vmem:[#allocation2 + $0x40] sm:$0xff] }
 0x12b   : > { %v1343_v2 = vadd.f32 %v7765_v63, %v1295_v0  ;;  %v1055_v6 = vpop.f32.mrb[25].mxu1  ;;  %8075 = vmatmul.mubr.msk.f32.gmra.mrb[130].mxu1 %vm288_vm1, %v10555_v8  ;;  %v6967_v63 = vld [vmem:[%s8526_s10 + $0xd0] sm:$0xff] }
 0x12c   : > { %v1342_v54 = vadd.f32 %v1294_v7, %v1055_v6  ;;  %8077 = vmatprep.mubr.msk.f32.mxu1 %vm288_vm1, %v10556_v55  ;;  %v7839_v23 = vpop.f32.mrb[24].mxu0 }
 0x12d   : > { %1391 = vst.msk [vmem:[#allocation2 + $0x8] sm:$0xff] %vm288_vm1, %v1343_v2  ;;  %v1703_v59 = vpop.f32.mrb[25].mxu0  ;;  %8149 = vmatmul.mubr.msk.f32.gmra.mrb[130].mxu0 %vm288_vm1, %v6958_v1  ;;  %v6870_v2 = vld [vmem:[%s8526_s10 + $0xc2] sm:$0xff] }
 0x12e   : > { %1390 = vst.msk [vmem:[#allocation2] sm:$0xff] %vm288_vm1, %v1342_v54  ;;  %v7768_v52 = vpop.f32.mrb[26].mxu1  ;;  %8151 = vmatprep.mubr.msk.f32.mxu0 %vm288_vm1, %v6959_v10  ;;  %v6871_v10 = vld [vmem:[%s8526_s10 + $0xca] sm:$0xff] }
 0x12f   : > { %v1345_v57 = vadd.f32 %v7768_v52, %v1297_v56  ;;  %v1065_v3 = vpop.f32.mrb[27].mxu1  ;;  %8078 = vmatmul.mubr.msk.f32.gmra.mrb[132].mxu1 %vm288_vm1, %v10557_v4  ;;  %v6968_v52 = vld [vmem:[%s8526_s10 + $0xd8] sm:$0xff] }
 0x130   : > { %v1344_v9 = vadd.f32 %v1296_v19, %v1065_v3  ;;  %8080 = vmatprep.mubr.msk.f32.mxu1 %vm288_vm1, %v10558_v12  ;;  %v7842_v14 = vpop.f32.mrb[26].mxu0  ;;  %v6969_v3 = vld [vmem:[%s8526_s10 + $0xe0] sm:$0xff] }
 0x131   : > { %1393 = vst.msk [vmem:[#allocation2 + $0x18] sm:$0xff] %vm288_vm1, %v1345_v57  ;;  %v1713_v15 = vpop.f32.mrb[27].mxu0  ;;  %8152 = vmatmul.mubr.msk.f32.gmra.mrb[132].mxu0 %vm288_vm1, %v6960_v16  ;;  %v1304_v57 = vld [vmem:[#allocation2 + $0x50] sm:$0xff] }
 0x132   : > { %1392 = vst.msk [vmem:[#allocation2 + $0x10] sm:$0xff] %vm288_vm1, %v1344_v9  ;;  %v7771_v17 = vpop.f32.mrb[28].mxu1  ;;  %8154 = vmatprep.mubr.msk.f32.mxu0 %vm288_vm1, %v6961_v5  ;;  %v6872_v5 = vld [vmem:[%s8526_s10 + $0xd2] sm:$0xff] }
 0x133   : > { %v1347_v21 = vadd.f32 %v7771_v17, %v1299_v18  ;;  %v1075_v22 = vpop.f32.mrb[29].mxu1  ;;  %8081 = vmatmul.mubr.msk.f32.gmra.mrb[134].mxu1 %vm288_vm1, %v10559_v25 }
 0x134   : > { %v1346_v27 = vadd.f32 %v1298_v24, %v1075_v22  ;;  %v1943_v28 = vld [vmem:[#allocation2 + $0x8] sm:$0xff]  ;;  %8083 = vmatprep.mubr.msk.f32.mxu1 %vm288_vm1, %v10560_v11  ;;  %v7845_v29 = vpop.f32.mrb[28].mxu0 }
 0x135   : > { %1395 = vst.msk [vmem:[#allocation2 + $0x28] sm:$0xff] %vm288_vm1, %v1347_v21  ;;  %v1991_v30 = vadd.f32 %v7839_v23, %v1943_v28  ;;  %v1942_v31 = vld [vmem:[#allocation2] sm:$0xff]  ;;  %v1723_v13 = vpop.f32.mrb[29].mxu0  ;;  %8155 = vmatmul.mubr.msk.f32.gmra.mrb[134].mxu0 %vm288_vm1, %v6962_v20  ;;  %v1307_v21 = vld [vmem:[#allocation2 + $0x68] sm:$0xff] }
 0x136   : > { %1394 = vst.msk [vmem:[#allocation2 + $0x20] sm:$0xff] %vm288_vm1, %v1346_v27  ;;  %v1990_v33 = vadd.f32 %v1942_v31, %v1703_v59  ;;  %v7774_v34 = vpop.f32.mrb[30].mxu1  ;;  %8157 = vmatprep.mubr.msk.f32.mxu0 %vm288_vm1, %v6963_v26  ;;  %v1305_v59 = vld [vmem:[#allocation2 + $0x58] sm:$0xff]  ;;  %v6970_v22 = vld [vmem:[%s8526_s10 + $0xe8] sm:$0xff]  ;;  %v1306_v26 = vld [vmem:[#allocation2 + $0x60] sm:$0xff] }
 0x137   : > { %2039 = vst.msk [vmem:[#allocation2 + $0x8] sm:$0xff] %vm288_vm1, %v1991_v30  ;;  %v1349_v37 = vadd.f32 %v7774_v34, %v1301_v35  ;;  %v1085_v38 = vpop.f32.mrb[31].mxu1  ;;  %8084 = vmatmul.mubr.msk.f32.gmra.mrb[136].mxu1 %vm288_vm1, %v10561_v40  ;;  %v6971_v27 = vld [vmem:[%s8526_s10 + $0xf0] sm:$0xff] }
 0x138   : > { %2038 = vst.msk [vmem:[#allocation2] sm:$0xff] %vm288_vm1, %v1990_v33  ;;  %v1348_v42 = vadd.f32 %v1300_v39, %v1085_v38  ;;  %v1945_v43 = vld [vmem:[#allocation2 + $0x18] sm:$0xff]  ;;  %8086 = vmatprep.mubr.msk.f32.mxu1 %vm288_vm1, %v6867_v32  ;;  %v7848_v45 = vpop.f32.mrb[30].mxu0  ;;  %v1308_v40 = vld [vmem:[#allocation2 + $0x70] sm:$0xff] }
 0x139   : > { %1397 = vst.msk [vmem:[#allocation2 + $0x38] sm:$0xff] %vm288_vm1, %v1349_v37  ;;  %v1993_v46 = vadd.f32 %v7842_v14, %v1945_v43  ;;  %v1944_v47 = vld [vmem:[#allocation2 + $0x10] sm:$0xff]  ;;  %v1733_v49 = vpop.f32.mrb[31].mxu0  ;;  %8158 = vmatmul.mubr.msk.f32.gmra.mrb[136].mxu0 %vm288_vm1, %v6964_v36  ;;  %v1309_v36 = vld [vmem:[#allocation2 + $0x78] sm:$0xff] }
 0x13a   : > { %1396 = vst.msk [vmem:[#allocation2 + $0x30] sm:$0xff] %vm288_vm1, %v1348_v42  ;;  %v1992_v50 = vadd.f32 %v1944_v47, %v1713_v15  ;;  %v7777_v51 = vpop.f32.mrb[32].mxu1  ;;  %8160 = vmatprep.mubr.msk.f32.mxu0 %vm288_vm1, %v6965_v41  ;;  %v6873_v15 = vld [vmem:[%s8526_s10 + $0xda] sm:$0xff] }
 0x13b   : > { %2041 = vst.msk [vmem:[#allocation2 + $0x18] sm:$0xff] %vm288_vm1, %v1993_v46  ;;  %v1351_v60 = vadd.f32 %v7777_v51, %v1303_v53  ;;  %v1095_v61 = vpop.f32.mrb[33].mxu1  ;;  %8087 = vmatmul.mubr.msk.f32.gmra.mrb[138].mxu1 %vm288_vm1, %v6868_v44  ;;  %v6972_v37 = vld [vmem:[%s8526_s10 + $0xf8] sm:$0xff]  ;;  %v6973_v41 = vld [vmem:[%s8526_s10 + $0x100] sm:$0xff]  ;;  %v1311_v53 = vld [vmem:[#allocation2 + $0x88] sm:$0xff] }
 0x13c   : > { %2040 = vst.msk [vmem:[#allocation2 + $0x10] sm:$0xff] %vm288_vm1, %v1992_v50  ;;  %v1350_v0 = vadd.f32 %v1302_v62, %v1095_v61  ;;  %v1947_v1 = vld [vmem:[#allocation2 + $0x28] sm:$0xff]  ;;  %8089 = vmatprep.mubr.msk.f32.mxu1 %vm288_vm1, %v6869_v48  ;;  %v7851_v6 = vpop.f32.mrb[32].mxu0  ;;  %v6876_v44 = vld [vmem:[%s8526_s10 + $0xf2] sm:$0xff]  ;;  %v6877_v48 = vld [vmem:[%s8526_s10 + $0xfa] sm:$0xff] }
 0x13d   : > { %1399 = vst.msk [vmem:[#allocation2 + $0x48] sm:$0xff] %vm288_vm1, %v1351_v60  ;;  %v1995_v7 = vadd.f32 %v7845_v29, %v1947_v1  ;;  %v1946_v8 = vld [vmem:[#allocation2 + $0x20] sm:$0xff]  ;;  %v1743_v54 = vpop.f32.mrb[33].mxu0  ;;  %8161 = vmatmul.mubr.msk.f32.gmra.mrb[138].mxu0 %vm288_vm1, %v6966_v58  ;;  %v6974_v58 = vld [vmem:[%s8526_s10 + $0x108] sm:$0xff] }
 0x13e   : > { %1398 = vst.msk [vmem:[#allocation2 + $0x40] sm:$0xff] %vm288_vm1, %v1350_v0  ;;  %v1994_v55 = vadd.f32 %v1946_v8, %v1723_v13  ;;  %v7780_v23 = vpop.f32.mrb[34].mxu1  ;;  %8163 = vmatprep.mubr.msk.f32.mxu0 %vm288_vm1, %v6967_v63  ;;  %v6874_v29 = vld [vmem:[%s8526_s10 + $0xe2] sm:$0xff]  ;;  %v6875_v13 = vld [vmem:[%s8526_s10 + $0xea] sm:$0xff] }
 0x13f   : > { %2043 = vst.msk [vmem:[#allocation2 + $0x28] sm:$0xff] %vm288_vm1, %v1995_v7  ;;  %v1353_v56 = vadd.f32 %v7780_v23, %v1305_v59  ;;  %v1105_v16 = vpop.f32.mrb[35].mxu1  ;;  %8090 = vmatmul.mubr.msk.f32.gmra.mrb[140].mxu1 %vm288_vm1, %v6870_v2  ;;  %v1310_v62 = vld [vmem:[#allocation2 + $0x80] sm:$0xff]  ;;  %v6975_v63 = vld [vmem:[%s8526_s10 + $0x110] sm:$0xff]  ;;  %v1313_v59 = vld [vmem:[#allocation2 + $0x98] sm:$0xff] }
 0x140   : > { %2042 = vst.msk [vmem:[#allocation2 + $0x20] sm:$0xff] %vm288_vm1, %v1994_v55  ;;  %v1352_v19 = vadd.f32 %v1304_v57, %v1105_v16  ;;  %v1949_v4 = vld [vmem:[#allocation2 + $0x38] sm:$0xff]  ;;  %8092 = vmatprep.mubr.msk.f32.mxu1 %vm288_vm1, %v6871_v10  ;;  %v7854_v9 = vpop.f32.mrb[34].mxu0  ;;  %v6878_v2 = vld [vmem:[%s8526_s10 + $0x102] sm:$0xff]  ;;  %v6879_v10 = vld [vmem:[%s8526_s10 + $0x10a] sm:$0xff] }
 0x141   : > { %1401 = vst.msk [vmem:[#allocation2 + $0x58] sm:$0xff] %vm288_vm1, %v1353_v56  ;;  %v1997_v12 = vadd.f32 %v7848_v45, %v1949_v4  ;;  %v1948_v14 = vld [vmem:[#allocation2 + $0x30] sm:$0xff]  ;;  %v1753_v17 = vpop.f32.mrb[35].mxu0  ;;  %8164 = vmatmul.mubr.msk.f32.gmra.mrb[140].mxu0 %vm288_vm1, %v6968_v52  ;;  %v6976_v52 = vld [vmem:[%s8526_s10 + $0x118] sm:$0xff] }
 0x142   : > { %1400 = vst.msk [vmem:[#allocation2 + $0x50] sm:$0xff] %vm288_vm1, %v1352_v19  ;;  %v1996_v18 = vadd.f32 %v1948_v14, %v1733_v49  ;;  %v7783_v20 = vpop.f32.mrb[36].mxu1  ;;  %8166 = vmatprep.mubr.msk.f32.mxu0 %vm288_vm1, %v6969_v3  ;;  %v1312_v57 = vld [vmem:[#allocation2 + $0x90] sm:$0xff]  ;;  %v6977_v3 = vld [vmem:[%s8526_s10 + $0x120] sm:$0xff] }
 0x143   : > { %2045 = vst.msk [vmem:[#allocation2 + $0x38] sm:$0xff] %vm288_vm1, %v1997_v12  ;;  %v1355_v24 = vadd.f32 %v7783_v20, %v1307_v21  ;;  %v1115_v25 = vpop.f32.mrb[37].mxu1  ;;  %8093 = vmatmul.mubr.msk.f32.gmra.mrb[142].mxu1 %vm288_vm1, %v6872_v5  ;;  %v6880_v5 = vld [vmem:[%s8526_s10 + $0x112] sm:$0xff]  ;;  %v1315_v21 = vld [vmem:[#allocation2 + $0xa8] sm:$0xff] }
 0x144   : > { %2044 = vst.msk [vmem:[#allocation2 + $0x30] sm:$0xff] %vm288_vm1, %v1996_v18  ;;  %v1354_v28 = vadd.f32 %v1306_v26, %v1115_v25  ;;  %v1951_v11 = vld [vmem:[#allocation2 + $0x48] sm:$0xff]  ;;  %8095 = vmatprep.mubr.msk.f32.mxu1 %vm288_vm1, %v6873_v15  ;;  %v7857_v30 = vpop.f32.mrb[36].mxu0  ;;  %v6881_v15 = vld [vmem:[%s8526_s10 + $0x11a] sm:$0xff] }
 0x145   : > { %1403 = vst.msk [vmem:[#allocation2 + $0x68] sm:$0xff] %vm288_vm1, %v1355_v24  ;;  %v1999_v31 = vadd.f32 %v7851_v6, %v1951_v11  ;;  %v1950_v32 = vld [vmem:[#allocation2 + $0x40] sm:$0xff]  ;;  %v1763_v33 = vpop.f32.mrb[37].mxu0  ;;  %8167 = vmatmul.mubr.msk.f32.gmra.mrb[142].mxu0 %vm288_vm1, %v6970_v22  ;;  %v6978_v22 = vld [vmem:[%s8526_s10 + $0x128] sm:$0xff] }
 0x146   : > { %1402 = vst.msk [vmem:[#allocation2 + $0x60] sm:$0xff] %vm288_vm1, %v1354_v28  ;;  %v1998_v34 = vadd.f32 %v1950_v32, %v1743_v54  ;;  %v7786_v35 = vpop.f32.mrb[38].mxu1  ;;  %8169 = vmatprep.mubr.msk.f32.mxu0 %vm288_vm1, %v6971_v27  ;;  %v1314_v26 = vld [vmem:[#allocation2 + $0xa0] sm:$0xff]  ;;  %v6979_v27 = vld [vmem:[%s8526_s10 + $0x130] sm:$0xff] }
 0x147   : > { %2047 = vst.msk [vmem:[#allocation2 + $0x48] sm:$0xff] %vm288_vm1, %v1999_v31  ;;  %v1357_v38 = vadd.f32 %v7786_v35, %v1309_v36  ;;  %v1125_v39 = vpop.f32.mrb[39].mxu1  ;;  %8096 = vmatmul.mubr.msk.f32.gmra.mrb[144].mxu1 %vm288_vm1, %v6874_v29  ;;  %v6882_v29 = vld [vmem:[%s8526_s10 + $0x122] sm:$0xff]  ;;  %v1317_v36 = vld [vmem:[#allocation2 + $0xb8] sm:$0xff] }
 0x148   : > { %2046 = vst.msk [vmem:[#allocation2 + $0x40] sm:$0xff] %vm288_vm1, %v1998_v34  ;;  %v1356_v42 = vadd.f32 %v1308_v40, %v1125_v39  ;;  %v1953_v43 = vld [vmem:[#allocation2 + $0x58] sm:$0xff]  ;;  %8098 = vmatprep.mubr.msk.f32.mxu1 %vm288_vm1, %v6875_v13  ;;  %v7860_v45 = vpop.f32.mrb[38].mxu0  ;;  %v6883_v13 = vld [vmem:[%s8526_s10 + $0x12a] sm:$0xff] }
 0x149   : > { %1405 = vst.msk [vmem:[#allocation2 + $0x78] sm:$0xff] %vm288_vm1, %v1357_v38  ;;  %v2001_v46 = vadd.f32 %v7854_v9, %v1953_v43  ;;  %v1952_v47 = vld [vmem:[#allocation2 + $0x50] sm:$0xff]  ;;  %v1773_v49 = vpop.f32.mrb[39].mxu0  ;;  %8170 = vmatmul.mubr.msk.f32.gmra.mrb[144].mxu0 %vm288_vm1, %v6972_v37  ;;  %v6980_v37 = vld [vmem:[%s8526_s10 + $0x138] sm:$0xff] }
 0x14a   : > { %1404 = vst.msk [vmem:[#allocation2 + $0x70] sm:$0xff] %vm288_vm1, %v1356_v42  ;;  %v2000_v50 = vadd.f32 %v1952_v47, %v1753_v17  ;;  %v7789_v51 = vpop.f32.mrb[40].mxu1  ;;  %8172 = vmatprep.mubr.msk.f32.mxu0 %vm288_vm1, %v6973_v41  ;;  %v1316_v40 = vld [vmem:[#allocation2 + $0xb0] sm:$0xff]  ;;  %v6981_v41 = vld [vmem:[%s8526_s10 + $0x140] sm:$0xff] }
 0x14b   : > { %2049 = vst.msk [vmem:[#allocation2 + $0x58] sm:$0xff] %vm288_vm1, %v2001_v46  ;;  %v1359_v60 = vadd.f32 %v7789_v51, %v1311_v53  ;;  %v1135_v61 = vpop.f32.mrb[41].mxu1  ;;  %8099 = vmatmul.mubr.msk.f32.gmra.mrb[146].mxu1 %vm288_vm1, %v6876_v44  ;;  %v6884_v44 = vld [vmem:[%s8526_s10 + $0x132] sm:$0xff]  ;;  %v1319_v53 = vld [vmem:[#allocation2 + $0xc8] sm:$0xff] }
 0x14c   : > { %2048 = vst.msk [vmem:[#allocation2 + $0x50] sm:$0xff] %vm288_vm1, %v2000_v50  ;;  %v1358_v0 = vadd.f32 %v1310_v62, %v1135_v61  ;;  %v1955_v1 = vld [vmem:[#allocation2 + $0x68] sm:$0xff]  ;;  %8101 = vmatprep.mubr.msk.f32.mxu1 %vm288_vm1, %v6877_v48  ;;  %v7863_v6 = vpop.f32.mrb[40].mxu0  ;;  %v6885_v48 = vld [vmem:[%s8526_s10 + $0x13a] sm:$0xff] }
 0x14d   : > { %1407 = vst.msk [vmem:[#allocation2 + $0x88] sm:$0xff] %vm288_vm1, %v1359_v60  ;;  %v2003_v7 = vadd.f32 %v7857_v30, %v1955_v1  ;;  %v1954_v8 = vld [vmem:[#allocation2 + $0x60] sm:$0xff]  ;;  %v1783_v54 = vpop.f32.mrb[41].mxu0  ;;  %8173 = vmatmul.mubr.msk.f32.gmra.mrb[146].mxu0 %vm288_vm1, %v6974_v58  ;;  %v6982_v58 = vld [vmem:[%s8526_s10 + $0x148] sm:$0xff] }
 0x14e   : > { %1406 = vst.msk [vmem:[#allocation2 + $0x80] sm:$0xff] %vm288_vm1, %v1358_v0  ;;  %v2002_v55 = vadd.f32 %v1954_v8, %v1763_v33  ;;  %v7792_v23 = vpop.f32.mrb[42].mxu1  ;;  %8175 = vmatprep.mubr.msk.f32.mxu0 %vm288_vm1, %v6975_v63  ;;  %v1318_v62 = vld [vmem:[#allocation2 + $0xc0] sm:$0xff]  ;;  %v6983_v63 = vld [vmem:[%s8526_s10 + $0x150] sm:$0xff] }
 0x14f   : > { %2051 = vst.msk [vmem:[#allocation2 + $0x68] sm:$0xff] %vm288_vm1, %v2003_v7  ;;  %v1361_v56 = vadd.f32 %v7792_v23, %v1313_v59  ;;  %v1145_v16 = vpop.f32.mrb[43].mxu1  ;;  %8102 = vmatmul.mubr.msk.f32.gmra.mrb[148].mxu1 %vm288_vm1, %v6878_v2  ;;  %v6886_v2 = vld [vmem:[%s8526_s10 + $0x142] sm:$0xff]  ;;  %v1321_v59 = vld [vmem:[#allocation2 + $0xd8] sm:$0xff] }
 0x150   : > { %2050 = vst.msk [vmem:[#allocation2 + $0x60] sm:$0xff] %vm288_vm1, %v2002_v55  ;;  %v1360_v19 = vadd.f32 %v1312_v57, %v1145_v16  ;;  %v1957_v4 = vld [vmem:[#allocation2 + $0x78] sm:$0xff]  ;;  %8104 = vmatprep.mubr.msk.f32.mxu1 %vm288_vm1, %v6879_v10  ;;  %v7866_v9 = vpop.f32.mrb[42].mxu0  ;;  %v6887_v10 = vld [vmem:[%s8526_s10 + $0x14a] sm:$0xff] }
 0x151   : > { %1409 = vst.msk [vmem:[#allocation2 + $0x98] sm:$0xff] %vm288_vm1, %v1361_v56  ;;  %v2005_v12 = vadd.f32 %v7860_v45, %v1957_v4  ;;  %v1956_v14 = vld [vmem:[#allocation2 + $0x70] sm:$0xff]  ;;  %v1793_v17 = vpop.f32.mrb[43].mxu0  ;;  %8176 = vmatmul.mubr.msk.f32.gmra.mrb[148].mxu0 %vm288_vm1, %v6976_v52  ;;  %v6984_v52 = vld [vmem:[%s8526_s10 + $0x158] sm:$0xff] }
 0x152   : > { %1408 = vst.msk [vmem:[#allocation2 + $0x90] sm:$0xff] %vm288_vm1, %v1360_v19  ;;  %v2004_v18 = vadd.f32 %v1956_v14, %v1773_v49  ;;  %v7795_v20 = vpop.f32.mrb[44].mxu1  ;;  %8178 = vmatprep.mubr.msk.f32.mxu0 %vm288_vm1, %v6977_v3  ;;  %v1320_v57 = vld [vmem:[#allocation2 + $0xd0] sm:$0xff]  ;;  %v6985_v3 = vld [vmem:[%s8526_s10 + $0x160] sm:$0xff] }
 0x153   : > { %2053 = vst.msk [vmem:[#allocation2 + $0x78] sm:$0xff] %vm288_vm1, %v2005_v12  ;;  %v1363_v24 = vadd.f32 %v7795_v20, %v1315_v21  ;;  %v1155_v25 = vpop.f32.mrb[45].mxu1  ;;  %8105 = vmatmul.mubr.msk.f32.gmra.mrb[150].mxu1 %vm288_vm1, %v6880_v5  ;;  %v6888_v5 = vld [vmem:[%s8526_s10 + $0x152] sm:$0xff]  ;;  %v1323_v21 = vld [vmem:[#allocation2 + $0xe8] sm:$0xff] }
 0x154   : > { %2052 = vst.msk [vmem:[#allocation2 + $0x70] sm:$0xff] %vm288_vm1, %v2004_v18  ;;  %v1362_v28 = vadd.f32 %v1314_v26, %v1155_v25  ;;  %v1959_v11 = vld [vmem:[#allocation2 + $0x88] sm:$0xff]  ;;  %8107 = vmatprep.mubr.msk.f32.mxu1 %vm288_vm1, %v6881_v15  ;;  %v7869_v30 = vpop.f32.mrb[44].mxu0  ;;  %v6889_v15 = vld [vmem:[%s8526_s10 + $0x15a] sm:$0xff] }
 0x155   : > { %1411 = vst.msk [vmem:[#allocation2 + $0xa8] sm:$0xff] %vm288_vm1, %v1363_v24  ;;  %v2007_v31 = vadd.f32 %v7863_v6, %v1959_v11  ;;  %v1958_v32 = vld [vmem:[#allocation2 + $0x80] sm:$0xff]  ;;  %v1803_v33 = vpop.f32.mrb[45].mxu0  ;;  %8179 = vmatmul.mubr.msk.f32.gmra.mrb[150].mxu0 %vm288_vm1, %v6978_v22  ;;  %v6986_v22 = vld [vmem:[%s8526_s10 + $0x168] sm:$0xff] }
 0x156   : > { %1410 = vst.msk [vmem:[#allocation2 + $0xa0] sm:$0xff] %vm288_vm1, %v1362_v28  ;;  %v2006_v34 = vadd.f32 %v1958_v32, %v1783_v54  ;;  %v7798_v35 = vpop.f32.mrb[46].mxu1  ;;  %8181 = vmatprep.mubr.msk.f32.mxu0 %vm288_vm1, %v6979_v27  ;;  %v1322_v26 = vld [vmem:[#allocation2 + $0xe0] sm:$0xff]  ;;  %v6987_v27 = vld [vmem:[%s8526_s10 + $0x170] sm:$0xff] }
 0x157   : > { %2055 = vst.msk [vmem:[#allocation2 + $0x88] sm:$0xff] %vm288_vm1, %v2007_v31  ;;  %v1365_v38 = vadd.f32 %v7798_v35, %v1317_v36  ;;  %v1165_v39 = vpop.f32.mrb[47].mxu1  ;;  %8108 = vmatmul.mubr.msk.f32.gmra.mrb[152].mxu1 %vm288_vm1, %v6882_v29  ;;  %v6890_v29 = vld [vmem:[%s8526_s10 + $0x162] sm:$0xff]  ;;  %v1325_v36 = vld [vmem:[#allocation2 + $0xf8] sm:$0xff] }
 0x158   : > { %2054 = vst.msk [vmem:[#allocation2 + $0x80] sm:$0xff] %vm288_vm1, %v2006_v34  ;;  %v1364_v42 = vadd.f32 %v1316_v40, %v1165_v39  ;;  %v1961_v43 = vld [vmem:[#allocation2 + $0x98] sm:$0xff]  ;;  %8110 = vmatprep.mubr.msk.f32.mxu1 %vm288_vm1, %v6883_v13  ;;  %v7872_v45 = vpop.f32.mrb[46].mxu0  ;;  %v6891_v13 = vld [vmem:[%s8526_s10 + $0x16a] sm:$0xff] }
 0x159   : > { %1413 = vst.msk [vmem:[#allocation2 + $0xb8] sm:$0xff] %vm288_vm1, %v1365_v38  ;;  %v2009_v46 = vadd.f32 %v7866_v9, %v1961_v43  ;;  %v1960_v47 = vld [vmem:[#allocation2 + $0x90] sm:$0xff]  ;;  %v1813_v49 = vpop.f32.mrb[47].mxu0  ;;  %8182 = vmatmul.mubr.msk.f32.gmra.mrb[152].mxu0 %vm288_vm1, %v6980_v37  ;;  %v6988_v37 = vld [vmem:[%s8526_s10 + $0x178] sm:$0xff] }
 0x15a   : > { %1412 = vst.msk [vmem:[#allocation2 + $0xb0] sm:$0xff] %vm288_vm1, %v1364_v42  ;;  %v2008_v50 = vadd.f32 %v1960_v47, %v1793_v17  ;;  %v7801_v51 = vpop.f32.mrb[48].mxu1  ;;  %8184 = vmatprep.mubr.msk.f32.mxu0 %vm288_vm1, %v6981_v41  ;;  %v1324_v40 = vld [vmem:[#allocation2 + $0xf0] sm:$0xff]  ;;  %v6989_v41 = vld [vmem:[%s8526_s10 + $0x180] sm:$0xff] }
 0x15b   : > { %2057 = vst.msk [vmem:[#allocation2 + $0x98] sm:$0xff] %vm288_vm1, %v2009_v46  ;;  %v1367_v60 = vadd.f32 %v7801_v51, %v1319_v53  ;;  %v1175_v61 = vpop.f32.mrb[49].mxu1  ;;  %8111 = vmatmul.mubr.msk.f32.gmra.mrb[154].mxu1 %vm288_vm1, %v6884_v44  ;;  %v6892_v44 = vld [vmem:[%s8526_s10 + $0x172] sm:$0xff]  ;;  %v1327_v53 = vld [vmem:[#allocation2 + $0x108] sm:$0xff] }
 0x15c   : > { %2056 = vst.msk [vmem:[#allocation2 + $0x90] sm:$0xff] %vm288_vm1, %v2008_v50  ;;  %v1366_v0 = vadd.f32 %v1318_v62, %v1175_v61  ;;  %v1963_v1 = vld [vmem:[#allocation2 + $0xa8] sm:$0xff]  ;;  %8113 = vmatprep.mubr.msk.f32.mxu1 %vm288_vm1, %v6885_v48  ;;  %v7875_v6 = vpop.f32.mrb[48].mxu0  ;;  %v6893_v48 = vld [vmem:[%s8526_s10 + $0x17a] sm:$0xff] }
 0x15d   : > { %1415 = vst.msk [vmem:[#allocation2 + $0xc8] sm:$0xff] %vm288_vm1, %v1367_v60  ;;  %v2011_v7 = vadd.f32 %v7869_v30, %v1963_v1  ;;  %v1962_v8 = vld [vmem:[#allocation2 + $0xa0] sm:$0xff]  ;;  %v1823_v54 = vpop.f32.mrb[49].mxu0  ;;  %8185 = vmatmul.mubr.msk.f32.gmra.mrb[154].mxu0 %vm288_vm1, %v6982_v58  ;;  %v6990_v58 = vld [vmem:[%s8526_s10 + $0x188] sm:$0xff] }
 0x15e   : > { %1414 = vst.msk [vmem:[#allocation2 + $0xc0] sm:$0xff] %vm288_vm1, %v1366_v0  ;;  %v2010_v55 = vadd.f32 %v1962_v8, %v1803_v33  ;;  %v7804_v23 = vpop.f32.mrb[50].mxu1  ;;  %8187 = vmatprep.mubr.msk.f32.mxu0 %vm288_vm1, %v6983_v63  ;;  %v1326_v62 = vld [vmem:[#allocation2 + $0x100] sm:$0xff]  ;;  %v6991_v63 = vld [vmem:[%s8526_s10 + $0x190] sm:$0xff] }
 0x15f   : > { %2059 = vst.msk [vmem:[#allocation2 + $0xa8] sm:$0xff] %vm288_vm1, %v2011_v7  ;;  %v1369_v56 = vadd.f32 %v7804_v23, %v1321_v59  ;;  %v1185_v16 = vpop.f32.mrb[51].mxu1  ;;  %8114 = vmatmul.mubr.msk.f32.gmra.mrb[156].mxu1 %vm288_vm1, %v6886_v2  ;;  %v6894_v2 = vld [vmem:[%s8526_s10 + $0x182] sm:$0xff]  ;;  %v1329_v59 = vld [vmem:[#allocation2 + $0x118] sm:$0xff] }
 0x160   : > { %2058 = vst.msk [vmem:[#allocation2 + $0xa0] sm:$0xff] %vm288_vm1, %v2010_v55  ;;  %v1368_v19 = vadd.f32 %v1320_v57, %v1185_v16  ;;  %v1965_v4 = vld [vmem:[#allocation2 + $0xb8] sm:$0xff]  ;;  %8116 = vmatprep.mubr.msk.f32.mxu1 %vm288_vm1, %v6887_v10  ;;  %v7878_v9 = vpop.f32.mrb[50].mxu0  ;;  %v6895_v10 = vld [vmem:[%s8526_s10 + $0x18a] sm:$0xff] }
 0x161   : > { %1417 = vst.msk [vmem:[#allocation2 + $0xd8] sm:$0xff] %vm288_vm1, %v1369_v56  ;;  %v2013_v12 = vadd.f32 %v7872_v45, %v1965_v4  ;;  %v1964_v14 = vld [vmem:[#allocation2 + $0xb0] sm:$0xff]  ;;  %v1833_v17 = vpop.f32.mrb[51].mxu0  ;;  %8188 = vmatmul.mubr.msk.f32.gmra.mrb[156].mxu0 %vm288_vm1, %v6984_v52  ;;  %v6992_v52 = vld [vmem:[%s8526_s10 + $0x198] sm:$0xff] }
 0x162   : > { %1416 = vst.msk [vmem:[#allocation2 + $0xd0] sm:$0xff] %vm288_vm1, %v1368_v19  ;;  %v2012_v18 = vadd.f32 %v1964_v14, %v1813_v49  ;;  %v7807_v20 = vpop.f32.mrb[52].mxu1  ;;  %8190 = vmatprep.mubr.msk.f32.mxu0 %vm288_vm1, %v6985_v3  ;;  %v1328_v57 = vld [vmem:[#allocation2 + $0x110] sm:$0xff]  ;;  %v6993_v3 = vld [vmem:[%s8526_s10 + $0x1a0] sm:$0xff] }
 0x163   : > { %2061 = vst.msk [vmem:[#allocation2 + $0xb8] sm:$0xff] %vm288_vm1, %v2013_v12  ;;  %v1371_v24 = vadd.f32 %v7807_v20, %v1323_v21  ;;  %v1195_v25 = vpop.f32.mrb[53].mxu1  ;;  %8117 = vmatmul.mubr.msk.f32.gmra.mrb[158].mxu1 %vm288_vm1, %v6888_v5  ;;  %v6896_v5 = vld [vmem:[%s8526_s10 + $0x192] sm:$0xff]  ;;  %v1331_v21 = vld [vmem:[#allocation2 + $0x128] sm:$0xff] }
 0x164   : > { %2060 = vst.msk [vmem:[#allocation2 + $0xb0] sm:$0xff] %vm288_vm1, %v2012_v18  ;;  %v1370_v28 = vadd.f32 %v1322_v26, %v1195_v25  ;;  %v1967_v11 = vld [vmem:[#allocation2 + $0xc8] sm:$0xff]  ;;  %8119 = vmatprep.mubr.msk.f32.mxu1 %vm288_vm1, %v6889_v15  ;;  %v7881_v30 = vpop.f32.mrb[52].mxu0  ;;  %v7045_v15 = vld [vmem:[%s8526_s10 + $0x31] sm:$0xff]  ;;  %v1330_v26 = vld [vmem:[#allocation2 + $0x120] sm:$0xff] }
 0x165   : > { %1419 = vst.msk [vmem:[#allocation2 + $0xe8] sm:$0xff] %vm288_vm1, %v1371_v24  ;;  %v2015_v31 = vadd.f32 %v7875_v6, %v1967_v11  ;;  %v1966_v32 = vld [vmem:[#allocation2 + $0xc0] sm:$0xff]  ;;  %v1843_v33 = vpop.f32.mrb[53].mxu0  ;;  %8191 = vmatmul.mubr.msk.f32.gmra.mrb[158].mxu0 %vm288_vm1, %v6986_v22  ;;  %v6994_v22 = vld [vmem:[%s8526_s10 + $0x1a8] sm:$0xff] }
 0x166   : > { %1418 = vst.msk [vmem:[#allocation2 + $0xe0] sm:$0xff] %vm288_vm1, %v1370_v28  ;;  %v2014_v34 = vadd.f32 %v1966_v32, %v1823_v54  ;;  %v7810_v35 = vpop.f32.mrb[54].mxu1  ;;  %8193 = vmatprep.mubr.msk.f32.mxu0 %vm288_vm1, %v6987_v27  ;;  %v7143_v27 = vld [vmem:[%s8526_s10 + $0x32] sm:$0xff] }
 0x167   : > { %2063 = vst.msk [vmem:[#allocation2 + $0xc8] sm:$0xff] %vm288_vm1, %v2015_v31  ;;  %v1373_v38 = vadd.f32 %v7810_v35, %v1325_v36  ;;  %v1205_v39 = vpop.f32.mrb[55].mxu1  ;;  %8120 = vmatmul.mubr.msk.f32.gmra.mrb[160].mxu1 %vm288_vm1, %v6890_v29  ;;  %v7046_v29 = vld [vmem:[%s8526_s10 + $0x39] sm:$0xff] }
 0x168   : > { %2062 = vst.msk [vmem:[#allocation2 + $0xc0] sm:$0xff] %vm288_vm1, %v2014_v34  ;;  %v1372_v42 = vadd.f32 %v1324_v40, %v1205_v39  ;;  %v1969_v43 = vld [vmem:[#allocation2 + $0xd8] sm:$0xff]  ;;  %8122 = vmatprep.mubr.msk.f32.mxu1 %vm288_vm1, %v6891_v13  ;;  %v7884_v45 = vpop.f32.mrb[54].mxu0  ;;  %v7047_v13 = vld [vmem:[%s8526_s10 + $0x41] sm:$0xff]  ;;  %v1332_v40 = vld [vmem:[#allocation2 + $0x130] sm:$0xff] }
 0x169   : > { %1421 = vst.msk [vmem:[#allocation2 + $0xf8] sm:$0xff] %vm288_vm1, %v1373_v38  ;;  %v2017_v46 = vadd.f32 %v7878_v9, %v1969_v43  ;;  %v1968_v47 = vld [vmem:[#allocation2 + $0xd0] sm:$0xff]  ;;  %v1853_v49 = vpop.f32.mrb[55].mxu0  ;;  %8194 = vmatmul.mubr.msk.f32.gmra.mrb[160].mxu0 %vm288_vm1, %v6988_v37  ;;  %v1333_v36 = vld [vmem:[#allocation2 + $0x138] sm:$0xff] }
 0x16a   : > { %1420 = vst.msk [vmem:[#allocation2 + $0xf0] sm:$0xff] %vm288_vm1, %v1372_v42  ;;  %v2016_v50 = vadd.f32 %v1968_v47, %v1833_v17  ;;  %v7813_v51 = vpop.f32.mrb[56].mxu1  ;;  %8196 = vmatprep.mubr.msk.f32.mxu0 %vm288_vm1, %v6989_v41  ;;  %v7144_v37 = vld [vmem:[%s8526_s10 + $0x3a] sm:$0xff]  ;;  %v7145_v41 = vld [vmem:[%s8526_s10 + $0x42] sm:$0xff] }
 0x16b   : > { %2065 = vst.msk [vmem:[#allocation2 + $0xd8] sm:$0xff] %vm288_vm1, %v2017_v46  ;;  %v1375_v60 = vadd.f32 %v7813_v51, %v1327_v53  ;;  %v1215_v61 = vpop.f32.mrb[57].mxu1  ;;  %8123 = vmatmul.mubr.msk.f32.gmra.mrb[162].mxu1 %vm288_vm1, %v6892_v44  ;;  %v7048_v44 = vld [vmem:[%s8526_s10 + $0x49] sm:$0xff] }
 0x16c   : > { %2064 = vst.msk [vmem:[#allocation2 + $0xd0] sm:$0xff] %vm288_vm1, %v2016_v50  ;;  %v1374_v0 = vadd.f32 %v1326_v62, %v1215_v61  ;;  %v1971_v1 = vld [vmem:[#allocation2 + $0xe8] sm:$0xff]  ;;  %8125 = vmatprep.mubr.msk.f32.mxu1 %vm288_vm1, %v6893_v48  ;;  %v7887_v6 = vpop.f32.mrb[56].mxu0  ;;  %v7049_v48 = vld [vmem:[%s8526_s10 + $0x51] sm:$0xff]  ;;  %v1334_v62 = vld [vmem:[#allocation2 + $0x140] sm:$0xff] }
 0x16d   : > { %1423 = vst.msk [vmem:[#allocation2 + $0x108] sm:$0xff] %vm288_vm1, %v1375_v60  ;;  %v2019_v7 = vadd.f32 %v7881_v30, %v1971_v1  ;;  %v1970_v8 = vld [vmem:[#allocation2 + $0xe0] sm:$0xff]  ;;  %v1863_v54 = vpop.f32.mrb[57].mxu0  ;;  %8197 = vmatmul.mubr.msk.f32.gmra.mrb[162].mxu0 %vm288_vm1, %v6990_v58  ;;  %v1335_v53 = vld [vmem:[#allocation2 + $0x148] sm:$0xff] }
 0x16e   : > { %1422 = vst.msk [vmem:[#allocation2 + $0x100] sm:$0xff] %vm288_vm1, %v1374_v0  ;;  %v2018_v55 = vadd.f32 %v1970_v8, %v1843_v33  ;;  %v7816_v23 = vpop.f32.mrb[58].mxu1  ;;  %8199 = vmatprep.mubr.msk.f32.mxu0 %vm288_vm1, %v6991_v63  ;;  %v7146_v58 = vld [vmem:[%s8526_s10 + $0x4a] sm:$0xff]  ;;  %v7147_v63 = vld [vmem:[%s8526_s10 + $0x52] sm:$0xff] }
 0x16f   : > { %2067 = vst.msk [vmem:[#allocation2 + $0xe8] sm:$0xff] %vm288_vm1, %v2019_v7  ;;  %v1377_v56 = vadd.f32 %v7816_v23, %v1329_v59  ;;  %v1225_v16 = vpop.f32.mrb[59].mxu1  ;;  %8126 = vmatmul.mubr.msk.f32.gmra.mrb[164].mxu1 %vm288_vm1, %v6894_v2  ;;  %v7050_v2 = vld [vmem:[%s8526_s10 + $0x59] sm:$0xff] }
 0x170   : > { %2066 = vst.msk [vmem:[#allocation2 + $0xe0] sm:$0xff] %vm288_vm1, %v2018_v55  ;;  %v1376_v19 = vadd.f32 %v1328_v57, %v1225_v16  ;;  %v1973_v4 = vld [vmem:[#allocation2 + $0xf8] sm:$0xff]  ;;  %8128 = vmatprep.mubr.msk.f32.mxu1 %vm288_vm1, %v6895_v10  ;;  %v7890_v9 = vpop.f32.mrb[58].mxu0  ;;  %v7051_v10 = vld [vmem:[%s8526_s10 + $0x61] sm:$0xff]  ;;  %v1336_v57 = vld [vmem:[#allocation2 + $0x150] sm:$0xff] }
 0x171   : > { %1425 = vst.msk [vmem:[#allocation2 + $0x118] sm:$0xff] %vm288_vm1, %v1377_v56  ;;  %v2021_v12 = vadd.f32 %v7884_v45, %v1973_v4  ;;  %v1972_v14 = vld [vmem:[#allocation2 + $0xf0] sm:$0xff]  ;;  %v1873_v17 = vpop.f32.mrb[59].mxu0  ;;  %8200 = vmatmul.mubr.msk.f32.gmra.mrb[164].mxu0 %vm288_vm1, %v6992_v52  ;;  %v1337_v59 = vld [vmem:[#allocation2 + $0x158] sm:$0xff] }
 0x172   : > { %1424 = vst.msk [vmem:[#allocation2 + $0x110] sm:$0xff] %vm288_vm1, %v1376_v19  ;;  %v2020_v18 = vadd.f32 %v1972_v14, %v1853_v49  ;;  %v7819_v20 = vpop.f32.mrb[60].mxu1  ;;  %8202 = vmatprep.mubr.msk.f32.mxu0 %vm288_vm1, %v6993_v3  ;;  %v7148_v52 = vld [vmem:[%s8526_s10 + $0x5a] sm:$0xff]  ;;  %v7149_v3 = vld [vmem:[%s8526_s10 + $0x62] sm:$0xff] }
 0x173   : > { %2069 = vst.msk [vmem:[#allocation2 + $0xf8] sm:$0xff] %vm288_vm1, %v2021_v12  ;;  %v1379_v24 = vadd.f32 %v7819_v20, %v1331_v21  ;;  %v1235_v25 = vpop.f32.mrb[61].mxu1  ;;  %8129 = vmatmul.mubr.msk.f32.gmra.mrb[166].mxu1 %vm288_vm1, %v6896_v5  ;;  %v7052_v5 = vld [vmem:[%s8526_s10 + $0x69] sm:$0xff] }
 0x174   : > { %2068 = vst.msk [vmem:[#allocation2 + $0xf0] sm:$0xff] %vm288_vm1, %v2020_v18  ;;  %v1378_v28 = vadd.f32 %v1330_v26, %v1235_v25  ;;  %v1975_v11 = vld [vmem:[#allocation2 + $0x108] sm:$0xff]  ;;  %8207 = vmatprep.mubr.msk.f32.mxu1 %vm288_vm1, %v7045_v15  ;;  %v7893_v30 = vpop.f32.mrb[60].mxu0  ;;  %v7053_v15 = vld [vmem:[%s8526_s10 + $0x71] sm:$0xff]  ;;  %v1338_v26 = vld [vmem:[#allocation2 + $0x160] sm:$0xff] }
 0x175   : > { %1427 = vst.msk [vmem:[#allocation2 + $0x128] sm:$0xff] %vm288_vm1, %v1379_v24  ;;  %v2023_v31 = vadd.f32 %v7887_v6, %v1975_v11  ;;  %v1974_v32 = vld [vmem:[#allocation2 + $0x100] sm:$0xff]  ;;  %v1883_v33 = vpop.f32.mrb[61].mxu0  ;;  %8203 = vmatmul.mubr.msk.f32.gmra.mrb[166].mxu0 %vm288_vm1, %v6994_v22  ;;  %v1339_v21 = vld [vmem:[#allocation2 + $0x168] sm:$0xff] }
 0x176   : > { %1426 = vst.msk [vmem:[#allocation2 + $0x120] sm:$0xff] %vm288_vm1, %v1378_v28  ;;  %v2022_v34 = vadd.f32 %v1974_v32, %v1863_v54  ;;  %v7822_v35 = vpop.f32.mrb[62].mxu1  ;;  %8281 = vmatprep.mubr.msk.f32.mxu0 %vm288_vm1, %v7143_v27  ;;  %v7150_v22 = vld [vmem:[%s8526_s10 + $0x6a] sm:$0xff]  ;;  %v7151_v27 = vld [vmem:[%s8526_s10 + $0x72] sm:$0xff] }
 0x177   : > { %2071 = vst.msk [vmem:[#allocation2 + $0x108] sm:$0xff] %vm288_vm1, %v2023_v31  ;;  %v1381_v38 = vadd.f32 %v7822_v35, %v1333_v36  ;;  %v1245_v39 = vpop.f32.mrb[63].mxu1  ;;  %8208 = vmatmul.mubr.msk.f32.vlgmr.msra.gmra.mrb[168].mxu1 %vm288_vm1, %v7046_v29  ;;  %v7054_v29 = vld [vmem:[%s8526_s10 + $0x79] sm:$0xff] }
 0x178   : > { %2070 = vst.msk [vmem:[#allocation2 + $0x100] sm:$0xff] %vm288_vm1, %v2022_v34  ;;  %v1380_v42 = vadd.f32 %v1332_v40, %v1245_v39  ;;  %v1977_v43 = vld [vmem:[#allocation2 + $0x118] sm:$0xff]  ;;  %8210 = vmatprep.mubr.msk.f32.mxu1 %vm288_vm1, %v7047_v13  ;;  %v7896_v45 = vpop.f32.mrb[62].mxu0  ;;  %v7055_v13 = vld [vmem:[%s8526_s10 + $0x81] sm:$0xff]  ;;  %v1340_v40 = vld [vmem:[#allocation2 + $0x170] sm:$0xff] }
 0x179   : > { %1429 = vst.msk [vmem:[#allocation2 + $0x138] sm:$0xff] %vm288_vm1, %v1381_v38  ;;  %v2025_v46 = vadd.f32 %v7890_v9, %v1977_v43  ;;  %v1976_v47 = vld [vmem:[#allocation2 + $0x110] sm:$0xff]  ;;  %v1893_v49 = vpop.f32.mrb[63].mxu0  ;;  %8282 = vmatmul.mubr.msk.f32.vlgmr.msra.gmra.mrb[168].mxu0 %vm288_vm1, %v7144_v37  ;;  %v1341_v36 = vld [vmem:[#allocation2 + $0x178] sm:$0xff] }
 0x17a   : > { %1428 = vst.msk [vmem:[#allocation2 + $0x130] sm:$0xff] %vm288_vm1, %v1380_v42  ;;  %v2024_v50 = vadd.f32 %v1976_v47, %v1873_v17  ;;  %v7825_v51 = vpop.f32.mrb[64].mxu1  ;;  %8284 = vmatprep.mubr.msk.f32.mxu0 %vm288_vm1, %v7145_v41  ;;  %v7152_v37 = vld [vmem:[%s8526_s10 + $0x7a] sm:$0xff]  ;;  %v7153_v41 = vld [vmem:[%s8526_s10 + $0x82] sm:$0xff] }
 0x17b   : > { %2073 = vst.msk [vmem:[#allocation2 + $0x118] sm:$0xff] %vm288_vm1, %v2025_v46  ;;  %v1383_v60 = vadd.f32 %v7825_v51, %v1335_v53  ;;  %v1255_v61 = vpop.f32.mrb[65].mxu1  ;;  %8211 = vmatmul.mubr.msk.f32.gmra.mrb[170].mxu1 %vm288_vm1, %v7048_v44  ;;  %v7056_v44 = vld [vmem:[%s8526_s10 + $0x89] sm:$0xff] }
 0x17c   : > { %2072 = vst.msk [vmem:[#allocation2 + $0x110] sm:$0xff] %vm288_vm1, %v2024_v50  ;;  %v1382_v0 = vadd.f32 %v1334_v62, %v1255_v61  ;;  %v1979_v1 = vld [vmem:[#allocation2 + $0x128] sm:$0xff]  ;;  %8213 = vmatprep.mubr.msk.f32.mxu1 %vm288_vm1, %v7049_v48  ;;  %v7899_v6 = vpop.f32.mrb[64].mxu0  ;;  %v7057_v48 = vld [vmem:[%s8526_s10 + $0x91] sm:$0xff]  ;;  %v2590_v62 = vld [vmem:[#allocation2] sm:$0xff] }
 0x17d   : > { %1431 = vst.msk [vmem:[#allocation2 + $0x148] sm:$0xff] %vm288_vm1, %v1383_v60  ;;  %v2027_v7 = vadd.f32 %v7893_v30, %v1979_v1  ;;  %v1978_v8 = vld [vmem:[#allocation2 + $0x120] sm:$0xff]  ;;  %v1903_v54 = vpop.f32.mrb[65].mxu0  ;;  %8285 = vmatmul.mubr.msk.f32.gmra.mrb[170].mxu0 %vm288_vm1, %v7146_v58  ;;  %v2591_v53 = vld [vmem:[#allocation2 + $0x8] sm:$0xff] }
 0x17e   : > { %1430 = vst.msk [vmem:[#allocation2 + $0x140] sm:$0xff] %vm288_vm1, %v1382_v0  ;;  %v2026_v55 = vadd.f32 %v1978_v8, %v1883_v33  ;;  %v7828_v23 = vpop.f32.mrb[66].mxu1  ;;  %8287 = vmatprep.mubr.msk.f32.mxu0 %vm288_vm1, %v7147_v63  ;;  %v7154_v58 = vld [vmem:[%s8526_s10 + $0x8a] sm:$0xff]  ;;  %v7155_v63 = vld [vmem:[%s8526_s10 + $0x92] sm:$0xff] }
 0x17f   : > { %2075 = vst.msk [vmem:[#allocation2 + $0x128] sm:$0xff] %vm288_vm1, %v2027_v7  ;;  %v1385_v56 = vadd.f32 %v7828_v23, %v1337_v59  ;;  %v1265_v16 = vpop.f32.mrb[67].mxu1  ;;  %8214 = vmatmul.mubr.msk.f32.gmra.mrb[172].mxu1 %vm288_vm1, %v7050_v2  ;;  %v7058_v2 = vld [vmem:[%s8526_s10 + $0x99] sm:$0xff] }
 0x180   : > { %2074 = vst.msk [vmem:[#allocation2 + $0x120] sm:$0xff] %vm288_vm1, %v2026_v55  ;;  %v1384_v19 = vadd.f32 %v1336_v57, %v1265_v16  ;;  %v1981_v4 = vld [vmem:[#allocation2 + $0x138] sm:$0xff]  ;;  %8216 = vmatprep.mubr.msk.f32.mxu1 %vm288_vm1, %v7051_v10  ;;  %v7902_v9 = vpop.f32.mrb[66].mxu0  ;;  %v7059_v10 = vld [vmem:[%s8526_s10 + $0xa1] sm:$0xff]  ;;  %v2592_v57 = vld [vmem:[#allocation2 + $0x10] sm:$0xff] }
 0x181   : > { %1433 = vst.msk [vmem:[#allocation2 + $0x158] sm:$0xff] %vm288_vm1, %v1385_v56  ;;  %v2029_v12 = vadd.f32 %v7896_v45, %v1981_v4  ;;  %v1980_v14 = vld [vmem:[#allocation2 + $0x130] sm:$0xff]  ;;  %v1913_v17 = vpop.f32.mrb[67].mxu0  ;;  %8288 = vmatmul.mubr.msk.f32.gmra.mrb[172].mxu0 %vm288_vm1, %v7148_v52  ;;  %v2593_v59 = vld [vmem:[#allocation2 + $0x18] sm:$0xff] }
 0x182   : > { %1432 = vst.msk [vmem:[#allocation2 + $0x150] sm:$0xff] %vm288_vm1, %v1384_v19  ;;  %v2028_v18 = vadd.f32 %v1980_v14, %v1893_v49  ;;  %v7831_v20 = vpop.f32.mrb[68].mxu1  ;;  %8290 = vmatprep.mubr.msk.f32.mxu0 %vm288_vm1, %v7149_v3  ;;  %v7156_v52 = vld [vmem:[%s8526_s10 + $0x9a] sm:$0xff]  ;;  %v7157_v3 = vld [vmem:[%s8526_s10 + $0xa2] sm:$0xff] }
 0x183   : > { %2077 = vst.msk [vmem:[#allocation2 + $0x138] sm:$0xff] %vm288_vm1, %v2029_v12  ;;  %v1387_v24 = vadd.f32 %v7831_v20, %v1339_v21  ;;  %v1275_v25 = vpop.f32.mrb[69].mxu1  ;;  %8217 = vmatmul.mubr.msk.f32.gmra.mrb[174].mxu1 %vm288_vm1, %v7052_v5  ;;  %v7060_v5 = vld [vmem:[%s8526_s10 + $0xa9] sm:$0xff] }
 0x184   : > { %2076 = vst.msk [vmem:[#allocation2 + $0x130] sm:$0xff] %vm288_vm1, %v2028_v18  ;;  %v1386_v28 = vadd.f32 %v1338_v26, %v1275_v25  ;;  %v1983_v11 = vld [vmem:[#allocation2 + $0x148] sm:$0xff]  ;;  %8219 = vmatprep.mubr.msk.f32.mxu1 %vm288_vm1, %v7053_v15  ;;  %v7905_v30 = vpop.f32.mrb[68].mxu0  ;;  %v7061_v15 = vld [vmem:[%s8526_s10 + $0xb1] sm:$0xff]  ;;  %v2594_v26 = vld [vmem:[#allocation2 + $0x20] sm:$0xff] }
 0x185   : > { %1435 = vst.msk [vmem:[#allocation2 + $0x168] sm:$0xff] %vm288_vm1, %v1387_v24  ;;  %v2031_v31 = vadd.f32 %v7899_v6, %v1983_v11  ;;  %v1982_v32 = vld [vmem:[#allocation2 + $0x140] sm:$0xff]  ;;  %v1923_v33 = vpop.f32.mrb[69].mxu0  ;;  %8291 = vmatmul.mubr.msk.f32.gmra.mrb[174].mxu0 %vm288_vm1, %v7150_v22  ;;  %v2595_v21 = vld [vmem:[#allocation2 + $0x28] sm:$0xff] }
 0x186   : > { %1434 = vst.msk [vmem:[#allocation2 + $0x160] sm:$0xff] %vm288_vm1, %v1386_v28  ;;  %v2030_v34 = vadd.f32 %v1982_v32, %v1903_v54  ;;  %v7834_v35 = vpop.f32.mrb[70].mxu1  ;;  %8293 = vmatprep.mubr.msk.f32.mxu0 %vm288_vm1, %v7151_v27  ;;  %v7158_v22 = vld [vmem:[%s8526_s10 + $0xaa] sm:$0xff]  ;;  %v7159_v27 = vld [vmem:[%s8526_s10 + $0xb2] sm:$0xff] }
 0x187   : > { %2079 = vst.msk [vmem:[#allocation2 + $0x148] sm:$0xff] %vm288_vm1, %v2031_v31  ;;  %v1389_v38 = vadd.f32 %v7834_v35, %v1341_v36  ;;  %v1285_v39 = vpop.f32.mrb[71].mxu1  ;;  %8220 = vmatmul.mubr.msk.f32.gmra.mrb[176].mxu1 %vm288_vm1, %v7054_v29  ;;  %v7062_v29 = vld [vmem:[%s8526_s10 + $0xb9] sm:$0xff] }
 0x188   : > { %2078 = vst.msk [vmem:[#allocation2 + $0x140] sm:$0xff] %vm288_vm1, %v2030_v34  ;;  %v1388_v42 = vadd.f32 %v1340_v40, %v1285_v39  ;;  %v1985_v43 = vld [vmem:[#allocation2 + $0x158] sm:$0xff]  ;;  %8222 = vmatprep.mubr.msk.f32.mxu1 %vm288_vm1, %v7055_v13  ;;  %v7908_v45 = vpop.f32.mrb[70].mxu0  ;;  %v7063_v13 = vld [vmem:[%s8526_s10 + $0xc1] sm:$0xff]  ;;  %v2596_v40 = vld [vmem:[#allocation2 + $0x30] sm:$0xff] }
 0x189   : > { %1437 = vst.msk [vmem:[#allocation2 + $0x178] sm:$0xff] %vm288_vm1, %v1389_v38  ;;  %v2033_v46 = vadd.f32 %v7902_v9, %v1985_v43  ;;  %v1984_v47 = vld [vmem:[#allocation2 + $0x150] sm:$0xff]  ;;  %v1933_v49 = vpop.f32.mrb[71].mxu0  ;;  %8294 = vmatmul.mubr.msk.f32.gmra.mrb[176].mxu0 %vm288_vm1, %v7152_v37  ;;  %v2597_v36 = vld [vmem:[#allocation2 + $0x38] sm:$0xff] }
 0x18a   : > { %1436 = vst.msk [vmem:[#allocation2 + $0x170] sm:$0xff] %vm288_vm1, %v1388_v42  ;;  %v2032_v50 = vadd.f32 %v1984_v47, %v1913_v17  ;;  %v7913_v51 = vpop.f32.mrb[72].mxu1  ;;  %8296 = vmatprep.mubr.msk.f32.mxu0 %vm288_vm1, %v7153_v41  ;;  %v7160_v37 = vld [vmem:[%s8526_s10 + $0xba] sm:$0xff]  ;;  %v7161_v41 = vld [vmem:[%s8526_s10 + $0xc2] sm:$0xff] }
 0x18b   : > { %2081 = vst.msk [vmem:[#allocation2 + $0x158] sm:$0xff] %vm288_vm1, %v2033_v46  ;;  %v2639_v60 = vadd.f32 %v7913_v51, %v2591_v53  ;;  %v2351_v61 = vpop.f32.mrb[73].mxu1  ;;  %8223 = vmatmul.mubr.msk.f32.gmra.mrb[178].mxu1 %vm288_vm1, %v7056_v44  ;;  %v7064_v44 = vld [vmem:[%s8526_s10 + $0xc9] sm:$0xff] }
 0x18c   : > { %2080 = vst.msk [vmem:[#allocation2 + $0x150] sm:$0xff] %vm288_vm1, %v2032_v50  ;;  %v1987_v0 = vld [vmem:[#allocation2 + $0x168] sm:$0xff]  ;;  %v2638_v1 = vadd.f32 %v2590_v62, %v2351_v61  ;;  %8225 = vmatprep.mubr.msk.f32.mxu1 %vm288_vm1, %v7057_v48  ;;  %v7987_v6 = vpop.f32.mrb[72].mxu0  ;;  %v7065_v48 = vld [vmem:[%s8526_s10 + $0xd1] sm:$0xff]  ;;  %v2598_v62 = vld [vmem:[#allocation2 + $0x40] sm:$0xff] }
 0x18d   : > { %2687 = vst.msk [vmem:[#allocation2 + $0x8] sm:$0xff] %vm288_vm1, %v2639_v60  ;;  %v2035_v7 = vadd.f32 %v7905_v30, %v1987_v0  ;;  %v1986_v8 = vld [vmem:[#allocation2 + $0x160] sm:$0xff]  ;;  %v2999_v54 = vpop.f32.mrb[73].mxu0  ;;  %8297 = vmatmul.mubr.msk.f32.gmra.mrb[178].mxu0 %vm288_vm1, %v7154_v58  ;;  %v2599_v53 = vld [vmem:[#allocation2 + $0x48] sm:$0xff] }
 0x18e   : > { %2686 = vst.msk [vmem:[#allocation2] sm:$0xff] %vm288_vm1, %v2638_v1  ;;  %v2034_v55 = vadd.f32 %v1986_v8, %v1923_v33  ;;  %v7916_v23 = vpop.f32.mrb[74].mxu1  ;;  %8299 = vmatprep.mubr.msk.f32.mxu0 %vm288_vm1, %v7155_v63  ;;  %v7162_v58 = vld [vmem:[%s8526_s10 + $0xca] sm:$0xff]  ;;  %v7163_v63 = vld [vmem:[%s8526_s10 + $0xd2] sm:$0xff] }
 0x18f   : > { %2083 = vst.msk [vmem:[#allocation2 + $0x168] sm:$0xff] %vm288_vm1, %v2035_v7  ;;  %v2641_v56 = vadd.f32 %v7916_v23, %v2593_v59  ;;  %v2361_v16 = vpop.f32.mrb[75].mxu1  ;;  %8226 = vmatmul.mubr.msk.f32.gmra.mrb[180].mxu1 %vm288_vm1, %v7058_v2  ;;  %v7066_v2 = vld [vmem:[%s8526_s10 + $0xd9] sm:$0xff] }
 0x190   : > { %2082 = vst.msk [vmem:[#allocation2 + $0x160] sm:$0xff] %vm288_vm1, %v2034_v55  ;;  %v1989_v19 = vld [vmem:[#allocation2 + $0x178] sm:$0xff]  ;;  %v2640_v4 = vadd.f32 %v2592_v57, %v2361_v16  ;;  %8228 = vmatprep.mubr.msk.f32.mxu1 %vm288_vm1, %v7059_v10  ;;  %v7990_v9 = vpop.f32.mrb[74].mxu0  ;;  %v7067_v10 = vld [vmem:[%s8526_s10 + $0xe1] sm:$0xff]  ;;  %v2600_v57 = vld [vmem:[#allocation2 + $0x50] sm:$0xff] }
 0x191   : > { %2689 = vst.msk [vmem:[#allocation2 + $0x18] sm:$0xff] %vm288_vm1, %v2641_v56  ;;  %v2037_v12 = vadd.f32 %v7908_v45, %v1989_v19  ;;  %v1988_v14 = vld [vmem:[#allocation2 + $0x170] sm:$0xff]  ;;  %v3009_v17 = vpop.f32.mrb[75].mxu0  ;;  %8300 = vmatmul.mubr.msk.f32.gmra.mrb[180].mxu0 %vm288_vm1, %v7156_v52  ;;  %v2601_v59 = vld [vmem:[#allocation2 + $0x58] sm:$0xff] }
 0x192   : > { %2688 = vst.msk [vmem:[#allocation2 + $0x10] sm:$0xff] %vm288_vm1, %v2640_v4  ;;  %v2036_v18 = vadd.f32 %v1988_v14, %v1933_v49  ;;  %v7919_v20 = vpop.f32.mrb[76].mxu1  ;;  %8302 = vmatprep.mubr.msk.f32.mxu0 %vm288_vm1, %v7157_v3  ;;  %v7164_v52 = vld [vmem:[%s8526_s10 + $0xda] sm:$0xff]  ;;  %v7165_v3 = vld [vmem:[%s8526_s10 + $0xe2] sm:$0xff] }
 0x193   : > { %2085 = vst.msk [vmem:[#allocation2 + $0x178] sm:$0xff] %vm288_vm1, %v2037_v12  ;;  %v2643_v24 = vadd.f32 %v7919_v20, %v2595_v21  ;;  %v2371_v25 = vpop.f32.mrb[77].mxu1  ;;  %8229 = vmatmul.mubr.msk.f32.gmra.mrb[182].mxu1 %vm288_vm1, %v7060_v5  ;;  %v7068_v5 = vld [vmem:[%s8526_s10 + $0xe9] sm:$0xff] }
 0x194   : > { %2084 = vst.msk [vmem:[#allocation2 + $0x170] sm:$0xff] %vm288_vm1, %v2036_v18  ;;  %v2642_v28 = vadd.f32 %v2594_v26, %v2371_v25  ;;  %v3239_v11 = vld [vmem:[#allocation2 + $0x8] sm:$0xff]  ;;  %8231 = vmatprep.mubr.msk.f32.mxu1 %vm288_vm1, %v7061_v15  ;;  %v7993_v30 = vpop.f32.mrb[76].mxu0  ;;  %v7069_v15 = vld [vmem:[%s8526_s10 + $0xf1] sm:$0xff]  ;;  %v2602_v26 = vld [vmem:[#allocation2 + $0x60] sm:$0xff] }
 0x195   : > { %2691 = vst.msk [vmem:[#allocation2 + $0x28] sm:$0xff] %vm288_vm1, %v2643_v24  ;;  %v3287_v31 = vadd.f32 %v7987_v6, %v3239_v11  ;;  %v3238_v32 = vld [vmem:[#allocation2] sm:$0xff]  ;;  %v3019_v33 = vpop.f32.mrb[77].mxu0  ;;  %8303 = vmatmul.mubr.msk.f32.gmra.mrb[182].mxu0 %vm288_vm1, %v7158_v22  ;;  %v2603_v21 = vld [vmem:[#allocation2 + $0x68] sm:$0xff] }
 0x196   : > { %2690 = vst.msk [vmem:[#allocation2 + $0x20] sm:$0xff] %vm288_vm1, %v2642_v28  ;;  %v3286_v34 = vadd.f32 %v3238_v32, %v2999_v54  ;;  %v7922_v35 = vpop.f32.mrb[78].mxu1  ;;  %8305 = vmatprep.mubr.msk.f32.mxu0 %vm288_vm1, %v7159_v27  ;;  %v7166_v22 = vld [vmem:[%s8526_s10 + $0xea] sm:$0xff]  ;;  %v7167_v27 = vld [vmem:[%s8526_s10 + $0xf2] sm:$0xff] }
 0x197   : > { %3335 = vst.msk [vmem:[#allocation2 + $0x8] sm:$0xff] %vm288_vm1, %v3287_v31  ;;  %v2645_v38 = vadd.f32 %v7922_v35, %v2597_v36  ;;  %v2381_v39 = vpop.f32.mrb[79].mxu1  ;;  %8232 = vmatmul.mubr.msk.f32.gmra.mrb[184].mxu1 %vm288_vm1, %v7062_v29  ;;  %v7070_v29 = vld [vmem:[%s8526_s10 + $0xf9] sm:$0xff] }
 0x198   : > { %3334 = vst.msk [vmem:[#allocation2] sm:$0xff] %vm288_vm1, %v3286_v34  ;;  %v2644_v42 = vadd.f32 %v2596_v40, %v2381_v39  ;;  %v3241_v43 = vld [vmem:[#allocation2 + $0x18] sm:$0xff]  ;;  %8234 = vmatprep.mubr.msk.f32.mxu1 %vm288_vm1, %v7063_v13  ;;  %v7996_v45 = vpop.f32.mrb[78].mxu0  ;;  %v7071_v13 = vld [vmem:[%s8526_s10 + $0x101] sm:$0xff]  ;;  %v2604_v40 = vld [vmem:[#allocation2 + $0x70] sm:$0xff] }
 0x199   : > { %2693 = vst.msk [vmem:[#allocation2 + $0x38] sm:$0xff] %vm288_vm1, %v2645_v38  ;;  %v3289_v46 = vadd.f32 %v7990_v9, %v3241_v43  ;;  %v3240_v47 = vld [vmem:[#allocation2 + $0x10] sm:$0xff]  ;;  %v3029_v49 = vpop.f32.mrb[79].mxu0  ;;  %8306 = vmatmul.mubr.msk.f32.gmra.mrb[184].mxu0 %vm288_vm1, %v7160_v37  ;;  %v2605_v36 = vld [vmem:[#allocation2 + $0x78] sm:$0xff] }
 0x19a   : > { %2692 = vst.msk [vmem:[#allocation2 + $0x30] sm:$0xff] %vm288_vm1, %v2644_v42  ;;  %v3288_v50 = vadd.f32 %v3240_v47, %v3009_v17  ;;  %v7925_v51 = vpop.f32.mrb[80].mxu1  ;;  %8308 = vmatprep.mubr.msk.f32.mxu0 %vm288_vm1, %v7161_v41  ;;  %v7168_v37 = vld [vmem:[%s8526_s10 + $0xfa] sm:$0xff]  ;;  %v7169_v41 = vld [vmem:[%s8526_s10 + $0x102] sm:$0xff] }
 0x19b   : > { %3337 = vst.msk [vmem:[#allocation2 + $0x18] sm:$0xff] %vm288_vm1, %v3289_v46  ;;  %v2647_v60 = vadd.f32 %v7925_v51, %v2599_v53  ;;  %v2391_v61 = vpop.f32.mrb[81].mxu1  ;;  %8235 = vmatmul.mubr.msk.f32.gmra.mrb[186].mxu1 %vm288_vm1, %v7064_v44  ;;  %v7072_v44 = vld [vmem:[%s8526_s10 + $0x109] sm:$0xff] }
 0x19c   : > { %3336 = vst.msk [vmem:[#allocation2 + $0x10] sm:$0xff] %vm288_vm1, %v3288_v50  ;;  %v2646_v0 = vadd.f32 %v2598_v62, %v2391_v61  ;;  %v3243_v1 = vld [vmem:[#allocation2 + $0x28] sm:$0xff]  ;;  %8237 = vmatprep.mubr.msk.f32.mxu1 %vm288_vm1, %v7065_v48  ;;  %v7999_v6 = vpop.f32.mrb[80].mxu0  ;;  %v7073_v48 = vld [vmem:[%s8526_s10 + $0x111] sm:$0xff]  ;;  %v2606_v62 = vld [vmem:[#allocation2 + $0x80] sm:$0xff] }
 0x19d   : > { %2695 = vst.msk [vmem:[#allocation2 + $0x48] sm:$0xff] %vm288_vm1, %v2647_v60  ;;  %v3291_v7 = vadd.f32 %v7993_v30, %v3243_v1  ;;  %v3242_v8 = vld [vmem:[#allocation2 + $0x20] sm:$0xff]  ;;  %v3039_v54 = vpop.f32.mrb[81].mxu0  ;;  %8309 = vmatmul.mubr.msk.f32.gmra.mrb[186].mxu0 %vm288_vm1, %v7162_v58  ;;  %v2607_v53 = vld [vmem:[#allocation2 + $0x88] sm:$0xff] }
 0x19e   : > { %2694 = vst.msk [vmem:[#allocation2 + $0x40] sm:$0xff] %vm288_vm1, %v2646_v0  ;;  %v3290_v55 = vadd.f32 %v3242_v8, %v3019_v33  ;;  %v7928_v23 = vpop.f32.mrb[82].mxu1  ;;  %8311 = vmatprep.mubr.msk.f32.mxu0 %vm288_vm1, %v7163_v63  ;;  %v7170_v58 = vld [vmem:[%s8526_s10 + $0x10a] sm:$0xff]  ;;  %v7171_v63 = vld [vmem:[%s8526_s10 + $0x112] sm:$0xff] }
 0x19f   : > { %3339 = vst.msk [vmem:[#allocation2 + $0x28] sm:$0xff] %vm288_vm1, %v3291_v7  ;;  %v2649_v56 = vadd.f32 %v7928_v23, %v2601_v59  ;;  %v2401_v16 = vpop.f32.mrb[83].mxu1  ;;  %8238 = vmatmul.mubr.msk.f32.gmra.mrb[188].mxu1 %vm288_vm1, %v7066_v2  ;;  %v7074_v2 = vld [vmem:[%s8526_s10 + $0x119] sm:$0xff] }
 0x1a0   : > { %3338 = vst.msk [vmem:[#allocation2 + $0x20] sm:$0xff] %vm288_vm1, %v3290_v55  ;;  %v2648_v19 = vadd.f32 %v2600_v57, %v2401_v16  ;;  %v3245_v4 = vld [vmem:[#allocation2 + $0x38] sm:$0xff]  ;;  %8240 = vmatprep.mubr.msk.f32.mxu1 %vm288_vm1, %v7067_v10  ;;  %v8002_v9 = vpop.f32.mrb[82].mxu0  ;;  %v7075_v10 = vld [vmem:[%s8526_s10 + $0x121] sm:$0xff]  ;;  %v2608_v57 = vld [vmem:[#allocation2 + $0x90] sm:$0xff] }
 0x1a1   : > { %2697 = vst.msk [vmem:[#allocation2 + $0x58] sm:$0xff] %vm288_vm1, %v2649_v56  ;;  %v3293_v12 = vadd.f32 %v7996_v45, %v3245_v4  ;;  %v3244_v14 = vld [vmem:[#allocation2 + $0x30] sm:$0xff]  ;;  %v3049_v17 = vpop.f32.mrb[83].mxu0  ;;  %8312 = vmatmul.mubr.msk.f32.gmra.mrb[188].mxu0 %vm288_vm1, %v7164_v52  ;;  %v2609_v59 = vld [vmem:[#allocation2 + $0x98] sm:$0xff] }
 0x1a2   : > { %2696 = vst.msk [vmem:[#allocation2 + $0x50] sm:$0xff] %vm288_vm1, %v2648_v19  ;;  %v3292_v18 = vadd.f32 %v3244_v14, %v3029_v49  ;;  %v7931_v20 = vpop.f32.mrb[84].mxu1  ;;  %8314 = vmatprep.mubr.msk.f32.mxu0 %vm288_vm1, %v7165_v3  ;;  %v7172_v52 = vld [vmem:[%s8526_s10 + $0x11a] sm:$0xff]  ;;  %v7173_v3 = vld [vmem:[%s8526_s10 + $0x122] sm:$0xff] }
 0x1a3   : > { %3341 = vst.msk [vmem:[#allocation2 + $0x38] sm:$0xff] %vm288_vm1, %v3293_v12  ;;  %v2651_v24 = vadd.f32 %v7931_v20, %v2603_v21  ;;  %v2411_v25 = vpop.f32.mrb[85].mxu1  ;;  %8241 = vmatmul.mubr.msk.f32.gmra.mrb[190].mxu1 %vm288_vm1, %v7068_v5  ;;  %v7076_v5 = vld [vmem:[%s8526_s10 + $0x129] sm:$0xff] }
 0x1a4   : > { %3340 = vst.msk [vmem:[#allocation2 + $0x30] sm:$0xff] %vm288_vm1, %v3292_v18  ;;  %v2650_v28 = vadd.f32 %v2602_v26, %v2411_v25  ;;  %v3247_v11 = vld [vmem:[#allocation2 + $0x48] sm:$0xff]  ;;  %8243 = vmatprep.mubr.msk.f32.mxu1 %vm288_vm1, %v7069_v15  ;;  %v8005_v30 = vpop.f32.mrb[84].mxu0  ;;  %v7077_v15 = vld [vmem:[%s8526_s10 + $0x131] sm:$0xff]  ;;  %v2610_v26 = vld [vmem:[#allocation2 + $0xa0] sm:$0xff] }
 0x1a5   : > { %2699 = vst.msk [vmem:[#allocation2 + $0x68] sm:$0xff] %vm288_vm1, %v2651_v24  ;;  %v3295_v31 = vadd.f32 %v7999_v6, %v3247_v11  ;;  %v3246_v32 = vld [vmem:[#allocation2 + $0x40] sm:$0xff]  ;;  %v3059_v33 = vpop.f32.mrb[85].mxu0  ;;  %8315 = vmatmul.mubr.msk.f32.gmra.mrb[190].mxu0 %vm288_vm1, %v7166_v22  ;;  %v2611_v21 = vld [vmem:[#allocation2 + $0xa8] sm:$0xff] }
 0x1a6   : > { %2698 = vst.msk [vmem:[#allocation2 + $0x60] sm:$0xff] %vm288_vm1, %v2650_v28  ;;  %v3294_v34 = vadd.f32 %v3246_v32, %v3039_v54  ;;  %v7934_v35 = vpop.f32.mrb[86].mxu1  ;;  %8317 = vmatprep.mubr.msk.f32.mxu0 %vm288_vm1, %v7167_v27  ;;  %v7174_v22 = vld [vmem:[%s8526_s10 + $0x12a] sm:$0xff]  ;;  %v7175_v27 = vld [vmem:[%s8526_s10 + $0x132] sm:$0xff] }
 0x1a7   : > { %3343 = vst.msk [vmem:[#allocation2 + $0x48] sm:$0xff] %vm288_vm1, %v3295_v31  ;;  %v2653_v38 = vadd.f32 %v7934_v35, %v2605_v36  ;;  %v2421_v39 = vpop.f32.mrb[87].mxu1  ;;  %8244 = vmatmul.mubr.msk.f32.gmra.mrb[192].mxu1 %vm288_vm1, %v7070_v29  ;;  %v7078_v29 = vld [vmem:[%s8526_s10 + $0x139] sm:$0xff] }
 0x1a8   : > { %3342 = vst.msk [vmem:[#allocation2 + $0x40] sm:$0xff] %vm288_vm1, %v3294_v34  ;;  %v2652_v42 = vadd.f32 %v2604_v40, %v2421_v39  ;;  %v3249_v43 = vld [vmem:[#allocation2 + $0x58] sm:$0xff]  ;;  %8246 = vmatprep.mubr.msk.f32.mxu1 %vm288_vm1, %v7071_v13  ;;  %v8008_v45 = vpop.f32.mrb[86].mxu0  ;;  %v7079_v13 = vld [vmem:[%s8526_s10 + $0x141] sm:$0xff]  ;;  %v2612_v40 = vld [vmem:[#allocation2 + $0xb0] sm:$0xff] }
 0x1a9   : > { %2701 = vst.msk [vmem:[#allocation2 + $0x78] sm:$0xff] %vm288_vm1, %v2653_v38  ;;  %v3297_v46 = vadd.f32 %v8002_v9, %v3249_v43  ;;  %v3248_v47 = vld [vmem:[#allocation2 + $0x50] sm:$0xff]  ;;  %v3069_v49 = vpop.f32.mrb[87].mxu0  ;;  %8318 = vmatmul.mubr.msk.f32.gmra.mrb[192].mxu0 %vm288_vm1, %v7168_v37  ;;  %v2613_v36 = vld [vmem:[#allocation2 + $0xb8] sm:$0xff] }
 0x1aa   : > { %2700 = vst.msk [vmem:[#allocation2 + $0x70] sm:$0xff] %vm288_vm1, %v2652_v42  ;;  %v3296_v50 = vadd.f32 %v3248_v47, %v3049_v17  ;;  %v7937_v51 = vpop.f32.mrb[88].mxu1  ;;  %8320 = vmatprep.mubr.msk.f32.mxu0 %vm288_vm1, %v7169_v41  ;;  %v7176_v37 = vld [vmem:[%s8526_s10 + $0x13a] sm:$0xff]  ;;  %v7177_v41 = vld [vmem:[%s8526_s10 + $0x142] sm:$0xff] }
 0x1ab   : > { %3345 = vst.msk [vmem:[#allocation2 + $0x58] sm:$0xff] %vm288_vm1, %v3297_v46  ;;  %v2655_v60 = vadd.f32 %v7937_v51, %v2607_v53  ;;  %v2431_v61 = vpop.f32.mrb[89].mxu1  ;;  %8247 = vmatmul.mubr.msk.f32.gmra.mrb[194].mxu1 %vm288_vm1, %v7072_v44  ;;  %v7080_v44 = vld [vmem:[%s8526_s10 + $0x149] sm:$0xff] }
 0x1ac   : > { %3344 = vst.msk [vmem:[#allocation2 + $0x50] sm:$0xff] %vm288_vm1, %v3296_v50  ;;  %v2654_v0 = vadd.f32 %v2606_v62, %v2431_v61  ;;  %v3251_v1 = vld [vmem:[#allocation2 + $0x68] sm:$0xff]  ;;  %8249 = vmatprep.mubr.msk.f32.mxu1 %vm288_vm1, %v7073_v48  ;;  %v8011_v6 = vpop.f32.mrb[88].mxu0  ;;  %v7081_v48 = vld [vmem:[%s8526_s10 + $0x151] sm:$0xff]  ;;  %v2614_v62 = vld [vmem:[#allocation2 + $0xc0] sm:$0xff] }
 0x1ad   : > { %2703 = vst.msk [vmem:[#allocation2 + $0x88] sm:$0xff] %vm288_vm1, %v2655_v60  ;;  %v3299_v7 = vadd.f32 %v8005_v30, %v3251_v1  ;;  %v3250_v8 = vld [vmem:[#allocation2 + $0x60] sm:$0xff]  ;;  %v3079_v54 = vpop.f32.mrb[89].mxu0  ;;  %8321 = vmatmul.mubr.msk.f32.gmra.mrb[194].mxu0 %vm288_vm1, %v7170_v58  ;;  %v2615_v53 = vld [vmem:[#allocation2 + $0xc8] sm:$0xff] }
 0x1ae   : > { %2702 = vst.msk [vmem:[#allocation2 + $0x80] sm:$0xff] %vm288_vm1, %v2654_v0  ;;  %v3298_v55 = vadd.f32 %v3250_v8, %v3059_v33  ;;  %v7940_v23 = vpop.f32.mrb[90].mxu1  ;;  %8323 = vmatprep.mubr.msk.f32.mxu0 %vm288_vm1, %v7171_v63  ;;  %v7178_v58 = vld [vmem:[%s8526_s10 + $0x14a] sm:$0xff]  ;;  %v7179_v63 = vld [vmem:[%s8526_s10 + $0x152] sm:$0xff] }
 0x1af   : > { %3347 = vst.msk [vmem:[#allocation2 + $0x68] sm:$0xff] %vm288_vm1, %v3299_v7  ;;  %v2657_v56 = vadd.f32 %v7940_v23, %v2609_v59  ;;  %v2441_v16 = vpop.f32.mrb[91].mxu1  ;;  %8250 = vmatmul.mubr.msk.f32.gmra.mrb[196].mxu1 %vm288_vm1, %v7074_v2  ;;  %v7082_v2 = vld [vmem:[%s8526_s10 + $0x159] sm:$0xff] }
 0x1b0   : > { %3346 = vst.msk [vmem:[#allocation2 + $0x60] sm:$0xff] %vm288_vm1, %v3298_v55  ;;  %v2656_v19 = vadd.f32 %v2608_v57, %v2441_v16  ;;  %v3253_v4 = vld [vmem:[#allocation2 + $0x78] sm:$0xff]  ;;  %8252 = vmatprep.mubr.msk.f32.mxu1 %vm288_vm1, %v7075_v10  ;;  %v8014_v9 = vpop.f32.mrb[90].mxu0  ;;  %v7083_v10 = vld [vmem:[%s8526_s10 + $0x161] sm:$0xff]  ;;  %v2616_v57 = vld [vmem:[#allocation2 + $0xd0] sm:$0xff] }
 0x1b1   : > { %2705 = vst.msk [vmem:[#allocation2 + $0x98] sm:$0xff] %vm288_vm1, %v2657_v56  ;;  %v3301_v12 = vadd.f32 %v8008_v45, %v3253_v4  ;;  %v3252_v14 = vld [vmem:[#allocation2 + $0x70] sm:$0xff]  ;;  %v3089_v17 = vpop.f32.mrb[91].mxu0  ;;  %8324 = vmatmul.mubr.msk.f32.gmra.mrb[196].mxu0 %vm288_vm1, %v7172_v52  ;;  %v2617_v59 = vld [vmem:[#allocation2 + $0xd8] sm:$0xff] }
 0x1b2   : > { %2704 = vst.msk [vmem:[#allocation2 + $0x90] sm:$0xff] %vm288_vm1, %v2656_v19  ;;  %v3300_v18 = vadd.f32 %v3252_v14, %v3069_v49  ;;  %v7943_v20 = vpop.f32.mrb[92].mxu1  ;;  %8326 = vmatprep.mubr.msk.f32.mxu0 %vm288_vm1, %v7173_v3  ;;  %v7180_v52 = vld [vmem:[%s8526_s10 + $0x15a] sm:$0xff]  ;;  %v7181_v3 = vld [vmem:[%s8526_s10 + $0x162] sm:$0xff] }
 0x1b3   : > { %3349 = vst.msk [vmem:[#allocation2 + $0x78] sm:$0xff] %vm288_vm1, %v3301_v12  ;;  %v2659_v24 = vadd.f32 %v7943_v20, %v2611_v21  ;;  %v2451_v25 = vpop.f32.mrb[93].mxu1  ;;  %8253 = vmatmul.mubr.msk.f32.gmra.mrb[198].mxu1 %vm288_vm1, %v7076_v5  ;;  %v7084_v5 = vld [vmem:[%s8526_s10 + $0x169] sm:$0xff] }
 0x1b4   : > { %3348 = vst.msk [vmem:[#allocation2 + $0x70] sm:$0xff] %vm288_vm1, %v3300_v18  ;;  %v2658_v28 = vadd.f32 %v2610_v26, %v2451_v25  ;;  %v3255_v11 = vld [vmem:[#allocation2 + $0x88] sm:$0xff]  ;;  %8255 = vmatprep.mubr.msk.f32.mxu1 %vm288_vm1, %v7077_v15  ;;  %v8017_v30 = vpop.f32.mrb[92].mxu0  ;;  %v7085_v15 = vld [vmem:[%s8526_s10 + $0x171] sm:$0xff]  ;;  %v2618_v26 = vld [vmem:[#allocation2 + $0xe0] sm:$0xff] }
 0x1b5   : > { %2707 = vst.msk [vmem:[#allocation2 + $0xa8] sm:$0xff] %vm288_vm1, %v2659_v24  ;;  %v3303_v31 = vadd.f32 %v8011_v6, %v3255_v11  ;;  %v3254_v32 = vld [vmem:[#allocation2 + $0x80] sm:$0xff]  ;;  %v3099_v33 = vpop.f32.mrb[93].mxu0  ;;  %8327 = vmatmul.mubr.msk.f32.gmra.mrb[198].mxu0 %vm288_vm1, %v7174_v22  ;;  %v2619_v21 = vld [vmem:[#allocation2 + $0xe8] sm:$0xff] }
 0x1b6   : > { %2706 = vst.msk [vmem:[#allocation2 + $0xa0] sm:$0xff] %vm288_vm1, %v2658_v28  ;;  %v3302_v34 = vadd.f32 %v3254_v32, %v3079_v54  ;;  %v7946_v35 = vpop.f32.mrb[94].mxu1  ;;  %8329 = vmatprep.mubr.msk.f32.mxu0 %vm288_vm1, %v7175_v27  ;;  %v7182_v22 = vld [vmem:[%s8526_s10 + $0x16a] sm:$0xff]  ;;  %v7183_v27 = vld [vmem:[%s8526_s10 + $0x172] sm:$0xff] }
 0x1b7   : > { %3351 = vst.msk [vmem:[#allocation2 + $0x88] sm:$0xff] %vm288_vm1, %v3303_v31  ;;  %v2661_v38 = vadd.f32 %v7946_v35, %v2613_v36  ;;  %v2461_v39 = vpop.f32.mrb[95].mxu1  ;;  %8256 = vmatmul.mubr.msk.f32.gmra.mrb[200].mxu1 %vm288_vm1, %v7078_v29  ;;  %v7086_v29 = vld [vmem:[%s8526_s10 + $0x179] sm:$0xff] }
 0x1b8   : > { %3350 = vst.msk [vmem:[#allocation2 + $0x80] sm:$0xff] %vm288_vm1, %v3302_v34  ;;  %v2660_v42 = vadd.f32 %v2612_v40, %v2461_v39  ;;  %v3257_v43 = vld [vmem:[#allocation2 + $0x98] sm:$0xff]  ;;  %8258 = vmatprep.mubr.msk.f32.mxu1 %vm288_vm1, %v7079_v13  ;;  %v8020_v45 = vpop.f32.mrb[94].mxu0  ;;  %v7087_v13 = vld [vmem:[%s8526_s10 + $0x181] sm:$0xff]  ;;  %v2620_v40 = vld [vmem:[#allocation2 + $0xf0] sm:$0xff] }
 0x1b9   : > { %2709 = vst.msk [vmem:[#allocation2 + $0xb8] sm:$0xff] %vm288_vm1, %v2661_v38  ;;  %v3305_v46 = vadd.f32 %v8014_v9, %v3257_v43  ;;  %v3256_v47 = vld [vmem:[#allocation2 + $0x90] sm:$0xff]  ;;  %v3109_v49 = vpop.f32.mrb[95].mxu0  ;;  %8330 = vmatmul.mubr.msk.f32.gmra.mrb[200].mxu0 %vm288_vm1, %v7176_v37  ;;  %v2621_v36 = vld [vmem:[#allocation2 + $0xf8] sm:$0xff] }
 0x1ba   : > { %2708 = vst.msk [vmem:[#allocation2 + $0xb0] sm:$0xff] %vm288_vm1, %v2660_v42  ;;  %v3304_v50 = vadd.f32 %v3256_v47, %v3089_v17  ;;  %v7949_v51 = vpop.f32.mrb[96].mxu1  ;;  %8332 = vmatprep.mubr.msk.f32.mxu0 %vm288_vm1, %v7177_v41  ;;  %v7184_v37 = vld [vmem:[%s8526_s10 + $0x17a] sm:$0xff]  ;;  %v7185_v41 = vld [vmem:[%s8526_s10 + $0x182] sm:$0xff] }
 0x1bb   : > { %3353 = vst.msk [vmem:[#allocation2 + $0x98] sm:$0xff] %vm288_vm1, %v3305_v46  ;;  %v2663_v60 = vadd.f32 %v7949_v51, %v2615_v53  ;;  %v2471_v61 = vpop.f32.mrb[97].mxu1  ;;  %8259 = vmatmul.mubr.msk.f32.gmra.mrb[202].mxu1 %vm288_vm1, %v7080_v44  ;;  %v7088_v44 = vld [vmem:[%s8526_s10 + $0x189] sm:$0xff] }
 0x1bc   : > { %3352 = vst.msk [vmem:[#allocation2 + $0x90] sm:$0xff] %vm288_vm1, %v3304_v50  ;;  %v2662_v0 = vadd.f32 %v2614_v62, %v2471_v61  ;;  %v3259_v1 = vld [vmem:[#allocation2 + $0xa8] sm:$0xff]  ;;  %8261 = vmatprep.mubr.msk.f32.mxu1 %vm288_vm1, %v7081_v48  ;;  %v8023_v6 = vpop.f32.mrb[96].mxu0  ;;  %v7089_v48 = vld [vmem:[%s8526_s10 + $0x191] sm:$0xff]  ;;  %v2622_v62 = vld [vmem:[#allocation2 + $0x100] sm:$0xff] }
 0x1bd   : > { %2711 = vst.msk [vmem:[#allocation2 + $0xc8] sm:$0xff] %vm288_vm1, %v2663_v60  ;;  %v3307_v7 = vadd.f32 %v8017_v30, %v3259_v1  ;;  %v3258_v8 = vld [vmem:[#allocation2 + $0xa0] sm:$0xff]  ;;  %v3119_v54 = vpop.f32.mrb[97].mxu0  ;;  %8333 = vmatmul.mubr.msk.f32.gmra.mrb[202].mxu0 %vm288_vm1, %v7178_v58  ;;  %v2623_v53 = vld [vmem:[#allocation2 + $0x108] sm:$0xff] }
 0x1be   : > { %2710 = vst.msk [vmem:[#allocation2 + $0xc0] sm:$0xff] %vm288_vm1, %v2662_v0  ;;  %v3306_v55 = vadd.f32 %v3258_v8, %v3099_v33  ;;  %v7952_v23 = vpop.f32.mrb[98].mxu1  ;;  %8335 = vmatprep.mubr.msk.f32.mxu0 %vm288_vm1, %v7179_v63  ;;  %v7186_v58 = vld [vmem:[%s8526_s10 + $0x18a] sm:$0xff]  ;;  %v7187_v63 = vld [vmem:[%s8526_s10 + $0x192] sm:$0xff] }
 0x1bf   : > { %3355 = vst.msk [vmem:[#allocation2 + $0xa8] sm:$0xff] %vm288_vm1, %v3307_v7  ;;  %v2665_v56 = vadd.f32 %v7952_v23, %v2617_v59  ;;  %v2481_v16 = vpop.f32.mrb[99].mxu1  ;;  %8262 = vmatmul.mubr.msk.f32.gmra.mrb[204].mxu1 %vm288_vm1, %v7082_v2  ;;  %v7090_v2 = vld [vmem:[%s8526_s10 + $0x199] sm:$0xff] }
 0x1c0   : > { %3354 = vst.msk [vmem:[#allocation2 + $0xa0] sm:$0xff] %vm288_vm1, %v3306_v55  ;;  %v2664_v19 = vadd.f32 %v2616_v57, %v2481_v16  ;;  %v3261_v4 = vld [vmem:[#allocation2 + $0xb8] sm:$0xff]  ;;  %8264 = vmatprep.mubr.msk.f32.mxu1 %vm288_vm1, %v7083_v10  ;;  %v8026_v9 = vpop.f32.mrb[98].mxu0  ;;  %v7091_v10 = vld [vmem:[%s8526_s10 + $0x1a1] sm:$0xff]  ;;  %v2624_v57 = vld [vmem:[#allocation2 + $0x110] sm:$0xff] }
 0x1c1   : > { %2713 = vst.msk [vmem:[#allocation2 + $0xd8] sm:$0xff] %vm288_vm1, %v2665_v56  ;;  %v3309_v12 = vadd.f32 %v8020_v45, %v3261_v4  ;;  %v3260_v14 = vld [vmem:[#allocation2 + $0xb0] sm:$0xff]  ;;  %v3129_v17 = vpop.f32.mrb[99].mxu0  ;;  %8336 = vmatmul.mubr.msk.f32.gmra.mrb[204].mxu0 %vm288_vm1, %v7180_v52  ;;  %v2625_v59 = vld [vmem:[#allocation2 + $0x118] sm:$0xff] }
 0x1c2   : > { %2712 = vst.msk [vmem:[#allocation2 + $0xd0] sm:$0xff] %vm288_vm1, %v2664_v19  ;;  %v3308_v18 = vadd.f32 %v3260_v14, %v3109_v49  ;;  %v7955_v20 = vpop.f32.mrb[100].mxu1  ;;  %8338 = vmatprep.mubr.msk.f32.mxu0 %vm288_vm1, %v7181_v3  ;;  %v7188_v52 = vld [vmem:[%s8526_s10 + $0x19a] sm:$0xff]  ;;  %v7189_v3 = vld [vmem:[%s8526_s10 + $0x1a2] sm:$0xff] }
 0x1c3   : > { %3357 = vst.msk [vmem:[#allocation2 + $0xb8] sm:$0xff] %vm288_vm1, %v3309_v12  ;;  %v2667_v24 = vadd.f32 %v7955_v20, %v2619_v21  ;;  %v2491_v25 = vpop.f32.mrb[101].mxu1  ;;  %8265 = vmatmul.mubr.msk.f32.gmra.mrb[206].mxu1 %vm288_vm1, %v7084_v5  ;;  %v7092_v5 = vld [vmem:[%s8526_s10 + $0x1a9] sm:$0xff] }
 0x1c4   : > { %3356 = vst.msk [vmem:[#allocation2 + $0xb0] sm:$0xff] %vm288_vm1, %v3308_v18  ;;  %v2666_v28 = vadd.f32 %v2618_v26, %v2491_v25  ;;  %v3263_v11 = vld [vmem:[#allocation2 + $0xc8] sm:$0xff]  ;;  %8267 = vmatprep.mubr.msk.f32.mxu1 %vm288_vm1, %v7085_v15  ;;  %v8029_v30 = vpop.f32.mrb[100].mxu0  ;;  %v2626_v25 = vld [vmem:[#allocation2 + $0x120] sm:$0xff] }
 0x1c5   : > { %2715 = vst.msk [vmem:[#allocation2 + $0xe8] sm:$0xff] %vm288_vm1, %v2667_v24  ;;  %v3311_v31 = vadd.f32 %v8023_v6, %v3263_v11  ;;  %v3262_v32 = vld [vmem:[#allocation2 + $0xc0] sm:$0xff]  ;;  %v3139_v33 = vpop.f32.mrb[101].mxu0  ;;  %8339 = vmatmul.mubr.msk.f32.gmra.mrb[206].mxu0 %vm288_vm1, %v7182_v22  ;;  %v2627_v20 = vld [vmem:[#allocation2 + $0x128] sm:$0xff] }
 0x1c6   : > { %2714 = vst.msk [vmem:[#allocation2 + $0xe0] sm:$0xff] %vm288_vm1, %v2666_v28  ;;  %v3310_v34 = vadd.f32 %v3262_v32, %v3119_v54  ;;  %v7958_v35 = vpop.f32.mrb[102].mxu1  ;;  %8341 = vmatprep.mubr.msk.f32.mxu0 %vm288_vm1, %v7183_v27  ;;  %v7190_v21 = vld [vmem:[%s8526_s10 + $0x1aa] sm:$0xff] }
 0x1c7   : > { %3359 = vst.msk [vmem:[#allocation2 + $0xc8] sm:$0xff] %vm288_vm1, %v3311_v31  ;;  %v2669_v38 = vadd.f32 %v7958_v35, %v2621_v36  ;;  %v2501_v39 = vpop.f32.mrb[103].mxu1  ;;  %8268 = vmatmul.mubr.msk.f32.gmra.mrb[208].mxu1 %vm288_vm1, %v7086_v29  ;;  %v2628_v35 = vld [vmem:[#allocation2 + $0x130] sm:$0xff] }
 0x1c8   : > { %3358 = vst.msk [vmem:[#allocation2 + $0xc0] sm:$0xff] %vm288_vm1, %v3310_v34  ;;  %v2668_v42 = vadd.f32 %v2620_v40, %v2501_v39  ;;  %v3265_v43 = vld [vmem:[#allocation2 + $0xd8] sm:$0xff]  ;;  %8270 = vmatprep.mubr.msk.f32.mxu1 %vm288_vm1, %v7087_v13  ;;  %v8032_v45 = vpop.f32.mrb[102].mxu0 }
 0x1c9   : > { %2717 = vst.msk [vmem:[#allocation2 + $0xf8] sm:$0xff] %vm288_vm1, %v2669_v38  ;;  %v3313_v46 = vadd.f32 %v8026_v9, %v3265_v43  ;;  %v3264_v47 = vld [vmem:[#allocation2 + $0xd0] sm:$0xff]  ;;  %v3149_v49 = vpop.f32.mrb[103].mxu0  ;;  %8342 = vmatmul.mubr.msk.f32.gmra.mrb[208].mxu0 %vm288_vm1, %v7184_v37  ;;  %v2629_v13 = vld [vmem:[#allocation2 + $0x138] sm:$0xff] }
 0x1ca   : > { %2716 = vst.msk [vmem:[#allocation2 + $0xf0] sm:$0xff] %vm288_vm1, %v2668_v42  ;;  %v3312_v50 = vadd.f32 %v3264_v47, %v3129_v17  ;;  %v7961_v51 = vpop.f32.mrb[104].mxu1  ;;  %8344 = vmatprep.mubr.msk.f32.mxu0 %vm288_vm1, %v7185_v41  ;;  %v2630_v47 = vld [vmem:[#allocation2 + $0x140] sm:$0xff] }
 0x1cb   : > { %3361 = vst.msk [vmem:[#allocation2 + $0xd8] sm:$0xff] %vm288_vm1, %v3313_v46  ;;  %v2671_v60 = vadd.f32 %v7961_v51, %v2623_v53  ;;  %v2511_v61 = vpop.f32.mrb[105].mxu1  ;;  %8271 = vmatmul.mubr.msk.f32.gmra.mrb[210].mxu1 %vm288_vm1, %v7088_v44  ;;  %v2631_v44 = vld [vmem:[#allocation2 + $0x148] sm:$0xff] }
 0x1cc   : > { %3360 = vst.msk [vmem:[#allocation2 + $0xd0] sm:$0xff] %vm288_vm1, %v3312_v50  ;;  %v2670_v0 = vadd.f32 %v2622_v62, %v2511_v61  ;;  %v3267_v1 = vld [vmem:[#allocation2 + $0xe8] sm:$0xff]  ;;  %8273 = vmatprep.mubr.msk.f32.mxu1 %vm288_vm1, %v7089_v48  ;;  %v8035_v6 = vpop.f32.mrb[104].mxu0  ;;  %v2633_v62 = vld [vmem:[#allocation2 + $0x158] sm:$0xff] }
 0x1cd   : > { %2719 = vst.msk [vmem:[#allocation2 + $0x108] sm:$0xff] %vm288_vm1, %v2671_v60  ;;  %v3315_v7 = vadd.f32 %v8029_v30, %v3267_v1  ;;  %v3266_v8 = vld [vmem:[#allocation2 + $0xe0] sm:$0xff]  ;;  %v3159_v54 = vpop.f32.mrb[105].mxu0  ;;  %8345 = vmatmul.mubr.msk.f32.gmra.mrb[210].mxu0 %vm288_vm1, %v7186_v58  ;;  %v2632_v1 = vld [vmem:[#allocation2 + $0x150] sm:$0xff] }
 0x1ce   : > { %2718 = vst.msk [vmem:[#allocation2 + $0x100] sm:$0xff] %vm288_vm1, %v2670_v0  ;;  %v3314_v55 = vadd.f32 %v3266_v8, %v3139_v33  ;;  %v7964_v23 = vpop.f32.mrb[106].mxu1  ;;  %8347 = vmatprep.mubr.msk.f32.mxu0 %vm288_vm1, %v7187_v63 }
 0x1cf   : > { %3363 = vst.msk [vmem:[#allocation2 + $0xe8] sm:$0xff] %vm288_vm1, %v3315_v7  ;;  %v2673_v56 = vadd.f32 %v7964_v23, %v2625_v59  ;;  %v2521_v16 = vpop.f32.mrb[107].mxu1  ;;  %8274 = vmatmul.mubr.msk.f32.gmra.mrb[212].mxu1 %vm288_vm1, %v7090_v2  ;;  %v2635_v59 = vld [vmem:[#allocation2 + $0x168] sm:$0xff] }
 0x1d0   : > { %3362 = vst.msk [vmem:[#allocation2 + $0xe0] sm:$0xff] %vm288_vm1, %v3314_v55  ;;  %v2672_v19 = vadd.f32 %v2624_v57, %v2521_v16  ;;  %v3269_v4 = vld [vmem:[#allocation2 + $0xf8] sm:$0xff]  ;;  %8276 = vmatprep.mubr.msk.f32.mxu1 %vm288_vm1, %v7091_v10  ;;  %v8038_v9 = vpop.f32.mrb[106].mxu0  ;;  %v2634_v16 = vld [vmem:[#allocation2 + $0x160] sm:$0xff] }
 0x1d1   : > { %2721 = vst.msk [vmem:[#allocation2 + $0x118] sm:$0xff] %vm288_vm1, %v2673_v56  ;;  %v3317_v12 = vadd.f32 %v8032_v45, %v3269_v4  ;;  %v3268_v14 = vld [vmem:[#allocation2 + $0xf0] sm:$0xff]  ;;  %v3169_v15 = vpop.f32.mrb[107].mxu0  ;;  %8348 = vmatmul.mubr.msk.f32.gmra.mrb[212].mxu0 %vm288_vm1, %v7188_v52 }
 0x1d2   : > { %2720 = vst.msk [vmem:[#allocation2 + $0x110] sm:$0xff] %vm288_vm1, %v2672_v19  ;;  %v3316_v17 = vadd.f32 %v3268_v14, %v3149_v49  ;;  %v7967_v18 = vpop.f32.mrb[108].mxu1  ;;  %8350 = vmatprep.mubr.msk.f32.mxu0 %vm288_vm1, %v7189_v3 }
 0x1d3   : > { %3365 = vst.msk [vmem:[#allocation2 + $0xf8] sm:$0xff] %vm288_vm1, %v3317_v12  ;;  %v2675_v22 = vadd.f32 %v7967_v18, %v2627_v20  ;;  %v2531_v24 = vpop.f32.mrb[109].mxu1  ;;  %8277 = vmatmul.mubr.msk.f32.gmra.mrb[214].mxu1 %vm288_vm1, %v7092_v5  ;;  %v2636_v20 = vld [vmem:[#allocation2 + $0x170] sm:$0xff] }
 0x1d4   : > { %3364 = vst.msk [vmem:[#allocation2 + $0xf0] sm:$0xff] %vm288_vm1, %v3316_v17  ;;  %v2674_v26 = vadd.f32 %v2626_v25, %v2531_v24  ;;  %v3271_v27 = vld [vmem:[#allocation2 + $0x108] sm:$0xff]  ;;  %v8041_v28 = vpop.f32.mrb[108].mxu0 }
 0x1d5   : > { %2723 = vst.msk [vmem:[#allocation2 + $0x128] sm:$0xff] %vm288_vm1, %v2675_v22  ;;  %v3319_v11 = vadd.f32 %v8035_v6, %v3271_v27  ;;  %v3270_v29 = vld [vmem:[#allocation2 + $0x100] sm:$0xff]  ;;  %v3179_v30 = vpop.f32.mrb[109].mxu0  ;;  %8351 = vmatmul.mubr.msk.f32.gmra.mrb[214].mxu0 %vm288_vm1, %v7190_v21 }
 0x1d6   : > { %2722 = vst.msk [vmem:[#allocation2 + $0x120] sm:$0xff] %vm288_vm1, %v2674_v26  ;;  %v3318_v31 = vadd.f32 %v3270_v29, %v3159_v54  ;;  %v7970_v32 = vpop.f32.mrb[110].mxu1  ;;  %v3887_v29 = vld [vmem:[#allocation2 + $0x8] sm:$0xff] }
 0x1d7   : > { %3367 = vst.msk [vmem:[#allocation2 + $0x108] sm:$0xff] %vm288_vm1, %v3319_v11  ;;  %v2677_v33 = vadd.f32 %v7970_v32, %v2629_v13  ;;  %v2541_v34 = vpop.f32.mrb[111].mxu1  ;;  %v3886_v32 = vld [vmem:[#allocation2] sm:$0xff] }
 0x1d8   : > { %3366 = vst.msk [vmem:[#allocation2 + $0x100] sm:$0xff] %vm288_vm1, %v3318_v31  ;;  %v2676_v36 = vadd.f32 %v2628_v35, %v2541_v34  ;;  %v3273_v37 = vld [vmem:[#allocation2 + $0x118] sm:$0xff]  ;;  %v8044_v38 = vpop.f32.mrb[110].mxu0 }
 0x1d9   : > { %2725 = vst.msk [vmem:[#allocation2 + $0x138] sm:$0xff] %vm288_vm1, %v2677_v33  ;;  %v3321_v39 = vadd.f32 %v8038_v9, %v3273_v37  ;;  %v3272_v40 = vld [vmem:[#allocation2 + $0x110] sm:$0xff]  ;;  %v3189_v41 = vpop.f32.mrb[111].mxu0 }
 0x1da   : > { %2724 = vst.msk [vmem:[#allocation2 + $0x130] sm:$0xff] %vm288_vm1, %v2676_v36  ;;  %v3320_v42 = vadd.f32 %v3272_v40, %v3169_v15  ;;  %v7973_v43 = vpop.f32.mrb[112].mxu1  ;;  %v2637_v15 = vld [vmem:[#allocation2 + $0x178] sm:$0xff] }
 0x1db   : > { %3369 = vst.msk [vmem:[#allocation2 + $0x118] sm:$0xff] %vm288_vm1, %v3321_v39  ;;  %v2679_v45 = vadd.f32 %v7973_v43, %v2631_v44  ;;  %v2551_v46 = vpop.f32.mrb[113].mxu1  ;;  %v3889_v40 = vld [vmem:[#allocation2 + $0x18] sm:$0xff]  ;;  %v3888_v43 = vld [vmem:[#allocation2 + $0x10] sm:$0xff] }
 0x1dc   : > { %3368 = vst.msk [vmem:[#allocation2 + $0x110] sm:$0xff] %vm288_vm1, %v3320_v42  ;;  %v2678_v48 = vadd.f32 %v2630_v47, %v2551_v46  ;;  %v3275_v49 = vld [vmem:[#allocation2 + $0x128] sm:$0xff]  ;;  %v8047_v50 = vpop.f32.mrb[112].mxu0 }
 0x1dd   : > { %2727 = vst.msk [vmem:[#allocation2 + $0x148] sm:$0xff] %vm288_vm1, %v2679_v45  ;;  %v3323_v51 = vadd.f32 %v8041_v28, %v3275_v49  ;;  %v3274_v53 = vld [vmem:[#allocation2 + $0x120] sm:$0xff]  ;;  %v3199_v58 = vpop.f32.mrb[113].mxu0 }
 0x1de   : > { %2726 = vst.msk [vmem:[#allocation2 + $0x140] sm:$0xff] %vm288_vm1, %v2678_v48  ;;  %v3322_v60 = vadd.f32 %v3274_v53, %v3179_v30  ;;  %v7976_v61 = vpop.f32.mrb[114].mxu1  ;;  %v3891_v53 = vld [vmem:[#allocation2 + $0x28] sm:$0xff] }
 0x1df   : > { %3371 = vst.msk [vmem:[#allocation2 + $0x128] sm:$0xff] %vm288_vm1, %v3323_v51  ;;  %v2681_v63 = vadd.f32 %v7976_v61, %v2633_v62  ;;  %v2561_v0 = vpop.f32.mrb[115].mxu1  ;;  %v3890_v61 = vld [vmem:[#allocation2 + $0x20] sm:$0xff] }
 0x1e0   : > { %3370 = vst.msk [vmem:[#allocation2 + $0x120] sm:$0xff] %vm288_vm1, %v3322_v60  ;;  %v2680_v2 = vadd.f32 %v2632_v1, %v2561_v0  ;;  %v3277_v6 = vld [vmem:[#allocation2 + $0x138] sm:$0xff]  ;;  %v8050_v7 = vpop.f32.mrb[114].mxu0 }
 0x1e1   : > { %2729 = vst.msk [vmem:[#allocation2 + $0x158] sm:$0xff] %vm288_vm1, %v2681_v63  ;;  %v3325_v8 = vadd.f32 %v8044_v38, %v3277_v6  ;;  %v3276_v10 = vld [vmem:[#allocation2 + $0x130] sm:$0xff]  ;;  %v3209_v54 = vpop.f32.mrb[115].mxu0 }
 0x1e2   : > { %2728 = vst.msk [vmem:[#allocation2 + $0x150] sm:$0xff] %vm288_vm1, %v2680_v2  ;;  %v3324_v55 = vadd.f32 %v3276_v10, %v3189_v41  ;;  %v7979_v23 = vpop.f32.mrb[116].mxu1  ;;  %v3893_v10 = vld [vmem:[#allocation2 + $0x38] sm:$0xff] }
 0x1e3   : > { %3373 = vst.msk [vmem:[#allocation2 + $0x138] sm:$0xff] %vm288_vm1, %v3325_v8  ;;  %v2683_v52 = vadd.f32 %v7979_v23, %v2635_v59  ;;  %v2571_v56 = vpop.f32.mrb[117].mxu1  ;;  %v3892_v23 = vld [vmem:[#allocation2 + $0x30] sm:$0xff] }
 0x1e4   : > { %3372 = vst.msk [vmem:[#allocation2 + $0x130] sm:$0xff] %vm288_vm1, %v3324_v55  ;;  %v2682_v57 = vadd.f32 %v2634_v16, %v2571_v56  ;;  %v3279_v3 = vld [vmem:[#allocation2 + $0x148] sm:$0xff]  ;;  %v8053_v19 = vpop.f32.mrb[116].mxu0 }
 0x1e5   : > { %2731 = vst.msk [vmem:[#allocation2 + $0x168] sm:$0xff] %vm288_vm1, %v2683_v52  ;;  %v3327_v4 = vadd.f32 %v8047_v50, %v3279_v3  ;;  %v3278_v5 = vld [vmem:[#allocation2 + $0x140] sm:$0xff]  ;;  %v3219_v9 = vpop.f32.mrb[117].mxu0 }
 0x1e6   : > { %2730 = vst.msk [vmem:[#allocation2 + $0x160] sm:$0xff] %vm288_vm1, %v2682_v57  ;;  %v3326_v12 = vadd.f32 %v3278_v5, %v3199_v58  ;;  %v7982_v14 = vpop.f32.mrb[118].mxu1  ;;  %v3895_v5 = vld [vmem:[#allocation2 + $0x48] sm:$0xff] }
 0x1e7   : > { %3375 = vst.msk [vmem:[#allocation2 + $0x148] sm:$0xff] %vm288_vm1, %v3327_v4  ;;  %v2685_v17 = vadd.f32 %v7982_v14, %v2637_v15  ;;  %v2581_v18 = vpop.f32.mrb[119].mxu1  ;;  %v3894_v14 = vld [vmem:[#allocation2 + $0x40] sm:$0xff] }
 0x1e8   : > { %3374 = vst.msk [vmem:[#allocation2 + $0x140] sm:$0xff] %vm288_vm1, %v3326_v12  ;;  %v2684_v21 = vadd.f32 %v2636_v20, %v2581_v18  ;;  %v3281_v22 = vld [vmem:[#allocation2 + $0x158] sm:$0xff]  ;;  %v8056_v24 = vpop.f32.mrb[118].mxu0 }
 0x1e9   : > { %2733 = vst.msk [vmem:[#allocation2 + $0x178] sm:$0xff] %vm288_vm1, %v2685_v17  ;;  %v3329_v25 = vadd.f32 %v8050_v7, %v3281_v22  ;;  %v3280_v26 = vld [vmem:[#allocation2 + $0x150] sm:$0xff]  ;;  %v3229_v27 = vpop.f32.mrb[119].mxu0 }
 0x1ea   : > { %2732 = vst.msk [vmem:[#allocation2 + $0x170] sm:$0xff] %vm288_vm1, %v2684_v21  ;;  %v3328_v28 = vadd.f32 %v3280_v26, %v3209_v54  ;;  %v8061_v11 = vpop.f32.mrb[120].mxu1  ;;  %v3897_v26 = vld [vmem:[#allocation2 + $0x58] sm:$0xff] }
 0x1eb   : > { %3377 = vst.msk [vmem:[#allocation2 + $0x158] sm:$0xff] %vm288_vm1, %v3329_v25  ;;  %v3935_v30 = vadd.f32 %v8061_v11, %v3887_v29  ;;  %v3647_v31 = vpop.f32.mrb[121].mxu1  ;;  %v3896_v11 = vld [vmem:[#allocation2 + $0x50] sm:$0xff] }
 0x1ec   : > { %3376 = vst.msk [vmem:[#allocation2 + $0x150] sm:$0xff] %vm288_vm1, %v3328_v28  ;;  %v3283_v13 = vld [vmem:[#allocation2 + $0x168] sm:$0xff]  ;;  %v3934_v33 = vadd.f32 %v3886_v32, %v3647_v31  ;;  %v8135_v34 = vpop.f32.mrb[120].mxu0 }
 0x1ed   : > { %3983 = vst.msk [vmem:[#allocation2 + $0x8] sm:$0xff] %vm288_vm1, %v3935_v30  ;;  %v3331_v35 = vadd.f32 %v8053_v19, %v3283_v13  ;;  %v3282_v36 = vld [vmem:[#allocation2 + $0x160] sm:$0xff]  ;;  %v4295_v37 = vpop.f32.mrb[121].mxu0 }
 0x1ee   : > { %3982 = vst.msk [vmem:[#allocation2] sm:$0xff] %vm288_vm1, %v3934_v33  ;;  %v3330_v38 = vadd.f32 %v3282_v36, %v3219_v9  ;;  %v8064_v39 = vpop.f32.mrb[122].mxu1  ;;  %v3899_v36 = vld [vmem:[#allocation2 + $0x68] sm:$0xff] }
 0x1ef   : > { %3379 = vst.msk [vmem:[#allocation2 + $0x168] sm:$0xff] %vm288_vm1, %v3331_v35  ;;  %v3937_v41 = vadd.f32 %v8064_v39, %v3889_v40  ;;  %v3657_v42 = vpop.f32.mrb[123].mxu1  ;;  %v3898_v39 = vld [vmem:[#allocation2 + $0x60] sm:$0xff] }
 0x1f0   : > { %3378 = vst.msk [vmem:[#allocation2 + $0x160] sm:$0xff] %vm288_vm1, %v3330_v38  ;;  %v3285_v44 = vld [vmem:[#allocation2 + $0x178] sm:$0xff]  ;;  %v3936_v45 = vadd.f32 %v3888_v43, %v3657_v42  ;;  %v8138_v46 = vpop.f32.mrb[122].mxu0 }
 0x1f1   : > { %3985 = vst.msk [vmem:[#allocation2 + $0x18] sm:$0xff] %vm288_vm1, %v3937_v41  ;;  %v3333_v47 = vadd.f32 %v8056_v24, %v3285_v44  ;;  %v3284_v48 = vld [vmem:[#allocation2 + $0x170] sm:$0xff]  ;;  %v4305_v49 = vpop.f32.mrb[123].mxu0 }
 0x1f2   : > { %3984 = vst.msk [vmem:[#allocation2 + $0x10] sm:$0xff] %vm288_vm1, %v3936_v45  ;;  %v3332_v50 = vadd.f32 %v3284_v48, %v3229_v27  ;;  %v8067_v51 = vpop.f32.mrb[124].mxu1  ;;  %v3901_v48 = vld [vmem:[#allocation2 + $0x78] sm:$0xff] }
 0x1f3   : > { %3381 = vst.msk [vmem:[#allocation2 + $0x178] sm:$0xff] %vm288_vm1, %v3333_v47  ;;  %v3939_v58 = vadd.f32 %v8067_v51, %v3891_v53  ;;  %v3667_v60 = vpop.f32.mrb[125].mxu1  ;;  %v3900_v51 = vld [vmem:[#allocation2 + $0x70] sm:$0xff] }
 0x1f4   : > { %3380 = vst.msk [vmem:[#allocation2 + $0x170] sm:$0xff] %vm288_vm1, %v3332_v50  ;;  %v3938_v62 = vadd.f32 %v3890_v61, %v3667_v60  ;;  %v4535_v63 = vld [vmem:[#allocation2 + $0x8] sm:$0xff]  ;;  %v8141_v0 = vpop.f32.mrb[124].mxu0 }
 0x1f5   : > { %3987 = vst.msk [vmem:[#allocation2 + $0x28] sm:$0xff] %vm288_vm1, %v3939_v58  ;;  %v4583_v1 = vadd.f32 %v8135_v34, %v4535_v63  ;;  %v4534_v2 = vld [vmem:[#allocation2] sm:$0xff]  ;;  %v4315_v6 = vpop.f32.mrb[125].mxu0 }
 0x1f6   : > { %3986 = vst.msk [vmem:[#allocation2 + $0x20] sm:$0xff] %vm288_vm1, %v3938_v62  ;;  %v4582_v7 = vadd.f32 %v4534_v2, %v4295_v37  ;;  %v8070_v8 = vpop.f32.mrb[126].mxu1  ;;  %v3903_v2 = vld [vmem:[#allocation2 + $0x88] sm:$0xff] }
 0x1f7   : > { %4631 = vst.msk [vmem:[#allocation2 + $0x8] sm:$0xff] %vm288_vm1, %v4583_v1  ;;  %v3941_v54 = vadd.f32 %v8070_v8, %v3893_v10  ;;  %v3677_v55 = vpop.f32.mrb[127].mxu1  ;;  %v3902_v8 = vld [vmem:[#allocation2 + $0x80] sm:$0xff] }
 0x1f8   : > { %4630 = vst.msk [vmem:[#allocation2] sm:$0xff] %vm288_vm1, %v4582_v7  ;;  %v3940_v59 = vadd.f32 %v3892_v23, %v3677_v55  ;;  %v4537_v52 = vld [vmem:[#allocation2 + $0x18] sm:$0xff]  ;;  %v8144_v56 = vpop.f32.mrb[126].mxu0 }
 0x1f9   : > { %3989 = vst.msk [vmem:[#allocation2 + $0x38] sm:$0xff] %vm288_vm1, %v3941_v54  ;;  %v4585_v16 = vadd.f32 %v8138_v46, %v4537_v52  ;;  %v4536_v57 = vld [vmem:[#allocation2 + $0x10] sm:$0xff]  ;;  %v4325_v3 = vpop.f32.mrb[127].mxu0 }
 0x1fa   : > { %3988 = vst.msk [vmem:[#allocation2 + $0x30] sm:$0xff] %vm288_vm1, %v3940_v59  ;;  %v4584_v19 = vadd.f32 %v4536_v57, %v4305_v49  ;;  %v8073_v4 = vpop.f32.mrb[128].mxu1  ;;  %v3905_v57 = vld [vmem:[#allocation2 + $0x98] sm:$0xff] }
 0x1fb   : > { %4633 = vst.msk [vmem:[#allocation2 + $0x18] sm:$0xff] %vm288_vm1, %v4585_v16  ;;  %v3943_v9 = vadd.f32 %v8073_v4, %v3895_v5  ;;  %v3687_v12 = vpop.f32.mrb[129].mxu1  ;;  %v3904_v4 = vld [vmem:[#allocation2 + $0x90] sm:$0xff] }
 0x1fc   : > { %4632 = vst.msk [vmem:[#allocation2 + $0x10] sm:$0xff] %vm288_vm1, %v4584_v19  ;;  %v3942_v15 = vadd.f32 %v3894_v14, %v3687_v12  ;;  %v4539_v17 = vld [vmem:[#allocation2 + $0x28] sm:$0xff]  ;;  %v8147_v18 = vpop.f32.mrb[128].mxu0 }
 0x1fd   : > { %3991 = vst.msk [vmem:[#allocation2 + $0x48] sm:$0xff] %vm288_vm1, %v3943_v9  ;;  %v4587_v20 = vadd.f32 %v8141_v0, %v4539_v17  ;;  %v4538_v21 = vld [vmem:[#allocation2 + $0x20] sm:$0xff]  ;;  %v4335_v22 = vpop.f32.mrb[129].mxu0 }
 0x1fe   : > { %3990 = vst.msk [vmem:[#allocation2 + $0x40] sm:$0xff] %vm288_vm1, %v3942_v15  ;;  %v4586_v24 = vadd.f32 %v4538_v21, %v4315_v6  ;;  %v8076_v25 = vpop.f32.mrb[130].mxu1  ;;  %v3907_v21 = vld [vmem:[#allocation2 + $0xa8] sm:$0xff] }
 0x1ff   : > { %4635 = vst.msk [vmem:[#allocation2 + $0x28] sm:$0xff] %vm288_vm1, %v4587_v20  ;;  %v3945_v27 = vadd.f32 %v8076_v25, %v3897_v26  ;;  %v3697_v28 = vpop.f32.mrb[131].mxu1  ;;  %v3906_v25 = vld [vmem:[#allocation2 + $0xa0] sm:$0xff] }
 0x200   : > { %4634 = vst.msk [vmem:[#allocation2 + $0x20] sm:$0xff] %vm288_vm1, %v4586_v24  ;;  %v3944_v29 = vadd.f32 %v3896_v11, %v3697_v28  ;;  %v4541_v30 = vld [vmem:[#allocation2 + $0x38] sm:$0xff]  ;;  %v8150_v31 = vpop.f32.mrb[130].mxu0 }
 0x201   : > { %3993 = vst.msk [vmem:[#allocation2 + $0x58] sm:$0xff] %vm288_vm1, %v3945_v27  ;;  %v4589_v32 = vadd.f32 %v8144_v56, %v4541_v30  ;;  %v4540_v13 = vld [vmem:[#allocation2 + $0x30] sm:$0xff]  ;;  %v4345_v33 = vpop.f32.mrb[131].mxu0 }
 0x202   : > { %3992 = vst.msk [vmem:[#allocation2 + $0x50] sm:$0xff] %vm288_vm1, %v3944_v29  ;;  %v4588_v34 = vadd.f32 %v4540_v13, %v4325_v3  ;;  %v8079_v35 = vpop.f32.mrb[132].mxu1  ;;  %v3909_v13 = vld [vmem:[#allocation2 + $0xb8] sm:$0xff] }
 0x203   : > { %4637 = vst.msk [vmem:[#allocation2 + $0x38] sm:$0xff] %vm288_vm1, %v4589_v32  ;;  %v3947_v37 = vadd.f32 %v8079_v35, %v3899_v36  ;;  %v3707_v38 = vpop.f32.mrb[133].mxu1  ;;  %v3908_v35 = vld [vmem:[#allocation2 + $0xb0] sm:$0xff] }
 0x204   : > { %4636 = vst.msk [vmem:[#allocation2 + $0x30] sm:$0xff] %vm288_vm1, %v4588_v34  ;;  %v3946_v40 = vadd.f32 %v3898_v39, %v3707_v38  ;;  %v4543_v41 = vld [vmem:[#allocation2 + $0x48] sm:$0xff]  ;;  %v8153_v42 = vpop.f32.mrb[132].mxu0 }
 0x205   : > { %3995 = vst.msk [vmem:[#allocation2 + $0x68] sm:$0xff] %vm288_vm1, %v3947_v37  ;;  %v4591_v43 = vadd.f32 %v8147_v18, %v4543_v41  ;;  %v4542_v44 = vld [vmem:[#allocation2 + $0x40] sm:$0xff]  ;;  %v4355_v45 = vpop.f32.mrb[133].mxu0 }
 0x206   : > { %3994 = vst.msk [vmem:[#allocation2 + $0x60] sm:$0xff] %vm288_vm1, %v3946_v40  ;;  %v4590_v46 = vadd.f32 %v4542_v44, %v4335_v22  ;;  %v8082_v47 = vpop.f32.mrb[134].mxu1  ;;  %v3911_v44 = vld [vmem:[#allocation2 + $0xc8] sm:$0xff] }
 0x207   : > { %4639 = vst.msk [vmem:[#allocation2 + $0x48] sm:$0xff] %vm288_vm1, %v4591_v43  ;;  %v3949_v49 = vadd.f32 %v8082_v47, %v3901_v48  ;;  %v3717_v50 = vpop.f32.mrb[135].mxu1  ;;  %v3910_v47 = vld [vmem:[#allocation2 + $0xc0] sm:$0xff] }
 0x208   : > { %4638 = vst.msk [vmem:[#allocation2 + $0x40] sm:$0xff] %vm288_vm1, %v4590_v46  ;;  %v3948_v53 = vadd.f32 %v3900_v51, %v3717_v50  ;;  %v4545_v58 = vld [vmem:[#allocation2 + $0x58] sm:$0xff]  ;;  %v8156_v60 = vpop.f32.mrb[134].mxu0 }
 0x209   : > { %3997 = vst.msk [vmem:[#allocation2 + $0x78] sm:$0xff] %vm288_vm1, %v3949_v49  ;;  %v4593_v61 = vadd.f32 %v8150_v31, %v4545_v58  ;;  %v4544_v62 = vld [vmem:[#allocation2 + $0x50] sm:$0xff]  ;;  %v4365_v63 = vpop.f32.mrb[135].mxu0 }
 0x20a   : > { %3996 = vst.msk [vmem:[#allocation2 + $0x70] sm:$0xff] %vm288_vm1, %v3948_v53  ;;  %v4592_v0 = vadd.f32 %v4544_v62, %v4345_v33  ;;  %v8085_v1 = vpop.f32.mrb[136].mxu1  ;;  %v3913_v62 = vld [vmem:[#allocation2 + $0xd8] sm:$0xff] }
 0x20b   : > { %4641 = vst.msk [vmem:[#allocation2 + $0x58] sm:$0xff] %vm288_vm1, %v4593_v61  ;;  %v3951_v6 = vadd.f32 %v8085_v1, %v3903_v2  ;;  %v3727_v7 = vpop.f32.mrb[137].mxu1  ;;  %v3912_v1 = vld [vmem:[#allocation2 + $0xd0] sm:$0xff] }
 0x20c   : > { %4640 = vst.msk [vmem:[#allocation2 + $0x50] sm:$0xff] %vm288_vm1, %v4592_v0  ;;  %v3950_v10 = vadd.f32 %v3902_v8, %v3727_v7  ;;  %v4547_v54 = vld [vmem:[#allocation2 + $0x68] sm:$0xff]  ;;  %v8159_v55 = vpop.f32.mrb[136].mxu0 }
 0x20d   : > { %3999 = vst.msk [vmem:[#allocation2 + $0x88] sm:$0xff] %vm288_vm1, %v3951_v6  ;;  %v4595_v23 = vadd.f32 %v8153_v42, %v4547_v54  ;;  %v4546_v59 = vld [vmem:[#allocation2 + $0x60] sm:$0xff]  ;;  %v4375_v52 = vpop.f32.mrb[137].mxu0 }
 0x20e   : > { %3998 = vst.msk [vmem:[#allocation2 + $0x80] sm:$0xff] %vm288_vm1, %v3950_v10  ;;  %v4594_v56 = vadd.f32 %v4546_v59, %v4355_v45  ;;  %v8088_v16 = vpop.f32.mrb[138].mxu1  ;;  %v3915_v59 = vld [vmem:[#allocation2 + $0xe8] sm:$0xff] }
 0x20f   : > { %4643 = vst.msk [vmem:[#allocation2 + $0x68] sm:$0xff] %vm288_vm1, %v4595_v23  ;;  %v3953_v3 = vadd.f32 %v8088_v16, %v3905_v57  ;;  %v3737_v19 = vpop.f32.mrb[139].mxu1  ;;  %v3914_v16 = vld [vmem:[#allocation2 + $0xe0] sm:$0xff] }
 0x210   : > { %4642 = vst.msk [vmem:[#allocation2 + $0x60] sm:$0xff] %vm288_vm1, %v4594_v56  ;;  %v3952_v5 = vadd.f32 %v3904_v4, %v3737_v19  ;;  %v4549_v9 = vld [vmem:[#allocation2 + $0x78] sm:$0xff]  ;;  %v8162_v12 = vpop.f32.mrb[138].mxu0 }
 0x211   : > { %4001 = vst.msk [vmem:[#allocation2 + $0x98] sm:$0xff] %vm288_vm1, %v3953_v3  ;;  %v4597_v14 = vadd.f32 %v8156_v60, %v4549_v9  ;;  %v4548_v15 = vld [vmem:[#allocation2 + $0x70] sm:$0xff]  ;;  %v4385_v17 = vpop.f32.mrb[139].mxu0 }
 0x212   : > { %4000 = vst.msk [vmem:[#allocation2 + $0x90] sm:$0xff] %vm288_vm1, %v3952_v5  ;;  %v4596_v18 = vadd.f32 %v4548_v15, %v4365_v63  ;;  %v8091_v20 = vpop.f32.mrb[140].mxu1  ;;  %v3917_v15 = vld [vmem:[#allocation2 + $0xf8] sm:$0xff] }
 0x213   : > { %4645 = vst.msk [vmem:[#allocation2 + $0x78] sm:$0xff] %vm288_vm1, %v4597_v14  ;;  %v3955_v22 = vadd.f32 %v8091_v20, %v3907_v21  ;;  %v3747_v24 = vpop.f32.mrb[141].mxu1  ;;  %v3916_v20 = vld [vmem:[#allocation2 + $0xf0] sm:$0xff] }
 0x214   : > { %4644 = vst.msk [vmem:[#allocation2 + $0x70] sm:$0xff] %vm288_vm1, %v4596_v18  ;;  %v3954_v26 = vadd.f32 %v3906_v25, %v3747_v24  ;;  %v4551_v27 = vld [vmem:[#allocation2 + $0x88] sm:$0xff]  ;;  %v8165_v28 = vpop.f32.mrb[140].mxu0 }
 0x215   : > { %4003 = vst.msk [vmem:[#allocation2 + $0xa8] sm:$0xff] %vm288_vm1, %v3955_v22  ;;  %v4599_v11 = vadd.f32 %v8159_v55, %v4551_v27  ;;  %v4550_v29 = vld [vmem:[#allocation2 + $0x80] sm:$0xff]  ;;  %v4395_v30 = vpop.f32.mrb[141].mxu0 }
 0x216   : > { %4002 = vst.msk [vmem:[#allocation2 + $0xa0] sm:$0xff] %vm288_vm1, %v3954_v26  ;;  %v4598_v31 = vadd.f32 %v4550_v29, %v4375_v52  ;;  %v8094_v32 = vpop.f32.mrb[142].mxu1  ;;  %v3919_v29 = vld [vmem:[#allocation2 + $0x108] sm:$0xff] }
 0x217   : > { %4647 = vst.msk [vmem:[#allocation2 + $0x88] sm:$0xff] %vm288_vm1, %v4599_v11  ;;  %v3957_v33 = vadd.f32 %v8094_v32, %v3909_v13  ;;  %v3757_v34 = vpop.f32.mrb[143].mxu1  ;;  %v3918_v32 = vld [vmem:[#allocation2 + $0x100] sm:$0xff] }
 0x218   : > { %4646 = vst.msk [vmem:[#allocation2 + $0x80] sm:$0xff] %vm288_vm1, %v4598_v31  ;;  %v3956_v36 = vadd.f32 %v3908_v35, %v3757_v34  ;;  %v4553_v37 = vld [vmem:[#allocation2 + $0x98] sm:$0xff]  ;;  %v8168_v38 = vpop.f32.mrb[142].mxu0 }
 0x219   : > { %4005 = vst.msk [vmem:[#allocation2 + $0xb8] sm:$0xff] %vm288_vm1, %v3957_v33  ;;  %v4601_v39 = vadd.f32 %v8162_v12, %v4553_v37  ;;  %v4552_v40 = vld [vmem:[#allocation2 + $0x90] sm:$0xff]  ;;  %v4405_v41 = vpop.f32.mrb[143].mxu0 }
 0x21a   : > { %4004 = vst.msk [vmem:[#allocation2 + $0xb0] sm:$0xff] %vm288_vm1, %v3956_v36  ;;  %v4600_v42 = vadd.f32 %v4552_v40, %v4385_v17  ;;  %v8097_v43 = vpop.f32.mrb[144].mxu1  ;;  %v3921_v40 = vld [vmem:[#allocation2 + $0x118] sm:$0xff] }
 0x21b   : > { %4649 = vst.msk [vmem:[#allocation2 + $0x98] sm:$0xff] %vm288_vm1, %v4601_v39  ;;  %v3959_v45 = vadd.f32 %v8097_v43, %v3911_v44  ;;  %v3767_v46 = vpop.f32.mrb[145].mxu1  ;;  %v3920_v43 = vld [vmem:[#allocation2 + $0x110] sm:$0xff] }
 0x21c   : > { %4648 = vst.msk [vmem:[#allocation2 + $0x90] sm:$0xff] %vm288_vm1, %v4600_v42  ;;  %v3958_v48 = vadd.f32 %v3910_v47, %v3767_v46  ;;  %v4555_v49 = vld [vmem:[#allocation2 + $0xa8] sm:$0xff]  ;;  %v8171_v50 = vpop.f32.mrb[144].mxu0 }
 0x21d   : > { %4007 = vst.msk [vmem:[#allocation2 + $0xc8] sm:$0xff] %vm288_vm1, %v3959_v45  ;;  %v4603_v51 = vadd.f32 %v8165_v28, %v4555_v49  ;;  %v4554_v53 = vld [vmem:[#allocation2 + $0xa0] sm:$0xff]  ;;  %v4415_v58 = vpop.f32.mrb[145].mxu0 }
 0x21e   : > { %4006 = vst.msk [vmem:[#allocation2 + $0xc0] sm:$0xff] %vm288_vm1, %v3958_v48  ;;  %v4602_v60 = vadd.f32 %v4554_v53, %v4395_v30  ;;  %v8100_v61 = vpop.f32.mrb[146].mxu1  ;;  %v3923_v53 = vld [vmem:[#allocation2 + $0x128] sm:$0xff] }
 0x21f   : > { %4651 = vst.msk [vmem:[#allocation2 + $0xa8] sm:$0xff] %vm288_vm1, %v4603_v51  ;;  %v3961_v63 = vadd.f32 %v8100_v61, %v3913_v62  ;;  %v3777_v0 = vpop.f32.mrb[147].mxu1  ;;  %v3922_v61 = vld [vmem:[#allocation2 + $0x120] sm:$0xff] }
 0x220   : > { %4650 = vst.msk [vmem:[#allocation2 + $0xa0] sm:$0xff] %vm288_vm1, %v4602_v60  ;;  %v3960_v2 = vadd.f32 %v3912_v1, %v3777_v0  ;;  %v4557_v6 = vld [vmem:[#allocation2 + $0xb8] sm:$0xff]  ;;  %v8174_v7 = vpop.f32.mrb[146].mxu0 }
 0x221   : > { %4009 = vst.msk [vmem:[#allocation2 + $0xd8] sm:$0xff] %vm288_vm1, %v3961_v63  ;;  %v4605_v8 = vadd.f32 %v8168_v38, %v4557_v6  ;;  %v4556_v10 = vld [vmem:[#allocation2 + $0xb0] sm:$0xff]  ;;  %v4425_v54 = vpop.f32.mrb[147].mxu0 }
 0x222   : > { %4008 = vst.msk [vmem:[#allocation2 + $0xd0] sm:$0xff] %vm288_vm1, %v3960_v2  ;;  %v4604_v55 = vadd.f32 %v4556_v10, %v4405_v41  ;;  %v8103_v23 = vpop.f32.mrb[148].mxu1  ;;  %v3925_v10 = vld [vmem:[#allocation2 + $0x138] sm:$0xff] }
 0x223   : > { %4653 = vst.msk [vmem:[#allocation2 + $0xb8] sm:$0xff] %vm288_vm1, %v4605_v8  ;;  %v3963_v52 = vadd.f32 %v8103_v23, %v3915_v59  ;;  %v3787_v56 = vpop.f32.mrb[149].mxu1  ;;  %v3924_v23 = vld [vmem:[#allocation2 + $0x130] sm:$0xff] }
 0x224   : > { %4652 = vst.msk [vmem:[#allocation2 + $0xb0] sm:$0xff] %vm288_vm1, %v4604_v55  ;;  %v3962_v57 = vadd.f32 %v3914_v16, %v3787_v56  ;;  %v4559_v3 = vld [vmem:[#allocation2 + $0xc8] sm:$0xff]  ;;  %v8177_v19 = vpop.f32.mrb[148].mxu0 }
 0x225   : > { %4011 = vst.msk [vmem:[#allocation2 + $0xe8] sm:$0xff] %vm288_vm1, %v3963_v52  ;;  %v4607_v4 = vadd.f32 %v8171_v50, %v4559_v3  ;;  %v4558_v5 = vld [vmem:[#allocation2 + $0xc0] sm:$0xff]  ;;  %v4435_v9 = vpop.f32.mrb[149].mxu0 }
 0x226   : > { %4010 = vst.msk [vmem:[#allocation2 + $0xe0] sm:$0xff] %vm288_vm1, %v3962_v57  ;;  %v4606_v12 = vadd.f32 %v4558_v5, %v4415_v58  ;;  %v8106_v14 = vpop.f32.mrb[150].mxu1  ;;  %v3927_v5 = vld [vmem:[#allocation2 + $0x148] sm:$0xff] }
 0x227   : > { %4655 = vst.msk [vmem:[#allocation2 + $0xc8] sm:$0xff] %vm288_vm1, %v4607_v4  ;;  %v3965_v17 = vadd.f32 %v8106_v14, %v3917_v15  ;;  %v3797_v18 = vpop.f32.mrb[151].mxu1  ;;  %v3926_v14 = vld [vmem:[#allocation2 + $0x140] sm:$0xff] }
 0x228   : > { %4654 = vst.msk [vmem:[#allocation2 + $0xc0] sm:$0xff] %vm288_vm1, %v4606_v12  ;;  %v3964_v21 = vadd.f32 %v3916_v20, %v3797_v18  ;;  %v4561_v22 = vld [vmem:[#allocation2 + $0xd8] sm:$0xff]  ;;  %v8180_v24 = vpop.f32.mrb[150].mxu0 }
 0x229   : > { %4013 = vst.msk [vmem:[#allocation2 + $0xf8] sm:$0xff] %vm288_vm1, %v3965_v17  ;;  %v4609_v25 = vadd.f32 %v8174_v7, %v4561_v22  ;;  %v4560_v26 = vld [vmem:[#allocation2 + $0xd0] sm:$0xff]  ;;  %v4445_v27 = vpop.f32.mrb[151].mxu0 }
 0x22a   : > { %4012 = vst.msk [vmem:[#allocation2 + $0xf0] sm:$0xff] %vm288_vm1, %v3964_v21  ;;  %v4608_v28 = vadd.f32 %v4560_v26, %v4425_v54  ;;  %v8109_v11 = vpop.f32.mrb[152].mxu1  ;;  %v3929_v26 = vld [vmem:[#allocation2 + $0x158] sm:$0xff] }
 0x22b   : > { %4657 = vst.msk [vmem:[#allocation2 + $0xd8] sm:$0xff] %vm288_vm1, %v4609_v25  ;;  %v3967_v30 = vadd.f32 %v8109_v11, %v3919_v29  ;;  %v3807_v31 = vpop.f32.mrb[153].mxu1  ;;  %v3928_v11 = vld [vmem:[#allocation2 + $0x150] sm:$0xff] }
 0x22c   : > { %4656 = vst.msk [vmem:[#allocation2 + $0xd0] sm:$0xff] %vm288_vm1, %v4608_v28  ;;  %v3966_v13 = vadd.f32 %v3918_v32, %v3807_v31  ;;  %v4563_v33 = vld [vmem:[#allocation2 + $0xe8] sm:$0xff]  ;;  %v8183_v34 = vpop.f32.mrb[152].mxu0 }
 0x22d   : > { %4015 = vst.msk [vmem:[#allocation2 + $0x108] sm:$0xff] %vm288_vm1, %v3967_v30  ;;  %v4611_v35 = vadd.f32 %v8177_v19, %v4563_v33  ;;  %v4562_v36 = vld [vmem:[#allocation2 + $0xe0] sm:$0xff]  ;;  %v4455_v37 = vpop.f32.mrb[153].mxu0 }
 0x22e   : > { %4014 = vst.msk [vmem:[#allocation2 + $0x100] sm:$0xff] %vm288_vm1, %v3966_v13  ;;  %v4610_v38 = vadd.f32 %v4562_v36, %v4435_v9  ;;  %v8112_v39 = vpop.f32.mrb[154].mxu1  ;;  %v3931_v36 = vld [vmem:[#allocation2 + $0x168] sm:$0xff] }
 0x22f   : > { %4659 = vst.msk [vmem:[#allocation2 + $0xe8] sm:$0xff] %vm288_vm1, %v4611_v35  ;;  %v3969_v41 = vadd.f32 %v8112_v39, %v3921_v40  ;;  %v3817_v42 = vpop.f32.mrb[155].mxu1  ;;  %v3930_v39 = vld [vmem:[#allocation2 + $0x160] sm:$0xff] }
 0x230   : > { %4658 = vst.msk [vmem:[#allocation2 + $0xe0] sm:$0xff] %vm288_vm1, %v4610_v38  ;;  %v3968_v44 = vadd.f32 %v3920_v43, %v3817_v42  ;;  %v4565_v45 = vld [vmem:[#allocation2 + $0xf8] sm:$0xff]  ;;  %v8186_v46 = vpop.f32.mrb[154].mxu0 }
 0x231   : > { %4017 = vst.msk [vmem:[#allocation2 + $0x118] sm:$0xff] %vm288_vm1, %v3969_v41  ;;  %v4613_v47 = vadd.f32 %v8180_v24, %v4565_v45  ;;  %v4564_v48 = vld [vmem:[#allocation2 + $0xf0] sm:$0xff]  ;;  %v4465_v49 = vpop.f32.mrb[155].mxu0 }
 0x232   : > { %4016 = vst.msk [vmem:[#allocation2 + $0x110] sm:$0xff] %vm288_vm1, %v3968_v44  ;;  %v4612_v50 = vadd.f32 %v4564_v48, %v4445_v27  ;;  %v8115_v51 = vpop.f32.mrb[156].mxu1  ;;  %v3933_v48 = vld [vmem:[#allocation2 + $0x178] sm:$0xff] }
 0x233   : > { %4661 = vst.msk [vmem:[#allocation2 + $0xf8] sm:$0xff] %vm288_vm1, %v4613_v47  ;;  %v3971_v58 = vadd.f32 %v8115_v51, %v3923_v53  ;;  %v3827_v60 = vpop.f32.mrb[157].mxu1  ;;  %v3932_v51 = vld [vmem:[#allocation2 + $0x170] sm:$0xff] }
 0x234   : > { %4660 = vst.msk [vmem:[#allocation2 + $0xf0] sm:$0xff] %vm288_vm1, %v4612_v50  ;;  %v3970_v62 = vadd.f32 %v3922_v61, %v3827_v60  ;;  %v4567_v63 = vld [vmem:[#allocation2 + $0x108] sm:$0xff]  ;;  %v8189_v0 = vpop.f32.mrb[156].mxu0 }
 0x235   : > { %4019 = vst.msk [vmem:[#allocation2 + $0x128] sm:$0xff] %vm288_vm1, %v3971_v58  ;;  %v4615_v1 = vadd.f32 %v8183_v34, %v4567_v63  ;;  %v4566_v2 = vld [vmem:[#allocation2 + $0x100] sm:$0xff]  ;;  %v4475_v6 = vpop.f32.mrb[157].mxu0 }
 0x236   : > { %4018 = vst.msk [vmem:[#allocation2 + $0x120] sm:$0xff] %vm288_vm1, %v3970_v62  ;;  %v4614_v7 = vadd.f32 %v4566_v2, %v4455_v37  ;;  %v8118_v8 = vpop.f32.mrb[158].mxu1  ;;  %v5183_v2 = vld [vmem:[#allocation2 + $0x8] sm:$0xff] }
 0x237   : > { %4663 = vst.msk [vmem:[#allocation2 + $0x108] sm:$0xff] %vm288_vm1, %v4615_v1  ;;  %v3973_v54 = vadd.f32 %v8118_v8, %v3925_v10  ;;  %v3837_v55 = vpop.f32.mrb[159].mxu1  ;;  %v5182_v8 = vld [vmem:[#allocation2] sm:$0xff] }
 0x238   : > { %4662 = vst.msk [vmem:[#allocation2 + $0x100] sm:$0xff] %vm288_vm1, %v4614_v7  ;;  %v3972_v59 = vadd.f32 %v3924_v23, %v3837_v55  ;;  %v4569_v52 = vld [vmem:[#allocation2 + $0x118] sm:$0xff]  ;;  %v8192_v56 = vpop.f32.mrb[158].mxu0 }
 0x239   : > { %4021 = vst.msk [vmem:[#allocation2 + $0x138] sm:$0xff] %vm288_vm1, %v3973_v54  ;;  %v4617_v16 = vadd.f32 %v8186_v46, %v4569_v52  ;;  %v4568_v57 = vld [vmem:[#allocation2 + $0x110] sm:$0xff]  ;;  %v4485_v3 = vpop.f32.mrb[159].mxu0 }
 0x23a   : > { %4020 = vst.msk [vmem:[#allocation2 + $0x130] sm:$0xff] %vm288_vm1, %v3972_v59  ;;  %v4616_v19 = vadd.f32 %v4568_v57, %v4465_v49  ;;  %v8121_v4 = vpop.f32.mrb[160].mxu1  ;;  %v5185_v57 = vld [vmem:[#allocation2 + $0x18] sm:$0xff] }
 0x23b   : > { %4665 = vst.msk [vmem:[#allocation2 + $0x118] sm:$0xff] %vm288_vm1, %v4617_v16  ;;  %v3975_v9 = vadd.f32 %v8121_v4, %v3927_v5  ;;  %v3847_v12 = vpop.f32.mrb[161].mxu1  ;;  %v5184_v4 = vld [vmem:[#allocation2 + $0x10] sm:$0xff] }
 0x23c   : > { %4664 = vst.msk [vmem:[#allocation2 + $0x110] sm:$0xff] %vm288_vm1, %v4616_v19  ;;  %v3974_v15 = vadd.f32 %v3926_v14, %v3847_v12  ;;  %v4571_v17 = vld [vmem:[#allocation2 + $0x128] sm:$0xff]  ;;  %v8195_v18 = vpop.f32.mrb[160].mxu0 }
 0x23d   : > { %4023 = vst.msk [vmem:[#allocation2 + $0x148] sm:$0xff] %vm288_vm1, %v3975_v9  ;;  %v4619_v20 = vadd.f32 %v8189_v0, %v4571_v17  ;;  %v4570_v21 = vld [vmem:[#allocation2 + $0x120] sm:$0xff]  ;;  %v4495_v22 = vpop.f32.mrb[161].mxu0 }
 0x23e   : > { %4022 = vst.msk [vmem:[#allocation2 + $0x140] sm:$0xff] %vm288_vm1, %v3974_v15  ;;  %v4618_v24 = vadd.f32 %v4570_v21, %v4475_v6  ;;  %v8124_v25 = vpop.f32.mrb[162].mxu1  ;;  %v5187_v21 = vld [vmem:[#allocation2 + $0x28] sm:$0xff] }
 0x23f   : > { %4667 = vst.msk [vmem:[#allocation2 + $0x128] sm:$0xff] %vm288_vm1, %v4619_v20  ;;  %v3977_v27 = vadd.f32 %v8124_v25, %v3929_v26  ;;  %v3857_v28 = vpop.f32.mrb[163].mxu1  ;;  %v5186_v25 = vld [vmem:[#allocation2 + $0x20] sm:$0xff] }
 0x240   : > { %4666 = vst.msk [vmem:[#allocation2 + $0x120] sm:$0xff] %vm288_vm1, %v4618_v24  ;;  %v3976_v29 = vadd.f32 %v3928_v11, %v3857_v28  ;;  %v4573_v30 = vld [vmem:[#allocation2 + $0x138] sm:$0xff]  ;;  %v8198_v31 = vpop.f32.mrb[162].mxu0 }
 0x241   : > { %4025 = vst.msk [vmem:[#allocation2 + $0x158] sm:$0xff] %vm288_vm1, %v3977_v27  ;;  %v4621_v32 = vadd.f32 %v8192_v56, %v4573_v30  ;;  %v4572_v13 = vld [vmem:[#allocation2 + $0x130] sm:$0xff]  ;;  %v4505_v33 = vpop.f32.mrb[163].mxu0 }
 0x242   : > { %4024 = vst.msk [vmem:[#allocation2 + $0x150] sm:$0xff] %vm288_vm1, %v3976_v29  ;;  %v4620_v34 = vadd.f32 %v4572_v13, %v4485_v3  ;;  %v8127_v35 = vpop.f32.mrb[164].mxu1  ;;  %v5189_v13 = vld [vmem:[#allocation2 + $0x38] sm:$0xff] }
 0x243   : > { %4669 = vst.msk [vmem:[#allocation2 + $0x138] sm:$0xff] %vm288_vm1, %v4621_v32  ;;  %v3979_v37 = vadd.f32 %v8127_v35, %v3931_v36  ;;  %v3867_v38 = vpop.f32.mrb[165].mxu1  ;;  %v5188_v35 = vld [vmem:[#allocation2 + $0x30] sm:$0xff] }
 0x244   : > { %4668 = vst.msk [vmem:[#allocation2 + $0x130] sm:$0xff] %vm288_vm1, %v4620_v34  ;;  %v3978_v40 = vadd.f32 %v3930_v39, %v3867_v38  ;;  %v4575_v41 = vld [vmem:[#allocation2 + $0x148] sm:$0xff]  ;;  %v8201_v42 = vpop.f32.mrb[164].mxu0 }
 0x245   : > { %4027 = vst.msk [vmem:[#allocation2 + $0x168] sm:$0xff] %vm288_vm1, %v3979_v37  ;;  %v4623_v43 = vadd.f32 %v8195_v18, %v4575_v41  ;;  %v4574_v44 = vld [vmem:[#allocation2 + $0x140] sm:$0xff]  ;;  %v4515_v45 = vpop.f32.mrb[165].mxu0 }
 0x246   : > { %4026 = vst.msk [vmem:[#allocation2 + $0x160] sm:$0xff] %vm288_vm1, %v3978_v40  ;;  %v4622_v46 = vadd.f32 %v4574_v44, %v4495_v22  ;;  %v8130_v47 = vpop.f32.mrb[166].mxu1  ;;  %v5191_v44 = vld [vmem:[#allocation2 + $0x48] sm:$0xff] }
 0x247   : > { %4671 = vst.msk [vmem:[#allocation2 + $0x148] sm:$0xff] %vm288_vm1, %v4623_v43  ;;  %v3981_v49 = vadd.f32 %v8130_v47, %v3933_v48  ;;  %v3877_v50 = vpop.f32.mrb[167].mxu1  ;;  %v5190_v47 = vld [vmem:[#allocation2 + $0x40] sm:$0xff] }
 0x248   : > { %4670 = vst.msk [vmem:[#allocation2 + $0x140] sm:$0xff] %vm288_vm1, %v4622_v46  ;;  %v3980_v53 = vadd.f32 %v3932_v51, %v3877_v50  ;;  %v4577_v58 = vld [vmem:[#allocation2 + $0x158] sm:$0xff]  ;;  %v8204_v60 = vpop.f32.mrb[166].mxu0  ;;  %v10124_v48 = vld [vmem:[%s10404_s2] ss:$0 sm:$0xff] }
 0x249   : > { %4029 = vst.msk [vmem:[#allocation2 + $0x178] sm:$0xff] %vm288_vm1, %v3981_v49  ;;  %v4625_v61 = vadd.f32 %v8198_v31, %v4577_v58  ;;  %v4576_v62 = vld [vmem:[#allocation2 + $0x150] sm:$0xff]  ;;  %v4525_v63 = vpop.f32.mrb[167].mxu0 }
 0x24a   : > { %4028 = vst.msk [vmem:[#allocation2 + $0x170] sm:$0xff] %vm288_vm1, %v3980_v53  ;;  %v4624_v0 = vadd.f32 %v4576_v62, %v4505_v33  ;;  %v8209_v1 = vpop.f32.mrb[168].mxu1 }
 0x24b   : > { %4673 = vst.msk [vmem:[#allocation2 + $0x158] sm:$0xff] %vm288_vm1, %v4625_v61  ;;  %v5231_v6 = vadd.f32 %v8209_v1, %v5183_v2  ;;  %v4943_v7 = vpop.f32.mrb[169].mxu1 }
 0x24c   : > { %4672 = vst.msk [vmem:[#allocation2 + $0x150] sm:$0xff] %vm288_vm1, %v4624_v0  ;;  %v4579_v10 = vld [vmem:[#allocation2 + $0x168] sm:$0xff]  ;;  %v5230_v54 = vadd.f32 %v5182_v8, %v4943_v7  ;;  %v8283_v55 = vpop.f32.mrb[168].mxu0  ;;  %v5193_v0 = vld [vmem:[#allocation2 + $0x58] sm:$0xff]  ;;  %v5192_v8 = vld [vmem:[#allocation2 + $0x50] sm:$0xff] }
 0x24d   : > { %5279 = vst.msk [vmem:[#allocation2 + $0x8] sm:$0xff] %vm288_vm1, %v5231_v6  ;;  %v4627_v23 = vadd.f32 %v8201_v42, %v4579_v10  ;;  %v4578_v59 = vld [vmem:[#allocation2 + $0x160] sm:$0xff]  ;;  %v5591_v52 = vpop.f32.mrb[169].mxu0 }
 0x24e   : > { %5278 = vst.msk [vmem:[#allocation2] sm:$0xff] %vm288_vm1, %v5230_v54  ;;  %v4626_v56 = vadd.f32 %v4578_v59, %v4515_v45  ;;  %v8212_v16 = vpop.f32.mrb[170].mxu1 }
 0x24f   : > { %4675 = vst.msk [vmem:[#allocation2 + $0x168] sm:$0xff] %vm288_vm1, %v4627_v23  ;;  %v5233_v3 = vadd.f32 %v8212_v16, %v5185_v57  ;;  %v4953_v19 = vpop.f32.mrb[171].mxu1  ;;  %v10137_v57 = vstv %s10117_s27 }
 0x250   : > { %4674 = vst.msk [vmem:[#allocation2 + $0x160] sm:$0xff] %vm288_vm1, %v4626_v56  ;;  %v4581_v5 = vld [vmem:[#allocation2 + $0x178] sm:$0xff]  ;;  %v5232_v9 = vadd.f32 %v5184_v4, %v4953_v19  ;;  %v8286_v12 = vpop.f32.mrb[170].mxu0 }
 0x251   : > { %5281 = vst.msk [vmem:[#allocation2 + $0x18] sm:$0xff] %vm288_vm1, %v5233_v3  ;;  %v4629_v14 = vadd.f32 %v8204_v60, %v4581_v5  ;;  %v4580_v15 = vld [vmem:[#allocation2 + $0x170] sm:$0xff]  ;;  %v5601_v17 = vpop.f32.mrb[171].mxu0 }
 0x252   : > { %5280 = vst.msk [vmem:[#allocation2 + $0x10] sm:$0xff] %vm288_vm1, %v5232_v9  ;;  %v4628_v18 = vadd.f32 %v4580_v15, %v4525_v63  ;;  %v8215_v20 = vpop.f32.mrb[172].mxu1  ;;  %v5195_v9 = vld [vmem:[#allocation2 + $0x68] sm:$0xff] }
 0x253   : > { %4677 = vst.msk [vmem:[#allocation2 + $0x178] sm:$0xff] %vm288_vm1, %v4629_v14  ;;  %v5235_v22 = vadd.f32 %v8215_v20, %v5187_v21  ;;  %v4963_v24 = vpop.f32.mrb[173].mxu1 }
 0x254   : > { %4676 = vst.msk [vmem:[#allocation2 + $0x170] sm:$0xff] %vm288_vm1, %v4628_v18  ;;  %v5234_v26 = vadd.f32 %v5186_v25, %v4963_v24  ;;  %v5831_v27 = vld [vmem:[#allocation2 + $0x8] sm:$0xff]  ;;  %v8289_v28 = vpop.f32.mrb[172].mxu0  ;;  %v5194_v18 = vld [vmem:[#allocation2 + $0x60] sm:$0xff] }
 0x255   : > { %5283 = vst.msk [vmem:[#allocation2 + $0x28] sm:$0xff] %vm288_vm1, %v5235_v22  ;;  %v5879_v11 = vadd.f32 %v8283_v55, %v5831_v27  ;;  %v5830_v29 = vld [vmem:[#allocation2] sm:$0xff]  ;;  %v5611_v30 = vpop.f32.mrb[173].mxu0 }
 0x256   : > { %5282 = vst.msk [vmem:[#allocation2 + $0x20] sm:$0xff] %vm288_vm1, %v5234_v26  ;;  %v5878_v31 = vadd.f32 %v5830_v29, %v5591_v52  ;;  %v8218_v32 = vpop.f32.mrb[174].mxu1 }
 0x257   : > { %5927 = vst.msk [vmem:[#allocation2 + $0x8] sm:$0xff] %vm288_vm1, %v5879_v11  ;;  %v5237_v33 = vadd.f32 %v8218_v32, %v5189_v13  ;;  %v4973_v34 = vpop.f32.mrb[175].mxu1 }
 0x258   : > { %5926 = vst.msk [vmem:[#allocation2] sm:$0xff] %vm288_vm1, %v5878_v31  ;;  %v5236_v36 = vadd.f32 %v5188_v35, %v4973_v34  ;;  %v5833_v37 = vld [vmem:[#allocation2 + $0x18] sm:$0xff]  ;;  %v8292_v38 = vpop.f32.mrb[174].mxu0 }
 0x259   : > { %5285 = vst.msk [vmem:[#allocation2 + $0x38] sm:$0xff] %vm288_vm1, %v5237_v33  ;;  %v5881_v39 = vadd.f32 %v8286_v12, %v5833_v37  ;;  %v5832_v40 = vld [vmem:[#allocation2 + $0x10] sm:$0xff]  ;;  %v5621_v41 = vpop.f32.mrb[175].mxu0  ;;  %v5197_v34 = vld [vmem:[#allocation2 + $0x78] sm:$0xff] }
 0x25a   : > { %5284 = vst.msk [vmem:[#allocation2 + $0x30] sm:$0xff] %vm288_vm1, %v5236_v36  ;;  %v5880_v42 = vadd.f32 %v5832_v40, %v5601_v17  ;;  %v8221_v43 = vpop.f32.mrb[176].mxu1  ;;  %v5196_v40 = vld [vmem:[#allocation2 + $0x70] sm:$0xff] }
 0x25b   : > { %5929 = vst.msk [vmem:[#allocation2 + $0x18] sm:$0xff] %vm288_vm1, %v5881_v39  ;;  %v5239_v45 = vadd.f32 %v8221_v43, %v5191_v44  ;;  %v4983_v46 = vpop.f32.mrb[177].mxu1 }
 0x25c   : > { %5928 = vst.msk [vmem:[#allocation2 + $0x10] sm:$0xff] %vm288_vm1, %v5880_v42  ;;  %v5238_v49 = vadd.f32 %v5190_v47, %v4983_v46  ;;  %v5835_v50 = vld [vmem:[#allocation2 + $0x28] sm:$0xff]  ;;  %v8295_v51 = vpop.f32.mrb[176].mxu0 }
 0x25d   : > { %5287 = vst.msk [vmem:[#allocation2 + $0x48] sm:$0xff] %vm288_vm1, %v5239_v45  ;;  %v5883_v53 = vadd.f32 %v8289_v28, %v5835_v50  ;;  %v5834_v58 = vld [vmem:[#allocation2 + $0x20] sm:$0xff]  ;;  %v5631_v60 = vpop.f32.mrb[177].mxu0 }
 0x25e   : > { %v5975_v61 = vld [vmem:[#allocation2 + $0x8] sm:$0xff]  ;;  %5286 = vst.msk [vmem:[#allocation2 + $0x40] sm:$0xff] %vm288_vm1, %v5238_v49  ;;  %v5882_v62 = vadd.f32 %v5834_v58, %v5611_v30  ;;  %v8224_v63 = vpop.f32.mrb[178].mxu1  ;;  %v10147_v30 = vstv %s10128_s30 }
 0x25f   : > { %v6014_v1 = vadd.f32 %v10124_v48, %v5975_v61  ;;  %v5974_v2 = vld [vmem:[#allocation2] sm:$0xff]  ;;  %5931 = vst.msk [vmem:[#allocation2 + $0x28] sm:$0xff] %vm288_vm1, %v5883_v53  ;;  %v5241_v6 = vadd.f32 %v8224_v63, %v5193_v0  ;;  %v4993_v7 = vpop.f32.mrb[179].mxu1  ;;  %v5199_v0 = vld [vmem:[#allocation2 + $0x88] sm:$0xff] }
 0x260   : > { %v6013_v10 = vadd.f32 %v10124_v48, %v5974_v2  ;;  %5930 = vst.msk [vmem:[#allocation2 + $0x20] sm:$0xff] %vm288_vm1, %v5882_v62  ;;  %v5240_v54 = vadd.f32 %v5192_v8, %v4993_v7  ;;  %v5837_v55 = vld [vmem:[#allocation2 + $0x38] sm:$0xff]  ;;  %v8298_v23 = vpop.f32.mrb[178].mxu0 }
 0x261   : > { %v6080_v59 = vadd.f32 3.0, %v6014_v1  ;;  %5289 = vst.msk [vmem:[#allocation2 + $0x58] sm:$0xff] %vm288_vm1, %v5241_v6  ;;  %v5885_v52 = vadd.f32 %v8292_v38, %v5837_v55  ;;  %v5836_v56 = vld [vmem:[#allocation2 + $0x30] sm:$0xff]  ;;  %v5641_v16 = vpop.f32.mrb[179].mxu0  ;;  %v6048_v25 = vmul.f32 %v10137_v57, %v6014_v1 }
 0x262   : > { %v6079_v3 = vadd.f32 3.0, %v6013_v10  ;;  %v5976_v19 = vld [vmem:[#allocation2 + $0x18] sm:$0xff]  ;;  %5288 = vst.msk [vmem:[#allocation2 + $0x50] sm:$0xff] %vm288_vm1, %v5240_v54  ;;  %v5884_v4 = vadd.f32 %v5836_v56, %v5621_v41  ;;  %v8227_v5 = vpop.f32.mrb[180].mxu1  ;;  %v6047_v31 = vmul.f32 %v10137_v57, %v6013_v10  ;;  %v5198_v10 = vld [vmem:[#allocation2 + $0x80] sm:$0xff] }
 0x263   : > { %v6112_v12 = vmax.f32 %v6080_v59, 0.0  ;;  %v6015_v14 = vadd.f32 %v10124_v48, %v5976_v19  ;;  %5933 = vst.msk [vmem:[#allocation2 + $0x38] sm:$0xff] %vm288_vm1, %v5885_v52  ;;  %v5243_v15 = vadd.f32 %v8227_v5, %v5195_v9  ;;  %v5003_v17 = vpop.f32.mrb[181].mxu1 }
 0x264   : > { %v6111_v20 = vmax.f32 %v6079_v3, 0.0  ;;  %5932 = vst.msk [vmem:[#allocation2 + $0x30] sm:$0xff] %vm288_vm1, %v5884_v4  ;;  %v5242_v21 = vadd.f32 %v5194_v18, %v5003_v17  ;;  %v5839_v22 = vld [vmem:[#allocation2 + $0x48] sm:$0xff]  ;;  %v8301_v24 = vpop.f32.mrb[180].mxu0  ;;  %v5201_v18 = vld [vmem:[#allocation2 + $0x98] sm:$0xff] }
 0x265   : > { %v6144_v26 = vmin.f32 %v6112_v12, 6.0  ;;  %v6081_v27 = vadd.f32 3.0, %v6015_v14  ;;  %5291 = vst.msk [vmem:[#allocation2 + $0x68] sm:$0xff] %vm288_vm1, %v5243_v15  ;;  %v5887_v28 = vadd.f32 %v8295_v51, %v5839_v22  ;;  %v5838_v11 = vld [vmem:[#allocation2 + $0x40] sm:$0xff]  ;;  %v5651_v29 = vpop.f32.mrb[181].mxu0  ;;  %v6049_v47 = vmul.f32 %v10137_v57, %v6015_v14 }
 0x266   : > { %v6143_v32 = vmin.f32 %v6111_v20, 6.0  ;;  %5290 = vst.msk [vmem:[#allocation2 + $0x60] sm:$0xff] %vm288_vm1, %v5242_v21  ;;  %v5886_v13 = vadd.f32 %v5838_v11, %v5631_v60  ;;  %v8230_v33 = vpop.f32.mrb[182].mxu1 }
 0x267   : > { %v6176_v35 = vmul.f32 %v6144_v26, %v6048_v25  ;;  %v6113_v36 = vmax.f32 %v6081_v27, 0.0  ;;  %v5977_v37 = vld [vmem:[#allocation2 + $0x20] sm:$0xff]  ;;  %5935 = vst.msk [vmem:[#allocation2 + $0x48] sm:$0xff] %vm288_vm1, %v5887_v28  ;;  %v5245_v38 = vadd.f32 %v8230_v33, %v5197_v34  ;;  %v5013_v39 = vpop.f32.mrb[183].mxu1  ;;  %v5200_v25 = vld [vmem:[#allocation2 + $0x90] sm:$0xff] }
 0x268   : > { %v6175_v41 = vmul.f32 %v6143_v32, %v6047_v31  ;;  %v6016_v42 = vadd.f32 %v10124_v48, %v5977_v37  ;;  %5934 = vst.msk [vmem:[#allocation2 + $0x40] sm:$0xff] %vm288_vm1, %v5886_v13  ;;  %v5244_v43 = vadd.f32 %v5196_v40, %v5013_v39  ;;  %v5841_v44 = vld [vmem:[#allocation2 + $0x58] sm:$0xff]  ;;  %v8304_v45 = vpop.f32.mrb[182].mxu0 }
 0x269   : > { %v6210_v46 = vadd.f32 %v10147_v30, %v6176_v35  ;;  %v6145_v49 = vmin.f32 %v6113_v36, 6.0  ;;  %5293 = vst.msk [vmem:[#allocation2 + $0x78] sm:$0xff] %vm288_vm1, %v5245_v38  ;;  %v5889_v50 = vadd.f32 %v8298_v23, %v5841_v44  ;;  %v5840_v51 = vld [vmem:[#allocation2 + $0x50] sm:$0xff]  ;;  %v5661_v53 = vpop.f32.mrb[183].mxu0 }
 0x26a   : > { %v6209_v58 = vadd.f32 %v10147_v30, %v6175_v41  ;;  %v6082_v60 = vadd.f32 3.0, %v6016_v42  ;;  %v5979_v61 = vld [vmem:[#allocation2 + $0x38] sm:$0xff]  ;;  %5292 = vst.msk [vmem:[#allocation2 + $0x70] sm:$0xff] %vm288_vm1, %v5244_v43  ;;  %v5888_v62 = vadd.f32 %v5840_v51, %v5641_v16  ;;  %v8233_v63 = vpop.f32.mrb[184].mxu1  ;;  %v6050_v5 = vmul.f32 %v10137_v57, %v6016_v42  ;;  %v5203_v41 = vld [vmem:[#allocation2 + $0xa8] sm:$0xff] }
 0x26b   : > { %6242 = vst.msk [vmem:[%s10155_s7 + $0x8] sm:$0xff] %vm288_vm1, %v6210_v46  ;;  %v6177_v1 = vmul.f32 %v6145_v49, %v6049_v47  ;;  %v6018_v2 = vadd.f32 %v10124_v48, %v5979_v61  ;;  %v5978_v6 = vld [vmem:[#allocation2 + $0x30] sm:$0xff]  ;;  %5937 = vst.msk [vmem:[#allocation2 + $0x58] sm:$0xff] %vm288_vm1, %v5889_v50  ;;  %v5247_v7 = vadd.f32 %v8233_v63, %v5199_v0  ;;  %v5023_v8 = vpop.f32.mrb[185].mxu1  ;;  %v5202_v47 = vld [vmem:[#allocation2 + $0xa0] sm:$0xff] }
 0x26c   : > { %6241 = vst.msk [vmem:[%s10155_s7] sm:$0xff] %vm288_vm1, %v6209_v58  ;;  %v6114_v54 = vmax.f32 %v6082_v60, 0.0  ;;  %v6017_v55 = vadd.f32 %v10124_v48, %v5978_v6  ;;  %5936 = vst.msk [vmem:[#allocation2 + $0x50] sm:$0xff] %vm288_vm1, %v5888_v62  ;;  %v5246_v23 = vadd.f32 %v5198_v10, %v5023_v8  ;;  %v5843_v59 = vld [vmem:[#allocation2 + $0x68] sm:$0xff]  ;;  %v8307_v52 = vpop.f32.mrb[184].mxu0 }
 0x26d   : > { %v6211_v56 = vadd.f32 %v10147_v30, %v6177_v1  ;;  %v6084_v16 = vadd.f32 3.0, %v6018_v2  ;;  %5295 = vst.msk [vmem:[#allocation2 + $0x88] sm:$0xff] %vm288_vm1, %v5247_v7  ;;  %v5891_v3 = vadd.f32 %v8301_v24, %v5843_v59  ;;  %v5842_v19 = vld [vmem:[#allocation2 + $0x60] sm:$0xff]  ;;  %v5671_v4 = vpop.f32.mrb[185].mxu0 }
 0x26e   : > { %v6146_v9 = vmin.f32 %v6114_v54, 6.0  ;;  %v6083_v12 = vadd.f32 3.0, %v6017_v55  ;;  %v5980_v14 = vld [vmem:[#allocation2 + $0x48] sm:$0xff]  ;;  %5294 = vst.msk [vmem:[#allocation2 + $0x80] sm:$0xff] %vm288_vm1, %v5246_v23  ;;  %v5890_v15 = vadd.f32 %v5842_v19, %v5651_v29  ;;  %v8236_v17 = vpop.f32.mrb[186].mxu1  ;;  %v6052_v29 = vmul.f32 %v10137_v57, %v6018_v2  ;;  %v5205_v54 = vld [vmem:[#allocation2 + $0xb8] sm:$0xff] }
 0x26f   : > { %6243 = vst.msk [vmem:[%s10155_s7 + $0x10] sm:$0xff] %vm288_vm1, %v6211_v56  ;;  %v6116_v20 = vmax.f32 %v6084_v16, 0.0  ;;  %v6019_v21 = vadd.f32 %v10124_v48, %v5980_v14  ;;  %5939 = vst.msk [vmem:[#allocation2 + $0x68] sm:$0xff] %vm288_vm1, %v5891_v3  ;;  %v5249_v22 = vadd.f32 %v8236_v17, %v5201_v18  ;;  %v5033_v24 = vpop.f32.mrb[187].mxu1  ;;  %v6051_v37 = vmul.f32 %v10137_v57, %v6017_v55  ;;  %v5204_v16 = vld [vmem:[#allocation2 + $0xb0] sm:$0xff] }
 0x270   : > { %v6178_v26 = vmul.f32 %v6146_v9, %v6050_v5  ;;  %v6115_v27 = vmax.f32 %v6083_v12, 0.0  ;;  %5938 = vst.msk [vmem:[#allocation2 + $0x60] sm:$0xff] %vm288_vm1, %v5890_v15  ;;  %v5248_v28 = vadd.f32 %v5200_v25, %v5033_v24  ;;  %v5845_v11 = vld [vmem:[#allocation2 + $0x78] sm:$0xff]  ;;  %v8310_v31 = vpop.f32.mrb[186].mxu0 }
 0x271   : > { %v6148_v32 = vmin.f32 %v6116_v20, 6.0  ;;  %v6085_v13 = vadd.f32 3.0, %v6019_v21  ;;  %5297 = vst.msk [vmem:[#allocation2 + $0x98] sm:$0xff] %vm288_vm1, %v5249_v22  ;;  %v5893_v33 = vadd.f32 %v8304_v45, %v5845_v11  ;;  %v5844_v34 = vld [vmem:[#allocation2 + $0x70] sm:$0xff]  ;;  %v5681_v35 = vpop.f32.mrb[187].mxu0  ;;  %v6053_v61 = vmul.f32 %v10137_v57, %v6019_v21 }
 0x272   : > { %v6212_v36 = vadd.f32 %v10147_v30, %v6178_v26  ;;  %v6147_v38 = vmin.f32 %v6115_v27, 6.0  ;;  %5296 = vst.msk [vmem:[#allocation2 + $0x90] sm:$0xff] %vm288_vm1, %v5248_v28  ;;  %v5892_v39 = vadd.f32 %v5844_v34, %v5661_v53  ;;  %v8239_v40 = vpop.f32.mrb[188].mxu1  ;;  %v5207_v27 = vld [vmem:[#allocation2 + $0xc8] sm:$0xff] }
 0x273   : > { %v6180_v42 = vmul.f32 %v6148_v32, %v6052_v29  ;;  %v6117_v43 = vmax.f32 %v6085_v13, 0.0  ;;  %v5981_v44 = vld [vmem:[#allocation2 + $0x50] sm:$0xff]  ;;  %5941 = vst.msk [vmem:[#allocation2 + $0x78] sm:$0xff] %vm288_vm1, %v5893_v33  ;;  %v5251_v46 = vadd.f32 %v8239_v40, %v5203_v41  ;;  %v5043_v45 = vpop.f32.mrb[189].mxu1  ;;  %v5206_v32 = vld [vmem:[#allocation2 + $0xc0] sm:$0xff] }
 0x274   : > { %6244 = vst.msk [vmem:[%s10155_s7 + $0x18] sm:$0xff] %vm288_vm1, %v6212_v36  ;;  %v6179_v49 = vmul.f32 %v6147_v38, %v6051_v37  ;;  %v6020_v50 = vadd.f32 %v10124_v48, %v5981_v44  ;;  %5940 = vst.msk [vmem:[#allocation2 + $0x70] sm:$0xff] %vm288_vm1, %v5892_v39  ;;  %v5250_v51 = vadd.f32 %v5202_v47, %v5043_v45  ;;  %v5847_v58 = vld [vmem:[#allocation2 + $0x88] sm:$0xff]  ;;  %v8313_v53 = vpop.f32.mrb[188].mxu0 }
 0x275   : > { %v6214_v60 = vadd.f32 %v10147_v30, %v6180_v42  ;;  %v6149_v62 = vmin.f32 %v6117_v43, 6.0  ;;  %5299 = vst.msk [vmem:[#allocation2 + $0xa8] sm:$0xff] %vm288_vm1, %v5251_v46  ;;  %v5895_v63 = vadd.f32 %v8307_v52, %v5847_v58  ;;  %v5846_v0 = vld [vmem:[#allocation2 + $0x80] sm:$0xff]  ;;  %v5691_v1 = vpop.f32.mrb[189].mxu0 }
 0x276   : > { %v6213_v2 = vadd.f32 %v10147_v30, %v6179_v49  ;;  %v6086_v6 = vadd.f32 3.0, %v6020_v50  ;;  %v5983_v7 = vld [vmem:[#allocation2 + $0x68] sm:$0xff]  ;;  %5298 = vst.msk [vmem:[#allocation2 + $0xa0] sm:$0xff] %vm288_vm1, %v5250_v51  ;;  %v5894_v8 = vadd.f32 %v5846_v0, %v5671_v4  ;;  %v8242_v10 = vpop.f32.mrb[190].mxu1  ;;  %v6054_v20 = vmul.f32 %v10137_v57, %v6020_v50  ;;  %v5209_v49 = vld [vmem:[#allocation2 + $0xd8] sm:$0xff] }
 0x277   : > { %6246 = vst.msk [vmem:[%s10155_s7 + $0x28] sm:$0xff] %vm288_vm1, %v6214_v60  ;;  %v6181_v55 = vmul.f32 %v6149_v62, %v6053_v61  ;;  %v6022_v23 = vadd.f32 %v10124_v48, %v5983_v7  ;;  %v5982_v59 = vld [vmem:[#allocation2 + $0x60] sm:$0xff]  ;;  %5943 = vst.msk [vmem:[#allocation2 + $0x88] sm:$0xff] %vm288_vm1, %v5895_v63  ;;  %v5253_v52 = vadd.f32 %v8242_v10, %v5205_v54  ;;  %v5053_v56 = vpop.f32.mrb[191].mxu1  ;;  %v5208_v61 = vld [vmem:[#allocation2 + $0xd0] sm:$0xff] }
 0x278   : > { %6245 = vst.msk [vmem:[%s10155_s7 + $0x20] sm:$0xff] %vm288_vm1, %v6213_v2  ;;  %v6118_v3 = vmax.f32 %v6086_v6, 0.0  ;;  %v6021_v19 = vadd.f32 %v10124_v48, %v5982_v59  ;;  %5942 = vst.msk [vmem:[#allocation2 + $0x80] sm:$0xff] %vm288_vm1, %v5894_v8  ;;  %v5252_v4 = vadd.f32 %v5204_v16, %v5053_v56  ;;  %v5849_v5 = vld [vmem:[#allocation2 + $0x98] sm:$0xff]  ;;  %v8316_v9 = vpop.f32.mrb[190].mxu0 }
 0x279   : > { %v6215_v12 = vadd.f32 %v10147_v30, %v6181_v55  ;;  %v6088_v14 = vadd.f32 3.0, %v6022_v23  ;;  %5301 = vst.msk [vmem:[#allocation2 + $0xb8] sm:$0xff] %vm288_vm1, %v5253_v52  ;;  %v5897_v15 = vadd.f32 %v8310_v31, %v5849_v5  ;;  %v5848_v17 = vld [vmem:[#allocation2 + $0x90] sm:$0xff]  ;;  %v5701_v18 = vpop.f32.mrb[191].mxu0 }
 0x27a   : > { %v6150_v21 = vmin.f32 %v6118_v3, 6.0  ;;  %v6087_v22 = vadd.f32 3.0, %v6021_v19  ;;  %v5984_v24 = vld [vmem:[#allocation2 + $0x78] sm:$0xff]  ;;  %5300 = vst.msk [vmem:[#allocation2 + $0xb0] sm:$0xff] %vm288_vm1, %v5252_v4  ;;  %v5896_v25 = vadd.f32 %v5848_v17, %v5681_v35  ;;  %v8245_v26 = vpop.f32.mrb[192].mxu1  ;;  %v6056_v35 = vmul.f32 %v10137_v57, %v6022_v23  ;;  %v5211_v3 = vld [vmem:[#allocation2 + $0xe8] sm:$0xff] }
 0x27b   : > { %6247 = vst.msk [vmem:[%s10155_s7 + $0x30] sm:$0xff] %vm288_vm1, %v6215_v12  ;;  %v6120_v28 = vmax.f32 %v6088_v14, 0.0  ;;  %v6023_v11 = vadd.f32 %v10124_v48, %v5984_v24  ;;  %5945 = vst.msk [vmem:[#allocation2 + $0x98] sm:$0xff] %vm288_vm1, %v5897_v15  ;;  %v5255_v31 = vadd.f32 %v8245_v26, %v5207_v27  ;;  %v5063_v29 = vpop.f32.mrb[193].mxu1  ;;  %v6055_v44 = vmul.f32 %v10137_v57, %v6021_v19  ;;  %v5210_v14 = vld [vmem:[#allocation2 + $0xe0] sm:$0xff] }
 0x27c   : > { %v6182_v13 = vmul.f32 %v6150_v21, %v6054_v20  ;;  %v6119_v33 = vmax.f32 %v6087_v22, 0.0  ;;  %5944 = vst.msk [vmem:[#allocation2 + $0x90] sm:$0xff] %vm288_vm1, %v5896_v25  ;;  %v5254_v34 = vadd.f32 %v5206_v32, %v5063_v29  ;;  %v5851_v36 = vld [vmem:[#allocation2 + $0xa8] sm:$0xff]  ;;  %v8319_v37 = vpop.f32.mrb[192].mxu0 }
 0x27d   : > { %v6152_v38 = vmin.f32 %v6120_v28, 6.0  ;;  %v6089_v39 = vadd.f32 3.0, %v6023_v11  ;;  %5303 = vst.msk [vmem:[#allocation2 + $0xc8] sm:$0xff] %vm288_vm1, %v5255_v31  ;;  %v5899_v40 = vadd.f32 %v8313_v53, %v5851_v36  ;;  %v5850_v41 = vld [vmem:[#allocation2 + $0xa0] sm:$0xff]  ;;  %v5711_v42 = vpop.f32.mrb[193].mxu0  ;;  %v6057_v7 = vmul.f32 %v10137_v57, %v6023_v11 }
 0x27e   : > { %v6216_v43 = vadd.f32 %v10147_v30, %v6182_v13  ;;  %v6151_v46 = vmin.f32 %v6119_v33, 6.0  ;;  %5302 = vst.msk [vmem:[#allocation2 + $0xc0] sm:$0xff] %vm288_vm1, %v5254_v34  ;;  %v5898_v45 = vadd.f32 %v5850_v41, %v5691_v1  ;;  %v8248_v47 = vpop.f32.mrb[194].mxu1  ;;  %v5213_v33 = vld [vmem:[#allocation2 + $0xf8] sm:$0xff] }
 0x27f   : > { %v6184_v50 = vmul.f32 %v6152_v38, %v6056_v35  ;;  %v6121_v51 = vmax.f32 %v6089_v39, 0.0  ;;  %v5985_v58 = vld [vmem:[#allocation2 + $0x80] sm:$0xff]  ;;  %5947 = vst.msk [vmem:[#allocation2 + $0xa8] sm:$0xff] %vm288_vm1, %v5899_v40  ;;  %v5257_v60 = vadd.f32 %v8248_v47, %v5209_v49  ;;  %v5073_v53 = vpop.f32.mrb[195].mxu1  ;;  %v5212_v38 = vld [vmem:[#allocation2 + $0xf0] sm:$0xff] }
 0x280   : > { %6248 = vst.msk [vmem:[%s10155_s7 + $0x38] sm:$0xff] %vm288_vm1, %v6216_v43  ;;  %v6183_v62 = vmul.f32 %v6151_v46, %v6055_v44  ;;  %v6024_v63 = vadd.f32 %v10124_v48, %v5985_v58  ;;  %5946 = vst.msk [vmem:[#allocation2 + $0xa0] sm:$0xff] %vm288_vm1, %v5898_v45  ;;  %v5256_v0 = vadd.f32 %v5208_v61, %v5073_v53  ;;  %v5853_v2 = vld [vmem:[#allocation2 + $0xb8] sm:$0xff]  ;;  %v8322_v1 = vpop.f32.mrb[194].mxu0 }
 0x281   : > { %v6218_v6 = vadd.f32 %v10147_v30, %v6184_v50  ;;  %v6153_v8 = vmin.f32 %v6121_v51, 6.0  ;;  %5305 = vst.msk [vmem:[#allocation2 + $0xd8] sm:$0xff] %vm288_vm1, %v5257_v60  ;;  %v5901_v10 = vadd.f32 %v8316_v9, %v5853_v2  ;;  %v5852_v54 = vld [vmem:[#allocation2 + $0xb0] sm:$0xff]  ;;  %v5721_v55 = vpop.f32.mrb[195].mxu0 }
 0x282   : > { %v6217_v23 = vadd.f32 %v10147_v30, %v6183_v62  ;;  %v6090_v59 = vadd.f32 3.0, %v6024_v63  ;;  %v5987_v52 = vld [vmem:[#allocation2 + $0x98] sm:$0xff]  ;;  %5304 = vst.msk [vmem:[#allocation2 + $0xd0] sm:$0xff] %vm288_vm1, %v5256_v0  ;;  %v5900_v56 = vadd.f32 %v5852_v54, %v5701_v18  ;;  %v8251_v16 = vpop.f32.mrb[196].mxu1  ;;  %v6058_v28 = vmul.f32 %v10137_v57, %v6024_v63  ;;  %v5215_v62 = vld [vmem:[#allocation2 + $0x108] sm:$0xff] }
 0x283   : > { %6250 = vst.msk [vmem:[%s10155_s7 + $0x48] sm:$0xff] %vm288_vm1, %v6218_v6  ;;  %v6185_v19 = vmul.f32 %v6153_v8, %v6057_v7  ;;  %v6026_v4 = vadd.f32 %v10124_v48, %v5987_v52  ;;  %v5986_v5 = vld [vmem:[#allocation2 + $0x90] sm:$0xff]  ;;  %5949 = vst.msk [vmem:[#allocation2 + $0xb8] sm:$0xff] %vm288_vm1, %v5901_v10  ;;  %v5259_v9 = vadd.f32 %v8251_v16, %v5211_v3  ;;  %v5083_v12 = vpop.f32.mrb[197].mxu1  ;;  %v5214_v7 = vld [vmem:[#allocation2 + $0x100] sm:$0xff] }
 0x284   : > { %6249 = vst.msk [vmem:[%s10155_s7 + $0x40] sm:$0xff] %vm288_vm1, %v6217_v23  ;;  %v6122_v15 = vmax.f32 %v6090_v59, 0.0  ;;  %v6025_v17 = vadd.f32 %v10124_v48, %v5986_v5  ;;  %5948 = vst.msk [vmem:[#allocation2 + $0xb0] sm:$0xff] %vm288_vm1, %v5900_v56  ;;  %v5258_v18 = vadd.f32 %v5210_v14, %v5083_v12  ;;  %v5855_v20 = vld [vmem:[#allocation2 + $0xc8] sm:$0xff]  ;;  %v8325_v21 = vpop.f32.mrb[196].mxu0 }
 0x285   : > { %v6219_v22 = vadd.f32 %v10147_v30, %v6185_v19  ;;  %v6092_v24 = vadd.f32 3.0, %v6026_v4  ;;  %5307 = vst.msk [vmem:[#allocation2 + $0xe8] sm:$0xff] %vm288_vm1, %v5259_v9  ;;  %v5903_v25 = vadd.f32 %v8319_v37, %v5855_v20  ;;  %v5854_v26 = vld [vmem:[#allocation2 + $0xc0] sm:$0xff]  ;;  %v5731_v27 = vpop.f32.mrb[197].mxu0 }
 0x286   : > { %v6154_v11 = vmin.f32 %v6122_v15, 6.0  ;;  %v6091_v31 = vadd.f32 3.0, %v6025_v17  ;;  %v5988_v29 = vld [vmem:[#allocation2 + $0xa8] sm:$0xff]  ;;  %5306 = vst.msk [vmem:[#allocation2 + $0xe0] sm:$0xff] %vm288_vm1, %v5258_v18  ;;  %v5902_v32 = vadd.f32 %v5854_v26, %v5711_v42  ;;  %v8254_v13 = vpop.f32.mrb[198].mxu1  ;;  %v6060_v42 = vmul.f32 %v10137_v57, %v6026_v4  ;;  %v5217_v15 = vld [vmem:[#allocation2 + $0x118] sm:$0xff] }
 0x287   : > { %6251 = vst.msk [vmem:[%s10155_s7 + $0x50] sm:$0xff] %vm288_vm1, %v6219_v22  ;;  %v6124_v34 = vmax.f32 %v6092_v24, 0.0  ;;  %v6027_v36 = vadd.f32 %v10124_v48, %v5988_v29  ;;  %5951 = vst.msk [vmem:[#allocation2 + $0xc8] sm:$0xff] %vm288_vm1, %v5903_v25  ;;  %v5261_v37 = vadd.f32 %v8254_v13, %v5213_v33  ;;  %v5093_v35 = vpop.f32.mrb[199].mxu1  ;;  %v6059_v58 = vmul.f32 %v10137_v57, %v6025_v17  ;;  %v5216_v24 = vld [vmem:[#allocation2 + $0x110] sm:$0xff] }
 0x288   : > { %v6186_v39 = vmul.f32 %v6154_v11, %v6058_v28  ;;  %v6123_v40 = vmax.f32 %v6091_v31, 0.0  ;;  %5950 = vst.msk [vmem:[#allocation2 + $0xc0] sm:$0xff] %vm288_vm1, %v5902_v32  ;;  %v5260_v41 = vadd.f32 %v5212_v38, %v5093_v35  ;;  %v5857_v43 = vld [vmem:[#allocation2 + $0xd8] sm:$0xff]  ;;  %v8328_v44 = vpop.f32.mrb[198].mxu0 }
 0x289   : > { %v6156_v46 = vmin.f32 %v6124_v34, 6.0  ;;  %v6093_v45 = vadd.f32 3.0, %v6027_v36  ;;  %5309 = vst.msk [vmem:[#allocation2 + $0xf8] sm:$0xff] %vm288_vm1, %v5261_v37  ;;  %v5905_v47 = vadd.f32 %v8322_v1, %v5857_v43  ;;  %v5856_v49 = vld [vmem:[#allocation2 + $0xd0] sm:$0xff]  ;;  %v5741_v50 = vpop.f32.mrb[199].mxu0  ;;  %v6061_v52 = vmul.f32 %v10137_v57, %v6027_v36 }
 0x28a   : > { %v6220_v51 = vadd.f32 %v10147_v30, %v6186_v39  ;;  %v6155_v60 = vmin.f32 %v6123_v40, 6.0  ;;  %5308 = vst.msk [vmem:[#allocation2 + $0xf0] sm:$0xff] %vm288_vm1, %v5260_v41  ;;  %v5904_v53 = vadd.f32 %v5856_v49, %v5721_v55  ;;  %v8257_v61 = vpop.f32.mrb[200].mxu1  ;;  %v5219_v40 = vld [vmem:[#allocation2 + $0x128] sm:$0xff] }
 0x28b   : > { %v6188_v63 = vmul.f32 %v6156_v46, %v6060_v42  ;;  %v6125_v0 = vmax.f32 %v6093_v45, 0.0  ;;  %v5989_v2 = vld [vmem:[#allocation2 + $0xb0] sm:$0xff]  ;;  %5953 = vst.msk [vmem:[#allocation2 + $0xd8] sm:$0xff] %vm288_vm1, %v5905_v47  ;;  %v5263_v6 = vadd.f32 %v8257_v61, %v5215_v62  ;;  %v5103_v1 = vpop.f32.mrb[201].mxu1  ;;  %v5218_v46 = vld [vmem:[#allocation2 + $0x120] sm:$0xff] }
 0x28c   : > { %6252 = vst.msk [vmem:[%s10155_s7 + $0x58] sm:$0xff] %vm288_vm1, %v6220_v51  ;;  %v6187_v8 = vmul.f32 %v6155_v60, %v6059_v58  ;;  %v6028_v10 = vadd.f32 %v10124_v48, %v5989_v2  ;;  %5952 = vst.msk [vmem:[#allocation2 + $0xd0] sm:$0xff] %vm288_vm1, %v5904_v53  ;;  %v5262_v54 = vadd.f32 %v5214_v7, %v5103_v1  ;;  %v5859_v23 = vld [vmem:[#allocation2 + $0xe8] sm:$0xff]  ;;  %v8331_v55 = vpop.f32.mrb[200].mxu0 }
 0x28d   : > { %v6222_v59 = vadd.f32 %v10147_v30, %v6188_v63  ;;  %v6157_v56 = vmin.f32 %v6125_v0, 6.0  ;;  %5311 = vst.msk [vmem:[#allocation2 + $0x108] sm:$0xff] %vm288_vm1, %v5263_v6  ;;  %v5907_v16 = vadd.f32 %v8325_v21, %v5859_v23  ;;  %v5858_v3 = vld [vmem:[#allocation2 + $0xe0] sm:$0xff]  ;;  %v5751_v19 = vpop.f32.mrb[201].mxu0 }
 0x28e   : > { %v6221_v4 = vadd.f32 %v10147_v30, %v6187_v8  ;;  %v6094_v5 = vadd.f32 3.0, %v6028_v10  ;;  %v5991_v9 = vld [vmem:[#allocation2 + $0xc8] sm:$0xff]  ;;  %5310 = vst.msk [vmem:[#allocation2 + $0x100] sm:$0xff] %vm288_vm1, %v5262_v54  ;;  %v5906_v12 = vadd.f32 %v5858_v3, %v5731_v27  ;;  %v8260_v14 = vpop.f32.mrb[202].mxu1  ;;  %v6062_v34 = vmul.f32 %v10137_v57, %v6028_v10  ;;  %v5221_v8 = vld [vmem:[#allocation2 + $0x138] sm:$0xff] }
 0x28f   : > { %6254 = vst.msk [vmem:[%s10155_s7 + $0x68] sm:$0xff] %vm288_vm1, %v6222_v59  ;;  %v6189_v17 = vmul.f32 %v6157_v56, %v6061_v52  ;;  %v6030_v18 = vadd.f32 %v10124_v48, %v5991_v9  ;;  %v5990_v20 = vld [vmem:[#allocation2 + $0xc0] sm:$0xff]  ;;  %5955 = vst.msk [vmem:[#allocation2 + $0xe8] sm:$0xff] %vm288_vm1, %v5907_v16  ;;  %v5265_v21 = vadd.f32 %v8260_v14, %v5217_v15  ;;  %v5113_v22 = vpop.f32.mrb[203].mxu1  ;;  %v5220_v52 = vld [vmem:[#allocation2 + $0x130] sm:$0xff] }
 0x290   : > { %6253 = vst.msk [vmem:[%s10155_s7 + $0x60] sm:$0xff] %vm288_vm1, %v6221_v4  ;;  %v6126_v25 = vmax.f32 %v6094_v5, 0.0  ;;  %v6029_v26 = vadd.f32 %v10124_v48, %v5990_v20  ;;  %5954 = vst.msk [vmem:[#allocation2 + $0xe0] sm:$0xff] %vm288_vm1, %v5906_v12  ;;  %v5264_v27 = vadd.f32 %v5216_v24, %v5113_v22  ;;  %v5861_v28 = vld [vmem:[#allocation2 + $0xf8] sm:$0xff]  ;;  %v8334_v11 = vpop.f32.mrb[202].mxu0 }
 0x291   : > { %v6223_v31 = vadd.f32 %v10147_v30, %v6189_v17  ;;  %v6096_v29 = vadd.f32 3.0, %v6030_v18  ;;  %5313 = vst.msk [vmem:[#allocation2 + $0x118] sm:$0xff] %vm288_vm1, %v5265_v21  ;;  %v5909_v32 = vadd.f32 %v8328_v44, %v5861_v28  ;;  %v5860_v13 = vld [vmem:[#allocation2 + $0xf0] sm:$0xff]  ;;  %v5761_v33 = vpop.f32.mrb[203].mxu0 }
 0x292   : > { %v6158_v36 = vmin.f32 %v6126_v25, 6.0  ;;  %v6095_v37 = vadd.f32 3.0, %v6029_v26  ;;  %v5992_v35 = vld [vmem:[#allocation2 + $0xd8] sm:$0xff]  ;;  %5312 = vst.msk [vmem:[#allocation2 + $0x110] sm:$0xff] %vm288_vm1, %v5264_v27  ;;  %v5908_v38 = vadd.f32 %v5860_v13, %v5741_v50  ;;  %v8263_v39 = vpop.f32.mrb[204].mxu1  ;;  %v6064_v50 = vmul.f32 %v10137_v57, %v6030_v18  ;;  %v5223_v25 = vld [vmem:[#allocation2 + $0x148] sm:$0xff] }
 0x293   : > { %6255 = vst.msk [vmem:[%s10155_s7 + $0x70] sm:$0xff] %vm288_vm1, %v6223_v31  ;;  %v6128_v41 = vmax.f32 %v6096_v29, 0.0  ;;  %v6031_v43 = vadd.f32 %v10124_v48, %v5992_v35  ;;  %5957 = vst.msk [vmem:[#allocation2 + $0xf8] sm:$0xff] %vm288_vm1, %v5909_v32  ;;  %v5267_v44 = vadd.f32 %v8263_v39, %v5219_v40  ;;  %v5123_v42 = vpop.f32.mrb[205].mxu1  ;;  %v6063_v2 = vmul.f32 %v10137_v57, %v6029_v26  ;;  %v5222_v29 = vld [vmem:[#allocation2 + $0x140] sm:$0xff] }
 0x294   : > { %v6190_v45 = vmul.f32 %v6158_v36, %v6062_v34  ;;  %v6127_v47 = vmax.f32 %v6095_v37, 0.0  ;;  %5956 = vst.msk [vmem:[#allocation2 + $0xf0] sm:$0xff] %vm288_vm1, %v5908_v38  ;;  %v5266_v49 = vadd.f32 %v5218_v46, %v5123_v42  ;;  %v5863_v51 = vld [vmem:[#allocation2 + $0x108] sm:$0xff]  ;;  %v8337_v58 = vpop.f32.mrb[204].mxu0 }
 0x295   : > { %v6160_v60 = vmin.f32 %v6128_v41, 6.0  ;;  %v6097_v53 = vadd.f32 3.0, %v6031_v43  ;;  %5315 = vst.msk [vmem:[#allocation2 + $0x128] sm:$0xff] %vm288_vm1, %v5267_v44  ;;  %v5911_v61 = vadd.f32 %v8331_v55, %v5863_v51  ;;  %v5862_v62 = vld [vmem:[#allocation2 + $0x100] sm:$0xff]  ;;  %v5771_v63 = vpop.f32.mrb[205].mxu0  ;;  %v6065_v9 = vmul.f32 %v10137_v57, %v6031_v43 }
 0x296   : > { %v6224_v0 = vadd.f32 %v10147_v30, %v6190_v45  ;;  %v6159_v6 = vmin.f32 %v6127_v47, 6.0  ;;  %5314 = vst.msk [vmem:[#allocation2 + $0x120] sm:$0xff] %vm288_vm1, %v5266_v49  ;;  %v5910_v1 = vadd.f32 %v5862_v62, %v5751_v19  ;;  %v8266_v7 = vpop.f32.mrb[206].mxu1  ;;  %v5225_v47 = vld [vmem:[#allocation2 + $0x158] sm:$0xff] }
 0x297   : > { %v6192_v10 = vmul.f32 %v6160_v60, %v6064_v50  ;;  %v6129_v54 = vmax.f32 %v6097_v53, 0.0  ;;  %v5993_v23 = vld [vmem:[#allocation2 + $0xe0] sm:$0xff]  ;;  %5959 = vst.msk [vmem:[#allocation2 + $0x108] sm:$0xff] %vm288_vm1, %v5911_v61  ;;  %v5269_v59 = vadd.f32 %v8266_v7, %v5221_v8  ;;  %v5133_v55 = vpop.f32.mrb[207].mxu1  ;;  %v5224_v60 = vld [vmem:[#allocation2 + $0x150] sm:$0xff] }
 0x298   : > { %6256 = vst.msk [vmem:[%s10155_s7 + $0x78] sm:$0xff] %vm288_vm1, %v6224_v0  ;;  %v6191_v56 = vmul.f32 %v6159_v6, %v6063_v2  ;;  %v6032_v16 = vadd.f32 %v10124_v48, %v5993_v23  ;;  %5958 = vst.msk [vmem:[#allocation2 + $0x100] sm:$0xff] %vm288_vm1, %v5910_v1  ;;  %v5268_v3 = vadd.f32 %v5220_v52, %v5133_v55  ;;  %v5865_v4 = vld [vmem:[#allocation2 + $0x118] sm:$0xff]  ;;  %v8340_v19 = vpop.f32.mrb[206].mxu0 }
 0x299   : > { %v6226_v5 = vadd.f32 %v10147_v30, %v6192_v10  ;;  %v6161_v12 = vmin.f32 %v6129_v54, 6.0  ;;  %5317 = vst.msk [vmem:[#allocation2 + $0x138] sm:$0xff] %vm288_vm1, %v5269_v59  ;;  %v5913_v14 = vadd.f32 %v8334_v11, %v5865_v4  ;;  %v5864_v15 = vld [vmem:[#allocation2 + $0x110] sm:$0xff]  ;;  %v5781_v17 = vpop.f32.mrb[207].mxu0 }
 0x29a   : > { %v6225_v18 = vadd.f32 %v10147_v30, %v6191_v56  ;;  %v6098_v20 = vadd.f32 3.0, %v6032_v16  ;;  %v5995_v21 = vld [vmem:[#allocation2 + $0xf8] sm:$0xff]  ;;  %5316 = vst.msk [vmem:[#allocation2 + $0x130] sm:$0xff] %vm288_vm1, %v5268_v3  ;;  %v5912_v22 = vadd.f32 %v5864_v15, %v5761_v33  ;;  %v8269_v24 = vpop.f32.mrb[208].mxu1  ;;  %v6066_v41 = vmul.f32 %v10137_v57, %v6032_v16  ;;  %v5227_v56 = vld [vmem:[#allocation2 + $0x168] sm:$0xff] }
 0x29b   : > { %6258 = vst.msk [vmem:[%s10155_s7 + $0x88] sm:$0xff] %vm288_vm1, %v6226_v5  ;;  %v6193_v26 = vmul.f32 %v6161_v12, %v6065_v9  ;;  %v6034_v27 = vadd.f32 %v10124_v48, %v5995_v21  ;;  %v5994_v28 = vld [vmem:[#allocation2 + $0xf0] sm:$0xff]  ;;  %5961 = vst.msk [vmem:[#allocation2 + $0x118] sm:$0xff] %vm288_vm1, %v5913_v14  ;;  %v5271_v11 = vadd.f32 %v8269_v24, %v5223_v25  ;;  %v5143_v31 = vpop.f32.mrb[209].mxu1  ;;  %v5226_v9 = vld [vmem:[#allocation2 + $0x160] sm:$0xff] }
 0x29c   : > { %6257 = vst.msk [vmem:[%s10155_s7 + $0x80] sm:$0xff] %vm288_vm1, %v6225_v18  ;;  %v6130_v32 = vmax.f32 %v6098_v20, 0.0  ;;  %v6033_v13 = vadd.f32 %v10124_v48, %v5994_v28  ;;  %5960 = vst.msk [vmem:[#allocation2 + $0x110] sm:$0xff] %vm288_vm1, %v5912_v22  ;;  %v5270_v33 = vadd.f32 %v5222_v29, %v5143_v31  ;;  %v5867_v34 = vld [vmem:[#allocation2 + $0x128] sm:$0xff]  ;;  %v8343_v36 = vpop.f32.mrb[208].mxu0  ;;  %v5229_v29 = vld [vmem:[#allocation2 + $0x178] sm:$0xff] }
 0x29d   : > { %v6227_v37 = vadd.f32 %v10147_v30, %v6193_v26  ;;  %v6100_v35 = vadd.f32 3.0, %v6034_v27  ;;  %5319 = vst.msk [vmem:[#allocation2 + $0x148] sm:$0xff] %vm288_vm1, %v5271_v11  ;;  %v5915_v38 = vadd.f32 %v8337_v58, %v5867_v34  ;;  %v5866_v39 = vld [vmem:[#allocation2 + $0x120] sm:$0xff]  ;;  %v5791_v40 = vpop.f32.mrb[209].mxu0 }
 0x29e   : > { %v6162_v43 = vmin.f32 %v6130_v32, 6.0  ;;  %v6099_v44 = vadd.f32 3.0, %v6033_v13  ;;  %v5996_v42 = vld [vmem:[#allocation2 + $0x108] sm:$0xff]  ;;  %5318 = vst.msk [vmem:[#allocation2 + $0x140] sm:$0xff] %vm288_vm1, %v5270_v33  ;;  %v5914_v46 = vadd.f32 %v5866_v39, %v5771_v63  ;;  %v8272_v45 = vpop.f32.mrb[210].mxu1  ;;  %v6068_v63 = vmul.f32 %v10137_v57, %v6034_v27 }
 0x29f   : > { %6259 = vst.msk [vmem:[%s10155_s7 + $0x90] sm:$0xff] %vm288_vm1, %v6227_v37  ;;  %v6132_v49 = vmax.f32 %v6100_v35, 0.0  ;;  %v6035_v51 = vadd.f32 %v10124_v48, %v5996_v42  ;;  %5963 = vst.msk [vmem:[#allocation2 + $0x128] sm:$0xff] %vm288_vm1, %v5915_v38  ;;  %v5273_v58 = vadd.f32 %v8272_v45, %v5225_v47  ;;  %v5153_v50 = vpop.f32.mrb[211].mxu1  ;;  %v6067_v23 = vmul.f32 %v10137_v57, %v6033_v13  ;;  %v10331_v13 = vld [vmem:[%s10404_s2] ss:$0 sm:$0xff] }
 0x2a0   : > { %v6194_v53 = vmul.f32 %v6162_v43, %v6066_v41  ;;  %v6131_v61 = vmax.f32 %v6099_v44, 0.0  ;;  %5962 = vst.msk [vmem:[#allocation2 + $0x120] sm:$0xff] %vm288_vm1, %v5914_v46  ;;  %v5272_v62 = vadd.f32 %v5224_v60, %v5153_v50  ;;  %v5869_v0 = vld [vmem:[#allocation2 + $0x138] sm:$0xff]  ;;  %v8346_v2 = vpop.f32.mrb[210].mxu0  ;;  %v5228_v35 = vld [vmem:[#allocation2 + $0x170] sm:$0xff] }
 0x2a1   : > { %v6164_v6 = vmin.f32 %v6132_v49, 6.0  ;;  %v6101_v1 = vadd.f32 3.0, %v6035_v51  ;;  %5321 = vst.msk [vmem:[#allocation2 + $0x158] sm:$0xff] %vm288_vm1, %v5273_v58  ;;  %v5917_v7 = vadd.f32 %v8340_v19, %v5869_v0  ;;  %v5868_v8 = vld [vmem:[#allocation2 + $0x130] sm:$0xff]  ;;  %v10311_v10 = vpop.f32.mrb[211].mxu0  ;;  %v6069_v21 = vmul.f32 %v10137_v57, %v6035_v51 }
 0x2a2   : > { %v6228_v54 = vadd.f32 %v10147_v30, %v6194_v53  ;;  %v6163_v59 = vmin.f32 %v6131_v61, 6.0  ;;  %5320 = vst.msk [vmem:[#allocation2 + $0x150] sm:$0xff] %vm288_vm1, %v5272_v62  ;;  %v5916_v55 = vadd.f32 %v5868_v8, %v5781_v17  ;;  %v8275_v52 = vpop.f32.mrb[212].mxu1 }
 0x2a3   : > { %v6196_v16 = vmul.f32 %v6164_v6, %v6068_v63  ;;  %v6133_v3 = vmax.f32 %v6101_v1, 0.0  ;;  %v5997_v4 = vld [vmem:[#allocation2 + $0x110] sm:$0xff]  ;;  %5965 = vst.msk [vmem:[#allocation2 + $0x138] sm:$0xff] %vm288_vm1, %v5917_v7  ;;  %v5275_v19 = vadd.f32 %v8275_v52, %v5227_v56  ;;  %v5163_v5 = vpop.f32.mrb[213].mxu1 }
 0x2a4   : > { %6260 = vst.msk [vmem:[%s10155_s7 + $0x98] sm:$0xff] %vm288_vm1, %v6228_v54  ;;  %v6195_v12 = vmul.f32 %v6163_v59, %v6067_v23  ;;  %v6036_v14 = vadd.f32 %v10124_v48, %v5997_v4  ;;  %5964 = vst.msk [vmem:[#allocation2 + $0x130] sm:$0xff] %vm288_vm1, %v5916_v55  ;;  %v5274_v15 = vadd.f32 %v5226_v9, %v5163_v5  ;;  %v5871_v18 = vld [vmem:[#allocation2 + $0x148] sm:$0xff]  ;;  %v8349_v17 = vpop.f32.mrb[212].mxu0 }
 0x2a5   : > { %v6230_v20 = vadd.f32 %v10147_v30, %v6196_v16  ;;  %v6165_v22 = vmin.f32 %v6133_v3, 6.0  ;;  %5323 = vst.msk [vmem:[#allocation2 + $0x168] sm:$0xff] %vm288_vm1, %v5275_v19  ;;  %v5919_v24 = vadd.f32 %v8343_v36, %v5871_v18  ;;  %v5870_v25 = vld [vmem:[#allocation2 + $0x140] sm:$0xff]  ;;  %v5811_v26 = vpop.f32.mrb[213].mxu0 }
 0x2a6   : > { %v6229_v27 = vadd.f32 %v10147_v30, %v6195_v12  ;;  %v6102_v48 = vadd.f32 3.0, %v6036_v14  ;;  %v5999_v28 = vld [vmem:[#allocation2 + $0x128] sm:$0xff]  ;;  %5322 = vst.msk [vmem:[#allocation2 + $0x160] sm:$0xff] %vm288_vm1, %v5274_v15  ;;  %v5918_v11 = vadd.f32 %v5870_v25, %v5791_v40  ;;  %v8278_v31 = vpop.f32.mrb[214].mxu1  ;;  %v6070_v49 = vmul.f32 %v10137_v57, %v6036_v14 }
 0x2a7   : > { %6262 = vst.msk [vmem:[%s10155_s7 + $0xa8] sm:$0xff] %vm288_vm1, %v6230_v20  ;;  %v6197_v32 = vmul.f32 %v6165_v22, %v6069_v21  ;;  %v6038_v33 = vadd.f32 %v10331_v13, %v5999_v28  ;;  %v5998_v34 = vld [vmem:[#allocation2 + $0x120] sm:$0xff]  ;;  %5967 = vst.msk [vmem:[#allocation2 + $0x148] sm:$0xff] %vm288_vm1, %v5919_v24  ;;  %v5277_v36 = vadd.f32 %v8278_v31, %v5229_v29  ;;  %v5173_v37 = vpop.f32.mrb[215].mxu1 }
 0x2a8   : > { %6261 = vst.msk [vmem:[%s10155_s7 + $0xa0] sm:$0xff] %vm288_vm1, %v6229_v27  ;;  %v6134_v38 = vmax.f32 %v6102_v48, 0.0  ;;  %v6037_v39 = vadd.f32 %v10331_v13, %v5998_v34  ;;  %5966 = vst.msk [vmem:[#allocation2 + $0x140] sm:$0xff] %vm288_vm1, %v5918_v11  ;;  %v5276_v40 = vadd.f32 %v5228_v35, %v5173_v37  ;;  %v5873_v41 = vld [vmem:[#allocation2 + $0x158] sm:$0xff]  ;;  %v8352_v43 = vpop.f32.mrb[214].mxu0 }
 0x2a9   : > { %v6231_v44 = vadd.f32 %v10147_v30, %v6197_v32  ;;  %v6104_v42 = vadd.f32 3.0, %v6038_v33  ;;  %5325 = vst.msk [vmem:[#allocation2 + $0x178] sm:$0xff] %vm288_vm1, %v5277_v36  ;;  %v5921_v46 = vadd.f32 %v8346_v2, %v5873_v41  ;;  %v5872_v45 = vld [vmem:[#allocation2 + $0x150] sm:$0xff]  ;;  %v5821_v47 = vpop.f32.mrb[215].mxu0  ;;  %v6072_v63 = vmul.f32 %v10137_v57, %v6038_v33 }
 0x2aa   : > { %v6166_v51 = vmin.f32 %v6134_v38, 6.0  ;;  %v6103_v58 = vadd.f32 3.0, %v6037_v39  ;;  %v6000_v50 = vld [vmem:[#allocation2 + $0x138] sm:$0xff]  ;;  %5324 = vst.msk [vmem:[#allocation2 + $0x170] sm:$0xff] %vm288_vm1, %v5276_v40  ;;  %v5920_v60 = vadd.f32 %v5872_v45, %v10311_v10  ;;  %v6071_v54 = vmul.f32 %v10137_v57, %v6037_v39 }
 0x2ab   : > { %6263 = vst.msk [vmem:[%s10155_s7 + $0xb0] sm:$0xff] %vm288_vm1, %v6231_v44  ;;  %v6136_v53 = vmax.f32 %v6104_v42, 0.0  ;;  %v6039_v61 = vadd.f32 %v10331_v13, %v6000_v50  ;;  %5969 = vst.msk [vmem:[#allocation2 + $0x158] sm:$0xff] %vm288_vm1, %v5921_v46 }
 0x2ac   : > { %v6198_v62 = vmul.f32 %v6166_v51, %v6070_v49  ;;  %v6135_v0 = vmax.f32 %v6103_v58, 0.0  ;;  %5968 = vst.msk [vmem:[#allocation2 + $0x150] sm:$0xff] %vm288_vm1, %v5920_v60  ;;  %v5875_v2 = vld [vmem:[#allocation2 + $0x168] sm:$0xff] }
 0x2ad   : > { %v6168_v6 = vmin.f32 %v6136_v53, 6.0  ;;  %v6105_v1 = vadd.f32 3.0, %v6039_v61  ;;  %v5923_v7 = vadd.f32 %v8349_v17, %v5875_v2  ;;  %v5874_v8 = vld [vmem:[#allocation2 + $0x160] sm:$0xff]  ;;  %v6073_v5 = vmul.f32 %v10137_v57, %v6039_v61 }
 0x2ae   : > { %v6232_v10 = vadd.f32 %v10147_v30, %v6198_v62  ;;  %v6167_v23 = vmin.f32 %v6135_v0, 6.0  ;;  %v5922_v59 = vadd.f32 %v5874_v8, %v5811_v26 }
 0x2af   : > { %v6200_v55 = vmul.f32 %v6168_v6, %v6072_v63  ;;  %v6137_v52 = vmax.f32 %v6105_v1, 0.0  ;;  %v6001_v56 = vld [vmem:[#allocation2 + $0x140] sm:$0xff]  ;;  %5971 = vst.msk [vmem:[#allocation2 + $0x168] sm:$0xff] %vm288_vm1, %v5923_v7 }
 0x2b0   : > { %6264 = vst.msk [vmem:[%s10155_s7 + $0xb8] sm:$0xff] %vm288_vm1, %v6232_v10  ;;  %v6199_v16 = vmul.f32 %v6167_v23, %v6071_v54  ;;  %v6040_v3 = vadd.f32 %v10331_v13, %v6001_v56  ;;  %5970 = vst.msk [vmem:[#allocation2 + $0x160] sm:$0xff] %vm288_vm1, %v5922_v59  ;;  %v5877_v4 = vld [vmem:[#allocation2 + $0x178] sm:$0xff] }
 0x2b1   : > { %v6234_v19 = vadd.f32 %v10147_v30, %v6200_v55  ;;  %v6169_v9 = vmin.f32 %v6137_v52, 6.0  ;;  %v5925_v12 = vadd.f32 %v8352_v43, %v5877_v4  ;;  %v5876_v14 = vld [vmem:[#allocation2 + $0x170] sm:$0xff] }
 0x2b2   : > { %v6233_v15 = vadd.f32 %v10147_v30, %v6199_v16  ;;  %v6106_v18 = vadd.f32 3.0, %v6040_v3  ;;  %v6003_v17 = vld [vmem:[#allocation2 + $0x158] sm:$0xff]  ;;  %v5924_v20 = vadd.f32 %v5876_v14, %v5821_v47  ;;  %v6074_v28 = vmul.f32 %v10137_v57, %v6040_v3 }
 0x2b3   : > { %6266 = vst.msk [vmem:[%s10155_s7 + $0xc8] sm:$0xff] %vm288_vm1, %v6234_v19  ;;  %v6201_v21 = vmul.f32 %v6169_v9, %v6073_v5  ;;  %v6042_v22 = vadd.f32 %v10331_v13, %v6003_v17  ;;  %v6002_v24 = vld [vmem:[#allocation2 + $0x150] sm:$0xff]  ;;  %5973 = vst.msk [vmem:[#allocation2 + $0x178] sm:$0xff] %vm288_vm1, %v5925_v12 }
 0x2b4   : > { %6265 = vst.msk [vmem:[%s10155_s7 + $0xc0] sm:$0xff] %vm288_vm1, %v6233_v15  ;;  %v6138_v25 = vmax.f32 %v6106_v18, 0.0  ;;  %v6041_v26 = vadd.f32 %v10331_v13, %v6002_v24  ;;  %5972 = vst.msk [vmem:[#allocation2 + $0x170] sm:$0xff] %vm288_vm1, %v5924_v20 }
 0x2b5   : > { %v6235_v27 = vadd.f32 %v10147_v30, %v6201_v21  ;;  %v6108_v48 = vadd.f32 3.0, %v6042_v22  ;;  %v6076_v37 = vmul.f32 %v10137_v57, %v6042_v22 }
 0x2b6   : > { %v6170_v11 = vmin.f32 %v6138_v25, 6.0  ;;  %v6107_v31 = vadd.f32 3.0, %v6041_v26  ;;  %v6004_v29 = vld [vmem:[#allocation2 + $0x168] sm:$0xff]  ;;  %v6075_v40 = vmul.f32 %v10137_v57, %v6041_v26 }
 0x2b7   : > { %6267 = vst.msk [vmem:[%s10155_s7 + $0xd0] sm:$0xff] %vm288_vm1, %v6235_v27  ;;  %v6140_v32 = vmax.f32 %v6108_v48, 0.0  ;;  %v6043_v33 = vadd.f32 %v10331_v13, %v6004_v29 }
 0x2b8   : > { %v6202_v34 = vmul.f32 %v6170_v11, %v6074_v28  ;;  %v6139_v36 = vmax.f32 %v6107_v31, 0.0 }
 0x2b9   : > { %v6172_v35 = vmin.f32 %v6140_v32, 6.0  ;;  %v6109_v38 = vadd.f32 3.0, %v6043_v33  ;;  %v6077_v49 = vmul.f32 %v10137_v57, %v6043_v33 }
 0x2ba   : > { %v6236_v39 = vadd.f32 %v10147_v30, %v6202_v34  ;;  %v6171_v41 = vmin.f32 %v6139_v36, 6.0 }
 0x2bb   : > { %v6204_v43 = vmul.f32 %v6172_v35, %v6076_v37  ;;  %v6141_v44 = vmax.f32 %v6109_v38, 0.0  ;;  %v6005_v42 = vld [vmem:[#allocation2 + $0x170] sm:$0xff] }
 0x2bc   : > { %6268 = vst.msk [vmem:[%s10155_s7 + $0xd8] sm:$0xff] %vm288_vm1, %v6236_v39  ;;  %v6203_v46 = vmul.f32 %v6171_v41, %v6075_v40  ;;  %v6044_v45 = vadd.f32 %v10331_v13, %v6005_v42 }
 0x2bd   : > { %v6238_v47 = vadd.f32 %v10147_v30, %v6204_v43  ;;  %v6173_v51 = vmin.f32 %v6141_v44, 6.0 }
 0x2be   : > { %v6237_v58 = vadd.f32 %v10147_v30, %v6203_v46  ;;  %v6110_v50 = vadd.f32 3.0, %v6044_v45  ;;  %v6078_v62 = vmul.f32 %v10137_v57, %v6044_v45 }
 0x2bf   : > { %6270 = vst.msk [vmem:[%s10155_s7 + $0xe8] sm:$0xff] %vm288_vm1, %v6238_v47  ;;  %v6205_v60 = vmul.f32 %v6173_v51, %v6077_v49 }
 0x2c0   : > { %6269 = vst.msk [vmem:[%s10155_s7 + $0xe0] sm:$0xff] %vm288_vm1, %v6237_v58  ;;  %v6142_v53 = vmax.f32 %v6110_v50, 0.0 }
 0x2c1   : > { %v6239_v61 = vadd.f32 %v10147_v30, %v6205_v60 }
 0x2c2   : > { %v6174_v13 = vmin.f32 %v6142_v53, 6.0 }
 0x2c3   : > { %6271 = vst.msk [vmem:[%s10155_s7 + $0xf0] sm:$0xff] %vm288_vm1, %v6239_v61 }
 0x2c4   : > { %v6206_v0 = vmul.f32 %v6174_v13, %v6078_v62 }
 0x2c6   : > { %v6240_v2 = vadd.f32 %v10147_v30, %v6206_v0 }
 0x2c8   : > { %6272 = vst.msk [vmem:[%s10155_s7 + $0xf8] sm:$0xff] %vm288_vm1, %v6240_v2 }
 0x2c9 PF: > { %s15_s17 = sadd.s32 1, %s8433_s17   ;;  %s10562_s15 = smov %s8429_s16 }
 0x2ca   : > { %p12_p2 = scmp.ge.s32.totalorder %s15_s17, 4   ;;  %s10563_s16 = smov %s10565_s19 }
 0x2cc   :  { %14 = sbr.rel (!%p12_p2) target bundleno = 2 (0x2), region = 88 }
 0x2d3   :  { %6305 = vsyncpa [#allocation4], 1 }
 0x2d4   :  { %6307 = vsyncpa [#allocation4 + $0x1], 1 }

</bundles_post_ra>
